<compile_context>
chip_gen: v7x
topology: tpu7x:2x2x1
jax: 0.10.0
libtpu: 0.0.40
codegen_flags: <defaults>
</compile_context>

<pallas_src>
import functools

import numpy as np

import jax
import jax.numpy as jnp
from jax.experimental import pallas as pl
from jax.experimental.pallas import tpu as pltpu


# --------------------------------------------------------------------------------------
# Host-side one-time weight packing
# --------------------------------------------------------------------------------------
def _conv_band_weights(w_oihw, in_w_phys, col_stride=1, out_w=None):
    """Pack (Cout, Cin, KH, KW) conv weights into KH banded matrices.

    The activation slab is channels-last with lane index = w_phys*Cin + ci, where the
    *logical* input column `w` lives at physical column `col_stride * w` (col_stride=2
    when the previous 2x2 pool did NOT compact its columns).  Returns B of shape
    (KH, in_w_phys*Cin, out_w*Cout) with
        B[d, (col_stride*(ow+dj))*Cin + ci, ow*Cout + co] = w[co, ci, d, dj]
    and zeros everywhere else, so
        conv(A)[oh, ow*Cout+co] = (sum_d A[row(oh)+row_stride*d, :] @ B[d])[ow*Cout+co].
    """
    w = np.asarray(w_oihw, np.float32)
    cout, cin, kh, kw = w.shape
    if out_w is None:
        assert col_stride == 1
        out_w = in_w_phys - kw + 1
    B = np.zeros((kh, in_w_phys, cin, out_w, cout), np.float32)
    for d in range(kh):
        for dj in range(kw):
            wk = w[:, :, d, dj].T                      # (cin, cout)
            for ow in range(out_w):
                B[d, col_stride * (ow + dj), :, ow, :] = wk
    return B.reshape(kh, in_w_phys * cin, out_w * cout)


def pack_params(raw):
    bf16, f32 = jnp.bfloat16, jnp.float32

    # conv1: input 28x28x1 (compact cols)          -> out 26x26x32, lane = ow*32+co
    B1 = _conv_band_weights(raw["w1"], in_w_phys=28, col_stride=1)             # (3,  28, 832)
    # conv2: input = un-compacted pool1 (26 phys cols, valid at even cols) -> 11x11x64
    B2 = _conv_band_weights(raw["w2"], in_w_phys=26, col_stride=2, out_w=11)   # (3, 832, 704)
    # conv3: input = un-compacted pool2 (11 phys cols, valid at even cols) -> 3x3x64
    B3 = _conv_band_weights(raw["w3"], in_w_phys=11, col_stride=2, out_w=3)    # (3, 704, 192)

    b1 = np.tile(np.asarray(raw["b1"], np.float32), 26)[None, :]               # (1, 832)
    b2 = np.tile(np.asarray(raw["b2"], np.float32), 11)[None, :]               # (1, 704)
    b3 = np.tile(np.asarray(raw["b3"], np.float32), 3)[None, :]                # (1, 192)

    # fc1: torch flattens conv3's output NCHW as (c, h, w); the kernel holds it as
    # rows=h, lane=w*64+c.  Pre-permute fc1's weight into 3 per-row band matrices so
    # fc1 is 3 banded dots (no flatten concat at runtime).
    wf1 = np.asarray(raw["wf1"], np.float32).reshape(64, 64, 3, 3)             # (j, c, h, w)
    wf1 = np.transpose(wf1, (2, 3, 1, 0)).reshape(3, 192, 64)                  # (h, w*64+c, j)

    # fc2: pad the 10 classes to 128 lanes (zero weights, -1e30 bias) for a lane-dense
    # output store; softmax over the padded lanes is unaffected (exp(-1e30) == 0).
    wf2 = np.zeros((64, 128), np.float32)
    wf2[:, :10] = np.asarray(raw["wf2"], np.float32).T
    bf2 = np.full((1, 128), -1e30, np.float32)
    bf2[0, :10] = np.asarray(raw["bf2"], np.float32)

    return dict(
        B1=jnp.asarray(B1, bf16), b1=jnp.asarray(b1, f32),
        B2=jnp.asarray(B2, bf16), b2=jnp.asarray(b2, f32),
        B3=jnp.asarray(B3, bf16), b3=jnp.asarray(b3, f32),
        Wf1=jnp.asarray(wf1, bf16), bf1=jnp.asarray(np.asarray(raw["bf1"], np.float32))[None, :],
        Wf2=jnp.asarray(wf2, bf16), bf2=jnp.asarray(bf2, f32),
    )


def init_params(key):
    """Deterministic torch-style init (uniform +/- 1/sqrt(fan_in))."""
    ks = jax.random.split(key, 10)

    def u(k, shape, fan_in):
        bound = 1.0 / float(np.sqrt(fan_in))
        return jax.random.uniform(k, shape, jnp.float32, -bound, bound)

    raw = dict(
        w1=u(ks[0], (32, 1, 3, 3), 9),      b1=u(ks[1], (32,), 9),
        w2=u(ks[2], (64, 32, 3, 3), 288),   b2=u(ks[3], (64,), 288),
        w3=u(ks[4], (64, 64, 3, 3), 576),   b3=u(ks[5], (64,), 576),
        wf1=u(ks[6], (64, 576), 576),       bf1=u(ks[7], (64,), 576),
        wf2=u(ks[8], (10, 64), 64),         bf2=u(ks[9], (10,), 64),
    )
    return pack_params(raw), raw


# --------------------------------------------------------------------------------------
# The fused kernel: Bt images per grid step, everything VMEM-resident, full-slab ops.
# Per-image row stride is 28 throughout; image b's data always starts at row 28*b.
#   after conv1 : valid rows 28b + oh          (oh  in [0,26)), lane = ow*32 + co
#   after pool1 : valid rows 28b + 2*i         (i   in [0,13)), lane = (2w')*32 + c
#   after conv2 : valid rows 28b + 2*i         (i   in [0,11)), lane = ow*64 + co
#   after pool2 : valid rows 28b + 4*i         (i   in [0, 5)), lane = (2w')*64 + c
#   after conv3 : valid rows 28b + 4*h         (h   in [0, 3)), lane = ow*64 + co
#   after fc1/2 : valid row  28b
# All other rows are "don't care" and are never read (or hit zero weight rows).
# --------------------------------------------------------------------------------------
def _net_kernel(x_ref, B1_ref, b1_ref, B2_ref, b2_ref, B3_ref, b3_ref,
                Wf1_ref, bf1_ref, Wf2_ref, bf2_ref, o_ref, *, bt):
    f32, bf16 = jnp.float32, jnp.bfloat16
    S = 28                                   # per-image row stride of the fused slab
    R0 = bt * S

    def banded_matmul(act, B_ref, bias_ref, row_step, rows_out):
        """sum_d act[d*row_step : d*row_step+rows_out, :] @ B[d]  (+bias), f32 acc."""
        acc = jnp.dot(act[0:rows_out, :], B_ref[0], preferred_element_type=f32)
        for d in range(1, 3):
            o = d * row_step
            acc = acc + jnp.dot(act[o:o + rows_out, :], B_ref[d],
                                preferred_element_type=f32)
        return acc + bias_ref[...]

    def pool_rows(a, step):
        # row half of the 2x2 pool: out[r] = max(a[r], a[r+step]); valid outputs are
        # only ever read at rows where both operands are valid.
        return jnp.maximum(a[:-step, :], a[step:, :])

    def pool_cols(a, c):
        # column half of the 2x2 pool, without lane compaction:
        #   out[:, w*c+ch] = max(a[:, w*c+ch], a[:, (w+1)*c+ch])
        # The stride-2 column subsample is folded into the next layer's banded weights.
        shifted = jnp.concatenate([a[:, c:], a[:, :c]], axis=1)   # lane shift by -c
        return jnp.maximum(a, shifted)

    # ---- stack the Bt images along the sublane axis: (Bt*28, 28), bf16 ----
    if bt == 1:
        x = x_ref[0, 0]
    else:
        x = jnp.concatenate([x_ref[0, b] for b in range(bt)], axis=0)

    # conv1 (1->32) + ReLU : (R0-2, 832)
    c1 = jnp.maximum(banded_matmul(x, B1_ref, b1_ref, 1, R0 - 2), 0.0)
    # pool1 (2x2): rows (shift 1) then columns (lane shift 32); no compaction
    p1 = pool_cols(pool_rows(c1, 1), 32).astype(bf16)             # (R0-3, 832)

    # conv2 (32->64) + ReLU ; pooled rows live at physical stride 2 -> band row step 2
    c2 = jnp.maximum(banded_matmul(p1, B2_ref, b2_ref, 2, R0 - 7), 0.0)   # (R0-7, 704)
    # pool2 (2x2, floor): rows (shift 2) then columns (lane shift 64)
    p2 = pool_cols(pool_rows(c2, 2), 64).astype(bf16)             # (R0-9, 704)

    # conv3 (64->64), no activation ; pooled rows at physical stride 4 -> band step 4
    c3 = banded_matmul(p2, B3_ref, b3_ref, 4, R0 - 17).astype(bf16)       # (R0-17, 192)

    # fc1 over the (h, w, c) flatten as 3 banded dots (rows at stride 4), + ReLU
    z1 = banded_matmul(c3, Wf1_ref, bf1_ref, 4, R0 - 25)                  # (R0-25, 64)
    z1 = jnp.maximum(z1, 0.0).astype(bf16)

    # fc2 (padded to 128 logits) + softmax(dim=-1); padded lanes carry -1e30 -> exp==0
    z2 = jnp.dot(z1, Wf2_ref[...], preferred_element_type=f32) + bf2_ref[...]
    z2 = z2 - jnp.max(z2, axis=-1, keepdims=True)
    e = jnp.exp(z2)
    inv = pl.reciprocal(jnp.sum(e, axis=-1, keepdims=True), approx=True)
    probs = e * inv                                                       # (R0-25, 128)

    # image b's result sits at row 28*b of the fused slab -> one lane-dense store
    rows = [probs[b * S:b * S + 1, :] for b in range(bt)]
    o_ref[0] = rows[0] if bt == 1 else jnp.concatenate(rows, axis=0)


def _choose_bt(n):
    # Fill the MXU's M rows (8 images -> conv1 M ~ 222 <= 256) but keep the grid length
    # >= 2 so v7x can shard grid steps across its two TensorCores.
    if n <= 1:
        return 1
    return max(1, min(8, n // 2))


@jax.jit
def net_forward(x_nchw, params):
    x = x_nchw[:, 0, :, :].astype(jnp.bfloat16)        # (N, 28, 28), Cin = 1
    n = x.shape[0]
    bt = _choose_bt(n)
    g = -(-n // bt)
    n_pad = g * bt
    if n_pad != n:
        x = jnp.pad(x, ((0, n_pad - n), (0, 0), (0, 0)))
    x = x.reshape(g, bt, 28, 28)

    out = pl.pallas_call(
        functools.partial(_net_kernel, bt=bt),
        out_shape=jax.ShapeDtypeStruct((g, bt, 128), jnp.float32),
        grid=(g,),
        in_specs=[
            pl.BlockSpec((1, bt, 28, 28), lambda i: (i, 0, 0, 0)),   # Bt images / step
            pl.BlockSpec((3, 28, 832), lambda i: (0, 0, 0)),         # conv1 bands
            pl.BlockSpec((1, 832), lambda i: (0, 0)),
            pl.BlockSpec((3, 832, 704), lambda i: (0, 0, 0)),        # conv2 bands
            pl.BlockSpec((1, 704), lambda i: (0, 0)),
            pl.BlockSpec((3, 704, 192), lambda i: (0, 0, 0)),        # conv3 bands
            pl.BlockSpec((1, 192), lambda i: (0, 0)),
            pl.BlockSpec((3, 192, 64), lambda i: (0, 0, 0)),         # fc1 bands
            pl.BlockSpec((1, 64), lambda i: (0, 0)),
            pl.BlockSpec((64, 128), lambda i: (0, 0)),               # fc2 (padded to 128)
            pl.BlockSpec((1, 128), lambda i: (0, 0)),
        ],
        out_specs=pl.BlockSpec((1, bt, 128), lambda i: (i, 0, 0)),
        compiler_params=pltpu.CompilerParams(
            dimension_semantics=("parallel",),
            vmem_limit_bytes=32 * 1024 * 1024),
    )(x, params["B1"], params["b1"], params["B2"], params["b2"],
      params["B3"], params["b3"], params["Wf1"], params["bf1"],
      params["Wf2"], params["bf2"])

    return out.reshape(n_pad, 128)[:n, :10]              # (N, 10)


# --------------------------------------------------------------------------------------
# Pure-JAX reference (mirrors the PyTorch module exactly, f32) for self-validation
# --------------------------------------------------------------------------------------
def reference_forward(x_nchw, raw):
    def conv(x, w, b):
        y = jax.lax.conv_general_dilated(
            x, w, (1, 1), "VALID", dimension_numbers=("NCHW", "OIHW", "NCHW"))
        return y + b[None, :, None, None]

    def pool(x):
        return jax.lax.reduce_window(x, -jnp.inf, jax.lax.max,
                                     (1, 1, 2, 2), (1, 1, 2, 2), "VALID")

    y = pool(jax.nn.relu(conv(x_nchw, raw["w1"], raw["b1"])))
    y = pool(jax.nn.relu(conv(y, raw["w2"], raw["b2"])))
    y = conv(y, raw["w3"], raw["b3"])
    y = y.reshape(y.shape[0], -1)                        # torch .view, (C, H, W) order
    y = jax.nn.relu(y @ raw["wf1"].T + raw["bf1"])
    y = y @ raw["wf2"].T + raw["bf2"]
    return jax.nn.softmax(y, axis=-1)


if __name__ == "__main__":
    key = jax.random.PRNGKey(0)
    k_x, k_p = jax.random.split(key)

    # fc1 expects 3*3*64 features, which implies 28x28x1 inputs.
    x = jax.random.normal(k_x, (2, 1, 28, 28), jnp.float32)
    params, raw = init_params(k_p)

    out = jax.block_until_ready(net_forward(x, params))

    assert out.shape == (2, 10)
    assert bool(jnp.all(jnp.isfinite(out)))
    # approx reciprocal in the softmax -> rows sum to 1 only to ~1e-3
    assert bool(jnp.all(jnp.abs(jnp.sum(out, axis=-1) - 1.0) < 2e-2))

    ref = reference_forward(x, raw)
    err = float(jnp.max(jnp.abs(out - ref)))
    assert err < 5e-2, f"max abs err vs reference: {err}"

    print("KERNEL_OK")
</pallas_src>

<mosaic_0001>
module attributes {stable_mosaic.version = 11 : i64} {
  func.func @_net_kernel(%arg0: i32, %arg1: memref<1x1x28x28xbf16, #tpu.memory_space<vmem>>, %arg2: memref<3x28x832xbf16, #tpu.memory_space<vmem>>, %arg3: memref<1x832xf32, #tpu.memory_space<vmem>>, %arg4: memref<3x832x704xbf16, #tpu.memory_space<vmem>>, %arg5: memref<1x704xf32, #tpu.memory_space<vmem>>, %arg6: memref<3x704x192xbf16, #tpu.memory_space<vmem>>, %arg7: memref<1x192xf32, #tpu.memory_space<vmem>>, %arg8: memref<3x192x64xbf16, #tpu.memory_space<vmem>>, %arg9: memref<1x64xf32, #tpu.memory_space<vmem>>, %arg10: memref<64x128xbf16, #tpu.memory_space<vmem>>, %arg11: memref<1x128xf32, #tpu.memory_space<vmem>>, %arg12: memref<1x1x128xf32, #tpu.memory_space<vmem>>) attributes {dimension_semantics = [#tpu.dimension_semantics<parallel>], iteration_bounds = array<i64: 2>, scalar_prefetch = 0 : i64, scratch_operands = 0 : i64, tpu.core_type = #tpu.core_type<tc>, window_params = [{transform_indices = @transform_0, window_bounds = array<i64: 1, 1, 28, 28>}, {pipeline_mode = #tpu.pipeline_mode<synchronous>, transform_indices = @transform_1, window_bounds = array<i64: 3, 28, 832>}, {pipeline_mode = #tpu.pipeline_mode<synchronous>, transform_indices = @transform_2, window_bounds = array<i64: 1, 832>}, {pipeline_mode = #tpu.pipeline_mode<synchronous>, transform_indices = @transform_3, window_bounds = array<i64: 3, 832, 704>}, {pipeline_mode = #tpu.pipeline_mode<synchronous>, transform_indices = @transform_4, window_bounds = array<i64: 1, 704>}, {pipeline_mode = #tpu.pipeline_mode<synchronous>, transform_indices = @transform_5, window_bounds = array<i64: 3, 704, 192>}, {pipeline_mode = #tpu.pipeline_mode<synchronous>, transform_indices = @transform_6, window_bounds = array<i64: 1, 192>}, {pipeline_mode = #tpu.pipeline_mode<synchronous>, transform_indices = @transform_7, window_bounds = array<i64: 3, 192, 64>}, {pipeline_mode = #tpu.pipeline_mode<synchronous>, transform_indices = @transform_8, window_bounds = array<i64: 1, 64>}, {pipeline_mode = #tpu.pipeline_mode<synchronous>, transform_indices = @transform_9, window_bounds = array<i64: 64, 128>}, {pipeline_mode = #tpu.pipeline_mode<synchronous>, transform_indices = @transform_10, window_bounds = array<i64: 1, 128>}, {transform_indices = @transform_11, window_bounds = array<i64: 1, 1, 128>}]} {
    %c0 = arith.constant 0 : index
    %c0_0 = arith.constant 0 : index
    %c0_1 = arith.constant 0 : index
    %c0_2 = arith.constant 0 : index
    %0 = vector.load %arg1[%c0, %c0_0, %c0_1, %c0_2] : memref<1x1x28x28xbf16, #tpu.memory_space<vmem>>, vector<1x1x28x28xbf16>
    %1 = vector.shape_cast %0 : vector<1x1x28x28xbf16> to vector<28x28xbf16>
    %2 = vector.extract_strided_slice %1 {offsets = [0, 0], sizes = [26, 28], strides = [1, 1]} : vector<28x28xbf16> to vector<26x28xbf16>
    %c0_3 = arith.constant 0 : index
    %c0_4 = arith.constant 0 : index
    %c0_5 = arith.constant 0 : index
    %3 = vector.load %arg2[%c0_3, %c0_4, %c0_5] : memref<3x28x832xbf16, #tpu.memory_space<vmem>>, vector<1x28x832xbf16>
    %4 = vector.shape_cast %3 : vector<1x28x832xbf16> to vector<28x832xbf16>
    %cst = arith.constant dense<0.000000e+00> : vector<26x832xf32>
    %5 = tpu.matmul %2, %4, %cst {dimension_numbers = #tpu.dot_dimension_numbers<[1], [0], [0], [1], [0, 0, 1, 1], [], []>} : vector<26x28xbf16>, vector<28x832xbf16>, vector<26x832xf32> -> vector<26x832xf32>
    %6 = vector.extract_strided_slice %1 {offsets = [1, 0], sizes = [26, 28], strides = [1, 1]} : vector<28x28xbf16> to vector<26x28xbf16>
    %c1 = arith.constant 1 : index
    %c0_6 = arith.constant 0 : index
    %c0_7 = arith.constant 0 : index
    %7 = vector.load %arg2[%c1, %c0_6, %c0_7] : memref<3x28x832xbf16, #tpu.memory_space<vmem>>, vector<1x28x832xbf16>
    %8 = vector.shape_cast %7 : vector<1x28x832xbf16> to vector<28x832xbf16>
    %cst_8 = arith.constant dense<0.000000e+00> : vector<26x832xf32>
    %9 = tpu.matmul %6, %8, %cst_8 {dimension_numbers = #tpu.dot_dimension_numbers<[1], [0], [0], [1], [0, 0, 1, 1], [], []>} : vector<26x28xbf16>, vector<28x832xbf16>, vector<26x832xf32> -> vector<26x832xf32>
    %10 = arith.addf %5, %9 : vector<26x832xf32>
    %11 = vector.extract_strided_slice %1 {offsets = [2, 0], sizes = [26, 28], strides = [1, 1]} : vector<28x28xbf16> to vector<26x28xbf16>
    %c2 = arith.constant 2 : index
    %c0_9 = arith.constant 0 : index
    %c0_10 = arith.constant 0 : index
    %12 = vector.load %arg2[%c2, %c0_9, %c0_10] : memref<3x28x832xbf16, #tpu.memory_space<vmem>>, vector<1x28x832xbf16>
    %13 = vector.shape_cast %12 : vector<1x28x832xbf16> to vector<28x832xbf16>
    %cst_11 = arith.constant dense<0.000000e+00> : vector<26x832xf32>
    %14 = tpu.matmul %11, %13, %cst_11 {dimension_numbers = #tpu.dot_dimension_numbers<[1], [0], [0], [1], [0, 0, 1, 1], [], []>} : vector<26x28xbf16>, vector<28x832xbf16>, vector<26x832xf32> -> vector<26x832xf32>
    %15 = arith.addf %10, %14 : vector<26x832xf32>
    %c0_12 = arith.constant 0 : index
    %c0_13 = arith.constant 0 : index
    %16 = vector.load %arg3[%c0_12, %c0_13] : memref<1x832xf32, #tpu.memory_space<vmem>>, vector<1x832xf32>
    %17 = vector.broadcast %16 : vector<1x832xf32> to vector<26x832xf32>
    %18 = arith.addf %15, %17 : vector<26x832xf32>
    %cst_14 = arith.constant 0.000000e+00 : f32
    %19 = vector.broadcast %cst_14 : f32 to vector<26x832xf32>
    %20 = arith.maximumf %18, %19 : vector<26x832xf32>
    %21 = vector.extract_strided_slice %20 {offsets = [0, 0], sizes = [25, 832], strides = [1, 1]} : vector<26x832xf32> to vector<25x832xf32>
    %22 = vector.extract_strided_slice %20 {offsets = [1, 0], sizes = [25, 832], strides = [1, 1]} : vector<26x832xf32> to vector<25x832xf32>
    %23 = arith.maximumf %21, %22 : vector<25x832xf32>
    %24 = vector.extract_strided_slice %23 {offsets = [0, 32], sizes = [25, 800], strides = [1, 1]} : vector<25x832xf32> to vector<25x800xf32>
    %25 = vector.extract_strided_slice %23 {offsets = [0, 0], sizes = [25, 32], strides = [1, 1]} : vector<25x832xf32> to vector<25x32xf32>
    %26 = tpu.concatenate %24, %25 in 1 : vector<25x800xf32>, vector<25x32xf32> -> vector<25x832xf32>
    %27 = arith.maximumf %23, %26 : vector<25x832xf32>
    %28 = arith.truncf %27 : vector<25x832xf32> to vector<25x832xbf16>
    %29 = vector.extract_strided_slice %28 {offsets = [0, 0], sizes = [21, 832], strides = [1, 1]} : vector<25x832xbf16> to vector<21x832xbf16>
    %c0_15 = arith.constant 0 : index
    %c0_16 = arith.constant 0 : index
    %c0_17 = arith.constant 0 : index
    %30 = vector.load %arg4[%c0_15, %c0_16, %c0_17] : memref<3x832x704xbf16, #tpu.memory_space<vmem>>, vector<1x832x704xbf16>
    %31 = vector.shape_cast %30 : vector<1x832x704xbf16> to vector<832x704xbf16>
    %cst_18 = arith.constant dense<0.000000e+00> : vector<21x704xf32>
    %32 = tpu.matmul %29, %31, %cst_18 {dimension_numbers = #tpu.dot_dimension_numbers<[1], [0], [0], [1], [0, 0, 1, 1], [], []>} : vector<21x832xbf16>, vector<832x704xbf16>, vector<21x704xf32> -> vector<21x704xf32>
    %33 = vector.extract_strided_slice %28 {offsets = [2, 0], sizes = [21, 832], strides = [1, 1]} : vector<25x832xbf16> to vector<21x832xbf16>
    %c1_19 = arith.constant 1 : index
    %c0_20 = arith.constant 0 : index
    %c0_21 = arith.constant 0 : index
    %34 = vector.load %arg4[%c1_19, %c0_20, %c0_21] : memref<3x832x704xbf16, #tpu.memory_space<vmem>>, vector<1x832x704xbf16>
    %35 = vector.shape_cast %34 : vector<1x832x704xbf16> to vector<832x704xbf16>
    %cst_22 = arith.constant dense<0.000000e+00> : vector<21x704xf32>
    %36 = tpu.matmul %33, %35, %cst_22 {dimension_numbers = #tpu.dot_dimension_numbers<[1], [0], [0], [1], [0, 0, 1, 1], [], []>} : vector<21x832xbf16>, vector<832x704xbf16>, vector<21x704xf32> -> vector<21x704xf32>
    %37 = arith.addf %32, %36 : vector<21x704xf32>
    %38 = vector.extract_strided_slice %28 {offsets = [4, 0], sizes = [21, 832], strides = [1, 1]} : vector<25x832xbf16> to vector<21x832xbf16>
    %c2_23 = arith.constant 2 : index
    %c0_24 = arith.constant 0 : index
    %c0_25 = arith.constant 0 : index
    %39 = vector.load %arg4[%c2_23, %c0_24, %c0_25] : memref<3x832x704xbf16, #tpu.memory_space<vmem>>, vector<1x832x704xbf16>
    %40 = vector.shape_cast %39 : vector<1x832x704xbf16> to vector<832x704xbf16>
    %cst_26 = arith.constant dense<0.000000e+00> : vector<21x704xf32>
    %41 = tpu.matmul %38, %40, %cst_26 {dimension_numbers = #tpu.dot_dimension_numbers<[1], [0], [0], [1], [0, 0, 1, 1], [], []>} : vector<21x832xbf16>, vector<832x704xbf16>, vector<21x704xf32> -> vector<21x704xf32>
    %42 = arith.addf %37, %41 : vector<21x704xf32>
    %c0_27 = arith.constant 0 : index
    %c0_28 = arith.constant 0 : index
    %43 = vector.load %arg5[%c0_27, %c0_28] : memref<1x704xf32, #tpu.memory_space<vmem>>, vector<1x704xf32>
    %44 = vector.broadcast %43 : vector<1x704xf32> to vector<21x704xf32>
    %45 = arith.addf %42, %44 : vector<21x704xf32>
    %cst_29 = arith.constant 0.000000e+00 : f32
    %46 = vector.broadcast %cst_29 : f32 to vector<21x704xf32>
    %47 = arith.maximumf %45, %46 : vector<21x704xf32>
    %48 = vector.extract_strided_slice %47 {offsets = [0, 0], sizes = [19, 704], strides = [1, 1]} : vector<21x704xf32> to vector<19x704xf32>
    %49 = vector.extract_strided_slice %47 {offsets = [2, 0], sizes = [19, 704], strides = [1, 1]} : vector<21x704xf32> to vector<19x704xf32>
    %50 = arith.maximumf %48, %49 : vector<19x704xf32>
    %51 = vector.extract_strided_slice %50 {offsets = [0, 64], sizes = [19, 640], strides = [1, 1]} : vector<19x704xf32> to vector<19x640xf32>
    %52 = vector.extract_strided_slice %50 {offsets = [0, 0], sizes = [19, 64], strides = [1, 1]} : vector<19x704xf32> to vector<19x64xf32>
    %53 = tpu.concatenate %51, %52 in 1 : vector<19x640xf32>, vector<19x64xf32> -> vector<19x704xf32>
    %54 = arith.maximumf %50, %53 : vector<19x704xf32>
    %55 = arith.truncf %54 : vector<19x704xf32> to vector<19x704xbf16>
    %56 = vector.extract_strided_slice %55 {offsets = [0, 0], sizes = [11, 704], strides = [1, 1]} : vector<19x704xbf16> to vector<11x704xbf16>
    %c0_30 = arith.constant 0 : index
    %c0_31 = arith.constant 0 : index
    %c0_32 = arith.constant 0 : index
    %57 = vector.load %arg6[%c0_30, %c0_31, %c0_32] : memref<3x704x192xbf16, #tpu.memory_space<vmem>>, vector<1x704x192xbf16>
    %58 = vector.shape_cast %57 : vector<1x704x192xbf16> to vector<704x192xbf16>
    %cst_33 = arith.constant dense<0.000000e+00> : vector<11x192xf32>
    %59 = tpu.matmul %56, %58, %cst_33 {dimension_numbers = #tpu.dot_dimension_numbers<[1], [0], [0], [1], [0, 0, 1, 1], [], []>} : vector<11x704xbf16>, vector<704x192xbf16>, vector<11x192xf32> -> vector<11x192xf32>
    %60 = vector.extract_strided_slice %55 {offsets = [4, 0], sizes = [11, 704], strides = [1, 1]} : vector<19x704xbf16> to vector<11x704xbf16>
    %c1_34 = arith.constant 1 : index
    %c0_35 = arith.constant 0 : index
    %c0_36 = arith.constant 0 : index
    %61 = vector.load %arg6[%c1_34, %c0_35, %c0_36] : memref<3x704x192xbf16, #tpu.memory_space<vmem>>, vector<1x704x192xbf16>
    %62 = vector.shape_cast %61 : vector<1x704x192xbf16> to vector<704x192xbf16>
    %cst_37 = arith.constant dense<0.000000e+00> : vector<11x192xf32>
    %63 = tpu.matmul %60, %62, %cst_37 {dimension_numbers = #tpu.dot_dimension_numbers<[1], [0], [0], [1], [0, 0, 1, 1], [], []>} : vector<11x704xbf16>, vector<704x192xbf16>, vector<11x192xf32> -> vector<11x192xf32>
    %64 = arith.addf %59, %63 : vector<11x192xf32>
    %65 = vector.extract_strided_slice %55 {offsets = [8, 0], sizes = [11, 704], strides = [1, 1]} : vector<19x704xbf16> to vector<11x704xbf16>
    %c2_38 = arith.constant 2 : index
    %c0_39 = arith.constant 0 : index
    %c0_40 = arith.constant 0 : index
    %66 = vector.load %arg6[%c2_38, %c0_39, %c0_40] : memref<3x704x192xbf16, #tpu.memory_space<vmem>>, vector<1x704x192xbf16>
    %67 = vector.shape_cast %66 : vector<1x704x192xbf16> to vector<704x192xbf16>
    %cst_41 = arith.constant dense<0.000000e+00> : vector<11x192xf32>
    %68 = tpu.matmul %65, %67, %cst_41 {dimension_numbers = #tpu.dot_dimension_numbers<[1], [0], [0], [1], [0, 0, 1, 1], [], []>} : vector<11x704xbf16>, vector<704x192xbf16>, vector<11x192xf32> -> vector<11x192xf32>
    %69 = arith.addf %64, %68 : vector<11x192xf32>
    %c0_42 = arith.constant 0 : index
    %c0_43 = arith.constant 0 : index
    %70 = vector.load %arg7[%c0_42, %c0_43] : memref<1x192xf32, #tpu.memory_space<vmem>>, vector<1x192xf32>
    %71 = vector.broadcast %70 : vector<1x192xf32> to vector<11x192xf32>
    %72 = arith.addf %69, %71 : vector<11x192xf32>
    %73 = arith.truncf %72 : vector<11x192xf32> to vector<11x192xbf16>
    %74 = vector.extract_strided_slice %73 {offsets = [0, 0], sizes = [3, 192], strides = [1, 1]} : vector<11x192xbf16> to vector<3x192xbf16>
    %c0_44 = arith.constant 0 : index
    %c0_45 = arith.constant 0 : index
    %c0_46 = arith.constant 0 : index
    %75 = vector.load %arg8[%c0_44, %c0_45, %c0_46] : memref<3x192x64xbf16, #tpu.memory_space<vmem>>, vector<1x192x64xbf16>
    %76 = vector.shape_cast %75 : vector<1x192x64xbf16> to vector<192x64xbf16>
    %cst_47 = arith.constant dense<0.000000e+00> : vector<3x64xf32>
    %77 = tpu.matmul %74, %76, %cst_47 {dimension_numbers = #tpu.dot_dimension_numbers<[1], [0], [0], [1], [0, 0, 1, 1], [], []>} : vector<3x192xbf16>, vector<192x64xbf16>, vector<3x64xf32> -> vector<3x64xf32>
    %78 = vector.extract_strided_slice %73 {offsets = [4, 0], sizes = [3, 192], strides = [1, 1]} : vector<11x192xbf16> to vector<3x192xbf16>
    %c1_48 = arith.constant 1 : index
    %c0_49 = arith.constant 0 : index
    %c0_50 = arith.constant 0 : index
    %79 = vector.load %arg8[%c1_48, %c0_49, %c0_50] : memref<3x192x64xbf16, #tpu.memory_space<vmem>>, vector<1x192x64xbf16>
    %80 = vector.shape_cast %79 : vector<1x192x64xbf16> to vector<192x64xbf16>
    %cst_51 = arith.constant dense<0.000000e+00> : vector<3x64xf32>
    %81 = tpu.matmul %78, %80, %cst_51 {dimension_numbers = #tpu.dot_dimension_numbers<[1], [0], [0], [1], [0, 0, 1, 1], [], []>} : vector<3x192xbf16>, vector<192x64xbf16>, vector<3x64xf32> -> vector<3x64xf32>
    %82 = arith.addf %77, %81 : vector<3x64xf32>
    %83 = vector.extract_strided_slice %73 {offsets = [8, 0], sizes = [3, 192], strides = [1, 1]} : vector<11x192xbf16> to vector<3x192xbf16>
    %c2_52 = arith.constant 2 : index
    %c0_53 = arith.constant 0 : index
    %c0_54 = arith.constant 0 : index
    %84 = vector.load %arg8[%c2_52, %c0_53, %c0_54] : memref<3x192x64xbf16, #tpu.memory_space<vmem>>, vector<1x192x64xbf16>
    %85 = vector.shape_cast %84 : vector<1x192x64xbf16> to vector<192x64xbf16>
    %cst_55 = arith.constant dense<0.000000e+00> : vector<3x64xf32>
    %86 = tpu.matmul %83, %85, %cst_55 {dimension_numbers = #tpu.dot_dimension_numbers<[1], [0], [0], [1], [0, 0, 1, 1], [], []>} : vector<3x192xbf16>, vector<192x64xbf16>, vector<3x64xf32> -> vector<3x64xf32>
    %87 = arith.addf %82, %86 : vector<3x64xf32>
    %c0_56 = arith.constant 0 : index
    %c0_57 = arith.constant 0 : index
    %88 = vector.load %arg9[%c0_56, %c0_57] : memref<1x64xf32, #tpu.memory_space<vmem>>, vector<1x64xf32>
    %89 = vector.broadcast %88 : vector<1x64xf32> to vector<3x64xf32>
    %90 = arith.addf %87, %89 : vector<3x64xf32>
    %cst_58 = arith.constant 0.000000e+00 : f32
    %91 = vector.broadcast %cst_58 : f32 to vector<3x64xf32>
    %92 = arith.maximumf %90, %91 : vector<3x64xf32>
    %93 = arith.truncf %92 : vector<3x64xf32> to vector<3x64xbf16>
    %c0_59 = arith.constant 0 : index
    %c0_60 = arith.constant 0 : index
    %94 = vector.load %arg10[%c0_59, %c0_60] : memref<64x128xbf16, #tpu.memory_space<vmem>>, vector<64x128xbf16>
    %cst_61 = arith.constant dense<0.000000e+00> : vector<3x128xf32>
    %95 = tpu.matmul %93, %94, %cst_61 {dimension_numbers = #tpu.dot_dimension_numbers<[1], [0], [0], [1], [0, 0, 1, 1], [], []>} : vector<3x64xbf16>, vector<64x128xbf16>, vector<3x128xf32> -> vector<3x128xf32>
    %c0_62 = arith.constant 0 : index
    %c0_63 = arith.constant 0 : index
    %96 = vector.load %arg11[%c0_62, %c0_63] : memref<1x128xf32, #tpu.memory_space<vmem>>, vector<1x128xf32>
    %97 = vector.broadcast %96 : vector<1x128xf32> to vector<3x128xf32>
    %98 = arith.addf %95, %97 : vector<3x128xf32>
    %cst_64 = arith.constant dense<0xFF800000> : vector<3xf32>
    %99 = vector.multi_reduction <maximumf>, %98, %cst_64 [1] : vector<3x128xf32> to vector<3xf32>
    %100 = vector.shape_cast %99 : vector<3xf32> to vector<3x1xf32>
    %101 = vector.broadcast %100 : vector<3x1xf32> to vector<3x128xf32>
    %102 = arith.subf %98, %101 : vector<3x128xf32>
    %103 = math.exp %102 : vector<3x128xf32>
    %cst_65 = arith.constant dense<0.000000e+00> : vector<3xf32>
    %104 = vector.multi_reduction <add>, %103, %cst_65 [1] : vector<3x128xf32> to vector<3xf32>
    %105 = vector.shape_cast %104 : vector<3xf32> to vector<3x1xf32>
    %106 = tpu.reciprocal %105 {approx = true} : vector<3x1xf32> -> vector<3x1xf32>
    %107 = vector.broadcast %106 : vector<3x1xf32> to vector<3x128xf32>
    %108 = arith.mulf %103, %107 : vector<3x128xf32>
    %109 = vector.extract_strided_slice %108 {offsets = [0, 0], sizes = [1, 128], strides = [1, 1]} : vector<3x128xf32> to vector<1x128xf32>
    %c0_66 = arith.constant 0 : index
    %c0_67 = arith.constant 0 : index
    %c0_68 = arith.constant 0 : index
    %110 = vector.load %arg12[%c0_66, %c0_67, %c0_68] : memref<1x1x128xf32, #tpu.memory_space<vmem>>, vector<1x1x128xf32>
    %111 = vector.shape_cast %110 : vector<1x1x128xf32> to vector<1x128xf32>
    %112 = vector.shape_cast %109 : vector<1x128xf32> to vector<1x1x128xf32>
    tpu.vector_store %arg12[%c0_66, %c0_67, %c0_68], %112 {strides = array<i32>} : memref<1x1x128xf32, #tpu.memory_space<vmem>>, vector<1x1x128xf32>,
    return
  }
  func.func @transform_0(%arg0: i32) -> (i32, i32, i32, i32) {
    %c0_i32 = arith.constant 0 : i32
    %c0_i32_0 = arith.constant 0 : i32
    %c0_i32_1 = arith.constant 0 : i32
    %c0_i32_2 = arith.constant 0 : i32
    return %arg0, %c0_i32, %c0_i32_0, %c0_i32_1 : i32, i32, i32, i32
  }
  func.func @transform_1(%arg0: i32) -> (i32, i32, i32) {
    %c0_i32 = arith.constant 0 : i32
    %c0_i32_0 = arith.constant 0 : i32
    %c0_i32_1 = arith.constant 0 : i32
    %c0_i32_2 = arith.constant 0 : i32
    return %c0_i32, %c0_i32_0, %c0_i32_1 : i32, i32, i32
  }
  func.func @transform_2(%arg0: i32) -> (i32, i32) {
    %c0_i32 = arith.constant 0 : i32
    %c0_i32_0 = arith.constant 0 : i32
    %c0_i32_1 = arith.constant 0 : i32
    return %c0_i32, %c0_i32_0 : i32, i32
  }
  func.func @transform_3(%arg0: i32) -> (i32, i32, i32) {
    %c0_i32 = arith.constant 0 : i32
    %c0_i32_0 = arith.constant 0 : i32
    %c0_i32_1 = arith.constant 0 : i32
    %c0_i32_2 = arith.constant 0 : i32
    return %c0_i32, %c0_i32_0, %c0_i32_1 : i32, i32, i32
  }
  func.func @transform_4(%arg0: i32) -> (i32, i32) {
    %c0_i32 = arith.constant 0 : i32
    %c0_i32_0 = arith.constant 0 : i32
    %c0_i32_1 = arith.constant 0 : i32
    return %c0_i32, %c0_i32_0 : i32, i32
  }
  func.func @transform_5(%arg0: i32) -> (i32, i32, i32) {
    %c0_i32 = arith.constant 0 : i32
    %c0_i32_0 = arith.constant 0 : i32
    %c0_i32_1 = arith.constant 0 : i32
    %c0_i32_2 = arith.constant 0 : i32
    return %c0_i32, %c0_i32_0, %c0_i32_1 : i32, i32, i32
  }
  func.func @transform_6(%arg0: i32) -> (i32, i32) {
    %c0_i32 = arith.constant 0 : i32
    %c0_i32_0 = arith.constant 0 : i32
    %c0_i32_1 = arith.constant 0 : i32
    return %c0_i32, %c0_i32_0 : i32, i32
  }
  func.func @transform_7(%arg0: i32) -> (i32, i32, i32) {
    %c0_i32 = arith.constant 0 : i32
    %c0_i32_0 = arith.constant 0 : i32
    %c0_i32_1 = arith.constant 0 : i32
    %c0_i32_2 = arith.constant 0 : i32
    return %c0_i32, %c0_i32_0, %c0_i32_1 : i32, i32, i32
  }
  func.func @transform_8(%arg0: i32) -> (i32, i32) {
    %c0_i32 = arith.constant 0 : i32
    %c0_i32_0 = arith.constant 0 : i32
    %c0_i32_1 = arith.constant 0 : i32
    return %c0_i32, %c0_i32_0 : i32, i32
  }
  func.func @transform_9(%arg0: i32) -> (i32, i32) {
    %c0_i32 = arith.constant 0 : i32
    %c0_i32_0 = arith.constant 0 : i32
    %c0_i32_1 = arith.constant 0 : i32
    return %c0_i32, %c0_i32_0 : i32, i32
  }
  func.func @transform_10(%arg0: i32) -> (i32, i32) {
    %c0_i32 = arith.constant 0 : i32
    %c0_i32_0 = arith.constant 0 : i32
    %c0_i32_1 = arith.constant 0 : i32
    return %c0_i32, %c0_i32_0 : i32, i32
  }
  func.func @transform_11(%arg0: i32) -> (i32, i32, i32) {
    %c0_i32 = arith.constant 0 : i32
    %c0_i32_0 = arith.constant 0 : i32
    %c0_i32_1 = arith.constant 0 : i32
    return %arg0, %c0_i32, %c0_i32_0 : i32, i32, i32
  }
}

</mosaic_0001>

<bundles_post_ra>
// kernel: net_forward.1
= control target key start
LH: loop header
LB: loop body
LE: loop exit
PB: predicated region body
PF: predicated region fallthrough
CT: control target
= control target key end

     0   :  { %16 = vsyncpa [#allocation3], 0  ;;  %s22140_s0 = inlined_call_operand.vmem [shape: bf16[2,1,28,28], index: 0, kind: input, shape index: {}]   ;;  %s22141_s1 = inlined_call_operand.vmem [shape: bf16[3,28,832], index: 1, kind: input, shape index: {}]   ;;  %s22142_s2 = inlined_call_operand.vmem [shape: f32[1,832], index: 2, kind: input, shape index: {}]   ;;  %s22143_s3 = inlined_call_operand.vmem [shape: bf16[3,832,704], index: 3, kind: input, shape index: {}]   ;;  %s22144_s4 = inlined_call_operand.vmem [shape: f32[1,704], index: 4, kind: input, shape index: {}]   ;;  %s22145_s5 = inlined_call_operand.vmem [shape: bf16[3,704,192], index: 5, kind: input, shape index: {}]   ;;  %s22146_s6 = inlined_call_operand.vmem [shape: f32[1,192], index: 6, kind: input, shape index: {}]   ;;  %s22147_s7 = inlined_call_operand.vmem [shape: bf16[3,192,64], index: 7, kind: input, shape index: {}]   ;;  %s22148_s8 = inlined_call_operand.vmem [shape: f32[1,64], index: 8, kind: input, shape index: {}]   ;;  %s22149_s9 = inlined_call_operand.vmem [shape: bf16[64,128], index: 9, kind: input, shape index: {}]   ;;  %s22150_s10 = inlined_call_operand.vmem [shape: f32[1,128], index: 10, kind: input, shape index: {}]   ;;  %s22151_s11 = inlined_call_operand.hbm [shape: f32[2,1,128], index: 11, kind: output, shape index: {}]  }
   0x1   :  { %18 = vsyncpa [#allocation3 + $0x1], 0  ;;  %s17027_s17 = smov 0   ;;  %s17029_s18 = smov 0  }
   0x2   :  { %s17031_s19 = smov 0   ;;  %s17033_s20 = smov 0  }
   0x3 LB: > { %s17048_s21 = sadd.s32 4294967295, %s16958_s20   ;;  %s12310_s22 = sadd.s32 4294967294, %s16958_s20   ;;  %s16958_s20 = sphi %s17033_s20, %s22159_s20   ;;  %s16954_s19 = sphi %s17031_s19, %s22158_s19   ;;  %s16950_s18 = sphi %s17029_s18, %s22157_s18   ;;  %s16946_s17 = sphi %s17027_s17, %s22156_s17  }
   0x4   : > { %s17052_s23 = sadd.s32 1, %s16958_s20   ;;  %s267_s24 = sadd.s32 1, %s16954_s19 }
   0x5   : > { %s264_s25 = ssub.s32 %s16958_s20, %s17052_s23  ;;  %p277_p0 = scmp.ne.s32.totalorder %s16954_s19, %s16950_s18 }
   0x6   : > { %p265_p1 = scmp.eq.s32.totalorder %s264_s25, 0  ;;  %p278_p2 = scmp.eq.s32.totalorder %s17048_s21, 1 }
   0x7   : > { %p283_p3 = scmp.ne.s32.totalorder %s16950_s18, %s16946_s17  ;;  %p284_p4 = scmp.eq.s32.totalorder %s12310_s22, 1 }
   0x8   : > { %s17063_s26 = scalar_select %p265_p1, %s16954_s19, %s267_s24  }
   0x9   : > { %p17065_p5 = por %p278_p2, %p277_p0  ;;  %p17069_p6 = por %p284_p4, %p283_p3 }
   0xa   : > { %22152 = sst [smem:[#allocation5_spill]] %s17063_s26  ;;  %p12313_p7 = scmp.ge.s32.totalorder %s16958_s20, 1 }
   0xb   : > { %p340_p8 = scmp.lt.s32.totalorder %s16958_s20, 3 }
   0xd   : > { %p341_p9 = pnand %p12313_p7, %p340_p8 }
   0xe   : > { %v14989_v0 = vld [vmem:[%s22141_s1 + $0x7c] ss:$28 sps:$4 sm:$0xff] (!%p341_p9)   ;;  %v14991_v1 = vld [vmem:[%s22141_s1 + $0x74] ss:$28 sps:$4 sm:$0xff] (!%p341_p9)   ;;  %v16960_v2 = vmov (!%p341_p9), 0   ;;  %p379_p10 = scmp.lt.s32.totalorder (!%p341_p9), %s17048_s21, 1 }
   0xf   : > { %344 = sbr.rel (%p341_p9) target bundleno = 3458 (0xd82), region = 64  ;;  %637 = vmatprep.mubr.bf16.mxu1 (!%p341_p9), %v16960_v2  ;;  %574 = vmatprep.mubr.bf16.mxu0 (!%p341_p9), %v16960_v2  ;;  %v14993_v3 = vld [vmem:[%s22141_s1 + $0x78] ss:$28 sps:$4 sm:$0xff] (!%p341_p9)   ;;  %v14994_v4 = vld [vmem:[%s22141_s1 + $0x70] ss:$28 sps:$4 sm:$0xff] (!%p341_p9)   ;;  %vm520_vm0 = vcmask (!%p341_p9), 1045504  }
  0x10   : > { %14597 = vmatprep.subr.bf16.mxu1 (!%p341_p9), %v14989_v0  ;;  %542 = vmatprep.subr.bf16.mxu0 (!%p341_p9), %v14991_v1  ;;  %v14995_v5 = vld [vmem:[%s22141_s1 + $0xb4] ss:$28 sps:$4 sm:$0x3f] (!%p341_p9)   ;;  %v14997_v6 = vld [vmem:[%s22141_s1 + $0xac] ss:$28 sps:$4 sm:$0x3f] (!%p341_p9)  }
  0x11   : > { %14599 = vmatpush1.bf16.msra.mxu1 (!%p341_p9), %v14993_v3  ;;  %543 = vmatpush1.bf16.msra.mxu0 (!%p341_p9), %v14994_v4  ;;  %v14999_v7 = vld [vmem:[%s22141_s1 + $0xb0] ss:$28 sps:$4 sm:$0x3f] (!%p341_p9)   ;;  %v15000_v8 = vld [vmem:[%s22141_s1 + $0xa8] ss:$28 sps:$4 sm:$0x3f] (!%p341_p9)  }
  0x12   : > { %14598 = vmatprep.subr.msk.bf16.mxu1 (!%p341_p9), %vm520_vm0, %v14995_v5  ;;  %12348 = vmatprep.subr.msk.bf16.mxu0 (!%p341_p9), %vm520_vm0, %v14997_v6  ;;  %v528_v9 = vsel (!%p341_p9), %vm520_vm0, %v14999_v7, 0  ;;  %v522_v10 = vsel (!%p341_p9), %vm520_vm0, %v15000_v8, 0  ;;  %v15002_v11 = vld [vmem:[%s22141_s1 + $0x88] ss:$28 sps:$4 sm:$0xff] (!%p341_p9)   ;;  %vm513_vm1 = vcmask (!%p341_p9), 228352   ;;  %vm1065_vm3 = vcmask (!%p341_p9), 1046528  }
  0x13   : > { %vm432_vm2 = vsmask.f32 (!%p341_p9), 7424  ;;  %v15004_v21 = vld [vmem:[%s22141_s1 + $0xc0] ss:$28 sps:$4 sm:$0x3f] (!%p341_p9)   ;;  %s16961_s24 = smov (!%p341_p9), 96  }
  0x14   : > { %v540_v24 = vsel (!%p341_p9), %vm520_vm0, %v15004_v21, 0  ;;  %v15007_v25 = vld [vmem:[%s22141_s1 + $0xc] ss:$28 sps:$4 sm:$0xff] (!%p341_p9)   ;;  %v15013_v26 = vld [vmem:[%s22141_s1 + $0x84] ss:$28 sps:$4 sm:$0xff] (!%p341_p9)   ;;  %s16962_s16 = smov (!%p341_p9), 32  }
  0x15   : > { %14600 = vmatpush1.bf16.msra.mxu1 (!%p341_p9), %v528_v9  ;;  %545 = vmatpush1.bf16.msra.mxu0 (!%p341_p9), %v522_v10  ;;  %v15005_v27 = vld [vmem:[%s22141_s1 + $0x8] ss:$28 sps:$4 sm:$0xff] (!%p341_p9)   ;;  %v15010_v29 = vld [vmem:[%s22141_s1 + $0x40] ss:$28 sps:$4 sm:$0x3f] (!%p341_p9)   ;;  %vm1708_vm4 = vcmask (!%p341_p9), 785408  }
  0x16   : > { %s380_s12 = scalar_select %p379_p10, %s17048_s21, 1  ;;  %14561 = vmatprep.subr.bf16.mxu1 %v15002_v11  ;;  %595 = vmatprep.subr.bf16.mxu0 %v14989_v0  ;;  %v15008_v28 = vld [vmem:[%s22141_s1 + $0x44] ss:$28 sps:$4 sm:$0x3f]   ;;  %v826_v30 = vsel %vm520_vm0, %v15010_v29, 0  ;;  %vm1773_vm5 = vcmask 261120  }
  0x17   : > { %v15017_v31 = vld [vmem:[%s22141_s1 + $0x18] ss:$28 sps:$4 sm:$0xff]   ;;  %v15021_v32 = vld [vmem:[%s22141_s1 + $0x50] ss:$28 sps:$4 sm:$0x3f]   ;;  %vm4052_vm6 = vcmask 523264  }
  0x18   : > { %s14543_s22 = sshll.u32 %s380_s12, 4  ;;  %v15011_v33 = vld [vmem:[%s22141_s1 + $0x80] ss:$28 sps:$4 sm:$0xff]   ;;  %v15016_v35 = vld [vmem:[%s22141_s1 + $0xb8] ss:$28 sps:$4 sm:$0x3f]  }
  0x19   : > { %s383_s29 = scalar_lea.vmem %s22140_s0, %s14543_s22  ;;  %v15014_v34 = vld [vmem:[%s22141_s1 + $0xbc] ss:$28 sps:$4 sm:$0x3f]   ;;  %v838_v36 = vsel %vm520_vm0, %v15021_v32, 0  ;;  %v15024_v37 = vld [vmem:[%s22141_s1 + $0xec] ss:$28 sps:$4 sm:$0xff]  }
  0x1a   : > { %v17113_v12 = vld [vmem:[%s383_s29 + $0x8] sm:$0x3f]   ;;  %v17115_v13 = vld [vmem:[%s383_s29] sm:$0xff]   ;;  %v534_v38 = vsel %vm520_vm0, %v15016_v35, 0  ;;  %v15033_v43 = vld [vmem:[%s22141_s1 + $0x14] ss:$28 sps:$4 sm:$0xff]  }
  0x1b   : > { %v441_v14 = vshll.u32 %v17113_v12, 16  ;;  %v445_v15 = vshrl.u32 %v17113_v12, 16  ;;  %v434_v16 = vshrl.u32 %v17115_v13, 16  ;;  %v436_v17 = vshll.u32 %v17115_v13, 16  ;;  %v15020_v39 = vld [vmem:[%s22141_s1 + $0x4] ss:$28 sps:$4 sm:$0xff]  }
  0x1c   : > { %v15018_v40 = vld [vmem:[%s22141_s1] ss:$28 sps:$4 sm:$0xff]   ;;  %v15027_v42 = vld [vmem:[%s22141_s1 + $0x38] ss:$28 sps:$4 sm:$0x3f]   ;;  %v1066_v49 = vrot.slane %v17115_v13, 1 }
  0x1d   : > { %v443_v18 = vrot.slane %v441_v14, 1  ;;  %v438_v19 = vrot.slane %v436_v17, 1  ;;  %v15025_v41 = vld [vmem:[%s22141_s1 + $0x3c] ss:$28 sps:$4 sm:$0x3f]   ;;  %v820_v45 = vsel %vm520_vm0, %v15027_v42, 0 }
  0x1e   : > { %v15022_v44 = vld [vmem:[%s22141_s1 + $0xe8] ss:$28 sps:$4 sm:$0xff]   ;;  %v15030_v47 = vld [vmem:[%s22141_s1 + $0x120] ss:$28 sps:$4 sm:$0x3f]   ;;  %v1067_v50 = vrot.slane %v17113_v12, 1 }
  0x1f   : > { %v17121_v20 = vor.u32 %v445_v15, %v443_v18  ;;  %v439_v22 = vor.u32 %v438_v19, %v434_v16  ;;  %v15028_v46 = vld [vmem:[%s22141_s1 + $0x124] ss:$28 sps:$4 sm:$0x3f]   ;;  %v15034_v48 = vld [vmem:[%s22141_s1 + $0xf8] ss:$28 sps:$4 sm:$0xff]   ;;  %v1147_v51 = vsel %vm520_vm0, %v15030_v47, 0 }
  0x20   : > { %v15038_v52 = vld [vmem:[%s22141_s1 + $0x130] ss:$28 sps:$4 sm:$0x3f]   ;;  %v1068_v53 = vsel %vm1065_vm3, %v1066_v49, %v1067_v50  ;;  %v15037_v56 = vld [vmem:[%s22141_s1 + $0x48] ss:$28 sps:$4 sm:$0x3f]  }
  0x21   : > { %12353 = vmatmul.mubr.msk.bf16.vlgmr.msra.gmra.mrb[0].mxu1 %vm513_vm1, %v17121_v20  ;;  %v444_v23 = vsel %vm432_vm2, %v439_v22, %v443_v18  ;;  %v15031_v54 = vld [vmem:[%s22141_s1 + $0x10] ss:$28 sps:$4 sm:$0xff]   ;;  %v1159_v57 = vsel %vm520_vm0, %v15038_v52, 0  ;;  %v15041_v58 = vld [vmem:[%s22141_s1 + $0xe4] ss:$28 sps:$4 sm:$0xff]   ;;  %v832_v59 = vsel %vm520_vm0, %v15037_v56, 0 }
  0x22   : > { %14562 = vmatpush3.bf16.msra.mxu1 %v15002_v11  ;;  %12349 = vmatmul.mubr.msk.bf16.vlgmr.msra.gmra.mrb[0].mxu0 %vm513_vm1, %v444_v23  ;;  %v15035_v55 = vld [vmem:[%s22141_s1 + $0x4c] ss:$28 sps:$4 sm:$0x3f]   ;;  %v15039_v60 = vld [vmem:[%s22141_s1 + $0xe0] ss:$28 sps:$4 sm:$0xff]   ;;  %s16963_s13 = smov 64  }
  0x23   : > { %14821 = vmatprep.subr.msk.bf16.mxu1 %vm520_vm0, %v15004_v21  ;;  %596 = vmatpush1.bf16.msra.mxu0 %v14993_v3  ;;  %v15042_v61 = vld [vmem:[%s22141_s1 + $0x11c] ss:$28 sps:$4 sm:$0x3f]   ;;  %v15047_v63 = vld [vmem:[%s22141_s1 + $0xf4] ss:$28 sps:$4 sm:$0xff]   ;;  %vm11091_vm7 = vcmask 1043456  }
  0x24   : > { %14565 = vmatprep.mubr.msk.bf16.mxu1 %vm513_vm1, %v444_v23  ;;  %584 = vmatprep.mubr.bf16.mxu0 %v16960_v2  ;;  %v15044_v62 = vld [vmem:[%s22141_s1 + $0x118] ss:$28 sps:$4 sm:$0x3f]   ;;  %v15045_v1 = vld [vmem:[%s22141_s1 + $0xf0] ss:$28 sps:$4 sm:$0xff]   ;;  %vm16965_vm8 = vmmov 0  }
  0x25   : > { %12351 = vmatprep.subr.msk.bf16.mxu0 %vm520_vm0, %v14995_v5  ;;  %v1141_v0 = vsel %vm520_vm0, %v15044_v62, 0  ;;  %v15048_v3 = vld [vmem:[%s22141_s1 + $0x12c] ss:$28 sps:$4 sm:$0x3f]   ;;  %v15051_v6 = vld [vmem:[%s22143_s3 + $0x9c0] ss:$24 sps:$4 sm:$0xff]  }
  0x26   : > { %14564 = vmatpush3.bf16.msra.mxu1 %v540_v24  ;;  %v15050_v4 = vld [vmem:[%s22141_s1 + $0x128] ss:$28 sps:$4 sm:$0x3f]   ;;  %v15059_v10 = vld [vmem:[%s22143_s3 + $0x9f4] ss:$24 sps:$4 sm:$0xff]   ;;  %vm12229_vm9 = vcmask 1042432  }
  0x27   : > { %893 = vmatprep.subr.bf16.mxu1 %v15007_v25  ;;  %598 = vmatpush1.bf16.msra.mxu0 %v528_v9  ;;  %v1153_v5 = vsel %vm520_vm0, %v15050_v4, 0  ;;  %v15053_v7 = vld [vmem:[%s22143_s3 + $0x9c4] ss:$24 sps:$4 sm:$0xff]   ;;  %v15054_v8 = vld [vmem:[%s22143_s3 + $0x9c8] ss:$24 sps:$4 sm:$0xff]   ;;  %s14540_s22 = sshll.u32 %s17048_s21, 4 }
  0x28   : > { %648 = vmatprep.subr.bf16.mxu0 %v15013_v26  ;;  %v15056_v9 = vld [vmem:[%s22143_s3 + $0x9cc] ss:$24 sps:$4 sm:$0xff]   ;;  %v15062_v11 = vld [vmem:[%s22143_s3 + $0x9fc] ss:$24 sps:$4 sm:$0xff]   ;;  %v15063_v16 = vld [vmem:[%s22143_s3 + $0xa20] ss:$24 sps:$4 sm:$0xff]   ;;  %s22098_s12 = scalar_lea.hbm %s22151_s11, %s14540_s22 }
  0x29   : > { %14566 = vmatmul.mubr.msk.bf16.vlgmr.msra.gmra.mrb[4].mxu1 %vm513_vm1, %v17121_v20  ;;  %v15065_v14 = vld [vmem:[%s22143_s3 + $0xa24] ss:$24 sps:$4 sm:$0xff]   ;;  %v15066_v17 = vld [vmem:[%s22143_s3 + $0xa28] ss:$24 sps:$4 sm:$0xff]   ;;  %v15071_v18 = vld [vmem:[%s22143_s3 + $0xa54] ss:$24 sps:$4 sm:$0xff]  }
  0x2a   : > { %894 = vmatpush1.bf16.msra.mxu1 %v15005_v27  ;;  %925 = vmatprep.mubr.bf16.mxu1 %v16960_v2  ;;  %v15068_v15 = vld [vmem:[%s22143_s3 + $0xa2c] ss:$24 sps:$4 sm:$0xff]   ;;  %v15074_v19 = vld [vmem:[%s22143_s3 + $0xa5c] ss:$24 sps:$4 sm:$0xff]   ;;  %v15072_v21 = vld [vmem:[%s22143_s3 + $0xa58] ss:$24 sps:$4 sm:$0xff]  }
  0x2b   : > { %12350 = vmatmul.mubr.msk.bf16.gmra.mrb[4].mxu0 %vm513_vm1, %v17121_v20  ;;  %12376 = vmatprep.subr.msk.bf16.mxu1 %vm520_vm0, %v15008_v28  ;;  %v15077_v22 = vld [vmem:[%s22143_s3 + $0xa84] ss:$24 sps:$4 sm:$0xff]   ;;  %v15078_v25 = vld [vmem:[%s22143_s3 + $0xa88] ss:$24 sps:$4 sm:$0xff]   ;;  %v15083_v26 = vld [vmem:[%s22143_s3 + $0xab4] ss:$24 sps:$4 sm:$0xff]  }
  0x2c   : > { %627 = vmatprep.mubr.bf16.mxu0 %v16960_v2  ;;  %v15080_v24 = vld [vmem:[%s22143_s3 + $0xa8c] ss:$24 sps:$4 sm:$0xff]   ;;  %v15086_v27 = vld [vmem:[%s22143_s3 + $0xabc] ss:$24 sps:$4 sm:$0xff]   ;;  %v15081_v28 = vld [vmem:[%s22143_s3 + $0xab0] ss:$24 sps:$4 sm:$0xff]  }
  0x2d   : > { %v15084_v29 = vld [vmem:[%s22143_s3 + $0xab8] ss:$24 sps:$4 sm:$0xff]   ;;  %v15101_v42 = vld [vmem:[%s22143_s3 + $0xb44] ss:$24 sps:$4 sm:$0xff]   ;;  %v15107_v47 = vld [vmem:[%s22143_s3 + $0xb74] ss:$24 sps:$4 sm:$0xff]  }
  0x2e   : > { %896 = vmatpush1.bf16.msra.mxu1 %v826_v30  ;;  %v15089_v30 = vld [vmem:[%s22143_s3 + $0xae4] ss:$24 sps:$4 sm:$0xff]   ;;  %s16966_s21 = smov [#allocation2]  }
  0x2f   : > { %14569 = vmatprep.subr.bf16.mxu1 %v15017_v31 }
  0x31   : > { %12377 = vmatmul.mubr.msk.bf16.vlgmr.msra.gmra.mrb[8].mxu1 %vm513_vm1, %v17115_v13 }
  0x32   : > { %935 = vmatprep.mubr.bf16.mxu1 %v16960_v2  ;;  %14570 = vmatpush3.bf16.msra.mxu1 %v15017_v31  ;;  %v15092_v31 = vld [vmem:[%s22143_s3 + $0xaec] ss:$24 sps:$4 sm:$0xff]  }
  0x33   : > { %12352 = vmatmul.mubr.msk.bf16.vlgmr.msra.gmra.mrb[8].mxu0 %vm513_vm1, %v444_v23  ;;  %14822 = vmatprep.subr.msk.bf16.mxu1 %vm520_vm0, %v15021_v32 }
  0x34   : > { %649 = vmatpush1.bf16.msra.mxu0 %v15011_v33  ;;  %680 = vmatprep.mubr.bf16.mxu0 %v16960_v2 }
  0x35   : > { %12354 = vmatprep.subr.msk.bf16.mxu0 %vm520_vm0, %v15014_v34  ;;  %v15087_v34 = vld [vmem:[%s22143_s3 + $0xae0] ss:$24 sps:$4 sm:$0xff]  }
  0x36   : > { %14572 = vmatpush3.bf16.msra.mxu1 %v838_v36  ;;  %v15090_v36 = vld [vmem:[%s22143_s3 + $0xae8] ss:$24 sps:$4 sm:$0xff]  }
  0x37   : > { %1214 = vmatprep.subr.bf16.mxu1 %v15024_v37  ;;  %v15095_v37 = vld [vmem:[%s22143_s3 + $0xb14] ss:$24 sps:$4 sm:$0xff]  }
  0x38   : > { %651 = vmatpush1.bf16.msra.mxu0 %v534_v38 }
  0x39   : > { %12378 = vmatmul.mubr.msk.bf16.gmra.mrb[0].mxu1 %vm513_vm1, %v17113_v12  ;;  %840 = vmatprep.subr.bf16.mxu0 %v15020_v39  ;;  %v15098_v39 = vld [vmem:[%s22143_s3 + $0xb1c] ss:$24 sps:$4 sm:$0xff]  }
  0x3a   : > { %14573 = vmatprep.mubr.msk.bf16.mxu1 %vm513_vm1, %v17115_v13 }
  0x3b   : > { %12355 = vmatmul.mubr.msk.bf16.vlgmr.msra.gmra.mrb[12].mxu0 %vm513_vm1, %v444_v23  ;;  %v15075_v23 = vld [vmem:[%s22143_s3 + $0xa80] ss:$24 sps:$4 sm:$0xff]  }
  0x3c   : > { %841 = vmatpush1.bf16.msra.mxu0 %v15018_v40  ;;  %690 = vmatprep.mubr.bf16.mxu0 %v16960_v2  ;;  %v15093_v40 = vld [vmem:[%s22143_s3 + $0xb10] ss:$24 sps:$4 sm:$0xff]  }
  0x3d   : > { %12373 = vmatprep.subr.msk.bf16.mxu0 %vm520_vm0, %v15025_v41  ;;  %v15096_v41 = vld [vmem:[%s22143_s3 + $0xb18] ss:$24 sps:$4 sm:$0xff]  }
  0x40   : > { %843 = vmatpush1.bf16.msra.mxu0 %v820_v45  ;;  %v15099_v45 = vld [vmem:[%s22143_s3 + $0xb40] ss:$24 sps:$4 sm:$0xff]  }
  0x41   : > { %14574 = vmatmul.mubr.msk.bf16.vlgmr.msra.gmra.mrb[4].mxu1 %vm513_vm1, %v17113_v12  ;;  %946 = vmatprep.subr.bf16.mxu0 %v15033_v43  ;;  %v15104_v43 = vld [vmem:[%s22143_s3 + $0xb4c] ss:$24 sps:$4 sm:$0xff]  }
  0x42   : > { %1215 = vmatpush1.bf16.msra.mxu1 %v15022_v44  ;;  %1246 = vmatprep.mubr.bf16.mxu1 %v16960_v2  ;;  %v1399_v44 = vlaneseq }
  0x43   : > { %12356 = vmatmul.mubr.msk.bf16.gmra.mrb[16].mxu0 %vm513_vm1, %v17121_v20  ;;  %12417 = vmatprep.subr.msk.bf16.mxu1 %vm520_vm0, %v15028_v46  ;;  %v15069_v20 = vld [vmem:[%s22143_s3 + $0xa50] ss:$24 sps:$4 sm:$0xff]  }
  0x44   : > { %872 = vmatprep.mubr.bf16.mxu0 %v16960_v2  ;;  %v15102_v46 = vld [vmem:[%s22143_s3 + $0xb48] ss:$24 sps:$4 sm:$0xff]   ;;  %v17412_v49 = vshrl.u32 %v1399_v44, 7 }
  0x46   : > { %1217 = vmatpush1.bf16.msra.mxu1 %v1147_v51  ;;  %v15108_v51 = vld [vmem:[%s22143_s3 + $0xb78] ss:$24 sps:$4 sm:$0xff]  }
  0x47   : > { %14577 = vmatprep.subr.bf16.mxu1 %v15034_v48 }
  0x49   : > { %12418 = vmatmul.mubr.msk.bf16.vlgmr.msra.gmra.mrb[8].mxu1 %vm513_vm1, %v1068_v53 }
  0x4a   : > { %1256 = vmatprep.mubr.bf16.mxu1 %v16960_v2  ;;  %14578 = vmatpush3.bf16.msra.mxu1 %v15034_v48  ;;  %v15110_v48 = vld [vmem:[%s22143_s3 + $0xb7c] ss:$24 sps:$4 sm:$0xff]  }
  0x4b   : > { %12374 = vmatmul.mubr.msk.bf16.vlgmr.msra.gmra.mrb[0].mxu0 %vm513_vm1, %v17115_v13  ;;  %14823 = vmatprep.subr.msk.bf16.mxu1 %vm520_vm0, %v15038_v52  ;;  %v17423_v52 = vld [vmem:[%s22142_s2] sm:$0x7f] }
  0x4c   : > { %947 = vmatpush1.bf16.msra.mxu0 %v15031_v54  ;;  %882 = vmatprep.mubr.bf16.mxu0 %v16960_v2  ;;  %v1413_v54 = vsub.s32 3, %v17412_v49 }
  0x4d   : > { %12379 = vmatprep.subr.msk.bf16.mxu0 %vm520_vm0, %v15035_v55 }
  0x4e   : > { %14580 = vmatpush3.bf16.msra.mxu1 %v1159_v57  ;;  %v1414_v57 = vrot.slane %v17423_v52, %v1413_v54 }
  0x4f   : > { %4059 = vmatprep.subr.bf16.mxu1 %v15053_v7 }
  0x50   : > { %949 = vmatpush1.bf16.msra.mxu0 %v832_v59 }
  0x51   : > { %12419 = vmatmul.mubr.msk.bf16.gmra.mrb[0].mxu1 %vm513_vm1, %v1067_v50  ;;  %1161 = vmatprep.subr.bf16.mxu0 %v15041_v58 }
  0x52   : > { %14581 = vmatprep.mubr.msk.bf16.mxu1 %vm513_vm1, %v1068_v53 }
  0x53   : > { %12375 = vmatmul.mubr.msk.bf16.gmra.mrb[4].mxu0 %vm513_vm1, %v17113_v12 }
  0x54   : > { %978 = vmatprep.mubr.bf16.mxu0 %v16960_v2 }
  0x59   : > { %14582 = vmatmul.mubr.msk.bf16.vlgmr.msra.gmra.mrb[4].mxu1 %vm513_vm1, %v1067_v50 }
  0x5a   : > { %4060 = vmatpush1.bf16.msra.mxu1 %v15051_v6 }
  0x5b   : > { %12380 = vmatmul.mubr.msk.bf16.vlgmr.msra.gmra.mrb[12].mxu0 %vm513_vm1, %v17115_v13  ;;  %4061 = vmatprep.subr.bf16.mxu1 %v15059_v10  ;;  %v15060_v13 = vld [vmem:[%s22143_s3 + $0x9f8] ss:$24 sps:$4 sm:$0xff]  }
  0x5c   : > { %1162 = vmatpush1.bf16.msra.mxu0 %v15039_v60  ;;  %988 = vmatprep.mubr.bf16.mxu0 %v16960_v2 }
  0x5d   : > { %12414 = vmatprep.subr.msk.bf16.mxu0 %vm520_vm0, %v15042_v61 }
  0x60   : > { %1164 = vmatpush1.bf16.msra.mxu0 %v1141_v0 }
  0x61   : > { %1267 = vmatprep.subr.bf16.mxu0 %v15047_v63 }
  0x63   : > { %12381 = vmatmul.mubr.msk.bf16.gmra.mrb[16].mxu0 %vm513_vm1, %v17113_v12  ;;  %v15057_v12 = vld [vmem:[%s22143_s3 + $0x9f0] ss:$24 sps:$4 sm:$0xff]  }
  0x64   : > { %1193 = vmatprep.mubr.bf16.mxu0 %v16960_v2  ;;  %4062 = vmatpush1.bf16.msra.mxu1 %v15057_v12 }
  0x65   : > { %4063 = vmatprep.subr.bf16.mxu1 %v15065_v14 }
  0x68   : > { %4064 = vmatpush1.bf16.msra.mxu1 %v15063_v16 }
  0x69   : > { %4065 = vmatprep.subr.bf16.mxu1 %v15071_v18 }
  0x6b   : > { %12415 = vmatmul.mubr.msk.bf16.vlgmr.msra.gmra.mrb[0].mxu0 %vm513_vm1, %v1068_v53 }
  0x6c   : > { %1203 = vmatprep.mubr.bf16.mxu0 %v16960_v2  ;;  %1268 = vmatpush1.bf16.msra.mxu0 %v15045_v1 }
  0x6d   : > { %12420 = vmatprep.subr.msk.bf16.mxu0 %vm520_vm0, %v15048_v3  ;;  %4066 = vmatpush1.bf16.msra.mxu1 %v15069_v20 }
  0x6e   : > { %4067 = vmatprep.subr.bf16.mxu1 %v15077_v22 }
  0x70   : > { %1270 = vmatpush1.bf16.msra.mxu0 %v1153_v5 }
  0x71   : > { %4263 = vmatprep.subr.bf16.mxu0 %v15056_v9  ;;  %4068 = vmatpush1.bf16.msra.mxu1 %v15075_v23 }
  0x72   : > { %4069 = vmatprep.subr.bf16.mxu1 %v15083_v26 }
  0x73   : > { %12416 = vmatmul.mubr.msk.bf16.gmra.mrb[4].mxu0 %vm513_vm1, %v1067_v50 }
  0x74   : > { %1299 = vmatprep.mubr.bf16.mxu0 %v16960_v2 }
  0x75   : > { %4070 = vmatpush1.bf16.msra.mxu1 %v15081_v28 }
  0x76   : > { %4071 = vmatprep.subr.bf16.mxu1 %v15089_v30 }
  0x79   : > { %4072 = vmatpush1.bf16.msra.mxu1 %v15087_v34 }
  0x7a   : > { %4073 = vmatprep.subr.bf16.mxu1 %v15095_v37 }
  0x7b   : > { %12421 = vmatmul.mubr.msk.bf16.vlgmr.msra.gmra.mrb[12].mxu0 %vm513_vm1, %v1068_v53  ;;  %v1409_v53 = vsub.s32 2, %v17412_v49 }
  0x7c   : > { %1309 = vmatprep.mubr.bf16.mxu0 %v16960_v2  ;;  %4264 = vmatpush1.bf16.msra.mxu0 %v15054_v8 }
  0x7d   : > { %4265 = vmatprep.subr.bf16.mxu0 %v15062_v11  ;;  %4074 = vmatpush1.bf16.msra.mxu1 %v15093_v40  ;;  %v1410_v55 = vrot.slane %v17423_v52, %v1409_v53  ;;  %v1425_v11 = vsub.s32 6, %v17412_v49 }
  0x7e   : > { %4075 = vmatprep.subr.bf16.mxu1 %v15101_v42 }
  0x7f   : > { %v1426_v30 = vrot.slane %v17423_v52, %v1425_v11 }
  0x80   : > { %4266 = vmatpush1.bf16.msra.mxu0 %v15060_v13 }
  0x81   : > { %4267 = vmatprep.subr.bf16.mxu0 %v15068_v15  ;;  %4076 = vmatpush1.bf16.msra.mxu1 %v15099_v45 }
  0x82   : > { %4077 = vmatprep.subr.bf16.mxu1 %v15107_v47 }
  0x83   : > { %12422 = vmatmul.mubr.msk.bf16.gmra.mrb[16].mxu0 %vm513_vm1, %v1067_v50  ;;  %v15105_v50 = vld [vmem:[%s22143_s3 + $0xb70] ss:$24 sps:$4 sm:$0xff]  }
  0x84   : > { %4268 = vmatpush1.bf16.msra.mxu0 %v15066_v17 }
  0x85   : > { %4269 = vmatprep.subr.bf16.mxu0 %v15074_v19  ;;  %4078 = vmatpush1.bf16.msra.mxu1 %v15105_v50 }
  0x88   : > { %4270 = vmatpush1.bf16.msra.mxu0 %v15072_v21 }
  0x89   : > { %4271 = vmatprep.subr.bf16.mxu0 %v15080_v24 }
  0x8c   : > { %4272 = vmatpush1.bf16.msra.mxu0 %v15078_v25 }
  0x8d   : > { %4273 = vmatprep.subr.bf16.mxu0 %v15086_v27 }
  0x90   : > { %4274 = vmatpush1.bf16.msra.mxu0 %v15084_v29 }
  0x91   : > { %4275 = vmatprep.subr.bf16.mxu0 %v15092_v31 }
  0x94   : > { %4276 = vmatpush1.bf16.msra.mxu0 %v15090_v36 }
  0x95   : > { %4277 = vmatprep.subr.bf16.mxu0 %v15098_v39 }
  0x98   : > { %4278 = vmatpush1.bf16.msra.mxu0 %v15096_v41 }
  0x99   : > { %4279 = vmatprep.subr.bf16.mxu0 %v15104_v43 }
  0x9c   : > { %4280 = vmatpush1.bf16.msra.mxu0 %v15102_v46 }
  0x9d   : > { %4281 = vmatprep.subr.bf16.mxu0 %v15110_v48 }
  0xa0   : > { %4282 = vmatpush1.bf16.msra.mxu0 %v15108_v51 }
 0x106   : > { %v629_v32 = vpop.f32.mrb[8].mxu0 }
 0x107   : > { %v631_v33 = vpop.f32.mrb[9].mxu0 }
 0x108   : > { %v633_v35 = vpop.f32.mrb[10].mxu0 }
 0x109   : > { %v635_v38 = vpop.f32.mrb[11].mxu0 }
 0x11c   : > { %v1248_v56 = vpop.f32.mrb[8].mxu1 }
 0x11d   : > { %v14601_v58 = vadd.f32 %v1248_v56, %v629_v32  ;;  %v1250_v59 = vpop.f32.mrb[9].mxu1 }
 0x11e   : > { %v14602_v60 = vadd.f32 %v1250_v59, %v631_v33  ;;  %v1252_v61 = vpop.f32.mrb[10].mxu1 }
 0x11f   : > { %v1436_v62 = vadd.f32 %v14601_v58, %v1410_v55  ;;  %v14603_v63 = vadd.f32 %v1252_v61, %v633_v35  ;;  %v1254_v0 = vpop.f32.mrb[11].mxu1 }
 0x120   : > { %v1437_v1 = vadd.f32 %v14602_v60, %v1414_v57  ;;  %v14604_v3 = vadd.f32 %v1254_v0, %v635_v38 }
 0x121   : > { %v1464_v4 = vmax.f32 %v1436_v62, 0.0  ;;  %v1443_v5 = vadd.f32 %v14603_v63, %v1410_v55 }
 0x122   : > { %v1465_v6 = vmax.f32 %v1437_v1, 0.0  ;;  %v1444_v7 = vadd.f32 %v14604_v3, %v1414_v57 }
 0x123   : > { %v1471_v8 = vmax.f32 %v1443_v5, 0.0  ;;  %v1525_v12 = vrot.slane %v1464_v4, 1 }
 0x124   : > { %v1472_v9 = vmax.f32 %v1444_v7, 0.0  ;;  %v1258_v10 = vpop.f32.mrb[0].mxu1  ;;  %v1528_v16 = vrot.slane %v1465_v6, 1 }
 0x125   : > { %v1526_v13 = vrot.slane %v1471_v8, 1  ;;  %v1450_v14 = vadd.f32 %v1410_v55, %v1258_v10  ;;  %v1260_v15 = vpop.f32.mrb[1].mxu1 }
 0x126   : > { %v1529_v17 = vrot.slane %v1472_v9, 1  ;;  %v1451_v18 = vadd.f32 %v1414_v57, %v1260_v15  ;;  %v1262_v19 = vpop.f32.mrb[2].mxu1 }
 0x127   : > { %v1478_v20 = vmax.f32 %v1450_v14, 0.0  ;;  %v17434_v21 = vadd.f32 %v1410_v55, %v1262_v19  ;;  %v1264_v22 = vpop.f32.mrb[3].mxu1  ;;  %v1527_v23 = vsel %vm1065_vm3, %v1525_v12, %v1526_v13  ;;  %v15113_v19 = vld [vmem:[%s22143_s3 + $0xba4] ss:$24 sps:$4 sm:$0xff]  }
 0x128   : > { %v1479_v24 = vmax.f32 %v1451_v18, 0.0  ;;  %v17437_v25 = vadd.f32 %v1414_v57, %v1264_v22  ;;  %v17439_v26 = vmax.f32 %v1464_v4, %v1527_v23  ;;  %v1530_v27 = vsel %vm1065_vm3, %v1528_v16, %v1529_v17  ;;  %4079 = vmatprep.subr.bf16.mxu1 %v15113_v19 }
 0x129   : > { %v1544_v28 = vrot.slane %v1478_v20, 1  ;;  %v1485_v29 = vmax.f32 %v17434_v21, 0.0  ;;  %v17444_v31 = vmax.f32 %v1465_v6, %v1530_v27  ;;  %v17485_v6 = vsub.s32 0, %v17412_v49  ;;  %v15114_v27 = vld [vmem:[%s22143_s3 + $0xba8] ss:$24 sps:$4 sm:$0xff]  }
 0x12a   : > { %v1546_v32 = vrot.slane %v1479_v24, 1  ;;  %v1486_v33 = vmax.f32 %v17437_v25, 0.0  ;;  %v15137_v21 = vld [vmem:[%s22143_s3 + $0xc64] ss:$24 sps:$4 sm:$0xff]  }
 0x12b   : > { %v17449_v34 = vrot.slane %v1485_v29, 1  ;;  %v1545_v35 = vsel %vm1065_vm3, %v1526_v13, %v1544_v28 }
 0x12c   : > { %v17454_v36 = vrot.slane %v1486_v33, 1  ;;  %v14583_v37 = vpop.f32.mrb[4].mxu1  ;;  %v17456_v38 = vmax.f32 %v1471_v8, %v1545_v35  ;;  %v1547_v39 = vsel %vm1065_vm3, %v1529_v17, %v1546_v32  ;;  %v17490_v8 = vsub.s32 1, %v17412_v49 }
 0x12d   : > { %v1454_v40 = vadd.f32 %v14583_v37, %v1426_v30  ;;  %v1354_v41 = vpop.f32.mrb[5].mxu1  ;;  %v1559_v42 = vsel %vm1065_vm3, %v1544_v28, %v17449_v34  ;;  %v17461_v43 = vmax.f32 %v1472_v9, %v1547_v39  ;;  %v1402_v9 = vrot.slane %v17423_v52, %v17485_v6  ;;  %v15120_v37 = vld [vmem:[%s22143_s3 + $0xbd8] ss:$24 sps:$4 sm:$0xff]   ;;  %v15122_v39 = vld [vmem:[%s22143_s3 + $0xbdc] ss:$24 sps:$4 sm:$0xff]  }
 0x12e   : > { %v1440_v44 = vadd.f32 %v1426_v30, %v1354_v41  ;;  %v14584_v45 = vpop.f32.mrb[6].mxu1  ;;  %v17463_v46 = vmax.f32 %v1478_v20, %v1559_v42  ;;  %v1561_v47 = vsel %vm1065_vm3, %v1546_v32, %v17454_v36  ;;  %v1406_v10 = vrot.slane %v17423_v52, %v17490_v8  ;;  %v15116_v20 = vld [vmem:[%s22143_s3 + $0xbac] ss:$24 sps:$4 sm:$0xff]  }
 0x12f   : > { %v1482_v48 = vmax.f32 %v1454_v40, 0.0  ;;  %v17467_v50 = vadd.f32 %v14584_v45, %v1426_v30  ;;  %v1357_v51 = vpop.f32.mrb[7].mxu1  ;;  %v17469_v55 = vmax.f32 %v1479_v24, %v1561_v47  ;;  %v15111_v24 = vld [vmem:[%s22143_s3 + $0xba0] ss:$24 sps:$4 sm:$0xff]   ;;  %4283 = vmatprep.subr.bf16.mxu0 %v15116_v20  ;;  %v15119_v32 = vld [vmem:[%s22143_s3 + $0xbd4] ss:$24 sps:$4 sm:$0xff]  }
 0x130   : > { %v1468_v56 = vmax.f32 %v1440_v44, 0.0  ;;  %v1447_v57 = vadd.f32 %v1426_v30, %v1357_v51  ;;  %v15117_v30 = vld [vmem:[%s22143_s3 + $0xbd0] ss:$24 sps:$4 sm:$0xff]   ;;  %4080 = vmatpush1.bf16.msra.mxu1 %v15111_v24  ;;  %4284 = vmatpush1.bf16.msra.mxu0 %v15114_v27 }
 0x131   : > { %v1489_v58 = vmax.f32 %v17467_v50, 0.0  ;;  %v1552_v60 = vrot.slane %v1482_v48, 1  ;;  %4081 = vmatprep.subr.bf16.mxu1 %v15119_v32  ;;  %4285 = vmatprep.subr.bf16.mxu0 %v15122_v39  ;;  %v15134_v32 = vld [vmem:[%s22143_s3 + $0xc3c] ss:$24 sps:$4 sm:$0xff]  }
 0x132   : > { %v1475_v59 = vmax.f32 %v1447_v57, 0.0  ;;  %v1537_v62 = vrot.slane %v1468_v56, 1 }
 0x133   : > { %v17474_v61 = vrot.slane %v1489_v58, 1 }
 0x134   : > { %v1538_v63 = vrot.slane %v1475_v59, 1  ;;  %4082 = vmatpush1.bf16.msra.mxu1 %v15117_v30  ;;  %4286 = vmatpush1.bf16.msra.mxu0 %v15120_v37  ;;  %v15131_v30 = vld [vmem:[%s22143_s3 + $0xc34] ss:$24 sps:$4 sm:$0xff]  }
 0x135   : > { %v1567_v0 = vsel %vm1065_vm3, %v1552_v60, %v17474_v61 }
 0x136   : > { %v1553_v1 = vsel %vm1065_vm3, %v1538_v63, %v1552_v60  ;;  %v1539_v3 = vsel %vm1065_vm3, %v1537_v62, %v1538_v63  ;;  %v17480_v4 = vmax.f32 %v1482_v48, %v1567_v0  ;;  %v1421_v62 = vsub.s32 5, %v17412_v49 }
 0x137   : > { %v17482_v5 = vmax.f32 %v1475_v59, %v1553_v1  ;;  %v17487_v7 = vmax.f32 %v1468_v56, %v1539_v3  ;;  %v1417_v56 = vsub.s32 4, %v17412_v49  ;;  %v16536_v49 = vld [vmem:[%s22145_s5 + $0x470] ss:$8 sps:$4 sm:$0xff]  }
 0x139   : > { %v17557_v20 = vrot.slane %v17423_v52, %v1417_v56 }
 0x13e   : > { %v1195_v11 = vpop.f32.mrb[0].mxu0 }
 0x13f   : > { %v1434_v12 = vadd.f32 %v1402_v9, %v1195_v11  ;;  %v1197_v13 = vpop.f32.mrb[1].mxu0 }
 0x140   : > { %v1435_v14 = vadd.f32 %v1406_v10, %v1197_v13  ;;  %v1199_v15 = vpop.f32.mrb[2].mxu0  ;;  %v15128_v13 = vld [vmem:[%s22143_s3 + $0xc0c] ss:$24 sps:$4 sm:$0xff]  }
 0x141   : > { %v1462_v16 = vmax.f32 %v1434_v12, 0.0  ;;  %v17496_v17 = vadd.f32 %v1402_v9, %v1199_v15  ;;  %v1201_v18 = vpop.f32.mrb[3].mxu0  ;;  %v15125_v12 = vld [vmem:[%s22143_s3 + $0xc04] ss:$24 sps:$4 sm:$0xff]   ;;  %4287 = vmatprep.subr.bf16.mxu0 %v15128_v13 }
 0x142   : > { %v1463_v22 = vmax.f32 %v1435_v14, 0.0  ;;  %v17504_v23 = vadd.f32 %v1406_v10, %v1201_v18  ;;  %4083 = vmatprep.subr.bf16.mxu1 %v15125_v12 }
 0x143   : > { %v1469_v28 = vmax.f32 %v17496_v17, 0.0  ;;  %v1519_v40 = vrot.slane %v1462_v16, 1 }
 0x144   : > { %v1470_v35 = vmax.f32 %v17504_v23, 0.0  ;;  %v1522_v42 = vrot.slane %v1463_v22, 1  ;;  %v17562_v23 = vrot.slane %v17423_v52, %v1421_v62 }
 0x145   : > { %v1520_v41 = vrot.slane %v1469_v28, 1 }
 0x146   : > { %v1523_v44 = vrot.slane %v1470_v35, 1  ;;  %v1205_v45 = vpop.f32.mrb[4].mxu0 }
 0x147   : > { %v1521_v47 = vsel %vm1065_vm3, %v1519_v40, %v1520_v41  ;;  %v17527_v48 = vadd.f32 %v1402_v9, %v1205_v45  ;;  %v1207_v51 = vpop.f32.mrb[5].mxu0 }
 0x148   : > { %v1449_v57 = vadd.f32 %v1406_v10, %v1207_v51  ;;  %v1209_v59 = vpop.f32.mrb[6].mxu0  ;;  %v1524_v60 = vsel %vm1065_vm3, %v1522_v42, %v1523_v44  ;;  %v17532_v63 = vmax.f32 %v1462_v16, %v1521_v47  ;;  %v15123_v16 = vld [vmem:[%s22143_s3 + $0xc00] ss:$24 sps:$4 sm:$0xff]  }
 0x149   : > { %v1476_v0 = vmax.f32 %v17527_v48, 0.0  ;;  %v17535_v1 = vadd.f32 %v1402_v9, %v1209_v59  ;;  %v1211_v3 = vpop.f32.mrb[7].mxu0  ;;  %v17537_v11 = vmax.f32 %v1463_v22, %v1524_v60  ;;  %v15126_v9 = vld [vmem:[%s22143_s3 + $0xc08] ss:$24 sps:$4 sm:$0xff]   ;;  %4084 = vmatpush1.bf16.msra.mxu1 %v15123_v16  ;;  %v15132_v42 = vld [vmem:[%s22143_s3 + $0xc38] ss:$24 sps:$4 sm:$0xff]  }
 0x14a   : > { %v1477_v14 = vmax.f32 %v1449_v57, 0.0  ;;  %v1456_v15 = vadd.f32 %v1406_v10, %v1211_v3  ;;  %4288 = vmatpush1.bf16.msra.mxu0 %v15126_v9  ;;  %4085 = vmatprep.subr.bf16.mxu1 %v15131_v30  ;;  %v15143_v30 = vld [vmem:[%s22143_s3 + $0xc94] ss:$24 sps:$4 sm:$0xff]  }
 0x14b   : > { %v1540_v17 = vrot.slane %v1476_v0, 1  ;;  %v1483_v18 = vmax.f32 %v17535_v1, 0.0  ;;  %v14869_v19 = vpack.i.bf16 %v17439_v26, %v17537_v11  ;;  %4289 = vmatprep.subr.bf16.mxu0 %v15134_v32 }
 0x14c   : > { %v1542_v10 = vrot.slane %v1477_v14, 1  ;;  %v1484_v22 = vmax.f32 %v1456_v15, 0.0 }
 0x14d   : > { %v1541_v24 = vsel %vm1065_vm3, %v1520_v41, %v1540_v17  ;;  %v1554_v27 = vrot.slane %v1483_v18, 1  ;;  %14870 = vrot.lane.b32.xlu0 %v14869_v19, %s16961_s24  ;;  %v15129_v41 = vld [vmem:[%s22143_s3 + $0xc30] ss:$24 sps:$4 sm:$0xff]  }
 0x14e   : > { %v1556_v52 = vrot.slane %v1484_v22, 1  ;;  %v1301_v37 = vpop.f32.mrb[12].mxu0  ;;  %v1543_v39 = vsel %vm1065_vm3, %v1523_v44, %v1542_v10  ;;  %v17575_v40 = vmax.f32 %v1469_v28, %v1541_v24  ;;  %v17590_v28 = vmax.f32 %v1485_v29, %v17449_v34  ;;  %4086 = vmatpush1.bf16.msra.mxu1 %v15129_v41  ;;  %4290 = vmatpush1.bf16.msra.mxu0 %v15132_v42  ;;  %v15140_v29 = vld [vmem:[%s22143_s3 + $0xc6c] ss:$24 sps:$4 sm:$0xff]   ;;  %v15138_v19 = vld [vmem:[%s22143_s3 + $0xc68] ss:$24 sps:$4 sm:$0xff]  }
 0x14f   : > { %v1555_v45 = vsel %vm1065_vm3, %v1540_v17, %v1554_v27  ;;  %v1438_v47 = vadd.f32 %v17557_v20, %v1301_v37  ;;  %v1303_v48 = vpop.f32.mrb[13].mxu0  ;;  %v17585_v51 = vmax.f32 %v1470_v35, %v1543_v39  ;;  %4087 = vmatprep.subr.bf16.mxu1 %v15137_v21  ;;  %4291 = vmatprep.subr.bf16.mxu0 %v15140_v29  ;;  %v15144_v37 = vld [vmem:[%s22143_s3 + $0xc98] ss:$24 sps:$4 sm:$0xff]   ;;  %v15146_v39 = vld [vmem:[%s22143_s3 + $0xc9c] ss:$24 sps:$4 sm:$0xff]  }
 0x150   : > { %v17592_v44 = vmax.f32 %v1484_v22, %v1556_v52  ;;  %v1439_v57 = vadd.f32 %v17562_v23, %v1303_v48  ;;  %v1305_v59 = vpop.f32.mrb[14].mxu0  ;;  %v1557_v60 = vsel %vm1065_vm3, %v1542_v10, %v1556_v52  ;;  %v17614_v17 = vmax.f32 %v1476_v0, %v1555_v45  ;;  %v15141_v0 = vld [vmem:[%s22143_s3 + $0xc90] ss:$24 sps:$4 sm:$0xff]  }
 0x151   : > { %v1466_v3 = vmax.f32 %v1438_v47, 0.0  ;;  %v17597_v12 = vadd.f32 %v17557_v20, %v1305_v59  ;;  %v1307_v35 = vpop.f32.mrb[15].mxu0  ;;  %v14874_v13 = vpack.i.bf16 %v17456_v38, %v17585_v51  ;;  %v17601_v15 = vmax.f32 %v1477_v14, %v1557_v60  ;;  %v15135_v14 = vld [vmem:[%s22143_s3 + $0xc60] ss:$24 sps:$4 sm:$0xff]  }
 0x152   : > { %v1467_v34 = vmax.f32 %v1439_v57, 0.0  ;;  %v17610_v16 = vadd.f32 %v17562_v23, %v1307_v35  ;;  %v14884_v9 = vpack.i.bf16 %v17590_v28, %v17592_v44  ;;  %v17634_v52 = vpack.i.bf16 %v17575_v40, %v17532_v63  ;;  %4088 = vmatpush1.bf16.msra.mxu1 %v15135_v14  ;;  %4292 = vmatpush1.bf16.msra.mxu0 %v15138_v19 }
 0x153   : > { %v1473_v10 = vmax.f32 %v17597_v12, 0.0  ;;  %14875 = vrot.lane.b32.xlu0 %v14874_v13, %s16961_s24  ;;  %v1531_v22 = vrot.slane %v1466_v3, 1  ;;  %v17644_v41 = vmax.f32 %v1483_v18, %v1554_v27  ;;  %v14889_v48 = vpack.i.bf16 %v17463_v46, %v17601_v15  ;;  %4089 = vmatprep.subr.bf16.mxu1 %v15143_v30 }
 0x154   : > { %v1474_v24 = vmax.f32 %v17610_v16, 0.0  ;;  %14885 = vrot.lane.b32.xlu1 %v14884_v9, %s16961_s24  ;;  %v1534_v42 = vrot.slane %v1467_v34, 1  ;;  %4293 = vmatprep.subr.bf16.mxu0 %v15146_v39  ;;  %v15149_v16 = vld [vmem:[%s22143_s3 + $0xcc4] ss:$24 sps:$4 sm:$0xff]  }
 0x155   : > { %v1532_v32 = vrot.slane %v1473_v10, 1  ;;  %v15152_v9 = vld [vmem:[%s22143_s3 + $0xccc] ss:$24 sps:$4 sm:$0xff]   ;;  %v14894_v19 = vpack.i.bf16 %v17644_v41, %v17614_v17 }
 0x156   : > { %v1535_v45 = vrot.slane %v1474_v24, 1  ;;  %v1311_v47 = vpop.f32.mrb[16].mxu0  ;;  %4090 = vmatpush1.bf16.msra.mxu1 %v15141_v0  ;;  %4294 = vmatpush1.bf16.msra.mxu0 %v15144_v37 }
 0x157   : > { %v1452_v57 = vadd.f32 %v17557_v20, %v1311_v47  ;;  %14880 = vrot.lane.b32.xlu0 %v17634_v52, %s16961_s24  ;;  %v1313_v59 = vpop.f32.mrb[17].mxu0  ;;  %v1533_v60 = vsel %vm1065_vm3, %v1531_v22, %v1532_v32  ;;  %4110 = vmatprep.subr.bf16.mxu1 %v15149_v16 }
 0x158   : > { %v1453_v1 = vadd.f32 %v17562_v23, %v1313_v59  ;;  %14890 = vrot.lane.b32.xlu1 %v14889_v48, %s16961_s24  ;;  %v1315_v18 = vpop.f32.mrb[18].mxu0  ;;  %v17654_v27 = vmax.f32 %v1466_v3, %v1533_v60  ;;  %v1536_v12 = vsel %vm1065_vm3, %v1534_v42, %v1535_v45  ;;  %4314 = vmatprep.subr.bf16.mxu0 %v15152_v9 }
 0x159   : > { %v1480_v35 = vmax.f32 %v1452_v57, 0.0  ;;  %v1459_v13 = vadd.f32 %v17557_v20, %v1315_v18  ;;  %v1317_v21 = vpop.f32.mrb[19].mxu0  ;;  %v17658_v29 = vmax.f32 %v1467_v34, %v1536_v12 }
 0x15a   : > { %v1481_v3 = vmax.f32 %v1453_v1, 0.0  ;;  %v1460_v14 = vadd.f32 %v17562_v23, %v1317_v21  ;;  %v14899_v20 = vpack.i.bf16 %v17654_v27, %v17444_v31 }
 0x15b   : > { %v1548_v34 = vrot.slane %v1480_v35, 1  ;;  %v1487_v22 = vmax.f32 %v1459_v13, 0.0 }
 0x15c   : > { %v1550_v0 = vrot.slane %v1481_v3, 1  ;;  %v1488_v30 = vmax.f32 %v1460_v14, 0.0  ;;  %14895 = vrot.lane.b32.xlu1 %v14894_v19, %s16961_s24  ;;  %14900 = vrot.lane.b32.xlu0 %v14899_v20, %s16961_s24 }
 0x15d   : > { %v1562_v37 = vrot.slane %v1487_v22, 1  ;;  %v1549_v39 = vsel %vm1065_vm3, %v1532_v32, %v1548_v34 }
 0x15e   : > { %v1564_v23 = vrot.slane %v1488_v30, 1  ;;  %v17674_v42 = vmax.f32 %v1473_v10, %v1549_v39  ;;  %v1551_v47 = vsel %vm1065_vm3, %v1535_v45, %v1550_v0  ;;  %v17692_v10 = vmax.f32 %v1486_v33, %v17454_v36 }
 0x15f   : > { %v1563_v48 = vsel %vm1065_vm3, %v1548_v34, %v1562_v37  ;;  %v17678_v57 = vmax.f32 %v1474_v24, %v1551_v47  ;;  %v17680_v59 = vmax.f32 %v1487_v22, %v1562_v37  ;;  %v14919_v45 = vpack.i.bf16 %v17487_v7, %v17658_v29 }
 0x160   : > { %v14904_v60 = vpack.i.bf16 %v17674_v42, %v17461_v43  ;;  %v17684_v1 = vmax.f32 %v1480_v35, %v1563_v48  ;;  %v1565_v18 = vsel %vm1065_vm3, %v1550_v0, %v1564_v23  ;;  %v17703_v35 = vmax.f32 %v1488_v30, %v1564_v23 }
 0x161   : > { %v17687_v12 = vmax.f32 %v1481_v3, %v1565_v18  ;;  %v14914_v32 = vpack.i.bf16 %v17680_v59, %v17692_v10  ;;  %v14924_v25 = vpack.i.bf16 %v17482_v5, %v17678_v57  ;;  %v17711_v33 = vmax.f32 %v1489_v58, %v17474_v61 }
 0x162   : > { %14905 = vrot.lane.b32.xlu1 %v14904_v60, %s16961_s24  ;;  %v14909_v24 = vpack.i.bf16 %v17684_v1, %v17469_v55 }
 0x163   : > { %v14929_v36 = vpack.i.bf16 %v17480_v4, %v17687_v12  ;;  %v14934_v13 = vpack.i.bf16 %v17711_v33, %v17703_v35 }
 0x164   : > { %14910 = vrot.lane.b32.xlu0 %v14909_v24, %s16961_s24 }
 0x166   : > { %14915 = vrot.lane.b32.xlu1 %v14914_v32, %s16961_s24 }
 0x168   : > { %14920 = vrot.lane.b32.xlu0 %v14919_v45, %s16961_s24 }
 0x16a   : > { %14925 = vrot.lane.b32.xlu1 %v14924_v25, %s16961_s24 }
 0x16c   : > { %14930 = vrot.lane.b32.xlu0 %v14929_v36, %s16961_s24 }
 0x16e   : > { %14935 = vrot.lane.b32.xlu1 %v14934_v13, %s16961_s24 }
 0x170   : > { %14940 = vrot.lane.b32.xlu0 %v17634_v52, %s16962_s16 }
 0x172   : > { %14945 = vrot.lane.b32.xlu1 %v14894_v19, %s16962_s16  ;;  %s16900_s16 = sshll.u32 %s16966_s21, 4  ;;  %s16901_s16 = int_to_ptr.vmem [resolvable:$false] %s16900_s16 }
 0x173   : > { %s16902_s24 = scalar_lea.vmem %s16901_s16, 32 }
 0x1bf   : > { %v14871_v21 = vpop.permute.xlu0 %14870 }
 0x1c0   : > { %v14873_v58 = vunpack.i.h.bf16 %v14871_v21  ;;  %v14872_v61 = vunpack.i.l.bf16 %v14871_v21 }
 0x1c2   : > { %v1710_v0 = vsel %vm1708_vm4, %v14872_v61, %v14873_v58 }
 0x1c3   : > { %v1779_v18 = vmax.f32 %v17537_v11, %v1710_v0 }
 0x1c5   : > { %v14876_v50 = vpop.permute.xlu0 %14875 }
 0x1c6   : > { %v14878_v16 = vunpack.i.h.bf16 %v14876_v50  ;;  %v14877_v9 = vunpack.i.l.bf16 %v14876_v50  ;;  %v17721_v3 = vpop.permute.xlu1 %14885 }
 0x1c7   : > { %v14888_v14 = vunpack.i.h.bf16 %v17721_v3  ;;  %v14887_v20 = vunpack.i.l.bf16 %v17721_v3 }
 0x1c8   : > { %v1716_v34 = vsel %vm1708_vm4, %v14877_v9, %v14878_v16 }
 0x1c9   : > { %v14881_v22 = vpop.permute.xlu0 %14880  ;;  %v1786_v37 = vmax.f32 %v17585_v51, %v1716_v34  ;;  %v1728_v39 = vsel %vm1708_vm4, %v14887_v20, %v14888_v14 }
 0x1ca   : > { %v14883_v52 = vunpack.i.h.bf16 %v14881_v22  ;;  %v14882_v19 = vunpack.i.l.bf16 %v14881_v22  ;;  %v14891_v30 = vpop.permute.xlu1 %14890  ;;  %v1800_v51 = vmax.f32 %v17592_v44, %v1728_v39  ;;  %v15150_v39 = vld [vmem:[%s22143_s3 + $0xcc8] ss:$24 sps:$4 sm:$0xff]  }
 0x1cb   : > { %v14893_v23 = vunpack.i.h.bf16 %v14891_v30  ;;  %v14892_v47 = vunpack.i.l.bf16 %v14891_v30  ;;  %v17741_v21 = vpack.c.bf16 %v1786_v37, %v1779_v18 }
 0x1cc   : > { %v1709_v48 = vsel %vm1708_vm4, %v14882_v19, %v14872_v61  ;;  %v1715_v60 = vsel %vm1708_vm4, %v14883_v52, %v14877_v9 }
 0x1cd   : > { %v1778_v24 = vmax.f32 %v17532_v63, %v1709_v48  ;;  %v1785_v32 = vmax.f32 %v17575_v40, %v1715_v60  ;;  %v1722_v45 = vsel %vm1708_vm4, %v14892_v47, %v14893_v23  ;;  %v2462_v52 = vrot.slane %v17741_v21, 1 }
 0x1ce   : > { %v1793_v25 = vmax.f32 %v17601_v15, %v1722_v45  ;;  %v14896_v36 = vpop.permute.xlu1 %14895  ;;  %v17739_v13 = vpop.permute.xlu0 %14900 }
 0x1cf   : > { %v14898_v50 = vunpack.i.h.bf16 %v14896_v36  ;;  %v14897_v61 = vunpack.i.l.bf16 %v14896_v36  ;;  %v14902_v11 = vunpack.i.l.bf16 %v17739_v13  ;;  %v17746_v63 = vpack.c.bf16 %v1785_v32, %v1778_v24  ;;  %v15155_v24 = vld [vmem:[%s22143_s3 + $0xcf4] ss:$24 sps:$4 sm:$0xff]  }
 0x1d0   : > { %v17743_v9 = vpack.c.bf16 %v1800_v51, %v1793_v25  ;;  %v14903_v22 = vunpack.i.h.bf16 %v17739_v13  ;;  %v15158_v36 = vld [vmem:[%s22143_s3 + $0xcfc] ss:$24 sps:$4 sm:$0xff]  }
 0x1d1   : > { %v1727_v40 = vsel %vm1708_vm4, %v14898_v50, %v14887_v20  ;;  %v1721_v34 = vsel %vm1708_vm4, %v14897_v61, %v14892_v47  ;;  %v1711_v0 = vsel %vm1708_vm4, %v14873_v58, %v14902_v11  ;;  %v15147_v20 = vld [vmem:[%s22143_s3 + $0xcc0] ss:$24 sps:$4 sm:$0xff]   ;;  %v2459_v60 = vrot.slane %v17746_v63, 1 }
 0x1d2   : > { %v1799_v44 = vmax.f32 %v17644_v41, %v1727_v40  ;;  %v1792_v15 = vmax.f32 %v17614_v17, %v1721_v34  ;;  %v17756_v19 = vrot.slane %v17743_v9, 1  ;;  %v1712_v47 = vsel %vm1708_vm4, %v14902_v11, %v14903_v22 }
 0x1d3   : > { %v1780_v13 = vmax.f32 %v17439_v26, %v1711_v0  ;;  %v15153_v26 = vld [vmem:[%s22143_s3 + $0xcf0] ss:$24 sps:$4 sm:$0xff]  }
 0x1d4   : > { %v17758_v30 = vpack.c.bf16 %v1799_v44, %v1792_v15  ;;  %v17760_v37 = vpop.permute.xlu1 %14905  ;;  %v17769_v58 = vsel %vm1065_vm3, %v2462_v52, %v17756_v19 }
 0x1d5   : > { %v14908_v41 = vunpack.i.h.bf16 %v17760_v37  ;;  %v14907_v17 = vunpack.i.l.bf16 %v17760_v37  ;;  %4091 = vmatprep.mubr.bf16.mxu1 %v17769_v58  ;;  %4295 = vmatprep.mubr.bf16.mxu0 %v17769_v58  ;;  %v15161_v37 = vld [vmem:[%s22143_s3 + $0xd24] ss:$24 sps:$4 sm:$0xff]  }
 0x1d6   : > { %v17777_v48 = vpop.permute.xlu0 %14910  ;;  %v17781_v18 = vrot.slane %v17758_v30, 1 }
 0x1d7   : > { %v1717_v32 = vsel %vm1708_vm4, %v14878_v16, %v14907_v17  ;;  %v1718_v45 = vsel %vm1708_vm4, %v14907_v17, %v14908_v41  ;;  %v14913_v51 = vunpack.i.h.bf16 %v17777_v48  ;;  %v14912_v25 = vunpack.i.l.bf16 %v17777_v48  ;;  %v15164_v17 = vld [vmem:[%s22143_s3 + $0xd2c] ss:$24 sps:$4 sm:$0xff]  }
 0x1d8   : > { %v1787_v50 = vmax.f32 %v17456_v38, %v1717_v32  ;;  %v17795_v61 = vpop.permute.xlu1 %14915  ;;  %v17799_v11 = vsel %vm1065_vm3, %v2459_v60, %v17781_v18  ;;  %v15156_v38 = vld [vmem:[%s22143_s3 + $0xcf8] ss:$24 sps:$4 sm:$0xff]   ;;  %v1788_v15 = vmax.f32 %v17461_v43, %v1718_v45 }
 0x1d9   : > { %v1723_v16 = vsel %vm1708_vm4, %v14893_v23, %v14912_v25  ;;  %v1724_v40 = vsel %vm1708_vm4, %v14912_v25, %v14913_v51  ;;  %v14918_v34 = vunpack.i.h.bf16 %v17795_v61  ;;  %v14917_v44 = vunpack.i.l.bf16 %v17795_v61  ;;  %4092 = vmatmul.mubr.bf16.vlgmr.msra.gmra.mrb[12].mxu1 %v17799_v11  ;;  %4296 = vmatmul.mubr.bf16.vlgmr.msra.gmra.mrb[20].mxu0 %v17799_v11  ;;  %v15170_v25 = vld [vmem:[%s22143_s3 + $0xd5c] ss:$24 sps:$4 sm:$0xff]  }
 0x1da   : > { %v1781_v23 = vmax.f32 %v17444_v31, %v1712_v47  ;;  %v17815_v0 = vpack.c.bf16 %v1787_v50, %v1780_v13  ;;  %4111 = vmatpush1.bf16.msra.mxu1 %v15147_v20  ;;  %v17817_v52 = vpop.permute.xlu0 %14920  ;;  %v1794_v48 = vmax.f32 %v17463_v46, %v1723_v16  ;;  %4315 = vmatpush1.bf16.msra.mxu0 %v15150_v39 }
 0x1db   : > { %v1729_v31 = vsel %vm1708_vm4, %v14888_v14, %v14917_v44  ;;  %v1730_v43 = vsel %vm1708_vm4, %v14917_v44, %v14918_v34  ;;  %4101 = vmatprep.mubr.bf16.mxu1 %v17756_v19  ;;  %v14922_v20 = vunpack.i.l.bf16 %v17817_v52  ;;  %v1795_v47 = vmax.f32 %v17469_v55, %v1724_v40  ;;  %4305 = vmatprep.mubr.bf16.mxu0 %v17756_v19  ;;  %v15159_v55 = vld [vmem:[%s22143_s3 + $0xd20] ss:$24 sps:$4 sm:$0xff]   ;;  %v15165_v44 = vld [vmem:[%s22143_s3 + $0xd50] ss:$24 sps:$4 sm:$0xff]  }
 0x1dc   : > { %v1801_v60 = vmax.f32 %v17590_v28, %v1729_v31  ;;  %v1802_v32 = vmax.f32 %v17692_v10, %v1730_v43  ;;  %4112 = vmatprep.subr.bf16.mxu1 %v15155_v24  ;;  %v17836_v46 = vpop.permute.xlu1 %14925  ;;  %4316 = vmatprep.subr.bf16.mxu0 %v15158_v36  ;;  %v15162_v28 = vld [vmem:[%s22143_s3 + $0xd28] ss:$24 sps:$4 sm:$0xff]   ;;  %v15167_v10 = vld [vmem:[%s22143_s3 + $0xd54] ss:$24 sps:$4 sm:$0xff]   ;;  %v17851_v39 = vpack.c.bf16 %v1788_v15, %v1781_v23 }
 0x1dd   : > { %v1713_v3 = vsel %vm1708_vm4, %v14903_v22, %v14922_v20  ;;  %v14927_v14 = vunpack.i.l.bf16 %v17836_v46 }
 0x1de   : > { %v17853_v24 = vpack.c.bf16 %v1801_v60, %v1794_v48  ;;  %v17855_v22 = vpack.c.bf16 %v1802_v32, %v1795_v47  ;;  %4113 = vmatpush1.bf16.msra.mxu1 %v15153_v26  ;;  %v17857_v45 = vpop.permute.xlu0 %14930  ;;  %4317 = vmatpush1.bf16.msra.mxu0 %v15156_v38  ;;  %v1782_v50 = vmax.f32 %v17654_v27, %v1713_v3  ;;  %v14923_v27 = vunpack.i.h.bf16 %v17817_v52  ;;  %v15176_v47 = vld [vmem:[%s22143_s3 + $0xd8c] ss:$24 sps:$4 sm:$0xff]  }
 0x1df   : > { %v1719_v36 = vsel %vm1708_vm4, %v14908_v41, %v14927_v14  ;;  %v14932_v13 = vunpack.i.l.bf16 %v17857_v45  ;;  %4114 = vmatprep.subr.bf16.mxu1 %v15161_v37  ;;  %4318 = vmatprep.subr.bf16.mxu0 %v15164_v17  ;;  %v2468_v15 = vrot.slane %v17851_v39, 1  ;;  %v15173_v37 = vld [vmem:[%s22143_s3 + $0xd84] ss:$24 sps:$4 sm:$0xff]   ;;  %v14933_v17 = vunpack.i.h.bf16 %v17857_v45  ;;  %v15246_v45 = vld [vmem:[%s22143_s3 + $0xfc8] ss:$24 sps:$4 sm:$0xff]  }
 0x1e0   : > { %v1789_v61 = vmax.f32 %v17674_v42, %v1719_v36  ;;  %v17868_v16 = vpop.permute.xlu1 %14935  ;;  %v17871_v40 = vrot.slane %v17855_v22, 1  ;;  %v14928_v42 = vunpack.i.h.bf16 %v17836_v46  ;;  %v15171_v36 = vld [vmem:[%s22143_s3 + $0xd80] ss:$24 sps:$4 sm:$0xff]   ;;  %v1714_v46 = vsel %vm1708_vm4, %v14922_v20, %v14923_v27 }
 0x1e1   : > { %v1725_v41 = vsel %vm1708_vm4, %v14913_v51, %v14932_v13  ;;  %v14937_v26 = vunpack.i.l.bf16 %v17868_v16  ;;  %4102 = vmatmul.mubr.bf16.gmra.mrb[16].mxu1 %v17781_v18  ;;  %4306 = vmatmul.mubr.bf16.gmra.mrb[24].mxu0 %v17781_v18  ;;  %v15168_v51 = vld [vmem:[%s22143_s3 + $0xd58] ss:$24 sps:$4 sm:$0xff]   ;;  %v14938_v32 = vunpack.i.h.bf16 %v17868_v16  ;;  %v1726_v16 = vsel %vm1708_vm4, %v14932_v13, %v14933_v17 }
 0x1e2   : > { %v17884_v38 = vpack.c.bf16 %v1789_v61, %v1782_v50  ;;  %4115 = vmatpush1.bf16.msra.mxu1 %v15159_v55  ;;  %v14941_v23 = vpop.permute.xlu0 %14940  ;;  %4319 = vmatpush1.bf16.msra.mxu0 %v15162_v28  ;;  %v1796_v60 = vmax.f32 %v17684_v1, %v1725_v41  ;;  %v17905_v55 = vsel %vm1065_vm3, %v2468_v15, %v17871_v40  ;;  %v15179_v50 = vld [vmem:[%s22143_s3 + $0xdb4] ss:$24 sps:$4 sm:$0xff]  }
 0x1e3   : > { %v1731_v48 = vsel %vm1708_vm4, %v14918_v34, %v14937_v26  ;;  %v14943_v31 = vunpack.i.h.bf16 %v14941_v23  ;;  %v14942_v43 = vunpack.i.l.bf16 %v14941_v23  ;;  %4116 = vmatprep.subr.bf16.mxu1 %v15167_v10  ;;  %4320 = vmatprep.subr.bf16.mxu0 %v15170_v25  ;;  %v15174_v25 = vld [vmem:[%s22143_s3 + $0xd88] ss:$24 sps:$4 sm:$0xff]   ;;  %v15182_v15 = vld [vmem:[%s22143_s3 + $0xdbc] ss:$24 sps:$4 sm:$0xff]   ;;  %v1783_v20 = vmax.f32 %v17658_v29, %v1714_v46  ;;  %v15252_v29 = vld [vmem:[%s22143_s3 + $0xff8] ss:$24 sps:$4 sm:$0xff]  }
 0x1e4   : > { %v1803_v3 = vmax.f32 %v17680_v59, %v1731_v48  ;;  %v14946_v34 = vpop.permute.xlu1 %14945  ;;  %4142 = vmatprep.mubr.bf16.mxu1 %v17905_v55  ;;  %4346 = vmatprep.mubr.bf16.mxu0 %v17905_v55  ;;  %v15290_v46 = vld [vmem:[%s22143_s3 + $0x111c] ss:$24 sps:$4 sm:$0xff]  }
 0x1e5   : > { %v1775_v28 = vsel %vm1773_vm5, %v14928_v42, %v14943_v31  ;;  %v1774_v10 = vsel %vm1773_vm5, %v14923_v27, %v14942_v43  ;;  %v14948_v1 = vunpack.i.h.bf16 %v14946_v34  ;;  %v14947_v59 = vunpack.i.l.bf16 %v14946_v34  ;;  %v15194_v34 = vld [vmem:[%s22143_s3 + $0xe1c] ss:$24 sps:$4 sm:$0xff]  }
 0x1e6   : > { %v17924_v61 = vpack.c.bf16 %v1803_v3, %v1796_v60  ;;  %v1791_v41 = vmax.f32 %v17482_v5, %v1775_v28  ;;  %v1784_v23 = vmax.f32 %v17487_v7, %v1774_v10  ;;  %4117 = vmatpush1.bf16.msra.mxu1 %v15165_v44  ;;  %4321 = vmatpush1.bf16.msra.mxu0 %v15168_v51  ;;  %v15177_v60 = vld [vmem:[%s22143_s3 + $0xdb0] ss:$24 sps:$4 sm:$0xff]   ;;  %v15191_v3 = vld [vmem:[%s22143_s3 + $0xe14] ss:$24 sps:$4 sm:$0xff]  }
 0x1e7   : > { %v1776_v48 = vsel %vm1773_vm5, %v14933_v17, %v14947_v59  ;;  %v1777_v31 = vsel %vm1773_vm5, %v14938_v32, %v14948_v1  ;;  %4118 = vmatprep.subr.bf16.mxu1 %v15173_v37  ;;  %4322 = vmatprep.subr.bf16.mxu0 %v15176_v47  ;;  %v15180_v51 = vld [vmem:[%s22143_s3 + $0xdb8] ss:$24 sps:$4 sm:$0xff]   ;;  %v15186_v47 = vld [vmem:[%s22143_s3 + $0xde8] ss:$24 sps:$4 sm:$0xff]   ;;  %v15197_v1 = vld [vmem:[%s22143_s3 + $0xe44] ss:$24 sps:$4 sm:$0xff]  }
 0x1e8   : > { %v17937_v43 = vpack.c.bf16 %v1791_v41, %v1784_v23  ;;  %v1798_v5 = vmax.f32 %v17480_v4, %v1776_v48  ;;  %v1805_v7 = vmax.f32 %v17711_v33, %v1777_v31  ;;  %v15185_v4 = vld [vmem:[%s22143_s3 + $0xde4] ss:$24 sps:$4 sm:$0xff]   ;;  %v15183_v37 = vld [vmem:[%s22143_s3 + $0xde0] ss:$24 sps:$4 sm:$0xff]   ;;  %v15189_v28 = vld [vmem:[%s22143_s3 + $0xe10] ss:$24 sps:$4 sm:$0xff]  }
 0x1e9   : > { %v15188_v33 = vld [vmem:[%s22143_s3 + $0xdec] ss:$24 sps:$4 sm:$0xff]   ;;  %v15192_v10 = vld [vmem:[%s22143_s3 + $0xe18] ss:$24 sps:$4 sm:$0xff]   ;;  %v15206_v41 = vld [vmem:[%s22143_s3 + $0xe7c] ss:$24 sps:$4 sm:$0xff]  }
 0x1ea   : > { %v17941_v44 = vpack.c.bf16 %v1805_v7, %v1798_v5  ;;  %4119 = vmatpush1.bf16.msra.mxu1 %v15171_v36  ;;  %4323 = vmatpush1.bf16.msra.mxu0 %v15174_v25  ;;  %v15200_v59 = vld [vmem:[%s22143_s3 + $0xe4c] ss:$24 sps:$4 sm:$0xff]   ;;  %v15195_v36 = vld [vmem:[%s22143_s3 + $0xe40] ss:$24 sps:$4 sm:$0xff]   ;;  %v15201_v23 = vld [vmem:[%s22143_s3 + $0xe70] ss:$24 sps:$4 sm:$0xff]  }
 0x1eb   : > { %4120 = vmatprep.subr.bf16.mxu1 %v15179_v50  ;;  %4324 = vmatprep.subr.bf16.mxu0 %v15182_v15  ;;  %v15198_v25 = vld [vmem:[%s22143_s3 + $0xe48] ss:$24 sps:$4 sm:$0xff]   ;;  %v15203_v50 = vld [vmem:[%s22143_s3 + $0xe74] ss:$24 sps:$4 sm:$0xff]   ;;  %v15204_v15 = vld [vmem:[%s22143_s3 + $0xe78] ss:$24 sps:$4 sm:$0xff]  }
 0x1ec   : > { %v15209_v48 = vld [vmem:[%s22143_s3 + $0xea4] ss:$24 sps:$4 sm:$0xff]   ;;  %v15207_v5 = vld [vmem:[%s22143_s3 + $0xea0] ss:$24 sps:$4 sm:$0xff]   ;;  %v15249_v17 = vld [vmem:[%s22143_s3 + $0xff0] ss:$24 sps:$4 sm:$0xff]  }
 0x1ed   : > { %v15212_v31 = vld [vmem:[%s22143_s3 + $0xeac] ss:$24 sps:$4 sm:$0xff]   ;;  %v15210_v7 = vld [vmem:[%s22143_s3 + $0xea8] ss:$24 sps:$4 sm:$0xff]  }
 0x1ee   : > { %4121 = vmatpush1.bf16.msra.mxu1 %v15177_v60  ;;  %4325 = vmatpush1.bf16.msra.mxu0 %v15180_v51  ;;  %v15215_v60 = vld [vmem:[%s22143_s3 + $0xed4] ss:$24 sps:$4 sm:$0xff]  }
 0x1ef   : > { %4122 = vmatprep.subr.bf16.mxu1 %v15185_v4  ;;  %4326 = vmatprep.subr.bf16.mxu0 %v15188_v33  ;;  %v15218_v51 = vld [vmem:[%s22143_s3 + $0xedc] ss:$24 sps:$4 sm:$0xff]   ;;  %v15213_v4 = vld [vmem:[%s22143_s3 + $0xed0] ss:$24 sps:$4 sm:$0xff]  }
 0x1f0   : > { %v15216_v33 = vld [vmem:[%s22143_s3 + $0xed8] ss:$24 sps:$4 sm:$0xff]  }
 0x1f2   : > { %4123 = vmatpush1.bf16.msra.mxu1 %v15183_v37  ;;  %4327 = vmatpush1.bf16.msra.mxu0 %v15186_v47  ;;  %v15221_v37 = vld [vmem:[%s22143_s3 + $0xf04] ss:$24 sps:$4 sm:$0xff]  }
 0x1f3   : > { %4124 = vmatprep.subr.bf16.mxu1 %v15191_v3  ;;  %4328 = vmatprep.subr.bf16.mxu0 %v15194_v34  ;;  %v15224_v47 = vld [vmem:[%s22143_s3 + $0xf0c] ss:$24 sps:$4 sm:$0xff]   ;;  %v15219_v3 = vld [vmem:[%s22143_s3 + $0xf00] ss:$24 sps:$4 sm:$0xff]  }
 0x1f4   : > { %v15222_v34 = vld [vmem:[%s22143_s3 + $0xf08] ss:$24 sps:$4 sm:$0xff]  }
 0x1f6   : > { %4125 = vmatpush1.bf16.msra.mxu1 %v15189_v28  ;;  %4329 = vmatpush1.bf16.msra.mxu0 %v15192_v10  ;;  %v15227_v28 = vld [vmem:[%s22143_s3 + $0xf34] ss:$24 sps:$4 sm:$0xff]  }
 0x1f7   : > { %4126 = vmatprep.subr.bf16.mxu1 %v15197_v1  ;;  %4330 = vmatprep.subr.bf16.mxu0 %v15200_v59  ;;  %v15230_v10 = vld [vmem:[%s22143_s3 + $0xf3c] ss:$24 sps:$4 sm:$0xff]   ;;  %v15225_v1 = vld [vmem:[%s22143_s3 + $0xf30] ss:$24 sps:$4 sm:$0xff]  }
 0x1f8   : > { %v15228_v59 = vld [vmem:[%s22143_s3 + $0xf38] ss:$24 sps:$4 sm:$0xff]  }
 0x1fa   : > { %4127 = vmatpush1.bf16.msra.mxu1 %v15195_v36  ;;  %4331 = vmatpush1.bf16.msra.mxu0 %v15198_v25  ;;  %v15233_v36 = vld [vmem:[%s22143_s3 + $0xf64] ss:$24 sps:$4 sm:$0xff]  }
 0x1fb   : > { %4128 = vmatprep.subr.bf16.mxu1 %v15203_v50  ;;  %4332 = vmatprep.subr.bf16.mxu0 %v15206_v41  ;;  %v15236_v25 = vld [vmem:[%s22143_s3 + $0xf6c] ss:$24 sps:$4 sm:$0xff]   ;;  %v15231_v50 = vld [vmem:[%s22143_s3 + $0xf60] ss:$24 sps:$4 sm:$0xff]  }
 0x1fc   : > { %v15234_v41 = vld [vmem:[%s22143_s3 + $0xf68] ss:$24 sps:$4 sm:$0xff]  }
 0x1fe   : > { %4129 = vmatpush1.bf16.msra.mxu1 %v15201_v23  ;;  %4333 = vmatpush1.bf16.msra.mxu0 %v15204_v15  ;;  %v15239_v23 = vld [vmem:[%s22143_s3 + $0xf94] ss:$24 sps:$4 sm:$0xff]  }
 0x1ff   : > { %4130 = vmatprep.subr.bf16.mxu1 %v15209_v48  ;;  %4334 = vmatprep.subr.bf16.mxu0 %v15212_v31  ;;  %v15242_v15 = vld [vmem:[%s22143_s3 + $0xf9c] ss:$24 sps:$4 sm:$0xff]   ;;  %v15237_v48 = vld [vmem:[%s22143_s3 + $0xf90] ss:$24 sps:$4 sm:$0xff]  }
 0x200   : > { %v15240_v31 = vld [vmem:[%s22143_s3 + $0xf98] ss:$24 sps:$4 sm:$0xff]  }
 0x202   : > { %4131 = vmatpush1.bf16.msra.mxu1 %v15207_v5  ;;  %4335 = vmatpush1.bf16.msra.mxu0 %v15210_v7  ;;  %v15245_v5 = vld [vmem:[%s22143_s3 + $0xfc4] ss:$24 sps:$4 sm:$0xff]   ;;  %v1732_v7 = vsel %vm1708_vm4, %v14937_v26, %v14938_v32  ;;  %v18091_v26 = vrot.slane %v17853_v24, 1 }
 0x203   : > { %4132 = vmatprep.subr.bf16.mxu1 %v15215_v60  ;;  %4336 = vmatprep.subr.bf16.mxu0 %v15218_v51  ;;  %v15248_v60 = vld [vmem:[%s22143_s3 + $0xfcc] ss:$24 sps:$4 sm:$0xff]   ;;  %v1720_v51 = vsel %vm1708_vm4, %v14927_v14, %v14928_v42  ;;  %v1804_v32 = vmax.f32 %v17703_v35, %v1732_v7  ;;  %v2465_v14 = vrot.slane %v17815_v0, 1  ;;  %v1797_v42 = vmax.f32 %v17687_v12, %v1726_v16  ;;  %v15276_v7 = vld [vmem:[%s22143_s3 + $0x10b8] ss:$24 sps:$4 sm:$0xff]  }
 0x204   : > { %v15251_v35 = vld [vmem:[%s22143_s3 + $0xff4] ss:$24 sps:$4 sm:$0xff]   ;;  %v1790_v13 = vmax.f32 %v17678_v57, %v1720_v51  ;;  %v15257_v12 = vld [vmem:[%s22143_s3 + $0x1024] ss:$24 sps:$4 sm:$0xff]   ;;  %v15279_v16 = vld [vmem:[%s22143_s3 + $0x10e0] ss:$24 sps:$4 sm:$0xff]  }
 0x205   : > { %v18113_v52 = vsel %vm1065_vm3, %v2465_v14, %v18091_v26  ;;  %v18116_v27 = vpack.c.bf16 %v1804_v32, %v1797_v42  ;;  %v15254_v57 = vld [vmem:[%s22143_s3 + $0xffc] ss:$24 sps:$4 sm:$0xff]   ;;  %v15284_v51 = vld [vmem:[%s22143_s3 + $0x10ec] ss:$24 sps:$4 sm:$0xff]   ;;  %v15282_v32 = vld [vmem:[%s22143_s3 + $0x10e8] ss:$24 sps:$4 sm:$0xff]  }
 0x206   : > { %4133 = vmatpush1.bf16.msra.mxu1 %v15213_v4  ;;  %4337 = vmatpush1.bf16.msra.mxu0 %v15216_v33  ;;  %v15243_v4 = vld [vmem:[%s22143_s3 + $0xfc0] ss:$24 sps:$4 sm:$0xff]   ;;  %v18133_v33 = vpack.c.bf16 %v1790_v13, %v1783_v20  ;;  %v15285_v14 = vld [vmem:[%s22143_s3 + $0x1110] ss:$24 sps:$4 sm:$0xff]   ;;  %v15296_v13 = vld [vmem:[%s22143_s3 + $0x114c] ss:$24 sps:$4 sm:$0xff]  }
 0x207   : > { %4134 = vmatprep.subr.bf16.mxu1 %v15221_v37  ;;  %4338 = vmatprep.subr.bf16.mxu0 %v15224_v47  ;;  %v15255_v37 = vld [vmem:[%s22143_s3 + $0x1020] ss:$24 sps:$4 sm:$0xff]   ;;  %v15260_v47 = vld [vmem:[%s22143_s3 + $0x102c] ss:$24 sps:$4 sm:$0xff]  }
 0x208   : > { %v15291_v42 = vld [vmem:[%s22143_s3 + $0x1140] ss:$24 sps:$4 sm:$0xff]  }
 0x209   : > { %v15294_v20 = vld [vmem:[%s22143_s3 + $0x1148] ss:$24 sps:$4 sm:$0xff]  }
 0x20a   : > { %4135 = vmatpush1.bf16.msra.mxu1 %v15219_v3  ;;  %4339 = vmatpush1.bf16.msra.mxu0 %v15222_v34  ;;  %v18143_v3 = vrot.slane %v18116_v27, 1  ;;  %v15258_v34 = vld [vmem:[%s22143_s3 + $0x1028] ss:$24 sps:$4 sm:$0xff]  }
 0x20b   : > { %4136 = vmatprep.subr.bf16.mxu1 %v15227_v28  ;;  %4340 = vmatprep.subr.bf16.mxu0 %v15230_v10  ;;  %v15263_v28 = vld [vmem:[%s22143_s3 + $0x1054] ss:$24 sps:$4 sm:$0xff]   ;;  %v2474_v10 = vrot.slane %v18133_v33, 1 }
 0x20e   : > { %4137 = vmatpush1.bf16.msra.mxu1 %v15225_v1  ;;  %4341 = vmatpush1.bf16.msra.mxu0 %v15228_v59  ;;  %v18155_v1 = vsel %vm1065_vm3, %v2474_v10, %v18143_v3  ;;  %v15261_v59 = vld [vmem:[%s22143_s3 + $0x1050] ss:$24 sps:$4 sm:$0xff]   ;;  %v15311_v10 = vld [vmem:[%s22143_s3 + $0x11d4] ss:$24 sps:$4 sm:$0xff]  }
 0x20f   : > { %4138 = vmatprep.subr.bf16.mxu1 %v15233_v36  ;;  %4342 = vmatprep.subr.bf16.mxu0 %v15236_v25  ;;  %v15266_v36 = vld [vmem:[%s22143_s3 + $0x105c] ss:$24 sps:$4 sm:$0xff]   ;;  %v15264_v25 = vld [vmem:[%s22143_s3 + $0x1058] ss:$24 sps:$4 sm:$0xff]  }
 0x212   : > { %4139 = vmatpush1.bf16.msra.mxu1 %v15231_v50  ;;  %4343 = vmatpush1.bf16.msra.mxu0 %v15234_v41  ;;  %v15269_v50 = vld [vmem:[%s22143_s3 + $0x1084] ss:$24 sps:$4 sm:$0xff]   ;;  %v15267_v41 = vld [vmem:[%s22143_s3 + $0x1080] ss:$24 sps:$4 sm:$0xff]  }
 0x213   : > { %4140 = vmatprep.subr.bf16.mxu1 %v15239_v23  ;;  %4344 = vmatprep.subr.bf16.mxu0 %v15242_v15  ;;  %v15272_v23 = vld [vmem:[%s22143_s3 + $0x108c] ss:$24 sps:$4 sm:$0xff]   ;;  %v15270_v15 = vld [vmem:[%s22143_s3 + $0x1088] ss:$24 sps:$4 sm:$0xff]  }
 0x216   : > { %4141 = vmatpush1.bf16.msra.mxu1 %v15237_v48  ;;  %4345 = vmatpush1.bf16.msra.mxu0 %v15240_v31  ;;  %v15275_v48 = vld [vmem:[%s22143_s3 + $0x10b4] ss:$24 sps:$4 sm:$0xff]  }
 0x217   : > { %4161 = vmatprep.subr.bf16.mxu1 %v15245_v5  ;;  %4365 = vmatprep.subr.bf16.mxu0 %v15248_v60  ;;  %v15278_v31 = vld [vmem:[%s22143_s3 + $0x10bc] ss:$24 sps:$4 sm:$0xff]   ;;  %v15273_v5 = vld [vmem:[%s22143_s3 + $0x10b0] ss:$24 sps:$4 sm:$0xff]  }
 0x218   : > { %v15281_v60 = vld [vmem:[%s22143_s3 + $0x10e4] ss:$24 sps:$4 sm:$0xff]  }
 0x219   : > { %4143 = vmatmul.mubr.bf16.vlgmr.msra.gmra.mrb[12].mxu1 %v18113_v52  ;;  %4347 = vmatmul.mubr.bf16.vlgmr.msra.gmra.mrb[20].mxu0 %v18113_v52 }
 0x21a   : > { %4152 = vmatprep.mubr.bf16.mxu1 %v17871_v40  ;;  %4162 = vmatpush1.bf16.msra.mxu1 %v15243_v4  ;;  %v15287_v4 = vld [vmem:[%s22143_s3 + $0x1114] ss:$24 sps:$4 sm:$0xff]  }
 0x21b   : > { %4356 = vmatprep.mubr.bf16.mxu0 %v17871_v40  ;;  %4366 = vmatpush1.bf16.msra.mxu0 %v15246_v45  ;;  %v15288_v45 = vld [vmem:[%s22143_s3 + $0x1118] ss:$24 sps:$4 sm:$0xff]  }
 0x21c   : > { %4163 = vmatprep.subr.bf16.mxu1 %v15251_v35  ;;  %4367 = vmatprep.subr.bf16.mxu0 %v15254_v57  ;;  %v15293_v35 = vld [vmem:[%s22143_s3 + $0x1144] ss:$24 sps:$4 sm:$0xff]  }
 0x21d   : > { %v15302_v57 = vld [vmem:[%s22143_s3 + $0x117c] ss:$24 sps:$4 sm:$0xff]  }
 0x21e   : > { %4164 = vmatpush1.bf16.msra.mxu1 %v15249_v17  ;;  %v15299_v17 = vld [vmem:[%s22143_s3 + $0x1174] ss:$24 sps:$4 sm:$0xff]  }
 0x21f   : > { %4368 = vmatpush1.bf16.msra.mxu0 %v15252_v29  ;;  %4165 = vmatprep.subr.bf16.mxu1 %v15257_v12  ;;  %v15297_v29 = vld [vmem:[%s22143_s3 + $0x1170] ss:$24 sps:$4 sm:$0xff]  }
 0x220   : > { %4369 = vmatprep.subr.bf16.mxu0 %v15260_v47  ;;  %v15300_v12 = vld [vmem:[%s22143_s3 + $0x1178] ss:$24 sps:$4 sm:$0xff]   ;;  %v15308_v47 = vld [vmem:[%s22143_s3 + $0x11ac] ss:$24 sps:$4 sm:$0xff]  }
 0x221   : > { %4153 = vmatmul.mubr.bf16.gmra.mrb[20].mxu1 %v18091_v26  ;;  %4357 = vmatmul.mubr.bf16.gmra.mrb[28].mxu0 %v18091_v26 }
 0x222   : > { %4193 = vmatprep.mubr.bf16.mxu1 %v18155_v1  ;;  %4166 = vmatpush1.bf16.msra.mxu1 %v15255_v37  ;;  %v15305_v37 = vld [vmem:[%s22143_s3 + $0x11a4] ss:$24 sps:$4 sm:$0xff]  }
 0x223   : > { %4397 = vmatprep.mubr.bf16.mxu0 %v18155_v1  ;;  %4370 = vmatpush1.bf16.msra.mxu0 %v15258_v34  ;;  %v15303_v34 = vld [vmem:[%s22143_s3 + $0x11a0] ss:$24 sps:$4 sm:$0xff]  }
 0x224   : > { %4167 = vmatprep.subr.bf16.mxu1 %v15263_v28  ;;  %4371 = vmatprep.subr.bf16.mxu0 %v15266_v36  ;;  %v15306_v28 = vld [vmem:[%s22143_s3 + $0x11a8] ss:$24 sps:$4 sm:$0xff]  }
 0x225   : > { %v15309_v36 = vld [vmem:[%s22143_s3 + $0x11d0] ss:$24 sps:$4 sm:$0xff]  }
 0x226   : > { %4168 = vmatpush1.bf16.msra.mxu1 %v15261_v59  ;;  %v15314_v59 = vld [vmem:[%s22143_s3 + $0x11dc] ss:$24 sps:$4 sm:$0xff]  }
 0x227   : > { %4372 = vmatpush1.bf16.msra.mxu0 %v15264_v25  ;;  %4169 = vmatprep.subr.bf16.mxu1 %v15269_v50  ;;  %v15312_v25 = vld [vmem:[%s22143_s3 + $0x11d8] ss:$24 sps:$4 sm:$0xff]   ;;  %v15317_v50 = vld [vmem:[%s22143_s3 + $0x1204] ss:$24 sps:$4 sm:$0xff]  }
 0x228   : > { %4373 = vmatprep.subr.bf16.mxu0 %v15272_v23  ;;  %v15315_v23 = vld [vmem:[%s22143_s3 + $0x1200] ss:$24 sps:$4 sm:$0xff]  }
 0x22a   : > { %4170 = vmatpush1.bf16.msra.mxu1 %v15267_v41  ;;  %v15320_v41 = vld [vmem:[%s22143_s3 + $0x120c] ss:$24 sps:$4 sm:$0xff]  }
 0x22b   : > { %4374 = vmatpush1.bf16.msra.mxu0 %v15270_v15  ;;  %4171 = vmatprep.subr.bf16.mxu1 %v15275_v48  ;;  %v15318_v15 = vld [vmem:[%s22143_s3 + $0x1208] ss:$24 sps:$4 sm:$0xff]   ;;  %v15323_v48 = vld [vmem:[%s22143_s3 + $0x1234] ss:$24 sps:$4 sm:$0xff]  }
 0x22c   : > { %4375 = vmatprep.subr.bf16.mxu0 %v15278_v31  ;;  %v15326_v31 = vld [vmem:[%s22143_s3 + $0x123c] ss:$24 sps:$4 sm:$0xff]  }
 0x22e   : > { %4172 = vmatpush1.bf16.msra.mxu1 %v15273_v5  ;;  %v15321_v5 = vld [vmem:[%s22143_s3 + $0x1230] ss:$24 sps:$4 sm:$0xff]  }
 0x22f   : > { %4376 = vmatpush1.bf16.msra.mxu0 %v15276_v7  ;;  %4173 = vmatprep.subr.bf16.mxu1 %v15281_v60  ;;  %v15324_v7 = vld [vmem:[%s22143_s3 + $0x1238] ss:$24 sps:$4 sm:$0xff]   ;;  %v15329_v60 = vld [vmem:[%s22143_s3 + $0x1264] ss:$24 sps:$4 sm:$0xff]  }
 0x230   : > { %4377 = vmatprep.subr.bf16.mxu0 %v15284_v51  ;;  %v15332_v51 = vld [vmem:[%s22143_s3 + $0x126c] ss:$24 sps:$4 sm:$0xff]  }
 0x232   : > { %4174 = vmatpush1.bf16.msra.mxu1 %v15279_v16  ;;  %v15327_v16 = vld [vmem:[%s22143_s3 + $0x1260] ss:$24 sps:$4 sm:$0xff]  }
 0x233   : > { %4378 = vmatpush1.bf16.msra.mxu0 %v15282_v32  ;;  %4175 = vmatprep.subr.bf16.mxu1 %v15287_v4  ;;  %v15330_v32 = vld [vmem:[%s22143_s3 + $0x1268] ss:$24 sps:$4 sm:$0xff]   ;;  %v15335_v4 = vld [vmem:[%s22143_s3 + $0x1294] ss:$24 sps:$4 sm:$0xff]  }
 0x234   : > { %4379 = vmatprep.subr.bf16.mxu0 %v15290_v46  ;;  %v15338_v46 = vld [vmem:[%s22143_s3 + $0x129c] ss:$24 sps:$4 sm:$0xff]  }
 0x236   : > { %4176 = vmatpush1.bf16.msra.mxu1 %v15285_v14  ;;  %v15333_v14 = vld [vmem:[%s22143_s3 + $0x1290] ss:$24 sps:$4 sm:$0xff]  }
 0x237   : > { %4380 = vmatpush1.bf16.msra.mxu0 %v15288_v45  ;;  %4177 = vmatprep.subr.bf16.mxu1 %v15293_v35  ;;  %v15336_v45 = vld [vmem:[%s22143_s3 + $0x1298] ss:$24 sps:$4 sm:$0xff]   ;;  %v15341_v35 = vld [vmem:[%s22143_s3 + $0x12c4] ss:$24 sps:$4 sm:$0xff]  }
 0x238   : > { %4381 = vmatprep.subr.bf16.mxu0 %v15296_v13  ;;  %v18317_v13 = vrot.slane %v17924_v61, 1 }
 0x23a   : > { %4178 = vmatpush1.bf16.msra.mxu1 %v15291_v42  ;;  %v15344_v42 = vld [vmem:[%s22143_s3 + $0x12cc] ss:$24 sps:$4 sm:$0xff]  }
 0x23b   : > { %4382 = vmatpush1.bf16.msra.mxu0 %v15294_v20  ;;  %4179 = vmatprep.subr.bf16.mxu1 %v15299_v17  ;;  %v2471_v20 = vrot.slane %v17884_v38, 1  ;;  %v15339_v17 = vld [vmem:[%s22143_s3 + $0x12c0] ss:$24 sps:$4 sm:$0xff]  }
 0x23c   : > { %4383 = vmatprep.subr.bf16.mxu0 %v15302_v57 }
 0x23d   : > { %v18328_v57 = vsel %vm1065_vm3, %v2471_v20, %v18317_v13  ;;  %v15383_v20 = vld [vmem:[%s22143_s3 + $0xa64] ss:$24 sps:$4 sm:$0xff]  }
 0x23e   : > { %4180 = vmatpush1.bf16.msra.mxu1 %v15297_v29  ;;  %v15342_v29 = vld [vmem:[%s22143_s3 + $0x12c8] ss:$24 sps:$4 sm:$0xff]  }
 0x23f   : > { %4384 = vmatpush1.bf16.msra.mxu0 %v15300_v12  ;;  %4181 = vmatprep.subr.bf16.mxu1 %v15305_v37  ;;  %v15347_v12 = vld [vmem:[%s22143_s3 + $0x12f4] ss:$24 sps:$4 sm:$0xff]  }
 0x240   : > { %4385 = vmatprep.subr.bf16.mxu0 %v15308_v47  ;;  %v15350_v37 = vld [vmem:[%s22143_s3 + $0x12fc] ss:$24 sps:$4 sm:$0xff]   ;;  %v15345_v47 = vld [vmem:[%s22143_s3 + $0x12f0] ss:$24 sps:$4 sm:$0xff]  }
 0x242   : > { %4182 = vmatpush1.bf16.msra.mxu1 %v15303_v34  ;;  %v15348_v34 = vld [vmem:[%s22143_s3 + $0x12f8] ss:$24 sps:$4 sm:$0xff]  }
 0x243   : > { %4386 = vmatpush1.bf16.msra.mxu0 %v15306_v28  ;;  %4183 = vmatprep.subr.bf16.mxu1 %v15311_v10  ;;  %v15353_v28 = vld [vmem:[%s22143_s3 + $0x1324] ss:$24 sps:$4 sm:$0xff]  }
 0x244   : > { %4387 = vmatprep.subr.bf16.mxu0 %v15314_v59  ;;  %v15356_v10 = vld [vmem:[%s22143_s3 + $0x132c] ss:$24 sps:$4 sm:$0xff]   ;;  %v15351_v59 = vld [vmem:[%s22143_s3 + $0x1320] ss:$24 sps:$4 sm:$0xff]  }
 0x246   : > { %4184 = vmatpush1.bf16.msra.mxu1 %v15309_v36  ;;  %v15354_v36 = vld [vmem:[%s22143_s3 + $0x1328] ss:$24 sps:$4 sm:$0xff]  }
 0x247   : > { %4388 = vmatpush1.bf16.msra.mxu0 %v15312_v25  ;;  %4185 = vmatprep.subr.bf16.mxu1 %v15317_v50  ;;  %v15359_v25 = vld [vmem:[%s22143_s3 + $0x1354] ss:$24 sps:$4 sm:$0xff]  }
 0x248   : > { %4389 = vmatprep.subr.bf16.mxu0 %v15320_v41  ;;  %v15362_v50 = vld [vmem:[%s22143_s3 + $0x135c] ss:$24 sps:$4 sm:$0xff]   ;;  %v15357_v41 = vld [vmem:[%s22143_s3 + $0x1350] ss:$24 sps:$4 sm:$0xff]  }
 0x24a   : > { %4186 = vmatpush1.bf16.msra.mxu1 %v15315_v23  ;;  %v15360_v23 = vld [vmem:[%s22143_s3 + $0x1358] ss:$24 sps:$4 sm:$0xff]  }
 0x24b   : > { %4390 = vmatpush1.bf16.msra.mxu0 %v15318_v15  ;;  %4187 = vmatprep.subr.bf16.mxu1 %v15323_v48  ;;  %v15365_v15 = vld [vmem:[%s22143_s3 + $0x9d4] ss:$24 sps:$4 sm:$0xff]   ;;  %v18381_v48 = vrot.slane %v17941_v44, 1 }
 0x24c   : > { %4391 = vmatprep.subr.bf16.mxu0 %v15326_v31  ;;  %v15368_v31 = vld [vmem:[%s22143_s3 + $0xc] ss:$24 sps:$4 sm:$0xff]  }
 0x24e   : > { %4188 = vmatpush1.bf16.msra.mxu1 %v15321_v5  ;;  %v2477_v5 = vrot.slane %v17937_v43, 1 }
 0x24f   : > { %4392 = vmatpush1.bf16.msra.mxu0 %v15324_v7  ;;  %4189 = vmatprep.subr.bf16.mxu1 %v15329_v60  ;;  %v15363_v7 = vld [vmem:[%s22143_s3 + $0x9d0] ss:$24 sps:$4 sm:$0xff]  }
 0x250   : > { %4393 = vmatprep.subr.bf16.mxu0 %v15332_v51  ;;  %v15366_v60 = vld [vmem:[%s22143_s3 + $0x8] ss:$24 sps:$4 sm:$0xff]   ;;  %v15371_v51 = vld [vmem:[%s22143_s3 + $0xa04] ss:$24 sps:$4 sm:$0xff]  }
 0x252   : > { %4190 = vmatpush1.bf16.msra.mxu1 %v15327_v16  ;;  %v18398_v16 = vsel %vm1065_vm3, %v2477_v5, %v18381_v48  ;;  %v15405_v5 = vld [vmem:[%s22143_s3 + $0xb20] ss:$24 sps:$4 sm:$0xff]  }
 0x253   : > { %4394 = vmatpush1.bf16.msra.mxu0 %v15330_v32  ;;  %4191 = vmatprep.subr.bf16.mxu1 %v15335_v4  ;;  %v15374_v32 = vld [vmem:[%s22143_s3 + $0x3c] ss:$24 sps:$4 sm:$0xff]   ;;  %v15369_v4 = vld [vmem:[%s22143_s3 + $0xa00] ss:$24 sps:$4 sm:$0xff]  }
 0x254   : > { %4395 = vmatprep.subr.bf16.mxu0 %v15338_v46  ;;  %v15372_v46 = vld [vmem:[%s22143_s3 + $0x38] ss:$24 sps:$4 sm:$0xff]  }
 0x256   : > { %4192 = vmatpush1.bf16.msra.mxu1 %v15333_v14  ;;  %v15377_v14 = vld [vmem:[%s22143_s3 + $0xa34] ss:$24 sps:$4 sm:$0xff]  }
 0x257   : > { %4396 = vmatpush1.bf16.msra.mxu0 %v15336_v45  ;;  %4212 = vmatprep.subr.bf16.mxu1 %v15341_v35  ;;  %v15380_v45 = vld [vmem:[%s22143_s3 + $0x6c] ss:$24 sps:$4 sm:$0xff]   ;;  %v15375_v35 = vld [vmem:[%s22143_s3 + $0xa30] ss:$24 sps:$4 sm:$0xff]  }
 0x258   : > { %4416 = vmatprep.subr.bf16.mxu0 %v15344_v42  ;;  %v15378_v42 = vld [vmem:[%s22143_s3 + $0x68] ss:$24 sps:$4 sm:$0xff]  }
 0x259   : > { %4194 = vmatmul.mubr.bf16.vlgmr.msra.gmra.mrb[12].mxu1 %v18328_v57 }
 0x25a   : > { %4398 = vmatmul.mubr.bf16.vlgmr.msra.gmra.mrb[20].mxu0 %v18328_v57  ;;  %4203 = vmatprep.mubr.bf16.mxu1 %v18143_v3 }
 0x25b   : > { %4213 = vmatpush1.bf16.msra.mxu1 %v15339_v17  ;;  %4407 = vmatprep.mubr.bf16.mxu0 %v18143_v3  ;;  %v15386_v17 = vld [vmem:[%s22143_s3 + $0x9c] ss:$24 sps:$4 sm:$0xff]  }
 0x25c   : > { %4417 = vmatpush1.bf16.msra.mxu0 %v15342_v29  ;;  %4214 = vmatprep.subr.bf16.mxu1 %v15347_v12  ;;  %v15381_v29 = vld [vmem:[%s22143_s3 + $0xa60] ss:$24 sps:$4 sm:$0xff]  }
 0x25d   : > { %4418 = vmatprep.subr.bf16.mxu0 %v15350_v37  ;;  %v15384_v12 = vld [vmem:[%s22143_s3 + $0x98] ss:$24 sps:$4 sm:$0xff]   ;;  %v15389_v37 = vld [vmem:[%s22143_s3 + $0xa94] ss:$24 sps:$4 sm:$0xff]  }
 0x25f   : > { %4215 = vmatpush1.bf16.msra.mxu1 %v15345_v47  ;;  %v15392_v47 = vld [vmem:[%s22143_s3 + $0xcc] ss:$24 sps:$4 sm:$0xff]  }
 0x260   : > { %4419 = vmatpush1.bf16.msra.mxu0 %v15348_v34  ;;  %4216 = vmatprep.subr.bf16.mxu1 %v15353_v28  ;;  %v15390_v34 = vld [vmem:[%s22143_s3 + $0xc8] ss:$24 sps:$4 sm:$0xff]   ;;  %v15395_v28 = vld [vmem:[%s22143_s3 + $0xac4] ss:$24 sps:$4 sm:$0xff]  }
 0x261   : > { %4204 = vmatmul.mubr.bf16.gmra.mrb[24].mxu1 %v18317_v13  ;;  %4420 = vmatprep.subr.bf16.mxu0 %v15356_v10  ;;  %v15398_v10 = vld [vmem:[%s22143_s3 + $0xfc] ss:$24 sps:$4 sm:$0xff]  }
 0x262   : > { %4408 = vmatmul.mubr.bf16.gmra.mrb[32].mxu0 %v18317_v13  ;;  %4244 = vmatprep.mubr.bf16.mxu1 %v16960_v2 }
 0x263   : > { %4217 = vmatpush1.bf16.msra.mxu1 %v15351_v59  ;;  %4448 = vmatprep.mubr.bf16.mxu0 %v16960_v2  ;;  %v15393_v59 = vld [vmem:[%s22143_s3 + $0xac0] ss:$24 sps:$4 sm:$0xff]  }
 0x264   : > { %4421 = vmatpush1.bf16.msra.mxu0 %v15354_v36  ;;  %4218 = vmatprep.subr.bf16.mxu1 %v15359_v25  ;;  %v15396_v36 = vld [vmem:[%s22143_s3 + $0xf8] ss:$24 sps:$4 sm:$0xff]   ;;  %v15401_v25 = vld [vmem:[%s22143_s3 + $0xaf4] ss:$24 sps:$4 sm:$0xff]  }
 0x265   : > { %4422 = vmatprep.subr.bf16.mxu0 %v15362_v50  ;;  %v15404_v50 = vld [vmem:[%s22143_s3 + $0x12c] ss:$24 sps:$4 sm:$0xff]  }
 0x267   : > { %4219 = vmatpush1.bf16.msra.mxu1 %v15357_v41  ;;  %v15399_v41 = vld [vmem:[%s22143_s3 + $0xaf0] ss:$24 sps:$4 sm:$0xff]  }
 0x268   : > { %4423 = vmatpush1.bf16.msra.mxu0 %v15360_v23  ;;  %4467 = vmatprep.subr.bf16.mxu1 %v15365_v15  ;;  %v15402_v23 = vld [vmem:[%s22143_s3 + $0x128] ss:$24 sps:$4 sm:$0xff]   ;;  %v15407_v15 = vld [vmem:[%s22143_s3 + $0xb24] ss:$24 sps:$4 sm:$0xff]  }
 0x269   : > { %6441 = vmatprep.subr.bf16.mxu0 %v15368_v31  ;;  %v15410_v31 = vld [vmem:[%s22143_s3 + $0x15c] ss:$24 sps:$4 sm:$0xff]  }
 0x26a   : > { %13049 = vmatmul.mubr.msk.bf16.vlgmr.msra.gmra.mrb[12].mxu1 %vm4052_vm6, %v18398_v16 }
 0x26b   : > { %13051 = vmatmul.mubr.msk.bf16.vlgmr.msra.gmra.mrb[20].mxu0 %vm4052_vm6, %v18398_v16  ;;  %4468 = vmatpush1.bf16.msra.mxu1 %v15363_v7  ;;  %v15408_v7 = vld [vmem:[%s22143_s3 + $0x158] ss:$24 sps:$4 sm:$0xff]  }
 0x26c   : > { %6442 = vmatpush1.bf16.msra.mxu0 %v15366_v60  ;;  %4469 = vmatprep.subr.bf16.mxu1 %v15371_v51  ;;  %v15413_v60 = vld [vmem:[%s22143_s3 + $0xb54] ss:$24 sps:$4 sm:$0xff]  }
 0x26d   : > { %6443 = vmatprep.subr.bf16.mxu0 %v15374_v32  ;;  %4254 = vmatprep.mubr.bf16.mxu1 %v16960_v2  ;;  %v15416_v51 = vld [vmem:[%s22143_s3 + $0x18c] ss:$24 sps:$4 sm:$0xff]   ;;  %v15411_v32 = vld [vmem:[%s22143_s3 + $0xb50] ss:$24 sps:$4 sm:$0xff]  }
 0x26e   : > { %4458 = vmatprep.mubr.bf16.mxu0 %v16960_v2 }
 0x26f   : > { %4470 = vmatpush1.bf16.msra.mxu1 %v15369_v4  ;;  %v15414_v4 = vld [vmem:[%s22143_s3 + $0x188] ss:$24 sps:$4 sm:$0xff]  }
 0x270   : > { %6444 = vmatpush1.bf16.msra.mxu0 %v15372_v46  ;;  %4471 = vmatprep.subr.bf16.mxu1 %v15377_v14  ;;  %v15419_v46 = vld [vmem:[%s22143_s3 + $0xb84] ss:$24 sps:$4 sm:$0xff]  }
 0x271   : > { %6445 = vmatprep.subr.bf16.mxu0 %v15380_v45  ;;  %v15422_v14 = vld [vmem:[%s22143_s3 + $0x1bc] ss:$24 sps:$4 sm:$0xff]   ;;  %v15417_v45 = vld [vmem:[%s22143_s3 + $0xb80] ss:$24 sps:$4 sm:$0xff]  }
 0x272   : > { %13050 = vmatmul.mubr.msk.bf16.gmra.mrb[28].mxu1 %vm4052_vm6, %v18381_v48 }
 0x273   : > { %13052 = vmatmul.mubr.msk.bf16.gmra.mrb[36].mxu0 %vm4052_vm6, %v18381_v48  ;;  %4472 = vmatpush1.bf16.msra.mxu1 %v15375_v35  ;;  %v15420_v35 = vld [vmem:[%s22143_s3 + $0x1b8] ss:$24 sps:$4 sm:$0xff]  }
 0x274   : > { %4499 = vmatprep.mubr.bf16.mxu1 %v17769_v58  ;;  %6446 = vmatpush1.bf16.msra.mxu0 %v15378_v42  ;;  %v15387_v58 = vld [vmem:[%s22143_s3 + $0xa90] ss:$24 sps:$4 sm:$0xff]   ;;  %v15425_v42 = vld [vmem:[%s22143_s3 + $0xbb4] ss:$24 sps:$4 sm:$0xff]  }
 0x275   : > { %6473 = vmatprep.mubr.bf16.mxu0 %v17741_v21  ;;  %4473 = vmatprep.subr.bf16.mxu1 %v15383_v20  ;;  %v15428_v20 = vld [vmem:[%s22143_s3 + $0x1ec] ss:$24 sps:$4 sm:$0xff]  }
 0x276   : > { %6447 = vmatprep.subr.bf16.mxu0 %v15386_v17  ;;  %v15423_v17 = vld [vmem:[%s22143_s3 + $0xbb0] ss:$24 sps:$4 sm:$0xff]  }
 0x277   : > { %4474 = vmatpush1.bf16.msra.mxu1 %v15381_v29  ;;  %v15426_v29 = vld [vmem:[%s22143_s3 + $0x1e8] ss:$24 sps:$4 sm:$0xff]  }
 0x278   : > { %6448 = vmatpush1.bf16.msra.mxu0 %v15384_v12  ;;  %4475 = vmatprep.subr.bf16.mxu1 %v15389_v37  ;;  %v15431_v12 = vld [vmem:[%s22143_s3 + $0xbe4] ss:$24 sps:$4 sm:$0xff]  }
 0x279   : > { %6449 = vmatprep.subr.bf16.mxu0 %v15392_v47  ;;  %v15434_v37 = vld [vmem:[%s22143_s3 + $0x21c] ss:$24 sps:$4 sm:$0xff]   ;;  %v15429_v47 = vld [vmem:[%s22143_s3 + $0xbe0] ss:$24 sps:$4 sm:$0xff]  }
 0x27b   : > { %4476 = vmatpush1.bf16.msra.mxu1 %v15387_v58  ;;  %v15432_v58 = vld [vmem:[%s22143_s3 + $0x218] ss:$24 sps:$4 sm:$0xff]  }
 0x27c   : > { %6450 = vmatpush1.bf16.msra.mxu0 %v15390_v34  ;;  %4477 = vmatprep.subr.bf16.mxu1 %v15395_v28  ;;  %v15437_v34 = vld [vmem:[%s22143_s3 + $0xc14] ss:$24 sps:$4 sm:$0xff]  }
 0x27d   : > { %6451 = vmatprep.subr.bf16.mxu0 %v15398_v10  ;;  %v15440_v28 = vld [vmem:[%s22143_s3 + $0x24c] ss:$24 sps:$4 sm:$0xff]   ;;  %v15435_v10 = vld [vmem:[%s22143_s3 + $0xc10] ss:$24 sps:$4 sm:$0xff]  }
 0x27f   : > { %4478 = vmatpush1.bf16.msra.mxu1 %v15393_v59  ;;  %v15438_v59 = vld [vmem:[%s22143_s3 + $0x248] ss:$24 sps:$4 sm:$0xff]  }
 0x280   : > { %6452 = vmatpush1.bf16.msra.mxu0 %v15396_v36  ;;  %4479 = vmatprep.subr.bf16.mxu1 %v15401_v25  ;;  %v15443_v36 = vld [vmem:[%s22143_s3 + $0xc44] ss:$24 sps:$4 sm:$0xff]  }
 0x281   : > { %6453 = vmatprep.subr.bf16.mxu0 %v15404_v50  ;;  %v15446_v25 = vld [vmem:[%s22143_s3 + $0x27c] ss:$24 sps:$4 sm:$0xff]   ;;  %v15441_v50 = vld [vmem:[%s22143_s3 + $0xc40] ss:$24 sps:$4 sm:$0xff]  }
 0x283   : > { %4480 = vmatpush1.bf16.msra.mxu1 %v15399_v41  ;;  %v15444_v41 = vld [vmem:[%s22143_s3 + $0x278] ss:$24 sps:$4 sm:$0xff]  }
 0x284   : > { %6454 = vmatpush1.bf16.msra.mxu0 %v15402_v23  ;;  %4481 = vmatprep.subr.bf16.mxu1 %v15407_v15  ;;  %v15449_v23 = vld [vmem:[%s22143_s3 + $0xc74] ss:$24 sps:$4 sm:$0xff]  }
 0x285   : > { %6455 = vmatprep.subr.bf16.mxu0 %v15410_v31  ;;  %v15452_v15 = vld [vmem:[%s22143_s3 + $0x2ac] ss:$24 sps:$4 sm:$0xff]   ;;  %v15447_v31 = vld [vmem:[%s22143_s3 + $0xc70] ss:$24 sps:$4 sm:$0xff]  }
 0x287   : > { %4482 = vmatpush1.bf16.msra.mxu1 %v15405_v5  ;;  %v15450_v5 = vld [vmem:[%s22143_s3 + $0x2a8] ss:$24 sps:$4 sm:$0xff]  }
 0x288   : > { %6456 = vmatpush1.bf16.msra.mxu0 %v15408_v7  ;;  %4483 = vmatprep.subr.bf16.mxu1 %v15413_v60  ;;  %v15455_v7 = vld [vmem:[%s22143_s3 + $0xca4] ss:$24 sps:$4 sm:$0xff]  }
 0x289   : > { %6457 = vmatprep.subr.bf16.mxu0 %v15416_v51  ;;  %v15458_v60 = vld [vmem:[%s22143_s3 + $0x2dc] ss:$24 sps:$4 sm:$0xff]   ;;  %v15453_v51 = vld [vmem:[%s22143_s3 + $0xca0] ss:$24 sps:$4 sm:$0xff]  }
 0x28b   : > { %4484 = vmatpush1.bf16.msra.mxu1 %v15411_v32  ;;  %v15456_v32 = vld [vmem:[%s22143_s3 + $0x2d8] ss:$24 sps:$4 sm:$0xff]  }
 0x28c   : > { %6458 = vmatpush1.bf16.msra.mxu0 %v15414_v4  ;;  %4485 = vmatprep.subr.bf16.mxu1 %v15419_v46  ;;  %v15461_v4 = vld [vmem:[%s22143_s3 + $0xcd4] ss:$24 sps:$4 sm:$0xff]  }
 0x28d   : > { %6459 = vmatprep.subr.bf16.mxu0 %v15422_v14  ;;  %v15464_v46 = vld [vmem:[%s22143_s3 + $0x30c] ss:$24 sps:$4 sm:$0xff]   ;;  %v15459_v14 = vld [vmem:[%s22143_s3 + $0xcd0] ss:$24 sps:$4 sm:$0xff]  }
 0x28f   : > { %4486 = vmatpush1.bf16.msra.mxu1 %v15417_v45  ;;  %v15462_v45 = vld [vmem:[%s22143_s3 + $0x308] ss:$24 sps:$4 sm:$0xff]  }
 0x290   : > { %6460 = vmatpush1.bf16.msra.mxu0 %v15420_v35  ;;  %4487 = vmatprep.subr.bf16.mxu1 %v15425_v42  ;;  %v15467_v35 = vld [vmem:[%s22143_s3 + $0xd04] ss:$24 sps:$4 sm:$0xff]  }
 0x291   : > { %6461 = vmatprep.subr.bf16.mxu0 %v15428_v20  ;;  %v15470_v42 = vld [vmem:[%s22143_s3 + $0x33c] ss:$24 sps:$4 sm:$0xff]   ;;  %v15465_v20 = vld [vmem:[%s22143_s3 + $0xd00] ss:$24 sps:$4 sm:$0xff]  }
 0x293   : > { %4488 = vmatpush1.bf16.msra.mxu1 %v15423_v17  ;;  %v15473_v17 = vld [vmem:[%s22143_s3 + $0xd34] ss:$24 sps:$4 sm:$0xff]  }
 0x294   : > { %6462 = vmatpush1.bf16.msra.mxu0 %v15426_v29  ;;  %4489 = vmatprep.subr.bf16.mxu1 %v15431_v12  ;;  %v15471_v29 = vld [vmem:[%s22143_s3 + $0xd30] ss:$24 sps:$4 sm:$0xff]  }
 0x295   : > { %6463 = vmatprep.subr.bf16.mxu0 %v15434_v37  ;;  %v15474_v12 = vld [vmem:[%s22143_s3 + $0x368] ss:$24 sps:$4 sm:$0xff]   ;;  %v15479_v37 = vld [vmem:[%s22143_s3 + $0xd64] ss:$24 sps:$4 sm:$0xff]  }
 0x297   : > { %4490 = vmatpush1.bf16.msra.mxu1 %v15429_v47  ;;  %v15482_v47 = vld [vmem:[%s22143_s3 + $0x39c] ss:$24 sps:$4 sm:$0xff]  }
 0x298   : > { %6464 = vmatpush1.bf16.msra.mxu0 %v15432_v58  ;;  %4491 = vmatprep.subr.bf16.mxu1 %v15437_v34 }
 0x299   : > { %6465 = vmatprep.subr.bf16.mxu0 %v15440_v28 }
 0x29b   : > { %4492 = vmatpush1.bf16.msra.mxu1 %v15435_v10 }
 0x29c   : > { %6466 = vmatpush1.bf16.msra.mxu0 %v15438_v59  ;;  %4493 = vmatprep.subr.bf16.mxu1 %v15443_v36 }
 0x29d   : > { %6467 = vmatprep.subr.bf16.mxu0 %v15446_v25  ;;  %v15485_v25 = vld [vmem:[%s22143_s3 + $0xd94] ss:$24 sps:$4 sm:$0xff]  }
 0x29f   : > { %4494 = vmatpush1.bf16.msra.mxu1 %v15441_v50 }
 0x2a0   : > { %6468 = vmatpush1.bf16.msra.mxu0 %v15444_v41  ;;  %4495 = vmatprep.subr.bf16.mxu1 %v15449_v23  ;;  %v15488_v23 = vld [vmem:[%s22143_s3 + $0x3cc] ss:$24 sps:$4 sm:$0xff]  }
 0x2a1   : > { %6469 = vmatprep.subr.bf16.mxu0 %v15452_v15  ;;  %v15483_v15 = vld [vmem:[%s22143_s3 + $0xd90] ss:$24 sps:$4 sm:$0xff]  }
 0x2a3   : > { %4496 = vmatpush1.bf16.msra.mxu1 %v15447_v31  ;;  %v15486_v31 = vld [vmem:[%s22143_s3 + $0x3c8] ss:$24 sps:$4 sm:$0xff]  }
 0x2a4   : > { %6470 = vmatpush1.bf16.msra.mxu0 %v15450_v5  ;;  %4497 = vmatprep.subr.bf16.mxu1 %v15455_v7  ;;  %v15491_v5 = vld [vmem:[%s22143_s3 + $0xdc4] ss:$24 sps:$4 sm:$0xff]  }
 0x2a5   : > { %6471 = vmatprep.subr.bf16.mxu0 %v15458_v60  ;;  %v15494_v7 = vld [vmem:[%s22143_s3 + $0x3fc] ss:$24 sps:$4 sm:$0xff]   ;;  %v15489_v60 = vld [vmem:[%s22143_s3 + $0xdc0] ss:$24 sps:$4 sm:$0xff]  }
 0x2a7   : > { %4498 = vmatpush1.bf16.msra.mxu1 %v15453_v51  ;;  %v15492_v51 = vld [vmem:[%s22143_s3 + $0x3f8] ss:$24 sps:$4 sm:$0xff]  }
 0x2a8   : > { %6472 = vmatpush1.bf16.msra.mxu0 %v15456_v32  ;;  %4518 = vmatprep.subr.bf16.mxu1 %v15461_v4  ;;  %v15497_v32 = vld [vmem:[%s22143_s3 + $0xdf4] ss:$24 sps:$4 sm:$0xff]  }
 0x2a9   : > { %6492 = vmatprep.subr.bf16.mxu0 %v15464_v46  ;;  %v15500_v4 = vld [vmem:[%s22143_s3 + $0x42c] ss:$24 sps:$4 sm:$0xff]   ;;  %v15495_v46 = vld [vmem:[%s22143_s3 + $0xdf0] ss:$24 sps:$4 sm:$0xff]  }
 0x2aa   : > { %4500 = vmatmul.mubr.bf16.vlgmr.msra.gmra.mrb[32].mxu1 %v17799_v11  ;;  %v15468_v11 = vld [vmem:[%s22143_s3 + $0x338] ss:$24 sps:$4 sm:$0xff]  }
 0x2ab   : > { %6474 = vmatmul.mubr.bf16.vlgmr.msra.gmra.mrb[20].mxu0 %v17746_v63  ;;  %4509 = vmatprep.mubr.bf16.mxu1 %v17756_v19  ;;  %v15476_v19 = vld [vmem:[%s22143_s3 + $0x36c] ss:$24 sps:$4 sm:$0xff]  }
 0x2ac   : > { %4519 = vmatpush1.bf16.msra.mxu1 %v15459_v14  ;;  %6483 = vmatprep.mubr.bf16.mxu0 %v17743_v9  ;;  %v15498_v14 = vld [vmem:[%s22143_s3 + $0x428] ss:$24 sps:$4 sm:$0xff]  }
 0x2ad   : > { %6493 = vmatpush1.bf16.msra.mxu0 %v15462_v45  ;;  %4520 = vmatprep.subr.bf16.mxu1 %v15467_v35  ;;  %v15503_v45 = vld [vmem:[%s22143_s3 + $0xe24] ss:$24 sps:$4 sm:$0xff]  }
 0x2ae   : > { %6494 = vmatprep.subr.bf16.mxu0 %v15470_v42  ;;  %v15506_v35 = vld [vmem:[%s22143_s3 + $0x45c] ss:$24 sps:$4 sm:$0xff]   ;;  %v15501_v42 = vld [vmem:[%s22143_s3 + $0xe20] ss:$24 sps:$4 sm:$0xff]  }
 0x2b0   : > { %4521 = vmatpush1.bf16.msra.mxu1 %v15465_v20  ;;  %v15504_v20 = vld [vmem:[%s22143_s3 + $0x458] ss:$24 sps:$4 sm:$0xff]  }
 0x2b1   : > { %6495 = vmatpush1.bf16.msra.mxu0 %v15468_v11  ;;  %4522 = vmatprep.subr.bf16.mxu1 %v15473_v17  ;;  %v15509_v11 = vld [vmem:[%s22143_s3 + $0xe54] ss:$24 sps:$4 sm:$0xff]  }
 0x2b2   : > { %4510 = vmatmul.mubr.bf16.gmra.mrb[36].mxu1 %v17781_v18  ;;  %6496 = vmatprep.subr.bf16.mxu0 %v15476_v19  ;;  %v15477_v18 = vld [vmem:[%s22143_s3 + $0xd60] ss:$24 sps:$4 sm:$0xff]   ;;  %v15512_v17 = vld [vmem:[%s22143_s3 + $0x48c] ss:$24 sps:$4 sm:$0xff]   ;;  %v15507_v19 = vld [vmem:[%s22143_s3 + $0xe50] ss:$24 sps:$4 sm:$0xff]  }
 0x2b3   : > { %6484 = vmatmul.mubr.bf16.gmra.mrb[40].mxu0 %v17758_v30  ;;  %4550 = vmatprep.mubr.bf16.mxu1 %v17905_v55  ;;  %v15480_v55 = vld [vmem:[%s22143_s3 + $0x398] ss:$24 sps:$4 sm:$0xff]  }
 0x2b4   : > { %v18638_v58 = vpop.f32.mrb[16].mxu1  ;;  %v18640_v34 = vpop.f32.mrb[24].mxu0  ;;  %4523 = vmatpush1.bf16.msra.mxu1 %v15471_v29  ;;  %6524 = vmatprep.mubr.bf16.mxu0 %v17851_v39  ;;  %v15510_v29 = vld [vmem:[%s22143_s3 + $0x488] ss:$24 sps:$4 sm:$0xff]  }
 0x2b5   : > { %v18646_v28 = vpop.f32.mrb[17].mxu1  ;;  %v18648_v10 = vpop.f32.mrb[25].mxu0  ;;  %6497 = vmatpush1.bf16.msra.mxu0 %v15474_v12  ;;  %4524 = vmatprep.subr.bf16.mxu1 %v15479_v37  ;;  %v15515_v12 = vld [vmem:[%s22143_s3 + $0xe84] ss:$24 sps:$4 sm:$0xff]  }
 0x2b6   : > { %v4107_v59 = vpop.f32.mrb[18].mxu1  ;;  %v4311_v36 = vpop.f32.mrb[26].mxu0  ;;  %6498 = vmatprep.subr.bf16.mxu0 %v15482_v47  ;;  %v15518_v37 = vld [vmem:[%s22143_s3 + $0x4bc] ss:$24 sps:$4 sm:$0xff]   ;;  %v15513_v47 = vld [vmem:[%s22143_s3 + $0xe80] ss:$24 sps:$4 sm:$0xff]  }
 0x2b7   : > { %v4108_v50 = vpop.f32.mrb[19].mxu1  ;;  %v4312_v41 = vpop.f32.mrb[27].mxu0  ;;  %v15524_v59 = vld [vmem:[%s22143_s3 + $0x4ec] ss:$24 sps:$4 sm:$0xff]   ;;  %v15519_v36 = vld [vmem:[%s22143_s3 + $0xeb0] ss:$24 sps:$4 sm:$0xff]  }
 0x2b8   : > { %4525 = vmatpush1.bf16.msra.mxu1 %v15477_v18  ;;  %v15516_v18 = vld [vmem:[%s22143_s3 + $0x4b8] ss:$24 sps:$4 sm:$0xff]   ;;  %v15527_v50 = vld [vmem:[%s22143_s3 + $0xee4] ss:$24 sps:$4 sm:$0xff]  }
 0x2b9   : > { %6499 = vmatpush1.bf16.msra.mxu0 %v15480_v55  ;;  %4526 = vmatprep.subr.bf16.mxu1 %v15485_v25  ;;  %v15521_v55 = vld [vmem:[%s22143_s3 + $0xeb4] ss:$24 sps:$4 sm:$0xff]   ;;  %v15522_v25 = vld [vmem:[%s22143_s3 + $0x4e8] ss:$24 sps:$4 sm:$0xff]  }
 0x2ba   : > { %6500 = vmatprep.subr.bf16.mxu0 %v15488_v23  ;;  %v15530_v41 = vld [vmem:[%s22143_s3 + $0x51c] ss:$24 sps:$4 sm:$0xff]   ;;  %v15525_v23 = vld [vmem:[%s22143_s3 + $0xee0] ss:$24 sps:$4 sm:$0xff]  }
 0x2bc   : > { %4527 = vmatpush1.bf16.msra.mxu1 %v15483_v15  ;;  %v15528_v15 = vld [vmem:[%s22143_s3 + $0x518] ss:$24 sps:$4 sm:$0xff]  }
 0x2bd   : > { %6501 = vmatpush1.bf16.msra.mxu0 %v15486_v31  ;;  %4528 = vmatprep.subr.bf16.mxu1 %v15491_v5  ;;  %v15533_v31 = vld [vmem:[%s22143_s3 + $0xf14] ss:$24 sps:$4 sm:$0xff]  }
 0x2be   : > { %6502 = vmatprep.subr.bf16.mxu0 %v15494_v7  ;;  %v15536_v5 = vld [vmem:[%s22143_s3 + $0x54c] ss:$24 sps:$4 sm:$0xff]   ;;  %v15531_v7 = vld [vmem:[%s22143_s3 + $0xf10] ss:$24 sps:$4 sm:$0xff]  }
 0x2c0   : > { %4529 = vmatpush1.bf16.msra.mxu1 %v15489_v60  ;;  %v15534_v60 = vld [vmem:[%s22143_s3 + $0x548] ss:$24 sps:$4 sm:$0xff]  }
 0x2c1   : > { %6503 = vmatpush1.bf16.msra.mxu0 %v15492_v51  ;;  %4530 = vmatprep.subr.bf16.mxu1 %v15497_v32  ;;  %v15539_v51 = vld [vmem:[%s22143_s3 + $0xf44] ss:$24 sps:$4 sm:$0xff]  }
 0x2c2   : > { %6504 = vmatprep.subr.bf16.mxu0 %v15500_v4  ;;  %v15542_v32 = vld [vmem:[%s22143_s3 + $0x57c] ss:$24 sps:$4 sm:$0xff]   ;;  %v15537_v4 = vld [vmem:[%s22143_s3 + $0xf40] ss:$24 sps:$4 sm:$0xff]  }
 0x2c4   : > { %4531 = vmatpush1.bf16.msra.mxu1 %v15495_v46  ;;  %v15540_v46 = vld [vmem:[%s22143_s3 + $0x578] ss:$24 sps:$4 sm:$0xff]  }
 0x2c5   : > { %6505 = vmatpush1.bf16.msra.mxu0 %v15498_v14  ;;  %4532 = vmatprep.subr.bf16.mxu1 %v15503_v45  ;;  %v15545_v14 = vld [vmem:[%s22143_s3 + $0xf74] ss:$24 sps:$4 sm:$0xff]  }
 0x2c6   : > { %6506 = vmatprep.subr.bf16.mxu0 %v15506_v35  ;;  %v15548_v45 = vld [vmem:[%s22143_s3 + $0x5ac] ss:$24 sps:$4 sm:$0xff]   ;;  %v15543_v35 = vld [vmem:[%s22143_s3 + $0xf70] ss:$24 sps:$4 sm:$0xff]  }
 0x2c8   : > { %4533 = vmatpush1.bf16.msra.mxu1 %v15501_v42  ;;  %v15546_v42 = vld [vmem:[%s22143_s3 + $0x5a8] ss:$24 sps:$4 sm:$0xff]  }
 0x2c9   : > { %6507 = vmatpush1.bf16.msra.mxu0 %v15504_v20  ;;  %4534 = vmatprep.subr.bf16.mxu1 %v15509_v11  ;;  %v15551_v20 = vld [vmem:[%s22143_s3 + $0xfa4] ss:$24 sps:$4 sm:$0xff]  }
 0x2ca   : > { %6508 = vmatprep.subr.bf16.mxu0 %v15512_v17  ;;  %v15554_v11 = vld [vmem:[%s22143_s3 + $0x5dc] ss:$24 sps:$4 sm:$0xff]   ;;  %v15549_v17 = vld [vmem:[%s22143_s3 + $0xfa0] ss:$24 sps:$4 sm:$0xff]  }
 0x2cc   : > { %4535 = vmatpush1.bf16.msra.mxu1 %v15507_v19  ;;  %v15552_v19 = vld [vmem:[%s22143_s3 + $0x5d8] ss:$24 sps:$4 sm:$0xff]  }
 0x2cd   : > { %6509 = vmatpush1.bf16.msra.mxu0 %v15510_v29  ;;  %4536 = vmatprep.subr.bf16.mxu1 %v15515_v12  ;;  %v15557_v29 = vld [vmem:[%s22143_s3 + $0xfd4] ss:$24 sps:$4 sm:$0xff]  }
 0x2ce   : > { %6510 = vmatprep.subr.bf16.mxu0 %v15518_v37  ;;  %v15560_v12 = vld [vmem:[%s22143_s3 + $0x60c] ss:$24 sps:$4 sm:$0xff]   ;;  %v15555_v37 = vld [vmem:[%s22143_s3 + $0xfd0] ss:$24 sps:$4 sm:$0xff]  }
 0x2d0   : > { %4537 = vmatpush1.bf16.msra.mxu1 %v15513_v47  ;;  %v15558_v47 = vld [vmem:[%s22143_s3 + $0x608] ss:$24 sps:$4 sm:$0xff]  }
 0x2d1   : > { %6511 = vmatpush1.bf16.msra.mxu0 %v15516_v18  ;;  %4538 = vmatprep.subr.bf16.mxu1 %v15521_v55  ;;  %v15563_v18 = vld [vmem:[%s22143_s3 + $0x1004] ss:$24 sps:$4 sm:$0xff]  }
 0x2d2   : > { %6512 = vmatprep.subr.bf16.mxu0 %v15524_v59  ;;  %v15566_v55 = vld [vmem:[%s22143_s3 + $0x63c] ss:$24 sps:$4 sm:$0xff]   ;;  %v15561_v59 = vld [vmem:[%s22143_s3 + $0x1000] ss:$24 sps:$4 sm:$0xff]  }
 0x2d4   : > { %4539 = vmatpush1.bf16.msra.mxu1 %v15519_v36  ;;  %v15569_v36 = vld [vmem:[%s22143_s3 + $0x1034] ss:$24 sps:$4 sm:$0xff]  }
 0x2d5   : > { %6513 = vmatpush1.bf16.msra.mxu0 %v15522_v25  ;;  %4540 = vmatprep.subr.bf16.mxu1 %v15527_v50  ;;  %v15567_v25 = vld [vmem:[%s22143_s3 + $0x1030] ss:$24 sps:$4 sm:$0xff]  }
 0x2d6   : > { %6514 = vmatprep.subr.bf16.mxu0 %v15530_v41  ;;  %v15570_v50 = vld [vmem:[%s22143_s3 + $0x668] ss:$24 sps:$4 sm:$0xff]   ;;  %v15575_v41 = vld [vmem:[%s22143_s3 + $0x1064] ss:$24 sps:$4 sm:$0xff]  }
 0x2d8   : > { %4541 = vmatpush1.bf16.msra.mxu1 %v15525_v23 }
 0x2d9   : > { %6515 = vmatpush1.bf16.msra.mxu0 %v15528_v15  ;;  %4542 = vmatprep.subr.bf16.mxu1 %v15533_v31  ;;  %v15578_v15 = vld [vmem:[%s22143_s3 + $0x69c] ss:$24 sps:$4 sm:$0xff]  }
 0x2da   : > { %6516 = vmatprep.subr.bf16.mxu0 %v15536_v5 }
 0x2dc   : > { %4543 = vmatpush1.bf16.msra.mxu1 %v15531_v7 }
 0x2dd   : > { %6517 = vmatpush1.bf16.msra.mxu0 %v15534_v60  ;;  %4544 = vmatprep.subr.bf16.mxu1 %v15539_v51 }
 0x2de   : > { %6518 = vmatprep.subr.bf16.mxu0 %v15542_v32  ;;  %v15573_v32 = vld [vmem:[%s22143_s3 + $0x1060] ss:$24 sps:$4 sm:$0xff]  }
 0x2e0   : > { %4545 = vmatpush1.bf16.msra.mxu1 %v15537_v4  ;;  %v15576_v4 = vld [vmem:[%s22143_s3 + $0x698] ss:$24 sps:$4 sm:$0xff]  }
 0x2e1   : > { %6519 = vmatpush1.bf16.msra.mxu0 %v15540_v46  ;;  %4546 = vmatprep.subr.bf16.mxu1 %v15545_v14 }
 0x2e2   : > { %6520 = vmatprep.subr.bf16.mxu0 %v15548_v45  ;;  %v15584_v45 = vld [vmem:[%s22143_s3 + $0x6cc] ss:$24 sps:$4 sm:$0xff]  }
 0x2e4   : > { %4547 = vmatpush1.bf16.msra.mxu1 %v15543_v35  ;;  %v15582_v35 = vld [vmem:[%s22143_s3 + $0x6c8] ss:$24 sps:$4 sm:$0xff]  }
 0x2e5   : > { %6521 = vmatpush1.bf16.msra.mxu0 %v15546_v42  ;;  %4548 = vmatprep.subr.bf16.mxu1 %v15551_v20  ;;  %v15587_v42 = vld [vmem:[%s22143_s3 + $0x10c4] ss:$24 sps:$4 sm:$0xff]  }
 0x2e6   : > { %6522 = vmatprep.subr.bf16.mxu0 %v15554_v11  ;;  %v15590_v20 = vld [vmem:[%s22143_s3 + $0x6fc] ss:$24 sps:$4 sm:$0xff]   ;;  %v15585_v11 = vld [vmem:[%s22143_s3 + $0x10c0] ss:$24 sps:$4 sm:$0xff]  }
 0x2e8   : > { %4549 = vmatpush1.bf16.msra.mxu1 %v15549_v17  ;;  %v15588_v17 = vld [vmem:[%s22143_s3 + $0x6f8] ss:$24 sps:$4 sm:$0xff]  }
 0x2e9   : > { %6523 = vmatpush1.bf16.msra.mxu0 %v15552_v19  ;;  %4569 = vmatprep.subr.bf16.mxu1 %v15557_v29  ;;  %v15593_v19 = vld [vmem:[%s22143_s3 + $0x10f4] ss:$24 sps:$4 sm:$0xff]  }
 0x2ea   : > { %6543 = vmatprep.subr.bf16.mxu0 %v15560_v12  ;;  %v15596_v29 = vld [vmem:[%s22143_s3 + $0x72c] ss:$24 sps:$4 sm:$0xff]   ;;  %v15591_v12 = vld [vmem:[%s22143_s3 + $0x10f0] ss:$24 sps:$4 sm:$0xff]  }
 0x2eb   : > { %4551 = vmatmul.mubr.bf16.vlgmr.msra.gmra.mrb[32].mxu1 %v18113_v52  ;;  %v15564_v52 = vld [vmem:[%s22143_s3 + $0x638] ss:$24 sps:$4 sm:$0xff]  }
 0x2ec   : > { %6525 = vmatmul.mubr.bf16.vlgmr.msra.gmra.mrb[20].mxu0 %v17815_v0  ;;  %4560 = vmatprep.mubr.bf16.mxu1 %v17871_v40  ;;  %v15572_v40 = vld [vmem:[%s22143_s3 + $0x66c] ss:$24 sps:$4 sm:$0xff]  }
 0x2ed   : > { %4570 = vmatpush1.bf16.msra.mxu1 %v15555_v37  ;;  %6534 = vmatprep.mubr.bf16.mxu0 %v17855_v22  ;;  %v15594_v37 = vld [vmem:[%s22143_s3 + $0x728] ss:$24 sps:$4 sm:$0xff]  }
 0x2ee   : > { %6544 = vmatpush1.bf16.msra.mxu0 %v15558_v47  ;;  %4571 = vmatprep.subr.bf16.mxu1 %v15563_v18  ;;  %v15599_v47 = vld [vmem:[%s22143_s3 + $0x1124] ss:$24 sps:$4 sm:$0xff]  }
 0x2ef   : > { %6545 = vmatprep.subr.bf16.mxu0 %v15566_v55  ;;  %v15602_v18 = vld [vmem:[%s22143_s3 + $0x75c] ss:$24 sps:$4 sm:$0xff]   ;;  %v15597_v55 = vld [vmem:[%s22143_s3 + $0x1120] ss:$24 sps:$4 sm:$0xff]  }
 0x2f1   : > { %4572 = vmatpush1.bf16.msra.mxu1 %v15561_v59  ;;  %v15600_v59 = vld [vmem:[%s22143_s3 + $0x758] ss:$24 sps:$4 sm:$0xff]  }
 0x2f2   : > { %6546 = vmatpush1.bf16.msra.mxu0 %v15564_v52  ;;  %4573 = vmatprep.subr.bf16.mxu1 %v15569_v36  ;;  %v15605_v52 = vld [vmem:[%s22143_s3 + $0x1154] ss:$24 sps:$4 sm:$0xff]  }
 0x2f3   : > { %4561 = vmatmul.mubr.bf16.gmra.mrb[40].mxu1 %v18091_v26  ;;  %6547 = vmatprep.subr.bf16.mxu0 %v15572_v40  ;;  %v15608_v36 = vld [vmem:[%s22143_s3 + $0x78c] ss:$24 sps:$4 sm:$0xff]   ;;  %v15603_v40 = vld [vmem:[%s22143_s3 + $0x1150] ss:$24 sps:$4 sm:$0xff]  }
 0x2f4   : > { %v4154_v23 = vpop.f32.mrb[20].mxu1  ;;  %6535 = vmatmul.mubr.bf16.gmra.mrb[44].mxu0 %v17853_v24  ;;  %4601 = vmatprep.mubr.bf16.mxu1 %v18155_v1  ;;  %v4358_v5 = vpop.f32.mrb[28].mxu0 }
 0x2f5   : > { %v18847_v31 = vadd.f32 %v4154_v23, %v18638_v58  ;;  %v4156_v7 = vpop.f32.mrb[21].mxu1  ;;  %4574 = vmatpush1.bf16.msra.mxu1 %v15567_v25  ;;  %6575 = vmatprep.mubr.bf16.mxu0 %v18133_v33  ;;  %v18851_v26 = vadd.f32 %v4358_v5, %v18640_v34  ;;  %v4360_v51 = vpop.f32.mrb[29].mxu0  ;;  %v15606_v25 = vld [vmem:[%s22143_s3 + $0x788] ss:$24 sps:$4 sm:$0xff]   ;;  %v15617_v5 = vld [vmem:[%s22143_s3 + $0x11b4] ss:$24 sps:$4 sm:$0xff]  }
 0x2f6   : > { %v18854_v60 = vadd.f32 %v4156_v7, %v18646_v28  ;;  %v4158_v1 = vpop.f32.mrb[22].mxu1  ;;  %6548 = vmatpush1.bf16.msra.mxu0 %v15570_v50  ;;  %v18860_v58 = vadd.f32 %v4360_v51, %v18648_v10  ;;  %4575 = vmatprep.subr.bf16.mxu1 %v15575_v41  ;;  %v4362_v34 = vpop.f32.mrb[30].mxu0  ;;  %v15581_v28 = vld [vmem:[%s22143_s3 + $0x1094] ss:$24 sps:$4 sm:$0xff]   ;;  %v15579_v10 = vld [vmem:[%s22143_s3 + $0x1090] ss:$24 sps:$4 sm:$0xff]  }
 0x2f7   : > { %v4159_v46 = vpop.f32.mrb[23].mxu1  ;;  %6549 = vmatprep.subr.bf16.mxu0 %v15578_v15  ;;  %v4363_v14 = vpop.f32.mrb[31].mxu0  ;;  %v15611_v50 = vld [vmem:[%s22143_s3 + $0x1184] ss:$24 sps:$4 sm:$0xff]   ;;  %v15609_v23 = vld [vmem:[%s22143_s3 + $0x1180] ss:$24 sps:$4 sm:$0xff]  }
 0x2f8   : > { %v15614_v41 = vld [vmem:[%s22143_s3 + $0x7bc] ss:$24 sps:$4 sm:$0xff]   ;;  %v15612_v15 = vld [vmem:[%s22143_s3 + $0x7b8] ss:$24 sps:$4 sm:$0xff]   ;;  %v15620_v7 = vld [vmem:[%s22143_s3 + $0x7ec] ss:$24 sps:$4 sm:$0xff]  }
 0x2f9   : > { %4576 = vmatpush1.bf16.msra.mxu1 %v15573_v32  ;;  %v15615_v51 = vld [vmem:[%s22143_s3 + $0x11b0] ss:$24 sps:$4 sm:$0xff]   ;;  %v15623_v1 = vld [vmem:[%s22143_s3 + $0x11e4] ss:$24 sps:$4 sm:$0xff]   ;;  %v15621_v34 = vld [vmem:[%s22143_s3 + $0x11e0] ss:$24 sps:$4 sm:$0xff]  }
 0x2fa   : > { %6550 = vmatpush1.bf16.msra.mxu0 %v15576_v4  ;;  %4577 = vmatprep.subr.bf16.mxu1 %v15581_v28  ;;  %v15618_v32 = vld [vmem:[%s22143_s3 + $0x7e8] ss:$24 sps:$4 sm:$0xff]   ;;  %v15626_v4 = vld [vmem:[%s22143_s3 + $0x81c] ss:$24 sps:$4 sm:$0xff]   ;;  %v15624_v46 = vld [vmem:[%s22143_s3 + $0x818] ss:$24 sps:$4 sm:$0xff]  }
 0x2fb   : > { %6551 = vmatprep.subr.bf16.mxu0 %v15584_v45  ;;  %v15629_v28 = vld [vmem:[%s22143_s3 + $0x1214] ss:$24 sps:$4 sm:$0xff]   ;;  %v15627_v45 = vld [vmem:[%s22143_s3 + $0x1210] ss:$24 sps:$4 sm:$0xff]  }
 0x2fc   : > { %v15632_v14 = vld [vmem:[%s22143_s3 + $0x84c] ss:$24 sps:$4 sm:$0xff]  }
 0x2fd   : > { %4578 = vmatpush1.bf16.msra.mxu1 %v15579_v10  ;;  %v15630_v10 = vld [vmem:[%s22143_s3 + $0x848] ss:$24 sps:$4 sm:$0xff]  }
 0x2fe   : > { %6552 = vmatpush1.bf16.msra.mxu0 %v15582_v35  ;;  %4579 = vmatprep.subr.bf16.mxu1 %v15587_v42  ;;  %v15635_v35 = vld [vmem:[%s22143_s3 + $0x1244] ss:$24 sps:$4 sm:$0xff]  }
 0x2ff   : > { %6553 = vmatprep.subr.bf16.mxu0 %v15590_v20  ;;  %v15638_v42 = vld [vmem:[%s22143_s3 + $0x87c] ss:$24 sps:$4 sm:$0xff]   ;;  %v15633_v20 = vld [vmem:[%s22143_s3 + $0x1240] ss:$24 sps:$4 sm:$0xff]  }
 0x301   : > { %4580 = vmatpush1.bf16.msra.mxu1 %v15585_v11  ;;  %v15636_v11 = vld [vmem:[%s22143_s3 + $0x878] ss:$24 sps:$4 sm:$0xff]  }
 0x302   : > { %6554 = vmatpush1.bf16.msra.mxu0 %v15588_v17  ;;  %4581 = vmatprep.subr.bf16.mxu1 %v15593_v19  ;;  %v15641_v17 = vld [vmem:[%s22143_s3 + $0x1274] ss:$24 sps:$4 sm:$0xff]  }
 0x303   : > { %6555 = vmatprep.subr.bf16.mxu0 %v15596_v29  ;;  %v15644_v19 = vld [vmem:[%s22143_s3 + $0x8ac] ss:$24 sps:$4 sm:$0xff]   ;;  %v15639_v29 = vld [vmem:[%s22143_s3 + $0x1270] ss:$24 sps:$4 sm:$0xff]  }
 0x305   : > { %4582 = vmatpush1.bf16.msra.mxu1 %v15591_v12  ;;  %v15642_v12 = vld [vmem:[%s22143_s3 + $0x8a8] ss:$24 sps:$4 sm:$0xff]  }
 0x306   : > { %6556 = vmatpush1.bf16.msra.mxu0 %v15594_v37  ;;  %4583 = vmatprep.subr.bf16.mxu1 %v15599_v47  ;;  %v15647_v37 = vld [vmem:[%s22143_s3 + $0x12a4] ss:$24 sps:$4 sm:$0xff]  }
 0x307   : > { %6557 = vmatprep.subr.bf16.mxu0 %v15602_v18  ;;  %v15650_v47 = vld [vmem:[%s22143_s3 + $0x8dc] ss:$24 sps:$4 sm:$0xff]   ;;  %v15645_v18 = vld [vmem:[%s22143_s3 + $0x12a0] ss:$24 sps:$4 sm:$0xff]  }
 0x309   : > { %4584 = vmatpush1.bf16.msra.mxu1 %v15597_v55  ;;  %v15648_v55 = vld [vmem:[%s22143_s3 + $0x8d8] ss:$24 sps:$4 sm:$0xff]  }
 0x30a   : > { %6558 = vmatpush1.bf16.msra.mxu0 %v15600_v59  ;;  %4585 = vmatprep.subr.bf16.mxu1 %v15605_v52  ;;  %v15653_v59 = vld [vmem:[%s22143_s3 + $0x12d4] ss:$24 sps:$4 sm:$0xff]  }
 0x30b   : > { %6559 = vmatprep.subr.bf16.mxu0 %v15608_v36  ;;  %v15656_v52 = vld [vmem:[%s22143_s3 + $0x90c] ss:$24 sps:$4 sm:$0xff]   ;;  %v15651_v36 = vld [vmem:[%s22143_s3 + $0x12d0] ss:$24 sps:$4 sm:$0xff]  }
 0x30d   : > { %4586 = vmatpush1.bf16.msra.mxu1 %v15603_v40  ;;  %v15654_v40 = vld [vmem:[%s22143_s3 + $0x908] ss:$24 sps:$4 sm:$0xff]  }
 0x30e   : > { %6560 = vmatpush1.bf16.msra.mxu0 %v15606_v25  ;;  %4587 = vmatprep.subr.bf16.mxu1 %v15611_v50  ;;  %v15659_v25 = vld [vmem:[%s22143_s3 + $0x1304] ss:$24 sps:$4 sm:$0xff]  }
 0x30f   : > { %6561 = vmatprep.subr.bf16.mxu0 %v15614_v41  ;;  %v15662_v50 = vld [vmem:[%s22143_s3 + $0x93c] ss:$24 sps:$4 sm:$0xff]   ;;  %v15657_v41 = vld [vmem:[%s22143_s3 + $0x1300] ss:$24 sps:$4 sm:$0xff]  }
 0x311   : > { %4588 = vmatpush1.bf16.msra.mxu1 %v15609_v23  ;;  %v15665_v23 = vld [vmem:[%s22143_s3 + $0x1334] ss:$24 sps:$4 sm:$0xff]  }
 0x312   : > { %6562 = vmatpush1.bf16.msra.mxu0 %v15612_v15  ;;  %4589 = vmatprep.subr.bf16.mxu1 %v15617_v5  ;;  %v15663_v15 = vld [vmem:[%s22143_s3 + $0x1330] ss:$24 sps:$4 sm:$0xff]  }
 0x313   : > { %6563 = vmatprep.subr.bf16.mxu0 %v15620_v7  ;;  %v15666_v5 = vld [vmem:[%s22143_s3 + $0x968] ss:$24 sps:$4 sm:$0xff]   ;;  %v15671_v7 = vld [vmem:[%s22143_s3 + $0x1364] ss:$24 sps:$4 sm:$0xff]  }
 0x315   : > { %4590 = vmatpush1.bf16.msra.mxu1 %v15615_v51 }
 0x316   : > { %6564 = vmatpush1.bf16.msra.mxu0 %v15618_v32  ;;  %4591 = vmatprep.subr.bf16.mxu1 %v15623_v1  ;;  %v15674_v32 = vld [vmem:[%s22143_s3 + $0x99c] ss:$24 sps:$4 sm:$0xff]  }
 0x317   : > { %6565 = vmatprep.subr.bf16.mxu0 %v15626_v4 }
 0x319   : > { %4592 = vmatpush1.bf16.msra.mxu1 %v15621_v34 }
 0x31a   : > { %6566 = vmatpush1.bf16.msra.mxu0 %v15624_v46  ;;  %4593 = vmatprep.subr.bf16.mxu1 %v15629_v28 }
 0x31b   : > { %6567 = vmatprep.subr.bf16.mxu0 %v15632_v14  ;;  %v15669_v14 = vld [vmem:[%s22143_s3 + $0x1360] ss:$24 sps:$4 sm:$0xff]  }
 0x31d   : > { %4594 = vmatpush1.bf16.msra.mxu1 %v15627_v45 }
 0x31e   : > { %6568 = vmatpush1.bf16.msra.mxu0 %v15630_v10  ;;  %4595 = vmatprep.subr.bf16.mxu1 %v15635_v35  ;;  %v15672_v10 = vld [vmem:[%s22143_s3 + $0x998] ss:$24 sps:$4 sm:$0xff]  }
 0x31f   : > { %6569 = vmatprep.subr.bf16.mxu0 %v15638_v42 }
 0x321   : > { %4596 = vmatpush1.bf16.msra.mxu1 %v15633_v20  ;;  %v15680_v20 = vld [vmem:[%s22143_s3 + $0x138c] ss:$24 sps:$4 sm:$0xff]  }
 0x322   : > { %6570 = vmatpush1.bf16.msra.mxu0 %v15636_v11  ;;  %4597 = vmatprep.subr.bf16.mxu1 %v15641_v17  ;;  %v15678_v11 = vld [vmem:[%s22143_s3 + $0x1388] ss:$24 sps:$4 sm:$0xff]   ;;  %v15683_v17 = vld [vmem:[%s22143_s3 + $0x34] ss:$24 sps:$4 sm:$0xff]  }
 0x323   : > { %6571 = vmatprep.subr.bf16.mxu0 %v15644_v19  ;;  %v15686_v19 = vld [vmem:[%s22143_s3 + $0x13bc] ss:$24 sps:$4 sm:$0xff]  }
 0x325   : > { %4598 = vmatpush1.bf16.msra.mxu1 %v15639_v29  ;;  %v15681_v29 = vld [vmem:[%s22143_s3 + $0x30] ss:$24 sps:$4 sm:$0xff]  }
 0x326   : > { %6572 = vmatpush1.bf16.msra.mxu0 %v15642_v12  ;;  %4599 = vmatprep.subr.bf16.mxu1 %v15647_v37  ;;  %v15684_v12 = vld [vmem:[%s22143_s3 + $0x13b8] ss:$24 sps:$4 sm:$0xff]   ;;  %v15689_v37 = vld [vmem:[%s22143_s3 + $0x64] ss:$24 sps:$4 sm:$0xff]  }
 0x327   : > { %6573 = vmatprep.subr.bf16.mxu0 %v15650_v47  ;;  %v15687_v47 = vld [vmem:[%s22143_s3 + $0x60] ss:$24 sps:$4 sm:$0xff]  }
 0x329   : > { %4600 = vmatpush1.bf16.msra.mxu1 %v15645_v18  ;;  %v15690_v18 = vld [vmem:[%s22143_s3 + $0x13e8] ss:$24 sps:$4 sm:$0xff]  }
 0x32a   : > { %6574 = vmatpush1.bf16.msra.mxu0 %v15648_v55  ;;  %4620 = vmatprep.subr.bf16.mxu1 %v15653_v59  ;;  %v19112_v55 = vrot.slane %v17743_v9, 2  ;;  %v15695_v59 = vld [vmem:[%s22143_s3 + $0x94] ss:$24 sps:$4 sm:$0xff]  }
 0x32b   : > { %6594 = vmatprep.subr.bf16.mxu0 %v15656_v52  ;;  %v7166_v52 = vrot.slane %v17741_v21, 2 }
 0x32c   : > { %4602 = vmatmul.mubr.bf16.vlgmr.msra.gmra.mrb[32].mxu1 %v18328_v57  ;;  %v15660_v57 = vld [vmem:[%s22143_s3 + $0x938] ss:$24 sps:$4 sm:$0xff]  }
 0x32d   : > { %6576 = vmatmul.mubr.bf16.vlgmr.msra.gmra.mrb[20].mxu0 %v17884_v38  ;;  %4611 = vmatprep.mubr.bf16.mxu1 %v18143_v3  ;;  %v15668_v3 = vld [vmem:[%s22143_s3 + $0x96c] ss:$24 sps:$4 sm:$0xff]  }
 0x32e   : > { %4621 = vmatpush1.bf16.msra.mxu1 %v15651_v36  ;;  %6585 = vmatprep.mubr.bf16.mxu0 %v18116_v27 }
 0x32f   : > { %6595 = vmatpush1.bf16.msra.mxu0 %v15654_v40  ;;  %4622 = vmatprep.subr.bf16.mxu1 %v15659_v25  ;;  %v15698_v40 = vld [vmem:[%s22143_s3 + $0x141c] ss:$24 sps:$4 sm:$0xff]  }
 0x330   : > { %6596 = vmatprep.subr.bf16.mxu0 %v15662_v50 }
 0x332   : > { %4623 = vmatpush1.bf16.msra.mxu1 %v15657_v41 }
 0x333   : > { %6597 = vmatpush1.bf16.msra.mxu0 %v15660_v57  ;;  %4624 = vmatprep.subr.bf16.mxu1 %v15665_v23  ;;  %v15693_v57 = vld [vmem:[%s22143_s3 + $0x90] ss:$24 sps:$4 sm:$0xff]  }
 0x334   : > { %4612 = vmatmul.mubr.bf16.gmra.mrb[44].mxu1 %v18317_v13  ;;  %6598 = vmatprep.subr.bf16.mxu0 %v15668_v3  ;;  %v4205_v51 = vpop.f32.mrb[24].mxu1 }
 0x335   : > { %6586 = vmatmul.mubr.bf16.gmra.mrb[48].mxu0 %v17924_v61  ;;  %v4206_v1 = vadd.f32 %v4205_v51, %v18847_v31  ;;  %v4409_v4 = vpop.f32.mrb[32].mxu0  ;;  %v4207_v34 = vpop.f32.mrb[25].mxu1  ;;  %4652 = vmatprep.mubr.bf16.mxu1 %v16960_v2  ;;  %v15701_v51 = vld [vmem:[%s22143_s3 + $0xc4] ss:$24 sps:$4 sm:$0xff]  }
 0x336   : > { %4625 = vmatpush1.bf16.msra.mxu1 %v15663_v15  ;;  %v4410_v46 = vadd.f32 %v4409_v4, %v18851_v26  ;;  %v4208_v28 = vadd.f32 %v4207_v34, %v18854_v60  ;;  %v4411_v13 = vpop.f32.mrb[33].mxu0  ;;  %v4209_v45 = vpop.f32.mrb[26].mxu1  ;;  %6626 = vmatprep.mubr.bf16.mxu0 %v16960_v2  ;;  %v15677_v60 = vld [vmem:[%s22143_s3 + $0x4] ss:$24 sps:$4 sm:$0xff]  }
 0x337   : > { %6599 = vmatpush1.bf16.msra.mxu0 %v15666_v5  ;;  %v4412_v31 = vadd.f32 %v4411_v13, %v18860_v58  ;;  %4626 = vmatprep.subr.bf16.mxu1 %v15671_v7  ;;  %v4413_v35 = vpop.f32.mrb[34].mxu0  ;;  %v4210_v26 = vpop.f32.mrb[27].mxu1  ;;  %v15675_v58 = vld [vmem:[%s22143_s3] ss:$24 sps:$4 sm:$0xff]   ;;  %v15704_v34 = vld [vmem:[%s22143_s3 + $0x144c] ss:$24 sps:$4 sm:$0xff]  }
 0x338   : > { %6600 = vmatprep.subr.bf16.mxu0 %v15674_v32  ;;  %v4414_v42 = vpop.f32.mrb[35].mxu0  ;;  %v15696_v5 = vld [vmem:[%s22143_s3 + $0x1418] ss:$24 sps:$4 sm:$0xff]   ;;  %v15702_v13 = vld [vmem:[%s22143_s3 + $0x1448] ss:$24 sps:$4 sm:$0xff]  }
 0x339   : > { %v15710_v45 = vld [vmem:[%s22143_s3 + $0x147c] ss:$24 sps:$4 sm:$0xff]   ;;  %v15716_v26 = vld [vmem:[%s22143_s3 + $0x14ac] ss:$24 sps:$4 sm:$0xff]   ;;  %v15714_v42 = vld [vmem:[%s22143_s3 + $0x14a8] ss:$24 sps:$4 sm:$0xff]  }
 0x33a   : > { %4627 = vmatpush1.bf16.msra.mxu1 %v15669_v14  ;;  %v15707_v14 = vld [vmem:[%s22143_s3 + $0xf4] ss:$24 sps:$4 sm:$0xff]   ;;  %v15713_v35 = vld [vmem:[%s22143_s3 + $0x124] ss:$24 sps:$4 sm:$0xff]  }
 0x33b   : > { %6601 = vmatpush1.bf16.msra.mxu0 %v15672_v10  ;;  %6237 = vmatprep.subr.bf16.mxu1 %v15677_v60  ;;  %v15708_v10 = vld [vmem:[%s22143_s3 + $0x1478] ss:$24 sps:$4 sm:$0xff]  }
 0x33c   : > { %8966 = vmatprep.subr.bf16.mxu0 %v15680_v20  ;;  %v15711_v60 = vld [vmem:[%s22143_s3 + $0x120] ss:$24 sps:$4 sm:$0xff]   ;;  %v15719_v20 = vld [vmem:[%s22143_s3 + $0x154] ss:$24 sps:$4 sm:$0xff]  }
 0x33d   : > { %13053 = vmatmul.mubr.msk.bf16.vlgmr.msra.gmra.mrb[32].mxu1 %vm4052_vm6, %v18398_v16  ;;  %v15692_v16 = vld [vmem:[%s22143_s3 + $0x13ec] ss:$24 sps:$4 sm:$0xff]  }
 0x33e   : > { %13369 = vmatmul.mubr.msk.bf16.vlgmr.msra.gmra.mrb[20].mxu0 %vm4052_vm6, %v17937_v43  ;;  %6238 = vmatpush1.bf16.msra.mxu1 %v15675_v58  ;;  %v15722_v58 = vld [vmem:[%s22143_s3 + $0x14dc] ss:$24 sps:$4 sm:$0xff]  }
 0x33f   : > { %8967 = vmatpush1.bf16.msra.mxu0 %v15678_v11  ;;  %6239 = vmatprep.subr.bf16.mxu1 %v15683_v17  ;;  %v15717_v11 = vld [vmem:[%s22143_s3 + $0x150] ss:$24 sps:$4 sm:$0xff]  }
 0x340   : > { %8968 = vmatprep.subr.bf16.mxu0 %v15686_v19  ;;  %4662 = vmatprep.mubr.bf16.mxu1 %v16960_v2  ;;  %v15720_v17 = vld [vmem:[%s22143_s3 + $0x14d8] ss:$24 sps:$4 sm:$0xff]   ;;  %v15725_v19 = vld [vmem:[%s22143_s3 + $0x184] ss:$24 sps:$4 sm:$0xff]  }
 0x341   : > { %6636 = vmatprep.mubr.bf16.mxu0 %v16960_v2 }
 0x342   : > { %6240 = vmatpush1.bf16.msra.mxu1 %v15681_v29  ;;  %v15728_v29 = vld [vmem:[%s22143_s3 + $0x150c] ss:$24 sps:$4 sm:$0xff]  }
 0x343   : > { %8969 = vmatpush1.bf16.msra.mxu0 %v15684_v12  ;;  %6241 = vmatprep.subr.bf16.mxu1 %v15689_v37  ;;  %v15723_v12 = vld [vmem:[%s22143_s3 + $0x180] ss:$24 sps:$4 sm:$0xff]  }
 0x344   : > { %8970 = vmatprep.subr.bf16.mxu0 %v15692_v16  ;;  %v15726_v37 = vld [vmem:[%s22143_s3 + $0x1508] ss:$24 sps:$4 sm:$0xff]   ;;  %v15731_v16 = vld [vmem:[%s22143_s3 + $0x1b4] ss:$24 sps:$4 sm:$0xff]  }
 0x345   : > { %13054 = vmatmul.mubr.msk.bf16.gmra.mrb[48].mxu1 %vm4052_vm6, %v18381_v48  ;;  %v4256_v36 = vpop.f32.mrb[28].mxu1  ;;  %v19133_v48 = vsel %vm520_vm0, %v7166_v52, %v19112_v55  ;;  %v15737_v52 = vld [vmem:[%s22143_s3 + $0x1e4] ss:$24 sps:$4 sm:$0xff]  }
 0x346   : > { %13370 = vmatmul.mubr.msk.bf16.gmra.mrb[52].mxu0 %vm4052_vm6, %v17941_v44  ;;  %6242 = vmatpush1.bf16.msra.mxu1 %v15687_v47  ;;  %v19125_v25 = vadd.f32 %v4256_v36, %v4206_v1  ;;  %v4460_v50 = vpop.f32.mrb[36].mxu0  ;;  %v4258_v41 = vpop.f32.mrb[29].mxu1  ;;  %v15734_v47 = vld [vmem:[%s22143_s3 + $0x153c] ss:$24 sps:$4 sm:$0xff]   ;;  %v15740_v36 = vld [vmem:[%s22143_s3 + $0x156c] ss:$24 sps:$4 sm:$0xff]  }
 0x347   : > { %6269 = vmatprep.mubr.bf16.mxu1 %v17741_v21  ;;  %8971 = vmatpush1.bf16.msra.mxu0 %v15690_v18  ;;  %v19135_v23 = vadd.f32 %v4460_v50, %v4410_v46  ;;  %v19137_v3 = vadd.f32 %v4258_v41, %v4208_v28  ;;  %v4462_v15 = vpop.f32.mrb[37].mxu0  ;;  %v4260_v7 = vpop.f32.mrb[30].mxu1  ;;  %v15699_v28 = vld [vmem:[%s22143_s3 + $0xc0] ss:$24 sps:$4 sm:$0xff]   ;;  %v15729_v18 = vld [vmem:[%s22143_s3 + $0x1b0] ss:$24 sps:$4 sm:$0xff]  }
 0x348   : > { %8998 = vmatprep.mubr.bf16.mxu0 %v19133_v48  ;;  %v19146_v32 = vadd.f32 %v4462_v15, %v4412_v31  ;;  %6243 = vmatprep.subr.bf16.mxu1 %v15695_v59  ;;  %v4464_v1 = vpop.f32.mrb[38].mxu0  ;;  %v4261_v4 = vpop.f32.mrb[31].mxu1  ;;  %v15705_v31 = vld [vmem:[%s22143_s3 + $0xf0] ss:$24 sps:$4 sm:$0xff]   ;;  %v15743_v41 = vld [vmem:[%s22143_s3 + $0x214] ss:$24 sps:$4 sm:$0xff]  }
 0x349   : > { %8972 = vmatprep.subr.bf16.mxu0 %v15698_v40  ;;  %v4465_v46 = vpop.f32.mrb[39].mxu0  ;;  %v15732_v59 = vld [vmem:[%s22143_s3 + $0x1538] ss:$24 sps:$4 sm:$0xff]   ;;  %v15738_v50 = vld [vmem:[%s22143_s3 + $0x1568] ss:$24 sps:$4 sm:$0xff]  }
 0x34a   : > { %6244 = vmatpush1.bf16.msra.mxu1 %v15693_v57  ;;  %v15735_v40 = vld [vmem:[%s22143_s3 + $0x1e0] ss:$24 sps:$4 sm:$0xff]   ;;  %v15746_v57 = vld [vmem:[%s22143_s3 + $0x159c] ss:$24 sps:$4 sm:$0xff]   ;;  %v15741_v15 = vld [vmem:[%s22143_s3 + $0x210] ss:$24 sps:$4 sm:$0xff]  }
 0x34b   : > { %8973 = vmatpush1.bf16.msra.mxu0 %v15696_v5  ;;  %6245 = vmatprep.subr.bf16.mxu1 %v15701_v51  ;;  %v15744_v5 = vld [vmem:[%s22143_s3 + $0x1598] ss:$24 sps:$4 sm:$0xff]   ;;  %v15749_v7 = vld [vmem:[%s22143_s3 + $0x244] ss:$24 sps:$4 sm:$0xff]   ;;  %v15750_v4 = vld [vmem:[%s22143_s3 + $0x15c8] ss:$24 sps:$4 sm:$0xff]  }
 0x34c   : > { %8974 = vmatprep.subr.bf16.mxu0 %v15704_v34  ;;  %v15752_v51 = vld [vmem:[%s22143_s3 + $0x15cc] ss:$24 sps:$4 sm:$0xff]   ;;  %v15747_v1 = vld [vmem:[%s22143_s3 + $0x240] ss:$24 sps:$4 sm:$0xff]   ;;  %v15758_v46 = vld [vmem:[%s22143_s3 + $0x15fc] ss:$24 sps:$4 sm:$0xff]  }
 0x34d   : > { %v15755_v34 = vld [vmem:[%s22143_s3 + $0x274] ss:$24 sps:$4 sm:$0xff]  }
 0x34e   : > { %6246 = vmatpush1.bf16.msra.mxu1 %v15699_v28  ;;  %v15753_v28 = vld [vmem:[%s22143_s3 + $0x270] ss:$24 sps:$4 sm:$0xff]  }
 0x34f   : > { %8975 = vmatpush1.bf16.msra.mxu0 %v15702_v13  ;;  %6247 = vmatprep.subr.bf16.mxu1 %v15707_v14  ;;  %v15756_v13 = vld [vmem:[%s22143_s3 + $0x15f8] ss:$24 sps:$4 sm:$0xff]   ;;  %v15761_v14 = vld [vmem:[%s22143_s3 + $0x2a4] ss:$24 sps:$4 sm:$0xff]  }
 0x350   : > { %8976 = vmatprep.subr.bf16.mxu0 %v15710_v45  ;;  %v15764_v45 = vld [vmem:[%s22143_s3 + $0x162c] ss:$24 sps:$4 sm:$0xff]  }
 0x352   : > { %6248 = vmatpush1.bf16.msra.mxu1 %v15705_v31  ;;  %v15759_v31 = vld [vmem:[%s22143_s3 + $0x2a0] ss:$24 sps:$4 sm:$0xff]  }
 0x353   : > { %8977 = vmatpush1.bf16.msra.mxu0 %v15708_v10  ;;  %6249 = vmatprep.subr.bf16.mxu1 %v15713_v35  ;;  %v15762_v10 = vld [vmem:[%s22143_s3 + $0x1628] ss:$24 sps:$4 sm:$0xff]   ;;  %v15767_v35 = vld [vmem:[%s22143_s3 + $0x2d4] ss:$24 sps:$4 sm:$0xff]  }
 0x354   : > { %8978 = vmatprep.subr.bf16.mxu0 %v15716_v26  ;;  %v15770_v26 = vld [vmem:[%s22143_s3 + $0x165c] ss:$24 sps:$4 sm:$0xff]  }
 0x356   : > { %6250 = vmatpush1.bf16.msra.mxu1 %v15711_v60  ;;  %v15765_v60 = vld [vmem:[%s22143_s3 + $0x2d0] ss:$24 sps:$4 sm:$0xff]  }
 0x357   : > { %8979 = vmatpush1.bf16.msra.mxu0 %v15714_v42  ;;  %6251 = vmatprep.subr.bf16.mxu1 %v15719_v20  ;;  %v15768_v42 = vld [vmem:[%s22143_s3 + $0x1658] ss:$24 sps:$4 sm:$0xff]   ;;  %v15773_v20 = vld [vmem:[%s22143_s3 + $0x304] ss:$24 sps:$4 sm:$0xff]  }
 0x358   : > { %8980 = vmatprep.subr.bf16.mxu0 %v15722_v58  ;;  %v15776_v58 = vld [vmem:[%s22143_s3 + $0x168c] ss:$24 sps:$4 sm:$0xff]  }
 0x35a   : > { %6252 = vmatpush1.bf16.msra.mxu1 %v15717_v11  ;;  %v19296_v11 = vrot.slane %v17758_v30, 2 }
 0x35b   : > { %8981 = vmatpush1.bf16.msra.mxu0 %v15720_v17  ;;  %6253 = vmatprep.subr.bf16.mxu1 %v15725_v19  ;;  %v15771_v17 = vld [vmem:[%s22143_s3 + $0x300] ss:$24 sps:$4 sm:$0xff]   ;;  %v7163_v19 = vrot.slane %v17746_v63, 2 }
 0x35c   : > { %8982 = vmatprep.subr.bf16.mxu0 %v15728_v29  ;;  %v15774_v29 = vld [vmem:[%s22143_s3 + $0x1688] ss:$24 sps:$4 sm:$0xff]  }
 0x35e   : > { %6254 = vmatpush1.bf16.msra.mxu1 %v15723_v12  ;;  %v15779_v12 = vld [vmem:[%s22143_s3 + $0x334] ss:$24 sps:$4 sm:$0xff]  }
 0x35f   : > { %8983 = vmatpush1.bf16.msra.mxu0 %v15726_v37  ;;  %6255 = vmatprep.subr.bf16.mxu1 %v15731_v16  ;;  %v19311_v37 = vsel %vm520_vm0, %v7163_v19, %v19296_v11  ;;  %v15782_v16 = vld [vmem:[%s22143_s3 + $0x16bc] ss:$24 sps:$4 sm:$0xff]   ;;  %v15812_v19 = vld [vmem:[%s22143_s3 + $0x17ac] ss:$24 sps:$4 sm:$0xff]  }
 0x360   : > { %8984 = vmatprep.subr.bf16.mxu0 %v15734_v47  ;;  %v15777_v47 = vld [vmem:[%s22143_s3 + $0x330] ss:$24 sps:$4 sm:$0xff]  }
 0x362   : > { %6256 = vmatpush1.bf16.msra.mxu1 %v15729_v18  ;;  %v15780_v18 = vld [vmem:[%s22143_s3 + $0x16b8] ss:$24 sps:$4 sm:$0xff]  }
 0x363   : > { %8985 = vmatpush1.bf16.msra.mxu0 %v15732_v59  ;;  %6257 = vmatprep.subr.bf16.mxu1 %v15737_v52  ;;  %v15785_v59 = vld [vmem:[%s22143_s3 + $0x364] ss:$24 sps:$4 sm:$0xff]  }
 0x364   : > { %8986 = vmatprep.subr.bf16.mxu0 %v15740_v36  ;;  %v15788_v52 = vld [vmem:[%s22143_s3 + $0x16ec] ss:$24 sps:$4 sm:$0xff]   ;;  %v19332_v36 = vrot.slane %v17855_v22, 2 }
 0x366   : > { %6258 = vmatpush1.bf16.msra.mxu1 %v15735_v40  ;;  %v15783_v40 = vld [vmem:[%s22143_s3 + $0x360] ss:$24 sps:$4 sm:$0xff]  }
 0x367   : > { %8987 = vmatpush1.bf16.msra.mxu0 %v15738_v50  ;;  %6259 = vmatprep.subr.bf16.mxu1 %v15743_v41  ;;  %v15786_v50 = vld [vmem:[%s22143_s3 + $0x16e8] ss:$24 sps:$4 sm:$0xff]   ;;  %v7172_v41 = vrot.slane %v17851_v39, 2 }
 0x368   : > { %8988 = vmatprep.subr.bf16.mxu0 %v15746_v57  ;;  %v15791_v57 = vld [vmem:[%s22143_s3 + $0x394] ss:$24 sps:$4 sm:$0xff]  }
 0x36a   : > { %6260 = vmatpush1.bf16.msra.mxu1 %v15741_v15 }
 0x36b   : > { %8989 = vmatpush1.bf16.msra.mxu0 %v15744_v5  ;;  %6261 = vmatprep.subr.bf16.mxu1 %v15749_v7  ;;  %v15794_v5 = vld [vmem:[%s22143_s3 + $0x171c] ss:$24 sps:$4 sm:$0xff]   ;;  %v19354_v7 = vsel %vm520_vm0, %v7172_v41, %v19332_v36  ;;  %v15822_v41 = vld [vmem:[%s22143_s3 + $0x1808] ss:$24 sps:$4 sm:$0xff]  }
 0x36c   : > { %8990 = vmatprep.subr.bf16.mxu0 %v15752_v51 }
 0x36e   : > { %6262 = vmatpush1.bf16.msra.mxu1 %v15747_v1 }
 0x36f   : > { %8991 = vmatpush1.bf16.msra.mxu0 %v15750_v4  ;;  %6263 = vmatprep.subr.bf16.mxu1 %v15755_v34  ;;  %v15789_v34 = vld [vmem:[%s22143_s3 + $0x390] ss:$24 sps:$4 sm:$0xff]  }
 0x370   : > { %8992 = vmatprep.subr.bf16.mxu0 %v15758_v46 }
 0x372   : > { %6264 = vmatpush1.bf16.msra.mxu1 %v15753_v28 }
 0x373   : > { %8993 = vmatpush1.bf16.msra.mxu0 %v15756_v13  ;;  %6265 = vmatprep.subr.bf16.mxu1 %v15761_v14  ;;  %v15792_v14 = vld [vmem:[%s22143_s3 + $0x1718] ss:$24 sps:$4 sm:$0xff]  }
 0x374   : > { %8994 = vmatprep.subr.bf16.mxu0 %v15764_v45 }
 0x376   : > { %6266 = vmatpush1.bf16.msra.mxu1 %v15759_v31 }
 0x377   : > { %8995 = vmatpush1.bf16.msra.mxu0 %v15762_v10  ;;  %6267 = vmatprep.subr.bf16.mxu1 %v15767_v35  ;;  %v15800_v35 = vld [vmem:[%s22143_s3 + $0x174c] ss:$24 sps:$4 sm:$0xff]  }
 0x378   : > { %8996 = vmatprep.subr.bf16.mxu0 %v15770_v26  ;;  %v15798_v26 = vld [vmem:[%s22143_s3 + $0x1748] ss:$24 sps:$4 sm:$0xff]  }
 0x37a   : > { %6268 = vmatpush1.bf16.msra.mxu1 %v15765_v60  ;;  %v15803_v60 = vld [vmem:[%s22143_s3 + $0x3f4] ss:$24 sps:$4 sm:$0xff]  }
 0x37b   : > { %8997 = vmatpush1.bf16.msra.mxu0 %v15768_v42  ;;  %6288 = vmatprep.subr.bf16.mxu1 %v15773_v20  ;;  %v15806_v42 = vld [vmem:[%s22143_s3 + $0x177c] ss:$24 sps:$4 sm:$0xff]   ;;  %v15801_v20 = vld [vmem:[%s22143_s3 + $0x3f0] ss:$24 sps:$4 sm:$0xff]  }
 0x37c   : > { %9017 = vmatprep.subr.bf16.mxu0 %v15776_v58  ;;  %v15804_v58 = vld [vmem:[%s22143_s3 + $0x1778] ss:$24 sps:$4 sm:$0xff]  }
 0x37d   : > { %6270 = vmatmul.mubr.bf16.vlgmr.msra.gmra.mrb[12].mxu1 %v17746_v63 }
 0x37e   : > { %8999 = vmatmul.mubr.bf16.vlgmr.msra.gmra.mrb[20].mxu0 %v19311_v37  ;;  %6279 = vmatprep.mubr.bf16.mxu1 %v17743_v9 }
 0x37f   : > { %6289 = vmatpush1.bf16.msra.mxu1 %v15771_v17  ;;  %9008 = vmatprep.mubr.bf16.mxu0 %v19112_v55  ;;  %v15809_v17 = vld [vmem:[%s22143_s3 + $0x424] ss:$24 sps:$4 sm:$0xff]  }
 0x380   : > { %9018 = vmatpush1.bf16.msra.mxu0 %v15774_v29  ;;  %6290 = vmatprep.subr.bf16.mxu1 %v15779_v12  ;;  %v15807_v29 = vld [vmem:[%s22143_s3 + $0x420] ss:$24 sps:$4 sm:$0xff]  }
 0x381   : > { %9019 = vmatprep.subr.bf16.mxu0 %v15782_v16  ;;  %v15810_v12 = vld [vmem:[%s22143_s3 + $0x17a8] ss:$24 sps:$4 sm:$0xff]   ;;  %v15815_v16 = vld [vmem:[%s22143_s3 + $0x454] ss:$24 sps:$4 sm:$0xff]  }
 0x383   : > { %6291 = vmatpush1.bf16.msra.mxu1 %v15777_v47  ;;  %v15818_v47 = vld [vmem:[%s22143_s3 + $0x17dc] ss:$24 sps:$4 sm:$0xff]  }
 0x384   : > { %9020 = vmatpush1.bf16.msra.mxu0 %v15780_v18  ;;  %6292 = vmatprep.subr.bf16.mxu1 %v15785_v59  ;;  %v15813_v18 = vld [vmem:[%s22143_s3 + $0x450] ss:$24 sps:$4 sm:$0xff]  }
 0x385   : > { %6280 = vmatmul.mubr.bf16.gmra.mrb[52].mxu1 %v17758_v30  ;;  %9021 = vmatprep.subr.bf16.mxu0 %v15788_v52  ;;  %v19345_v15 = vpop.f32.mrb[36].mxu1  ;;  %v15816_v59 = vld [vmem:[%s22143_s3 + $0x17d8] ss:$24 sps:$4 sm:$0xff]   ;;  %v15821_v52 = vld [vmem:[%s22143_s3 + $0x484] ss:$24 sps:$4 sm:$0xff]  }
 0x386   : > { %9009 = vmatmul.mubr.bf16.gmra.mrb[56].mxu0 %v19296_v11  ;;  %6320 = vmatprep.mubr.bf16.mxu1 %v17851_v39  ;;  %v6485_v51 = vpop.f32.mrb[40].mxu0  ;;  %v19356_v1 = vpop.f32.mrb[37].mxu1 }
 0x387   : > { %6293 = vmatpush1.bf16.msra.mxu1 %v15783_v40  ;;  %9049 = vmatprep.mubr.bf16.mxu0 %v19354_v7  ;;  %v19360_v4 = vadd.f32 %v6485_v51, %v19135_v23  ;;  %v6487_v46 = vpop.f32.mrb[41].mxu0  ;;  %v4515_v28 = vpop.f32.mrb[38].mxu1  ;;  %v15797_v23 = vld [vmem:[%s22143_s3 + $0x3c4] ss:$24 sps:$4 sm:$0xff]   ;;  %v15825_v51 = vld [vmem:[%s22143_s3 + $0x4b0] ss:$24 sps:$4 sm:$0xff]  }
 0x388   : > { %9022 = vmatpush1.bf16.msra.mxu0 %v15786_v50  ;;  %6294 = vmatprep.subr.bf16.mxu1 %v15791_v57  ;;  %v19366_v13 = vadd.f32 %v6487_v46, %v19146_v32  ;;  %v6489_v45 = vpop.f32.mrb[42].mxu0  ;;  %v4516_v31 = vpop.f32.mrb[39].mxu1  ;;  %v15795_v32 = vld [vmem:[%s22143_s3 + $0x3c0] ss:$24 sps:$4 sm:$0xff]   ;;  %v15824_v40 = vld [vmem:[%s22143_s3 + $0x180c] ss:$24 sps:$4 sm:$0xff]  }
 0x389   : > { %9023 = vmatprep.subr.bf16.mxu0 %v15794_v5  ;;  %v6490_v10 = vpop.f32.mrb[43].mxu0  ;;  %v15819_v50 = vld [vmem:[%s22143_s3 + $0x480] ss:$24 sps:$4 sm:$0xff]   ;;  %v15827_v57 = vld [vmem:[%s22143_s3 + $0x4b4] ss:$24 sps:$4 sm:$0xff]  }
 0x38a   : > { %v15830_v5 = vld [vmem:[%s22143_s3 + $0x183c] ss:$24 sps:$4 sm:$0xff]   ;;  %v15836_v28 = vld [vmem:[%s22143_s3 + $0x186c] ss:$24 sps:$4 sm:$0xff]   ;;  %v15834_v45 = vld [vmem:[%s22143_s3 + $0x1868] ss:$24 sps:$4 sm:$0xff]  }
 0x38b   : > { %6295 = vmatpush1.bf16.msra.mxu1 %v15789_v34  ;;  %v15828_v34 = vld [vmem:[%s22143_s3 + $0x1838] ss:$24 sps:$4 sm:$0xff]   ;;  %v15833_v46 = vld [vmem:[%s22143_s3 + $0x4e4] ss:$24 sps:$4 sm:$0xff]   ;;  %v15839_v31 = vld [vmem:[%s22143_s3 + $0x514] ss:$24 sps:$4 sm:$0xff]  }
 0x38c   : > { %9024 = vmatpush1.bf16.msra.mxu0 %v15792_v14  ;;  %6296 = vmatprep.subr.bf16.mxu1 %v15797_v23  ;;  %v15831_v14 = vld [vmem:[%s22143_s3 + $0x4e0] ss:$24 sps:$4 sm:$0xff]   ;;  %v15842_v23 = vld [vmem:[%s22143_s3 + $0x189c] ss:$24 sps:$4 sm:$0xff]   ;;  %v15837_v10 = vld [vmem:[%s22143_s3 + $0x510] ss:$24 sps:$4 sm:$0xff]  }
 0x38d   : > { %9025 = vmatprep.subr.bf16.mxu0 %v15800_v35  ;;  %v15840_v35 = vld [vmem:[%s22143_s3 + $0x1898] ss:$24 sps:$4 sm:$0xff]  }
 0x38f   : > { %6297 = vmatpush1.bf16.msra.mxu1 %v15795_v32  ;;  %v15845_v32 = vld [vmem:[%s22143_s3 + $0x544] ss:$24 sps:$4 sm:$0xff]  }
 0x390   : > { %9026 = vmatpush1.bf16.msra.mxu0 %v15798_v26  ;;  %6298 = vmatprep.subr.bf16.mxu1 %v15803_v60  ;;  %v15848_v26 = vld [vmem:[%s22143_s3 + $0x18cc] ss:$24 sps:$4 sm:$0xff]   ;;  %v15843_v60 = vld [vmem:[%s22143_s3 + $0x540] ss:$24 sps:$4 sm:$0xff]  }
 0x391   : > { %9027 = vmatprep.subr.bf16.mxu0 %v15806_v42  ;;  %v15846_v42 = vld [vmem:[%s22143_s3 + $0x18c8] ss:$24 sps:$4 sm:$0xff]  }
 0x393   : > { %6299 = vmatpush1.bf16.msra.mxu1 %v15801_v20  ;;  %v15851_v20 = vld [vmem:[%s22143_s3 + $0x574] ss:$24 sps:$4 sm:$0xff]  }
 0x394   : > { %9028 = vmatpush1.bf16.msra.mxu0 %v15804_v58  ;;  %6300 = vmatprep.subr.bf16.mxu1 %v15809_v17  ;;  %v15854_v58 = vld [vmem:[%s22143_s3 + $0x18fc] ss:$24 sps:$4 sm:$0xff]   ;;  %v15849_v17 = vld [vmem:[%s22143_s3 + $0x570] ss:$24 sps:$4 sm:$0xff]  }
 0x395   : > { %9029 = vmatprep.subr.bf16.mxu0 %v15812_v19  ;;  %v15852_v19 = vld [vmem:[%s22143_s3 + $0x18f8] ss:$24 sps:$4 sm:$0xff]  }
 0x397   : > { %6301 = vmatpush1.bf16.msra.mxu1 %v15807_v29  ;;  %v15857_v29 = vld [vmem:[%s22143_s3 + $0x5a4] ss:$24 sps:$4 sm:$0xff]  }
 0x398   : > { %9030 = vmatpush1.bf16.msra.mxu0 %v15810_v12  ;;  %6302 = vmatprep.subr.bf16.mxu1 %v15815_v16  ;;  %v15860_v12 = vld [vmem:[%s22143_s3 + $0x192c] ss:$24 sps:$4 sm:$0xff]   ;;  %v15855_v16 = vld [vmem:[%s22143_s3 + $0x5a0] ss:$24 sps:$4 sm:$0xff]  }
 0x399   : > { %9031 = vmatprep.subr.bf16.mxu0 %v15818_v47  ;;  %v15858_v47 = vld [vmem:[%s22143_s3 + $0x1928] ss:$24 sps:$4 sm:$0xff]  }
 0x39b   : > { %6303 = vmatpush1.bf16.msra.mxu1 %v15813_v18  ;;  %v15863_v18 = vld [vmem:[%s22143_s3 + $0x5d4] ss:$24 sps:$4 sm:$0xff]  }
 0x39c   : > { %9032 = vmatpush1.bf16.msra.mxu0 %v15816_v59  ;;  %6304 = vmatprep.subr.bf16.mxu1 %v15821_v52  ;;  %v15866_v59 = vld [vmem:[%s22143_s3 + $0x195c] ss:$24 sps:$4 sm:$0xff]   ;;  %v15861_v52 = vld [vmem:[%s22143_s3 + $0x5d0] ss:$24 sps:$4 sm:$0xff]  }
 0x39d   : > { %9033 = vmatprep.subr.bf16.mxu0 %v15824_v40  ;;  %v15864_v40 = vld [vmem:[%s22143_s3 + $0x1958] ss:$24 sps:$4 sm:$0xff]  }
 0x39f   : > { %6305 = vmatpush1.bf16.msra.mxu1 %v15819_v50  ;;  %v15869_v50 = vld [vmem:[%s22143_s3 + $0x604] ss:$24 sps:$4 sm:$0xff]  }
 0x3a0   : > { %9034 = vmatpush1.bf16.msra.mxu0 %v15822_v41  ;;  %6306 = vmatprep.subr.bf16.mxu1 %v15827_v57  ;;  %v15872_v41 = vld [vmem:[%s22143_s3 + $0x198c] ss:$24 sps:$4 sm:$0xff]   ;;  %v19522_v57 = vrot.slane %v17853_v24, 2 }
 0x3a1   : > { %9035 = vmatprep.subr.bf16.mxu0 %v15830_v5  ;;  %v15867_v5 = vld [vmem:[%s22143_s3 + $0x600] ss:$24 sps:$4 sm:$0xff]  }
 0x3a3   : > { %6307 = vmatpush1.bf16.msra.mxu1 %v15825_v51  ;;  %v7169_v51 = vrot.slane %v17815_v0, 2 }
 0x3a4   : > { %9036 = vmatpush1.bf16.msra.mxu0 %v15828_v34  ;;  %6308 = vmatprep.subr.bf16.mxu1 %v15833_v46  ;;  %v15870_v34 = vld [vmem:[%s22143_s3 + $0x1988] ss:$24 sps:$4 sm:$0xff]   ;;  %v15875_v46 = vld [vmem:[%s22143_s3 + $0x634] ss:$24 sps:$4 sm:$0xff]  }
 0x3a5   : > { %9037 = vmatprep.subr.bf16.mxu0 %v15836_v28  ;;  %v19537_v28 = vsel %vm520_vm0, %v7169_v51, %v19522_v57  ;;  %v15894_v51 = vld [vmem:[%s22143_s3 + $0x1a48] ss:$24 sps:$4 sm:$0xff]  }
 0x3a7   : > { %6309 = vmatpush1.bf16.msra.mxu1 %v15831_v14  ;;  %v15878_v14 = vld [vmem:[%s22143_s3 + $0x19bc] ss:$24 sps:$4 sm:$0xff]  }
 0x3a8   : > { %9038 = vmatpush1.bf16.msra.mxu0 %v15834_v45  ;;  %6310 = vmatprep.subr.bf16.mxu1 %v15839_v31  ;;  %v15873_v45 = vld [vmem:[%s22143_s3 + $0x630] ss:$24 sps:$4 sm:$0xff]  }
 0x3a9   : > { %9039 = vmatprep.subr.bf16.mxu0 %v15842_v23  ;;  %v15876_v31 = vld [vmem:[%s22143_s3 + $0x19b8] ss:$24 sps:$4 sm:$0xff]   ;;  %v15881_v23 = vld [vmem:[%s22143_s3 + $0x664] ss:$24 sps:$4 sm:$0xff]  }
 0x3ab   : > { %6311 = vmatpush1.bf16.msra.mxu1 %v15837_v10  ;;  %v15884_v10 = vld [vmem:[%s22143_s3 + $0x19ec] ss:$24 sps:$4 sm:$0xff]  }
 0x3ac   : > { %9040 = vmatpush1.bf16.msra.mxu0 %v15840_v35  ;;  %6312 = vmatprep.subr.bf16.mxu1 %v15845_v32  ;;  %v19558_v35 = vrot.slane %v18116_v27, 2  ;;  %v15879_v32 = vld [vmem:[%s22143_s3 + $0x660] ss:$24 sps:$4 sm:$0xff]  }
 0x3ad   : > { %9041 = vmatprep.subr.bf16.mxu0 %v15848_v26  ;;  %v15882_v26 = vld [vmem:[%s22143_s3 + $0x19e8] ss:$24 sps:$4 sm:$0xff]  }
 0x3af   : > { %6313 = vmatpush1.bf16.msra.mxu1 %v15843_v60  ;;  %v7178_v60 = vrot.slane %v18133_v33, 2 }
 0x3b0   : > { %9042 = vmatpush1.bf16.msra.mxu0 %v15846_v42  ;;  %6314 = vmatprep.subr.bf16.mxu1 %v15851_v20  ;;  %v15887_v42 = vld [vmem:[%s22143_s3 + $0x694] ss:$24 sps:$4 sm:$0xff]  }
 0x3b1   : > { %9043 = vmatprep.subr.bf16.mxu0 %v15854_v58  ;;  %v15890_v58 = vld [vmem:[%s22143_s3 + $0x1a1c] ss:$24 sps:$4 sm:$0xff]  }
 0x3b3   : > { %6315 = vmatpush1.bf16.msra.mxu1 %v15849_v17  ;;  %v19578_v17 = vsel %vm520_vm0, %v7178_v60, %v19558_v35  ;;  %v15914_v60 = vld [vmem:[%s22143_s3 + $0x1adc] ss:$24 sps:$4 sm:$0xff]  }
 0x3b4   : > { %9044 = vmatpush1.bf16.msra.mxu0 %v15852_v19  ;;  %6316 = vmatprep.subr.bf16.mxu1 %v15857_v29 }
 0x3b5   : > { %9045 = vmatprep.subr.bf16.mxu0 %v15860_v12 }
 0x3b7   : > { %6317 = vmatpush1.bf16.msra.mxu1 %v15855_v16 }
 0x3b8   : > { %9046 = vmatpush1.bf16.msra.mxu0 %v15858_v47  ;;  %6318 = vmatprep.subr.bf16.mxu1 %v15863_v18  ;;  %v15885_v18 = vld [vmem:[%s22143_s3 + $0x690] ss:$24 sps:$4 sm:$0xff]  }
 0x3b9   : > { %9047 = vmatprep.subr.bf16.mxu0 %v15866_v59 }
 0x3bb   : > { %6319 = vmatpush1.bf16.msra.mxu1 %v15861_v52 }
 0x3bc   : > { %9048 = vmatpush1.bf16.msra.mxu0 %v15864_v40  ;;  %6339 = vmatprep.subr.bf16.mxu1 %v15869_v50  ;;  %v15888_v40 = vld [vmem:[%s22143_s3 + $0x1a18] ss:$24 sps:$4 sm:$0xff]  }
 0x3bd   : > { %9068 = vmatprep.subr.bf16.mxu0 %v15872_v41 }
 0x3be   : > { %6321 = vmatmul.mubr.bf16.vlgmr.msra.gmra.mrb[12].mxu1 %v17815_v0 }
 0x3bf   : > { %9050 = vmatmul.mubr.bf16.vlgmr.msra.gmra.mrb[20].mxu0 %v19537_v28  ;;  %6330 = vmatprep.mubr.bf16.mxu1 %v17855_v22 }
 0x3c0   : > { %6340 = vmatpush1.bf16.msra.mxu1 %v15867_v5  ;;  %9059 = vmatprep.mubr.bf16.mxu0 %v19332_v36  ;;  %v15896_v5 = vld [vmem:[%s22143_s3 + $0x1a4c] ss:$24 sps:$4 sm:$0xff]  }
 0x3c1   : > { %9069 = vmatpush1.bf16.msra.mxu0 %v15870_v34  ;;  %6341 = vmatprep.subr.bf16.mxu1 %v15875_v46  ;;  %v15899_v34 = vld [vmem:[%s22143_s3 + $0x6f4] ss:$24 sps:$4 sm:$0xff]  }
 0x3c2   : > { %9070 = vmatprep.subr.bf16.mxu0 %v15878_v14  ;;  %v15902_v46 = vld [vmem:[%s22143_s3 + $0x1a7c] ss:$24 sps:$4 sm:$0xff]   ;;  %v15897_v14 = vld [vmem:[%s22143_s3 + $0x6f0] ss:$24 sps:$4 sm:$0xff]  }
 0x3c4   : > { %6342 = vmatpush1.bf16.msra.mxu1 %v15873_v45  ;;  %v15900_v45 = vld [vmem:[%s22143_s3 + $0x1a78] ss:$24 sps:$4 sm:$0xff]  }
 0x3c5   : > { %9071 = vmatpush1.bf16.msra.mxu0 %v15876_v31  ;;  %6343 = vmatprep.subr.bf16.mxu1 %v15881_v23  ;;  %v15905_v31 = vld [vmem:[%s22143_s3 + $0x724] ss:$24 sps:$4 sm:$0xff]  }
 0x3c6   : > { %6331 = vmatmul.mubr.bf16.gmra.mrb[56].mxu1 %v17853_v24  ;;  %9072 = vmatprep.subr.bf16.mxu0 %v15884_v10  ;;  %v4562_v20 = vpop.f32.mrb[40].mxu1  ;;  %v15908_v23 = vld [vmem:[%s22143_s3 + $0x1aac] ss:$24 sps:$4 sm:$0xff]   ;;  %v15903_v10 = vld [vmem:[%s22143_s3 + $0x720] ss:$24 sps:$4 sm:$0xff]  }
 0x3c7   : > { %9060 = vmatmul.mubr.bf16.gmra.mrb[60].mxu0 %v19522_v57  ;;  %6371 = vmatprep.mubr.bf16.mxu1 %v18133_v33  ;;  %v19581_v19 = vadd.f32 %v4562_v20, %v19345_v15  ;;  %v6536_v29 = vpop.f32.mrb[44].mxu0  ;;  %v4564_v12 = vpop.f32.mrb[41].mxu1  ;;  %v15912_v20 = vld [vmem:[%s22143_s3 + $0x1ad8] ss:$24 sps:$4 sm:$0xff]  }
 0x3c8   : > { %6344 = vmatpush1.bf16.msra.mxu1 %v15879_v32  ;;  %9100 = vmatprep.mubr.bf16.mxu0 %v19578_v17  ;;  %v19585_v16 = vadd.f32 %v6536_v29, %v19360_v4  ;;  %v19588_v47 = vadd.f32 %v4564_v12, %v19356_v1  ;;  %v6538_v59 = vpop.f32.mrb[45].mxu0  ;;  %v4566_v52 = vpop.f32.mrb[42].mxu1  ;;  %v15893_v1 = vld [vmem:[%s22143_s3 + $0x6c4] ss:$24 sps:$4 sm:$0xff]   ;;  %v15906_v32 = vld [vmem:[%s22143_s3 + $0x1aa8] ss:$24 sps:$4 sm:$0xff]  }
 0x3c9   : > { %9073 = vmatpush1.bf16.msra.mxu0 %v15882_v26  ;;  %6345 = vmatprep.subr.bf16.mxu1 %v15887_v42  ;;  %v19594_v15 = vadd.f32 %v6538_v59, %v19366_v13  ;;  %v6540_v4 = vpop.f32.mrb[46].mxu0  ;;  %v4567_v50 = vpop.f32.mrb[43].mxu1  ;;  %v15891_v13 = vld [vmem:[%s22143_s3 + $0x6c0] ss:$24 sps:$4 sm:$0xff]   ;;  %v15911_v26 = vld [vmem:[%s22143_s3 + $0x754] ss:$24 sps:$4 sm:$0xff]  }
 0x3ca   : > { %9074 = vmatprep.subr.bf16.mxu0 %v15890_v58  ;;  %v6541_v41 = vpop.f32.mrb[47].mxu0  ;;  %v15909_v42 = vld [vmem:[%s22143_s3 + $0x750] ss:$24 sps:$4 sm:$0xff]   ;;  %v15917_v58 = vld [vmem:[%s22143_s3 + $0x784] ss:$24 sps:$4 sm:$0xff]  }
 0x3cb   : > { %v15920_v29 = vld [vmem:[%s22143_s3 + $0x1b0c] ss:$24 sps:$4 sm:$0xff]   ;;  %v15915_v12 = vld [vmem:[%s22143_s3 + $0x780] ss:$24 sps:$4 sm:$0xff]   ;;  %v15926_v52 = vld [vmem:[%s22143_s3 + $0x1b3c] ss:$24 sps:$4 sm:$0xff]  }
 0x3cc   : > { %6346 = vmatpush1.bf16.msra.mxu1 %v15885_v18  ;;  %v15918_v18 = vld [vmem:[%s22143_s3 + $0x1b08] ss:$24 sps:$4 sm:$0xff]   ;;  %v15923_v59 = vld [vmem:[%s22143_s3 + $0x7b4] ss:$24 sps:$4 sm:$0xff]   ;;  %v15924_v4 = vld [vmem:[%s22143_s3 + $0x1b38] ss:$24 sps:$4 sm:$0xff]  }
 0x3cd   : > { %9075 = vmatpush1.bf16.msra.mxu0 %v15888_v40  ;;  %6347 = vmatprep.subr.bf16.mxu1 %v15893_v1  ;;  %v15921_v40 = vld [vmem:[%s22143_s3 + $0x7b0] ss:$24 sps:$4 sm:$0xff]   ;;  %v15929_v50 = vld [vmem:[%s22143_s3 + $0x7e4] ss:$24 sps:$4 sm:$0xff]   ;;  %v15927_v41 = vld [vmem:[%s22143_s3 + $0x7e0] ss:$24 sps:$4 sm:$0xff]  }
 0x3ce   : > { %9076 = vmatprep.subr.bf16.mxu0 %v15896_v5  ;;  %v15932_v1 = vld [vmem:[%s22143_s3 + $0x1b6c] ss:$24 sps:$4 sm:$0xff]   ;;  %v15930_v5 = vld [vmem:[%s22143_s3 + $0x1b68] ss:$24 sps:$4 sm:$0xff]  }
 0x3d0   : > { %6348 = vmatpush1.bf16.msra.mxu1 %v15891_v13  ;;  %v15935_v13 = vld [vmem:[%s22143_s3 + $0x814] ss:$24 sps:$4 sm:$0xff]  }
 0x3d1   : > { %9077 = vmatpush1.bf16.msra.mxu0 %v15894_v51  ;;  %6349 = vmatprep.subr.bf16.mxu1 %v15899_v34  ;;  %v15938_v51 = vld [vmem:[%s22143_s3 + $0x1b9c] ss:$24 sps:$4 sm:$0xff]   ;;  %v15933_v34 = vld [vmem:[%s22143_s3 + $0x810] ss:$24 sps:$4 sm:$0xff]  }
 0x3d2   : > { %9078 = vmatprep.subr.bf16.mxu0 %v15902_v46  ;;  %v15936_v46 = vld [vmem:[%s22143_s3 + $0x1b98] ss:$24 sps:$4 sm:$0xff]  }
 0x3d4   : > { %6350 = vmatpush1.bf16.msra.mxu1 %v15897_v14  ;;  %v15941_v14 = vld [vmem:[%s22143_s3 + $0x844] ss:$24 sps:$4 sm:$0xff]  }
 0x3d5   : > { %9079 = vmatpush1.bf16.msra.mxu0 %v15900_v45  ;;  %6351 = vmatprep.subr.bf16.mxu1 %v15905_v31  ;;  %v15944_v45 = vld [vmem:[%s22143_s3 + $0x1bcc] ss:$24 sps:$4 sm:$0xff]   ;;  %v15939_v31 = vld [vmem:[%s22143_s3 + $0x840] ss:$24 sps:$4 sm:$0xff]  }
 0x3d6   : > { %9080 = vmatprep.subr.bf16.mxu0 %v15908_v23  ;;  %v15942_v23 = vld [vmem:[%s22143_s3 + $0x1bc8] ss:$24 sps:$4 sm:$0xff]  }
 0x3d8   : > { %6352 = vmatpush1.bf16.msra.mxu1 %v15903_v10  ;;  %v15947_v10 = vld [vmem:[%s22143_s3 + $0x874] ss:$24 sps:$4 sm:$0xff]  }
 0x3d9   : > { %9081 = vmatpush1.bf16.msra.mxu0 %v15906_v32  ;;  %6353 = vmatprep.subr.bf16.mxu1 %v15911_v26  ;;  %v15950_v32 = vld [vmem:[%s22143_s3 + $0x1bfc] ss:$24 sps:$4 sm:$0xff]   ;;  %v15945_v26 = vld [vmem:[%s22143_s3 + $0x870] ss:$24 sps:$4 sm:$0xff]  }
 0x3da   : > { %9082 = vmatprep.subr.bf16.mxu0 %v15914_v60  ;;  %v15948_v60 = vld [vmem:[%s22143_s3 + $0x1bf8] ss:$24 sps:$4 sm:$0xff]  }
 0x3dc   : > { %6354 = vmatpush1.bf16.msra.mxu1 %v15909_v42  ;;  %v15953_v42 = vld [vmem:[%s22143_s3 + $0x8a4] ss:$24 sps:$4 sm:$0xff]  }
 0x3dd   : > { %9083 = vmatpush1.bf16.msra.mxu0 %v15912_v20  ;;  %6355 = vmatprep.subr.bf16.mxu1 %v15917_v58  ;;  %v15956_v20 = vld [vmem:[%s22143_s3 + $0x1c2c] ss:$24 sps:$4 sm:$0xff]   ;;  %v15951_v58 = vld [vmem:[%s22143_s3 + $0x8a0] ss:$24 sps:$4 sm:$0xff]  }
 0x3de   : > { %9084 = vmatprep.subr.bf16.mxu0 %v15920_v29  ;;  %v15954_v29 = vld [vmem:[%s22143_s3 + $0x1c28] ss:$24 sps:$4 sm:$0xff]  }
 0x3e0   : > { %6356 = vmatpush1.bf16.msra.mxu1 %v15915_v12  ;;  %v15959_v12 = vld [vmem:[%s22143_s3 + $0x8d4] ss:$24 sps:$4 sm:$0xff]  }
 0x3e1   : > { %9085 = vmatpush1.bf16.msra.mxu0 %v15918_v18  ;;  %6357 = vmatprep.subr.bf16.mxu1 %v15923_v59  ;;  %v15962_v18 = vld [vmem:[%s22143_s3 + $0x1c5c] ss:$24 sps:$4 sm:$0xff]   ;;  %v15957_v59 = vld [vmem:[%s22143_s3 + $0x8d0] ss:$24 sps:$4 sm:$0xff]  }
 0x3e2   : > { %9086 = vmatprep.subr.bf16.mxu0 %v15926_v52  ;;  %v15960_v52 = vld [vmem:[%s22143_s3 + $0x1c58] ss:$24 sps:$4 sm:$0xff]  }
 0x3e4   : > { %6358 = vmatpush1.bf16.msra.mxu1 %v15921_v40  ;;  %v15965_v40 = vld [vmem:[%s22143_s3 + $0x904] ss:$24 sps:$4 sm:$0xff]  }
 0x3e5   : > { %9087 = vmatpush1.bf16.msra.mxu0 %v15924_v4  ;;  %6359 = vmatprep.subr.bf16.mxu1 %v15929_v50  ;;  %v15968_v4 = vld [vmem:[%s22143_s3 + $0x1c8c] ss:$24 sps:$4 sm:$0xff]   ;;  %v19750_v50 = vrot.slane %v17924_v61, 2 }
 0x3e6   : > { %9088 = vmatprep.subr.bf16.mxu0 %v15932_v1  ;;  %v15963_v1 = vld [vmem:[%s22143_s3 + $0x900] ss:$24 sps:$4 sm:$0xff]  }
 0x3e8   : > { %6360 = vmatpush1.bf16.msra.mxu1 %v15927_v41  ;;  %v7175_v41 = vrot.slane %v17884_v38, 2 }
 0x3e9   : > { %9089 = vmatpush1.bf16.msra.mxu0 %v15930_v5  ;;  %6361 = vmatprep.subr.bf16.mxu1 %v15935_v13  ;;  %v15966_v5 = vld [vmem:[%s22143_s3 + $0x1c88] ss:$24 sps:$4 sm:$0xff]   ;;  %v15971_v13 = vld [vmem:[%s22143_s3 + $0x934] ss:$24 sps:$4 sm:$0xff]  }
 0x3ea   : > { %9090 = vmatprep.subr.bf16.mxu0 %v15938_v51  ;;  %v19765_v51 = vsel %vm520_vm0, %v7175_v41, %v19750_v50  ;;  %v19815_v41 = vrot.slane %v17941_v44, 2 }
 0x3ec   : > { %6362 = vmatpush1.bf16.msra.mxu1 %v15933_v34  ;;  %v15974_v34 = vld [vmem:[%s22143_s3 + $0x1cbc] ss:$24 sps:$4 sm:$0xff]  }
 0x3ed   : > { %9091 = vmatpush1.bf16.msra.mxu0 %v15936_v46  ;;  %6363 = vmatprep.subr.bf16.mxu1 %v15941_v14  ;;  %v15969_v46 = vld [vmem:[%s22143_s3 + $0x930] ss:$24 sps:$4 sm:$0xff]  }
 0x3ee   : > { %9092 = vmatprep.subr.bf16.mxu0 %v15944_v45  ;;  %v15972_v14 = vld [vmem:[%s22143_s3 + $0x1cb8] ss:$24 sps:$4 sm:$0xff]   ;;  %v15977_v45 = vld [vmem:[%s22143_s3 + $0x964] ss:$24 sps:$4 sm:$0xff]  }
 0x3f0   : > { %6364 = vmatpush1.bf16.msra.mxu1 %v15939_v31  ;;  %v15980_v31 = vld [vmem:[%s22143_s3 + $0x1cec] ss:$24 sps:$4 sm:$0xff]  }
 0x3f1   : > { %9093 = vmatpush1.bf16.msra.mxu0 %v15942_v23  ;;  %6365 = vmatprep.subr.bf16.mxu1 %v15947_v10  ;;  %v15975_v23 = vld [vmem:[%s22143_s3 + $0x960] ss:$24 sps:$4 sm:$0xff]  }
 0x3f2   : > { %9094 = vmatprep.subr.bf16.mxu0 %v15950_v32  ;;  %v15978_v10 = vld [vmem:[%s22143_s3 + $0x1ce8] ss:$24 sps:$4 sm:$0xff]   ;;  %v15983_v32 = vld [vmem:[%s22143_s3 + $0x994] ss:$24 sps:$4 sm:$0xff]  }
 0x3f4   : > { %6366 = vmatpush1.bf16.msra.mxu1 %v15945_v26 }
 0x3f5   : > { %9095 = vmatpush1.bf16.msra.mxu0 %v15948_v60  ;;  %6367 = vmatprep.subr.bf16.mxu1 %v15953_v42  ;;  %v15986_v60 = vld [vmem:[%s22143_s3 + $0x1d1c] ss:$24 sps:$4 sm:$0xff]  }
 0x3f6   : > { %9096 = vmatprep.subr.bf16.mxu0 %v15956_v20 }
 0x3f8   : > { %6368 = vmatpush1.bf16.msra.mxu1 %v15951_v58 }
 0x3f9   : > { %9097 = vmatpush1.bf16.msra.mxu0 %v15954_v29  ;;  %6369 = vmatprep.subr.bf16.mxu1 %v15959_v12 }
 0x3fa   : > { %9098 = vmatprep.subr.bf16.mxu0 %v15962_v18  ;;  %v15981_v18 = vld [vmem:[%s22143_s3 + $0x990] ss:$24 sps:$4 sm:$0xff]  }
 0x3fc   : > { %6370 = vmatpush1.bf16.msra.mxu1 %v15957_v59 }
 0x3fd   : > { %9099 = vmatpush1.bf16.msra.mxu0 %v15960_v52  ;;  %6390 = vmatprep.subr.bf16.mxu1 %v15965_v40  ;;  %v15984_v40 = vld [vmem:[%s22143_s3 + $0x1d18] ss:$24 sps:$4 sm:$0xff]  }
 0x3fe   : > { %9119 = vmatprep.subr.bf16.mxu0 %v15968_v4 }
 0x3ff   : > { %6372 = vmatmul.mubr.bf16.vlgmr.msra.gmra.mrb[12].mxu1 %v17884_v38 }
 0x400   : > { %9101 = vmatmul.mubr.bf16.vlgmr.msra.gmra.mrb[20].mxu0 %v19765_v51  ;;  %6381 = vmatprep.mubr.bf16.mxu1 %v18116_v27 }
 0x401   : > { %6391 = vmatpush1.bf16.msra.mxu1 %v15963_v1  ;;  %9110 = vmatprep.mubr.bf16.mxu0 %v19558_v35 }
 0x402   : > { %9120 = vmatpush1.bf16.msra.mxu0 %v15966_v5  ;;  %6392 = vmatprep.subr.bf16.mxu1 %v15971_v13  ;;  %v7181_v5 = vrot.slane %v17937_v43, 2  ;;  %v15992_v13 = vld [vmem:[%s22143_s3 + $0x44] ss:$24 sps:$4 sm:$0xff]  }
 0x403   : > { %9121 = vmatprep.subr.bf16.mxu0 %v15974_v34 }
 0x404   : > { %v19828_v34 = vsel %vm520_vm0, %v7181_v5, %v19815_v41  ;;  %v16013_v5 = vld [vmem:[%s22143_s3 + $0x194] ss:$24 sps:$4 sm:$0xff]  }
 0x405   : > { %6393 = vmatpush1.bf16.msra.mxu1 %v15969_v46  ;;  %v15990_v46 = vld [vmem:[%s22143_s3 + $0x40] ss:$24 sps:$4 sm:$0xff]  }
 0x406   : > { %9122 = vmatpush1.bf16.msra.mxu0 %v15972_v14  ;;  %6394 = vmatprep.subr.bf16.mxu1 %v15977_v45  ;;  %v15995_v14 = vld [vmem:[%s22143_s3 + $0x74] ss:$24 sps:$4 sm:$0xff]   ;;  %v15993_v45 = vld [vmem:[%s22143_s3 + $0x70] ss:$24 sps:$4 sm:$0xff]  }
 0x407   : > { %6382 = vmatmul.mubr.bf16.gmra.mrb[60].mxu1 %v17924_v61  ;;  %9123 = vmatprep.subr.bf16.mxu0 %v15980_v31  ;;  %v4613_v26 = vpop.f32.mrb[44].mxu1  ;;  %v15998_v31 = vld [vmem:[%s22143_s3 + $0xa4] ss:$24 sps:$4 sm:$0xff]  }
 0x408   : > { %9111 = vmatmul.mubr.bf16.gmra.mrb[64].mxu0 %v19750_v50  ;;  %v4614_v42 = vadd.f32 %v4613_v26, %v19581_v19  ;;  %v6587_v20 = vpop.f32.mrb[48].mxu0  ;;  %v4615_v58 = vpop.f32.mrb[45].mxu1  ;;  %6422 = vmatprep.mubr.bf16.mxu1 %v16960_v2 }
 0x409   : > { %6395 = vmatpush1.bf16.msra.mxu1 %v15975_v23  ;;  %v6588_v29 = vadd.f32 %v6587_v20, %v19585_v16  ;;  %v4616_v12 = vadd.f32 %v4615_v58, %v19588_v47  ;;  %v6589_v59 = vpop.f32.mrb[49].mxu0  ;;  %v4617_v52 = vpop.f32.mrb[46].mxu1  ;;  %9151 = vmatprep.mubr.bf16.mxu0 %v16960_v2  ;;  %v15989_v47 = vld [vmem:[%s22143_s3 + $0x14] ss:$24 sps:$4 sm:$0xff]  }
 0x40a   : > { %9124 = vmatpush1.bf16.msra.mxu0 %v15978_v10  ;;  %6396 = vmatprep.subr.bf16.mxu1 %v15983_v32  ;;  %v6590_v19 = vadd.f32 %v6589_v59, %v19594_v15  ;;  %v6591_v4 = vpop.f32.mrb[50].mxu0  ;;  %v4618_v16 = vpop.f32.mrb[47].mxu1  ;;  %v15987_v15 = vld [vmem:[%s22143_s3 + $0x10] ss:$24 sps:$4 sm:$0xff]  }
 0x40b   : > { %9125 = vmatprep.subr.bf16.mxu0 %v15986_v60  ;;  %v6592_v1 = vpop.f32.mrb[51].mxu0  ;;  %v15996_v60 = vld [vmem:[%s22143_s3 + $0xa0] ss:$24 sps:$4 sm:$0xff]  }
 0x40c   : > { %v16010_v1 = vld [vmem:[%s22143_s3 + $0x164] ss:$24 sps:$4 sm:$0xff]  }
 0x40d   : > { %6397 = vmatpush1.bf16.msra.mxu1 %v15981_v18 }
 0x40e   : > { %9126 = vmatpush1.bf16.msra.mxu0 %v15984_v40  ;;  %6645 = vmatprep.subr.bf16.mxu1 %v15989_v47  ;;  %v16005_v47 = vld [vmem:[%s22143_s3 + $0x130] ss:$24 sps:$4 sm:$0xff]  }
 0x410   : > { %13367 = vmatmul.mubr.msk.bf16.vlgmr.msra.gmra.mrb[12].mxu1 %vm4052_vm6, %v17937_v43 }
 0x411   : > { %13999 = vmatmul.mubr.msk.bf16.vlgmr.msra.gmra.mrb[20].mxu0 %vm4052_vm6, %v19828_v34  ;;  %6646 = vmatpush1.bf16.msra.mxu1 %v15987_v15  ;;  %v16008_v15 = vld [vmem:[%s22143_s3 + $0x160] ss:$24 sps:$4 sm:$0xff]  }
 0x412   : > { %6647 = vmatprep.subr.bf16.mxu1 %v15992_v13  ;;  %6432 = vmatprep.mubr.bf16.mxu1 %v16960_v2  ;;  %v16011_v13 = vld [vmem:[%s22143_s3 + $0x190] ss:$24 sps:$4 sm:$0xff]  }
 0x413   : > { %9161 = vmatprep.mubr.bf16.mxu0 %v16960_v2 }
 0x415   : > { %6648 = vmatpush1.bf16.msra.mxu1 %v15990_v46  ;;  %v16016_v46 = vld [vmem:[%s22143_s3 + $0x1c4] ss:$24 sps:$4 sm:$0xff]  }
 0x416   : > { %6649 = vmatprep.subr.bf16.mxu1 %v15995_v14  ;;  %v16014_v14 = vld [vmem:[%s22143_s3 + $0x1c0] ss:$24 sps:$4 sm:$0xff]  }
 0x418   : > { %13368 = vmatmul.mubr.msk.bf16.gmra.mrb[64].mxu1 %vm4052_vm6, %v17941_v44  ;;  %v4664_v23 = vpop.f32.mrb[48].mxu1 }
 0x419   : > { %14000 = vmatmul.mubr.msk.bf16.gmra.mrb[68].mxu0 %vm4052_vm6, %v19815_v41  ;;  %6650 = vmatpush1.bf16.msra.mxu1 %v15993_v45  ;;  %v19850_v10 = vadd.f32 %v4664_v23, %v4614_v42  ;;  %v6638_v32 = vpop.f32.mrb[52].mxu0  ;;  %v4666_v26 = vpop.f32.mrb[49].mxu1  ;;  %v16001_v42 = vld [vmem:[%s22143_s3 + $0xd4] ss:$24 sps:$4 sm:$0xff]   ;;  %v16022_v23 = vld [vmem:[%s22143_s3 + $0x224] ss:$24 sps:$4 sm:$0xff]  }
 0x41a   : > { %6677 = vmatprep.mubr.bf16.mxu1 %v17741_v21  ;;  %v19856_v20 = vadd.f32 %v6638_v32, %v6588_v29  ;;  %v19858_v58 = vadd.f32 %v4666_v26, %v4616_v12  ;;  %v6640_v18 = vpop.f32.mrb[53].mxu0  ;;  %6651 = vmatprep.subr.bf16.mxu1 %v15998_v31  ;;  %v4668_v59 = vpop.f32.mrb[50].mxu1  ;;  %v15999_v21 = vld [vmem:[%s22143_s3 + $0xd0] ss:$24 sps:$4 sm:$0xff]   ;;  %v16004_v29 = vld [vmem:[%s22143_s3 + $0x104] ss:$24 sps:$4 sm:$0xff]  }
 0x41b   : > { %v19863_v52 = vadd.f32 %v6640_v18, %v6590_v19  ;;  %v6642_v40 = vpop.f32.mrb[54].mxu0  ;;  %v4669_v4 = vpop.f32.mrb[51].mxu1  ;;  %v16002_v12 = vld [vmem:[%s22143_s3 + $0x100] ss:$24 sps:$4 sm:$0xff]   ;;  %v16007_v19 = vld [vmem:[%s22143_s3 + $0x134] ss:$24 sps:$4 sm:$0xff]  }
 0x41c   : > { %v6643_v16 = vpop.f32.mrb[55].mxu0  ;;  %v16019_v45 = vld [vmem:[%s22143_s3 + $0x1f4] ss:$24 sps:$4 sm:$0xff]   ;;  %v16017_v31 = vld [vmem:[%s22143_s3 + $0x1f0] ss:$24 sps:$4 sm:$0xff]  }
 0x41d   : > { %6652 = vmatpush1.bf16.msra.mxu1 %v15996_v60  ;;  %v16020_v32 = vld [vmem:[%s22143_s3 + $0x220] ss:$24 sps:$4 sm:$0xff]   ;;  %v16025_v26 = vld [vmem:[%s22143_s3 + $0x254] ss:$24 sps:$4 sm:$0xff]   ;;  %v16023_v60 = vld [vmem:[%s22143_s3 + $0x250] ss:$24 sps:$4 sm:$0xff]  }
 0x41e   : > { %6653 = vmatprep.subr.bf16.mxu1 %v16001_v42  ;;  %v16028_v18 = vld [vmem:[%s22143_s3 + $0x284] ss:$24 sps:$4 sm:$0xff]   ;;  %v16026_v59 = vld [vmem:[%s22143_s3 + $0x280] ss:$24 sps:$4 sm:$0xff]   ;;  %v16031_v42 = vld [vmem:[%s22143_s3 + $0x2b4] ss:$24 sps:$4 sm:$0xff]  }
 0x41f   : > { %v16029_v40 = vld [vmem:[%s22143_s3 + $0x2b0] ss:$24 sps:$4 sm:$0xff]   ;;  %v16034_v4 = vld [vmem:[%s22143_s3 + $0x2e4] ss:$24 sps:$4 sm:$0xff]   ;;  %v16032_v16 = vld [vmem:[%s22143_s3 + $0x2e0] ss:$24 sps:$4 sm:$0xff]  }
 0x421   : > { %6654 = vmatpush1.bf16.msra.mxu1 %v15999_v21  ;;  %v16037_v21 = vld [vmem:[%s22143_s3 + $0x314] ss:$24 sps:$4 sm:$0xff]  }
 0x422   : > { %6655 = vmatprep.subr.bf16.mxu1 %v16004_v29  ;;  %v16035_v29 = vld [vmem:[%s22143_s3 + $0x310] ss:$24 sps:$4 sm:$0xff]  }
 0x425   : > { %6656 = vmatpush1.bf16.msra.mxu1 %v16002_v12  ;;  %v16040_v12 = vld [vmem:[%s22143_s3 + $0x344] ss:$24 sps:$4 sm:$0xff]  }
 0x426   : > { %6657 = vmatprep.subr.bf16.mxu1 %v16007_v19  ;;  %v16038_v19 = vld [vmem:[%s22143_s3 + $0x340] ss:$24 sps:$4 sm:$0xff]  }
 0x429   : > { %6658 = vmatpush1.bf16.msra.mxu1 %v16005_v47  ;;  %v16043_v47 = vld [vmem:[%s22143_s3 + $0x374] ss:$24 sps:$4 sm:$0xff]  }
 0x42a   : > { %6659 = vmatprep.subr.bf16.mxu1 %v16010_v1  ;;  %v16041_v1 = vld [vmem:[%s22143_s3 + $0x370] ss:$24 sps:$4 sm:$0xff]  }
 0x42d   : > { %6660 = vmatpush1.bf16.msra.mxu1 %v16008_v15 }
 0x42e   : > { %6661 = vmatprep.subr.bf16.mxu1 %v16013_v5 }
 0x431   : > { %6662 = vmatpush1.bf16.msra.mxu1 %v16011_v13 }
 0x432   : > { %6663 = vmatprep.subr.bf16.mxu1 %v16016_v46  ;;  %v16044_v46 = vld [vmem:[%s22143_s3 + $0x3a0] ss:$24 sps:$4 sm:$0xff]  }
 0x435   : > { %6664 = vmatpush1.bf16.msra.mxu1 %v16014_v14 }
 0x436   : > { %6665 = vmatprep.subr.bf16.mxu1 %v16019_v45 }
 0x439   : > { %6666 = vmatpush1.bf16.msra.mxu1 %v16017_v31 }
 0x43a   : > { %6667 = vmatprep.subr.bf16.mxu1 %v16022_v23 }
 0x43d   : > { %6668 = vmatpush1.bf16.msra.mxu1 %v16020_v32  ;;  %v16047_v32 = vld [vmem:[%s22143_s3 + $0x3d0] ss:$24 sps:$4 sm:$0xff]  }
 0x43e   : > { %6669 = vmatprep.subr.bf16.mxu1 %v16025_v26  ;;  %v16050_v26 = vld [vmem:[%s22143_s3 + $0x400] ss:$24 sps:$4 sm:$0xff]  }
 0x441   : > { %6670 = vmatpush1.bf16.msra.mxu1 %v16023_v60  ;;  %v16055_v60 = vld [vmem:[%s22143_s3 + $0x434] ss:$24 sps:$4 sm:$0xff]  }
 0x442   : > { %6671 = vmatprep.subr.bf16.mxu1 %v16028_v18  ;;  %v16053_v18 = vld [vmem:[%s22143_s3 + $0x430] ss:$24 sps:$4 sm:$0xff]  }
 0x445   : > { %6672 = vmatpush1.bf16.msra.mxu1 %v16026_v59  ;;  %v16058_v59 = vld [vmem:[%s22143_s3 + $0x464] ss:$24 sps:$4 sm:$0xff]  }
 0x446   : > { %6673 = vmatprep.subr.bf16.mxu1 %v16031_v42  ;;  %v16056_v42 = vld [vmem:[%s22143_s3 + $0x460] ss:$24 sps:$4 sm:$0xff]  }
 0x449   : > { %6674 = vmatpush1.bf16.msra.mxu1 %v16029_v40  ;;  %v16061_v40 = vld [vmem:[%s22143_s3 + $0x494] ss:$24 sps:$4 sm:$0xff]  }
 0x44a   : > { %6675 = vmatprep.subr.bf16.mxu1 %v16034_v4  ;;  %v16059_v4 = vld [vmem:[%s22143_s3 + $0x490] ss:$24 sps:$4 sm:$0xff]  }
 0x44d   : > { %6676 = vmatpush1.bf16.msra.mxu1 %v16032_v16  ;;  %v16064_v16 = vld [vmem:[%s22143_s3 + $0x4c4] ss:$24 sps:$4 sm:$0xff]  }
 0x44e   : > { %6696 = vmatprep.subr.bf16.mxu1 %v16037_v21  ;;  %v16062_v21 = vld [vmem:[%s22143_s3 + $0x4c0] ss:$24 sps:$4 sm:$0xff]  }
 0x450   : > { %6678 = vmatmul.mubr.bf16.vlgmr.msra.gmra.mrb[32].mxu1 %v17746_v63 }
 0x451   : > { %6687 = vmatprep.mubr.bf16.mxu1 %v17743_v9  ;;  %6697 = vmatpush1.bf16.msra.mxu1 %v16035_v29  ;;  %v16046_v9 = vld [vmem:[%s22143_s3 + $0x3a4] ss:$24 sps:$4 sm:$0xff]   ;;  %v16067_v29 = vld [vmem:[%s22143_s3 + $0x4f4] ss:$24 sps:$4 sm:$0xff]  }
 0x452   : > { %6698 = vmatprep.subr.bf16.mxu1 %v16040_v12  ;;  %v16065_v12 = vld [vmem:[%s22143_s3 + $0x4f0] ss:$24 sps:$4 sm:$0xff]  }
 0x455   : > { %6699 = vmatpush1.bf16.msra.mxu1 %v16038_v19  ;;  %v16070_v19 = vld [vmem:[%s22143_s3 + $0x524] ss:$24 sps:$4 sm:$0xff]  }
 0x456   : > { %6700 = vmatprep.subr.bf16.mxu1 %v16043_v47  ;;  %v16068_v47 = vld [vmem:[%s22143_s3 + $0x520] ss:$24 sps:$4 sm:$0xff]  }
 0x458   : > { %6688 = vmatmul.mubr.bf16.gmra.mrb[68].mxu1 %v17758_v30  ;;  %v6281_v63 = vpop.f32.mrb[52].mxu1 }
 0x459   : > { %6701 = vmatpush1.bf16.msra.mxu1 %v16041_v1  ;;  %6728 = vmatprep.mubr.bf16.mxu1 %v17851_v39  ;;  %v19960_v15 = vadd.f32 %v6281_v63, %v19125_v25  ;;  %v19962_v5 = vpop.f32.mrb[56].mxu0  ;;  %v6283_v13 = vpop.f32.mrb[53].mxu1  ;;  %v16049_v39 = vld [vmem:[%s22143_s3 + $0x3d4] ss:$24 sps:$4 sm:$0xff]   ;;  %v16076_v63 = vld [vmem:[%s22143_s3 + $0x584] ss:$24 sps:$4 sm:$0xff]  }
 0x45a   : > { %v19968_v14 = vadd.f32 %v6283_v13, %v19137_v3  ;;  %6702 = vmatprep.subr.bf16.mxu1 %v16046_v9  ;;  %v19970_v45 = vpop.f32.mrb[57].mxu0  ;;  %v6285_v30 = vpop.f32.mrb[54].mxu1  ;;  %v16052_v3 = vld [vmem:[%s22143_s3 + $0x404] ss:$24 sps:$4 sm:$0xff]   ;;  %v16073_v1 = vld [vmem:[%s22143_s3 + $0x554] ss:$24 sps:$4 sm:$0xff]  }
 0x45b   : > { %v9014_v25 = vpop.f32.mrb[58].mxu0  ;;  %v6286_v31 = vpop.f32.mrb[55].mxu1  ;;  %v16071_v9 = vld [vmem:[%s22143_s3 + $0x550] ss:$24 sps:$4 sm:$0xff]   ;;  %v16074_v13 = vld [vmem:[%s22143_s3 + $0x580] ss:$24 sps:$4 sm:$0xff]  }
 0x45c   : > { %v9015_v23 = vpop.f32.mrb[59].mxu0  ;;  %v16077_v30 = vld [vmem:[%s22143_s3 + $0x5b0] ss:$24 sps:$4 sm:$0xff]   ;;  %v16080_v25 = vld [vmem:[%s22143_s3 + $0x5e0] ss:$24 sps:$4 sm:$0xff]  }
 0x45d   : > { %6703 = vmatpush1.bf16.msra.mxu1 %v16044_v46  ;;  %v16079_v46 = vld [vmem:[%s22143_s3 + $0x5b4] ss:$24 sps:$4 sm:$0xff]   ;;  %v16083_v23 = vld [vmem:[%s22143_s3 + $0x610] ss:$24 sps:$4 sm:$0xff]  }
 0x45e   : > { %6704 = vmatprep.subr.bf16.mxu1 %v16049_v39  ;;  %v16082_v39 = vld [vmem:[%s22143_s3 + $0x5e4] ss:$24 sps:$4 sm:$0xff]   ;;  %v16085_v31 = vld [vmem:[%s22143_s3 + $0x614] ss:$24 sps:$4 sm:$0xff]  }
 0x461   : > { %6705 = vmatpush1.bf16.msra.mxu1 %v16047_v32  ;;  %v16088_v32 = vld [vmem:[%s22143_s3 + $0x644] ss:$24 sps:$4 sm:$0xff]  }
 0x462   : > { %6706 = vmatprep.subr.bf16.mxu1 %v16052_v3  ;;  %v16086_v3 = vld [vmem:[%s22143_s3 + $0x640] ss:$24 sps:$4 sm:$0xff]  }
 0x465   : > { %6707 = vmatpush1.bf16.msra.mxu1 %v16050_v26  ;;  %v16091_v26 = vld [vmem:[%s22143_s3 + $0x674] ss:$24 sps:$4 sm:$0xff]  }
 0x466   : > { %6708 = vmatprep.subr.bf16.mxu1 %v16055_v60  ;;  %v16089_v60 = vld [vmem:[%s22143_s3 + $0x670] ss:$24 sps:$4 sm:$0xff]  }
 0x469   : > { %6709 = vmatpush1.bf16.msra.mxu1 %v16053_v18  ;;  %v16092_v18 = vld [vmem:[%s22143_s3 + $0x6a0] ss:$24 sps:$4 sm:$0xff]  }
 0x46a   : > { %6710 = vmatprep.subr.bf16.mxu1 %v16058_v59 }
 0x46d   : > { %6711 = vmatpush1.bf16.msra.mxu1 %v16056_v42 }
 0x46e   : > { %6712 = vmatprep.subr.bf16.mxu1 %v16061_v40 }
 0x471   : > { %6713 = vmatpush1.bf16.msra.mxu1 %v16059_v4  ;;  %v16097_v4 = vld [vmem:[%s22143_s3 + $0x6d4] ss:$24 sps:$4 sm:$0xff]  }
 0x472   : > { %6714 = vmatprep.subr.bf16.mxu1 %v16064_v16 }
 0x475   : > { %6715 = vmatpush1.bf16.msra.mxu1 %v16062_v21 }
 0x476   : > { %6716 = vmatprep.subr.bf16.mxu1 %v16067_v29 }
 0x479   : > { %6717 = vmatpush1.bf16.msra.mxu1 %v16065_v12 }
 0x47a   : > { %6718 = vmatprep.subr.bf16.mxu1 %v16070_v19 }
 0x47d   : > { %6719 = vmatpush1.bf16.msra.mxu1 %v16068_v47  ;;  %v16095_v47 = vld [vmem:[%s22143_s3 + $0x6d0] ss:$24 sps:$4 sm:$0xff]  }
 0x47e   : > { %6720 = vmatprep.subr.bf16.mxu1 %v16073_v1  ;;  %v16101_v1 = vld [vmem:[%s22143_s3 + $0x730] ss:$24 sps:$4 sm:$0xff]  }
 0x481   : > { %6721 = vmatpush1.bf16.msra.mxu1 %v16071_v9  ;;  %v16106_v9 = vld [vmem:[%s22143_s3 + $0x764] ss:$24 sps:$4 sm:$0xff]  }
 0x482   : > { %6722 = vmatprep.subr.bf16.mxu1 %v16076_v63  ;;  %v16104_v63 = vld [vmem:[%s22143_s3 + $0x760] ss:$24 sps:$4 sm:$0xff]  }
 0x485   : > { %6723 = vmatpush1.bf16.msra.mxu1 %v16074_v13  ;;  %v16109_v13 = vld [vmem:[%s22143_s3 + $0x794] ss:$24 sps:$4 sm:$0xff]  }
 0x486   : > { %6724 = vmatprep.subr.bf16.mxu1 %v16079_v46  ;;  %v16107_v46 = vld [vmem:[%s22143_s3 + $0x790] ss:$24 sps:$4 sm:$0xff]  }
 0x489   : > { %6725 = vmatpush1.bf16.msra.mxu1 %v16077_v30  ;;  %v16112_v30 = vld [vmem:[%s22143_s3 + $0x7c4] ss:$24 sps:$4 sm:$0xff]  }
 0x48a   : > { %6726 = vmatprep.subr.bf16.mxu1 %v16082_v39  ;;  %v16110_v39 = vld [vmem:[%s22143_s3 + $0x7c0] ss:$24 sps:$4 sm:$0xff]  }
 0x48d   : > { %6727 = vmatpush1.bf16.msra.mxu1 %v16080_v25  ;;  %v16115_v25 = vld [vmem:[%s22143_s3 + $0x7f4] ss:$24 sps:$4 sm:$0xff]  }
 0x48e   : > { %6747 = vmatprep.subr.bf16.mxu1 %v16085_v31  ;;  %v16113_v31 = vld [vmem:[%s22143_s3 + $0x7f0] ss:$24 sps:$4 sm:$0xff]  }
 0x490   : > { %6729 = vmatmul.mubr.bf16.vlgmr.msra.gmra.mrb[32].mxu1 %v17815_v0  ;;  %v16094_v0 = vld [vmem:[%s22143_s3 + $0x6a4] ss:$24 sps:$4 sm:$0xff]  }
 0x491   : > { %6738 = vmatprep.mubr.bf16.mxu1 %v17855_v22  ;;  %6748 = vmatpush1.bf16.msra.mxu1 %v16083_v23  ;;  %v16118_v23 = vld [vmem:[%s22143_s3 + $0x824] ss:$24 sps:$4 sm:$0xff]  }
 0x492   : > { %6749 = vmatprep.subr.bf16.mxu1 %v16088_v32  ;;  %v16116_v32 = vld [vmem:[%s22143_s3 + $0x820] ss:$24 sps:$4 sm:$0xff]  }
 0x495   : > { %6750 = vmatpush1.bf16.msra.mxu1 %v16086_v3  ;;  %v16121_v3 = vld [vmem:[%s22143_s3 + $0x854] ss:$24 sps:$4 sm:$0xff]  }
 0x496   : > { %6751 = vmatprep.subr.bf16.mxu1 %v16091_v26  ;;  %v16119_v26 = vld [vmem:[%s22143_s3 + $0x850] ss:$24 sps:$4 sm:$0xff]  }
 0x498   : > { %6739 = vmatmul.mubr.bf16.gmra.mrb[72].mxu1 %v17853_v24 }
 0x499   : > { %6752 = vmatpush1.bf16.msra.mxu1 %v16089_v60  ;;  %6779 = vmatprep.mubr.bf16.mxu1 %v18133_v33  ;;  %v6332_v22 = vpop.f32.mrb[56].mxu1  ;;  %v16124_v60 = vld [vmem:[%s22143_s3 + $0x884] ss:$24 sps:$4 sm:$0xff]  }
 0x49a   : > { %v20073_v59 = vadd.f32 %v6332_v22, %v19960_v15  ;;  %v9061_v42 = vpop.f32.mrb[60].mxu0  ;;  %v6334_v40 = vpop.f32.mrb[57].mxu1  ;;  %6753 = vmatprep.subr.bf16.mxu1 %v16094_v0  ;;  %v16122_v0 = vld [vmem:[%s22143_s3 + $0x880] ss:$24 sps:$4 sm:$0xff]   ;;  %v16127_v22 = vld [vmem:[%s22143_s3 + $0x8b4] ss:$24 sps:$4 sm:$0xff]  }
 0x49b   : > { %v20079_v24 = vadd.f32 %v9061_v42, %v19962_v5  ;;  %v20082_v33 = vadd.f32 %v6334_v40, %v19968_v14  ;;  %v9063_v16 = vpop.f32.mrb[61].mxu0  ;;  %v6336_v21 = vpop.f32.mrb[58].mxu1  ;;  %v16100_v5 = vld [vmem:[%s22143_s3 + $0x704] ss:$24 sps:$4 sm:$0xff]   ;;  %v16098_v14 = vld [vmem:[%s22143_s3 + $0x700] ss:$24 sps:$4 sm:$0xff]  }
 0x49c   : > { %v20085_v29 = vadd.f32 %v9063_v16, %v19970_v45  ;;  %v9065_v15 = vpop.f32.mrb[62].mxu0  ;;  %v6337_v12 = vpop.f32.mrb[59].mxu1  ;;  %v16103_v45 = vld [vmem:[%s22143_s3 + $0x734] ss:$24 sps:$4 sm:$0xff]   ;;  %v16130_v42 = vld [vmem:[%s22143_s3 + $0x8e4] ss:$24 sps:$4 sm:$0xff]  }
 0x49d   : > { %6754 = vmatpush1.bf16.msra.mxu1 %v16092_v18  ;;  %v9066_v19 = vpop.f32.mrb[63].mxu0  ;;  %v16125_v18 = vld [vmem:[%s22143_s3 + $0x8b0] ss:$24 sps:$4 sm:$0xff]   ;;  %v16128_v40 = vld [vmem:[%s22143_s3 + $0x8e0] ss:$24 sps:$4 sm:$0xff]  }
 0x49e   : > { %6755 = vmatprep.subr.bf16.mxu1 %v16097_v4  ;;  %v16133_v4 = vld [vmem:[%s22143_s3 + $0x914] ss:$24 sps:$4 sm:$0xff]   ;;  %v16131_v16 = vld [vmem:[%s22143_s3 + $0x910] ss:$24 sps:$4 sm:$0xff]   ;;  %v16136_v21 = vld [vmem:[%s22143_s3 + $0x944] ss:$24 sps:$4 sm:$0xff]  }
 0x49f   : > { %v16134_v15 = vld [vmem:[%s22143_s3 + $0x940] ss:$24 sps:$4 sm:$0xff]   ;;  %v16139_v12 = vld [vmem:[%s22143_s3 + $0x974] ss:$24 sps:$4 sm:$0xff]   ;;  %v16137_v19 = vld [vmem:[%s22143_s3 + $0x970] ss:$24 sps:$4 sm:$0xff]  }
 0x4a1   : > { %6756 = vmatpush1.bf16.msra.mxu1 %v16095_v47 }
 0x4a2   : > { %6757 = vmatprep.subr.bf16.mxu1 %v16100_v5  ;;  %v16145_v5 = vld [vmem:[%s22143_s3 + $0x1384] ss:$24 sps:$4 sm:$0xff]  }
 0x4a5   : > { %6758 = vmatpush1.bf16.msra.mxu1 %v16098_v14 }
 0x4a6   : > { %6759 = vmatprep.subr.bf16.mxu1 %v16103_v45 }
 0x4a9   : > { %6760 = vmatpush1.bf16.msra.mxu1 %v16101_v1 }
 0x4aa   : > { %6761 = vmatprep.subr.bf16.mxu1 %v16106_v9 }
 0x4ad   : > { %6762 = vmatpush1.bf16.msra.mxu1 %v16104_v63 }
 0x4ae   : > { %6763 = vmatprep.subr.bf16.mxu1 %v16109_v13 }
 0x4b1   : > { %6764 = vmatpush1.bf16.msra.mxu1 %v16107_v46 }
 0x4b2   : > { %6765 = vmatprep.subr.bf16.mxu1 %v16112_v30 }
 0x4b5   : > { %6766 = vmatpush1.bf16.msra.mxu1 %v16110_v39 }
 0x4b6   : > { %6767 = vmatprep.subr.bf16.mxu1 %v16115_v25  ;;  %v16143_v25 = vld [vmem:[%s22143_s3 + $0x1380] ss:$24 sps:$4 sm:$0xff]  }
 0x4b9   : > { %6768 = vmatpush1.bf16.msra.mxu1 %v16113_v31 }
 0x4ba   : > { %6769 = vmatprep.subr.bf16.mxu1 %v16118_v23 }
 0x4bd   : > { %6770 = vmatpush1.bf16.msra.mxu1 %v16116_v32  ;;  %v16151_v32 = vld [vmem:[%s22143_s3 + $0x13e4] ss:$24 sps:$4 sm:$0xff]  }
 0x4be   : > { %6771 = vmatprep.subr.bf16.mxu1 %v16121_v3 }
 0x4c1   : > { %6772 = vmatpush1.bf16.msra.mxu1 %v16119_v26 }
 0x4c2   : > { %6773 = vmatprep.subr.bf16.mxu1 %v16124_v60 }
 0x4c5   : > { %6774 = vmatpush1.bf16.msra.mxu1 %v16122_v0 }
 0x4c6   : > { %6775 = vmatprep.subr.bf16.mxu1 %v16127_v22  ;;  %v16154_v22 = vld [vmem:[%s22143_s3 + $0x1414] ss:$24 sps:$4 sm:$0xff]  }
 0x4c9   : > { %6776 = vmatpush1.bf16.msra.mxu1 %v16125_v18 }
 0x4ca   : > { %6777 = vmatprep.subr.bf16.mxu1 %v16130_v42 }
 0x4cd   : > { %6778 = vmatpush1.bf16.msra.mxu1 %v16128_v40 }
 0x4ce   : > { %6798 = vmatprep.subr.bf16.mxu1 %v16133_v4 }
 0x4d0   : > { %6780 = vmatmul.mubr.bf16.vlgmr.msra.gmra.mrb[32].mxu1 %v17884_v38  ;;  %v16142_v38 = vld [vmem:[%s22143_s3 + $0x9a4] ss:$24 sps:$4 sm:$0xff]  }
 0x4d1   : > { %6789 = vmatprep.mubr.bf16.mxu1 %v18116_v27  ;;  %6799 = vmatpush1.bf16.msra.mxu1 %v16131_v16  ;;  %v16140_v27 = vld [vmem:[%s22143_s3 + $0x9a0] ss:$24 sps:$4 sm:$0xff]  }
 0x4d2   : > { %6800 = vmatprep.subr.bf16.mxu1 %v16136_v21  ;;  %v16152_v21 = vld [vmem:[%s22143_s3 + $0x1410] ss:$24 sps:$4 sm:$0xff]  }
 0x4d5   : > { %6801 = vmatpush1.bf16.msra.mxu1 %v16134_v15 }
 0x4d6   : > { %6802 = vmatprep.subr.bf16.mxu1 %v16139_v12  ;;  %v16157_v12 = vld [vmem:[%s22143_s3 + $0x1444] ss:$24 sps:$4 sm:$0xff]  }
 0x4d8   : > { %6790 = vmatmul.mubr.bf16.gmra.mrb[76].mxu1 %v17924_v61 }
 0x4d9   : > { %6803 = vmatpush1.bf16.msra.mxu1 %v16137_v19  ;;  %6830 = vmatprep.mubr.bf16.mxu1 %v16960_v2 }
 0x4da   : > { %v6383_v47 = vpop.f32.mrb[60].mxu1  ;;  %6804 = vmatprep.subr.bf16.mxu1 %v16142_v38 }
 0x4db   : > { %v6384_v14 = vadd.f32 %v6383_v47, %v20073_v59  ;;  %v9112_v45 = vpop.f32.mrb[64].mxu0  ;;  %v6385_v1 = vpop.f32.mrb[61].mxu1  ;;  %v9392_v59 = vld [vmem:[%s22144_s4] sm:$0x3f] }
 0x4dc   : > { %v9113_v9 = vadd.f32 %v9112_v45, %v20079_v24  ;;  %v6386_v61 = vadd.f32 %v6385_v1, %v20082_v33  ;;  %v9114_v63 = vpop.f32.mrb[65].mxu0  ;;  %v6387_v13 = vpop.f32.mrb[62].mxu1  ;;  %v16148_v24 = vld [vmem:[%s22143_s3 + $0x13b4] ss:$24 sps:$4 sm:$0xff]   ;;  %v9405_v33 = vrot.slane %v9392_v59, %v1409_v53  ;;  %v9409_v23 = vrot.slane %v9392_v59, %v1413_v54  ;;  %v16149_v53 = vld [vmem:[%s22143_s3 + $0x13e0] ss:$24 sps:$4 sm:$0xff]  }
 0x4dd   : > { %v9115_v46 = vadd.f32 %v9114_v63, %v20085_v29  ;;  %6805 = vmatpush1.bf16.msra.mxu1 %v16140_v27  ;;  %v9116_v30 = vpop.f32.mrb[66].mxu0  ;;  %v6388_v39 = vpop.f32.mrb[63].mxu1  ;;  %v16146_v29 = vld [vmem:[%s22143_s3 + $0x13b0] ss:$24 sps:$4 sm:$0xff]  }
 0x4de   : > { %v9117_v31 = vpop.f32.mrb[67].mxu0  ;;  %8762 = vmatprep.subr.bf16.mxu1 %v16145_v5 }
 0x4e0   : > { %13371 = vmatmul.mubr.msk.bf16.vlgmr.msra.gmra.mrb[32].mxu1 %vm4052_vm6, %v17937_v43 }
 0x4e1   : > { %8763 = vmatpush1.bf16.msra.mxu1 %v16143_v25  ;;  %6840 = vmatprep.mubr.bf16.mxu1 %v16960_v2  ;;  %v16155_v25 = vld [vmem:[%s22143_s3 + $0x1440] ss:$24 sps:$4 sm:$0xff]  }
 0x4e2   : > { %8764 = vmatprep.subr.bf16.mxu1 %v16148_v24 }
 0x4e4   : > { %v9153_v3 = vpop.f32.mrb[20].mxu0 }
 0x4e5   : > { %v9426_v43 = vadd.f32 %v9405_v33, %v9153_v3  ;;  %v9155_v26 = vpop.f32.mrb[21].mxu0  ;;  %8765 = vmatpush1.bf16.msra.mxu1 %v16146_v29 }
 0x4e6   : > { %v9427_v60 = vadd.f32 %v9409_v23, %v9155_v26  ;;  %v9157_v0 = vpop.f32.mrb[22].mxu0  ;;  %8766 = vmatprep.subr.bf16.mxu1 %v16151_v32 }
 0x4e7   : > { %v9444_v54 = vmax.f32 %v9426_v43, 0.0  ;;  %v9432_v18 = vadd.f32 %v9405_v33, %v9157_v0  ;;  %v9159_v42 = vpop.f32.mrb[23].mxu0  ;;  %v16163_v0 = vld [vmem:[%s22143_s3 + $0x14a4] ss:$24 sps:$4 sm:$0xff]  }
 0x4e8   : > { %v9445_v40 = vmax.f32 %v9427_v60, 0.0  ;;  %v9433_v4 = vadd.f32 %v9409_v23, %v9159_v42  ;;  %13372 = vmatmul.mubr.msk.bf16.gmra.mrb[80].mxu1 %vm4052_vm6, %v17941_v44 }
 0x4e9   : > { %v9450_v16 = vmax.f32 %v9432_v18, 0.0  ;;  %8767 = vmatpush1.bf16.msra.mxu1 %v16149_v53  ;;  %8794 = vmatprep.mubr.bf16.mxu1 %v19133_v48  ;;  %v9484_v19 = vrot.slane %v9444_v54, 2 }
 0x4ea   : > { %v9451_v15 = vmax.f32 %v9433_v4, 0.0  ;;  %8768 = vmatprep.subr.bf16.mxu1 %v16154_v22  ;;  %v9487_v47 = vrot.slane %v9445_v40, 2 }
 0x4eb   : > { %v9485_v38 = vrot.slane %v9450_v16, 2  ;;  %v6434_v27 = vpop.f32.mrb[64].mxu1 }
 0x4ec   : > { %v9488_v5 = vrot.slane %v9451_v15, 2  ;;  %v20228_v44 = vadd.f32 %v6434_v27, %v6384_v14  ;;  %v9163_v45 = vpop.f32.mrb[68].mxu0  ;;  %v6436_v1 = vpop.f32.mrb[65].mxu1  ;;  %v16160_v14 = vld [vmem:[%s22143_s3 + $0x1474] ss:$24 sps:$4 sm:$0xff]  }
 0x4ed   : > { %v9164_v63 = vadd.f32 %v9163_v45, %v9113_v9  ;;  %v20230_v13 = vadd.f32 %v6436_v1, %v6386_v61  ;;  %v9165_v30 = vpop.f32.mrb[69].mxu0  ;;  %v6438_v39 = vpop.f32.mrb[66].mxu1  ;;  %8769 = vmatpush1.bf16.msra.mxu1 %v16152_v21  ;;  %v9486_v31 = vsel %vm520_vm0, %v9484_v19, %v9485_v38  ;;  %v16164_v21 = vld [vmem:[%s22143_s3 + $0x14d0] ss:$24 sps:$4 sm:$0xff]   ;;  %v16169_v19 = vld [vmem:[%s22143_s3 + $0x1504] ss:$24 sps:$4 sm:$0xff]  }
 0x4ee   : > { %v9166_v59 = vadd.f32 %v9165_v30, %v9115_v46  ;;  %v9167_v24 = vpop.f32.mrb[70].mxu0  ;;  %v6439_v29 = vpop.f32.mrb[67].mxu1  ;;  %8770 = vmatprep.subr.bf16.mxu1 %v16157_v12  ;;  %v20239_v9 = vmax.f32 %v9444_v54, %v9486_v31  ;;  %v9489_v61 = vsel %vm520_vm0, %v9487_v47, %v9488_v5  ;;  %v16158_v46 = vld [vmem:[%s22143_s3 + $0x1470] ss:$24 sps:$4 sm:$0xff]   ;;  %v16175_v27 = vld [vmem:[%s22143_s3 + $0x1564] ss:$24 sps:$4 sm:$0xff]  }
 0x4ef   : > { %v9388_v32 = vadd.f32 %v9164_v63, %v19856_v20  ;;  %v9168_v3 = vpop.f32.mrb[71].mxu0  ;;  %v20243_v43 = vmax.f32 %v9445_v40, %v9489_v61  ;;  %v16173_v47 = vld [vmem:[%s22143_s3 + $0x1560] ss:$24 sps:$4 sm:$0xff]   ;;  %v16176_v45 = vld [vmem:[%s22143_s3 + $0x1590] ss:$24 sps:$4 sm:$0xff]  }
 0x4f0   : > { %v9389_v26 = vadd.f32 %v9166_v59, %v19863_v52  ;;  %v16161_v52 = vld [vmem:[%s22143_s3 + $0x14a0] ss:$24 sps:$4 sm:$0xff]   ;;  %v16181_v1 = vld [vmem:[%s22143_s3 + $0x15c4] ss:$24 sps:$4 sm:$0xff]   ;;  %v16184_v30 = vld [vmem:[%s22143_s3 + $0x15f4] ss:$24 sps:$4 sm:$0xff]  }
 0x4f1   : > { %v9438_v53 = vadd.f32 %v9405_v33, %v9388_v32  ;;  %8771 = vmatpush1.bf16.msra.mxu1 %v16155_v25  ;;  %v16179_v63 = vld [vmem:[%s22143_s3 + $0x15c0] ss:$24 sps:$4 sm:$0xff]   ;;  %v16182_v39 = vld [vmem:[%s22143_s3 + $0x15f0] ss:$24 sps:$4 sm:$0xff]   ;;  %v16187_v25 = vld [vmem:[%s22143_s3 + $0x1624] ss:$24 sps:$4 sm:$0xff]  }
 0x4f2   : > { %v20249_v60 = vadd.f32 %v9409_v23, %v9389_v26  ;;  %8772 = vmatprep.subr.bf16.mxu1 %v16160_v14  ;;  %v16166_v23 = vld [vmem:[%s22143_s3 + $0x14d4] ss:$24 sps:$4 sm:$0xff]   ;;  %v16185_v31 = vld [vmem:[%s22143_s3 + $0x1620] ss:$24 sps:$4 sm:$0xff]   ;;  %v16188_v24 = vld [vmem:[%s22143_s3 + $0x1650] ss:$24 sps:$4 sm:$0xff]  }
 0x4f3   : > { %v9456_v22 = vmax.f32 %v9438_v53, 0.0  ;;  %v16190_v59 = vld [vmem:[%s22143_s3 + $0x1654] ss:$24 sps:$4 sm:$0xff]   ;;  %v16193_v29 = vld [vmem:[%s22143_s3 + $0x1684] ss:$24 sps:$4 sm:$0xff]  }
 0x4f4   : > { %v9457_v20 = vmax.f32 %v20249_v60, 0.0  ;;  %v16191_v14 = vld [vmem:[%s22143_s3 + $0x1680] ss:$24 sps:$4 sm:$0xff]   ;;  %v16196_v61 = vld [vmem:[%s22143_s3 + $0x16b4] ss:$24 sps:$4 sm:$0xff]  }
 0x4f5   : > { %v9500_v54 = vrot.slane %v9456_v22, 2  ;;  %8773 = vmatpush1.bf16.msra.mxu1 %v16158_v46  ;;  %v16194_v32 = vld [vmem:[%s22143_s3 + $0x16b0] ss:$24 sps:$4 sm:$0xff]   ;;  %v16199_v3 = vld [vmem:[%s22143_s3 + $0x16e4] ss:$24 sps:$4 sm:$0xff]  }
 0x4f6   : > { %v20260_v33 = vrot.slane %v9457_v20, 2  ;;  %8774 = vmatprep.subr.bf16.mxu1 %v16163_v0  ;;  %v16197_v26 = vld [vmem:[%s22143_s3 + $0x16e0] ss:$24 sps:$4 sm:$0xff]   ;;  %v16202_v53 = vld [vmem:[%s22143_s3 + $0x1714] ss:$24 sps:$4 sm:$0xff]  }
 0x4f7   : > { %v9501_v18 = vsel %vm520_vm0, %v9485_v38, %v9500_v54  ;;  %v20266_v42 = vmax.f32 %v9456_v22, %v9500_v54  ;;  %v16172_v38 = vld [vmem:[%s22143_s3 + $0x1534] ss:$24 sps:$4 sm:$0xff]   ;;  %v16200_v46 = vld [vmem:[%s22143_s3 + $0x1710] ss:$24 sps:$4 sm:$0xff]   ;;  %v16205_v0 = vld [vmem:[%s22143_s3 + $0x1744] ss:$24 sps:$4 sm:$0xff]  }
 0x4f8   : > { %v20268_v40 = vmax.f32 %v9450_v16, %v9501_v18  ;;  %v9503_v4 = vsel %vm520_vm0, %v9488_v5, %v20260_v33  ;;  %v16167_v16 = vld [vmem:[%s22143_s3 + $0x1500] ss:$24 sps:$4 sm:$0xff]   ;;  %v16178_v5 = vld [vmem:[%s22143_s3 + $0x1594] ss:$24 sps:$4 sm:$0xff]  }
 0x4f9   : > { %8775 = vmatpush1.bf16.msra.mxu1 %v16161_v52  ;;  %v20275_v12 = vmax.f32 %v9451_v15, %v9503_v4  ;;  %v16170_v15 = vld [vmem:[%s22143_s3 + $0x1530] ss:$24 sps:$4 sm:$0xff]   ;;  %v16203_v4 = vld [vmem:[%s22143_s3 + $0x1740] ss:$24 sps:$4 sm:$0xff]  }
 0x4fa   : > { %8776 = vmatprep.subr.bf16.mxu1 %v16166_v23 }
 0x4fd   : > { %8777 = vmatpush1.bf16.msra.mxu1 %v16164_v21 }
 0x4fe   : > { %8778 = vmatprep.subr.bf16.mxu1 %v16169_v19  ;;  %v16208_v19 = vld [vmem:[%s22143_s3 + $0x1774] ss:$24 sps:$4 sm:$0xff]  }
 0x501   : > { %8779 = vmatpush1.bf16.msra.mxu1 %v16167_v16  ;;  %v16209_v16 = vld [vmem:[%s22143_s3 + $0x17a0] ss:$24 sps:$4 sm:$0xff]  }
 0x502   : > { %8780 = vmatprep.subr.bf16.mxu1 %v16172_v38  ;;  %v16214_v38 = vld [vmem:[%s22143_s3 + $0x17d4] ss:$24 sps:$4 sm:$0xff]  }
 0x505   : > { %8781 = vmatpush1.bf16.msra.mxu1 %v16170_v15  ;;  %v16212_v15 = vld [vmem:[%s22143_s3 + $0x17d0] ss:$24 sps:$4 sm:$0xff]  }
 0x506   : > { %8782 = vmatprep.subr.bf16.mxu1 %v16175_v27  ;;  %v16217_v27 = vld [vmem:[%s22143_s3 + $0x1804] ss:$24 sps:$4 sm:$0xff]  }
 0x509   : > { %8783 = vmatpush1.bf16.msra.mxu1 %v16173_v47  ;;  %v16215_v47 = vld [vmem:[%s22143_s3 + $0x1800] ss:$24 sps:$4 sm:$0xff]  }
 0x50a   : > { %8784 = vmatprep.subr.bf16.mxu1 %v16178_v5  ;;  %v16220_v5 = vld [vmem:[%s22143_s3 + $0x1834] ss:$24 sps:$4 sm:$0xff]  }
 0x50d   : > { %8785 = vmatpush1.bf16.msra.mxu1 %v16176_v45  ;;  %v16218_v45 = vld [vmem:[%s22143_s3 + $0x1830] ss:$24 sps:$4 sm:$0xff]  }
 0x50e   : > { %8786 = vmatprep.subr.bf16.mxu1 %v16181_v1  ;;  %v16223_v1 = vld [vmem:[%s22143_s3 + $0x1864] ss:$24 sps:$4 sm:$0xff]  }
 0x511   : > { %8787 = vmatpush1.bf16.msra.mxu1 %v16179_v63  ;;  %v16221_v63 = vld [vmem:[%s22143_s3 + $0x1860] ss:$24 sps:$4 sm:$0xff]  }
 0x512   : > { %8788 = vmatprep.subr.bf16.mxu1 %v16184_v30  ;;  %v16226_v30 = vld [vmem:[%s22143_s3 + $0x1894] ss:$24 sps:$4 sm:$0xff]  }
 0x515   : > { %8789 = vmatpush1.bf16.msra.mxu1 %v16182_v39  ;;  %v16224_v39 = vld [vmem:[%s22143_s3 + $0x1890] ss:$24 sps:$4 sm:$0xff]  }
 0x516   : > { %8790 = vmatprep.subr.bf16.mxu1 %v16187_v25  ;;  %v16229_v25 = vld [vmem:[%s22143_s3 + $0x18c4] ss:$24 sps:$4 sm:$0xff]  }
 0x519   : > { %8791 = vmatpush1.bf16.msra.mxu1 %v16185_v31  ;;  %v16227_v31 = vld [vmem:[%s22143_s3 + $0x18c0] ss:$24 sps:$4 sm:$0xff]  }
 0x51a   : > { %8792 = vmatprep.subr.bf16.mxu1 %v16190_v59  ;;  %v16232_v59 = vld [vmem:[%s22143_s3 + $0x18f4] ss:$24 sps:$4 sm:$0xff]  }
 0x51d   : > { %8793 = vmatpush1.bf16.msra.mxu1 %v16188_v24  ;;  %v16230_v24 = vld [vmem:[%s22143_s3 + $0x18f0] ss:$24 sps:$4 sm:$0xff]  }
 0x51e   : > { %8813 = vmatprep.subr.bf16.mxu1 %v16193_v29  ;;  %v16235_v29 = vld [vmem:[%s22143_s3 + $0x1924] ss:$24 sps:$4 sm:$0xff]  }
 0x520   : > { %8795 = vmatmul.mubr.bf16.vlgmr.msra.gmra.mrb[12].mxu1 %v19311_v37 }
 0x521   : > { %8804 = vmatprep.mubr.bf16.mxu1 %v19112_v55  ;;  %8814 = vmatpush1.bf16.msra.mxu1 %v16191_v14  ;;  %v16233_v14 = vld [vmem:[%s22143_s3 + $0x1920] ss:$24 sps:$4 sm:$0xff]  }
 0x522   : > { %8815 = vmatprep.subr.bf16.mxu1 %v16196_v61  ;;  %v16238_v61 = vld [vmem:[%s22143_s3 + $0x1954] ss:$24 sps:$4 sm:$0xff]  }
 0x525   : > { %8816 = vmatpush1.bf16.msra.mxu1 %v16194_v32  ;;  %v16236_v32 = vld [vmem:[%s22143_s3 + $0x1950] ss:$24 sps:$4 sm:$0xff]  }
 0x526   : > { %8817 = vmatprep.subr.bf16.mxu1 %v16199_v3  ;;  %v16241_v3 = vld [vmem:[%s22143_s3 + $0x1984] ss:$24 sps:$4 sm:$0xff]  }
 0x528   : > { %8805 = vmatmul.mubr.bf16.gmra.mrb[84].mxu1 %v19296_v11 }
 0x529   : > { %8818 = vmatpush1.bf16.msra.mxu1 %v16197_v26  ;;  %8845 = vmatprep.mubr.bf16.mxu1 %v19354_v7  ;;  %v16239_v26 = vld [vmem:[%s22143_s3 + $0x1980] ss:$24 sps:$4 sm:$0xff]  }
 0x52a   : > { %8819 = vmatprep.subr.bf16.mxu1 %v16202_v53  ;;  %v16244_v53 = vld [vmem:[%s22143_s3 + $0x19b4] ss:$24 sps:$4 sm:$0xff]  }
 0x52b   : > { %v6689_v22 = vpop.f32.mrb[68].mxu1 }
 0x52c   : > { %v20357_v54 = vadd.f32 %v6689_v22, %v19850_v10  ;;  %v6691_v52 = vpop.f32.mrb[69].mxu1  ;;  %v16206_v10 = vld [vmem:[%s22143_s3 + $0x1770] ss:$24 sps:$4 sm:$0xff]   ;;  %v16245_v22 = vld [vmem:[%s22143_s3 + $0x19e0] ss:$24 sps:$4 sm:$0xff]  }
 0x52d   : > { %v20360_v23 = vadd.f32 %v6691_v52, %v19858_v58  ;;  %v6693_v18 = vpop.f32.mrb[70].mxu1  ;;  %8820 = vmatpush1.bf16.msra.mxu1 %v16200_v46  ;;  %v16211_v58 = vld [vmem:[%s22143_s3 + $0x17a4] ss:$24 sps:$4 sm:$0xff]   ;;  %v16242_v46 = vld [vmem:[%s22143_s3 + $0x19b0] ss:$24 sps:$4 sm:$0xff]  }
 0x52e   : > { %v6694_v21 = vpop.f32.mrb[71].mxu1  ;;  %8821 = vmatprep.subr.bf16.mxu1 %v16205_v0  ;;  %v16247_v0 = vld [vmem:[%s22143_s3 + $0x19e4] ss:$24 sps:$4 sm:$0xff]   ;;  %v16250_v52 = vld [vmem:[%s22143_s3 + $0x1a14] ss:$24 sps:$4 sm:$0xff]  }
 0x52f   : > { %v16248_v18 = vld [vmem:[%s22143_s3 + $0x1a10] ss:$24 sps:$4 sm:$0xff]  }
 0x531   : > { %8822 = vmatpush1.bf16.msra.mxu1 %v16203_v4  ;;  %v16253_v4 = vld [vmem:[%s22143_s3 + $0x1a44] ss:$24 sps:$4 sm:$0xff]  }
 0x532   : > { %8823 = vmatprep.subr.bf16.mxu1 %v16208_v19 }
 0x535   : > { %8824 = vmatpush1.bf16.msra.mxu1 %v16206_v10 }
 0x536   : > { %8825 = vmatprep.subr.bf16.mxu1 %v16211_v58 }
 0x539   : > { %8826 = vmatpush1.bf16.msra.mxu1 %v16209_v16 }
 0x53a   : > { %8827 = vmatprep.subr.bf16.mxu1 %v16214_v38  ;;  %v16251_v38 = vld [vmem:[%s22143_s3 + $0x1a40] ss:$24 sps:$4 sm:$0xff]  }
 0x53d   : > { %8828 = vmatpush1.bf16.msra.mxu1 %v16212_v15 }
 0x53e   : > { %8829 = vmatprep.subr.bf16.mxu1 %v16217_v27  ;;  %v16256_v27 = vld [vmem:[%s22143_s3 + $0x1a74] ss:$24 sps:$4 sm:$0xff]  }
 0x541   : > { %8830 = vmatpush1.bf16.msra.mxu1 %v16215_v47  ;;  %v16257_v47 = vld [vmem:[%s22143_s3 + $0x1aa0] ss:$24 sps:$4 sm:$0xff]  }
 0x542   : > { %8831 = vmatprep.subr.bf16.mxu1 %v16220_v5  ;;  %v16262_v5 = vld [vmem:[%s22143_s3 + $0x1ad4] ss:$24 sps:$4 sm:$0xff]  }
 0x545   : > { %8832 = vmatpush1.bf16.msra.mxu1 %v16218_v45  ;;  %v16260_v45 = vld [vmem:[%s22143_s3 + $0x1ad0] ss:$24 sps:$4 sm:$0xff]  }
 0x546   : > { %8833 = vmatprep.subr.bf16.mxu1 %v16223_v1  ;;  %v16265_v1 = vld [vmem:[%s22143_s3 + $0x1b04] ss:$24 sps:$4 sm:$0xff]  }
 0x549   : > { %8834 = vmatpush1.bf16.msra.mxu1 %v16221_v63  ;;  %v16263_v63 = vld [vmem:[%s22143_s3 + $0x1b00] ss:$24 sps:$4 sm:$0xff]  }
 0x54a   : > { %8835 = vmatprep.subr.bf16.mxu1 %v16226_v30  ;;  %v16268_v30 = vld [vmem:[%s22143_s3 + $0x1b34] ss:$24 sps:$4 sm:$0xff]  }
 0x54d   : > { %8836 = vmatpush1.bf16.msra.mxu1 %v16224_v39  ;;  %v16266_v39 = vld [vmem:[%s22143_s3 + $0x1b30] ss:$24 sps:$4 sm:$0xff]  }
 0x54e   : > { %8837 = vmatprep.subr.bf16.mxu1 %v16229_v25  ;;  %v16271_v25 = vld [vmem:[%s22143_s3 + $0x1b64] ss:$24 sps:$4 sm:$0xff]  }
 0x551   : > { %8838 = vmatpush1.bf16.msra.mxu1 %v16227_v31  ;;  %v16269_v31 = vld [vmem:[%s22143_s3 + $0x1b60] ss:$24 sps:$4 sm:$0xff]  }
 0x552   : > { %8839 = vmatprep.subr.bf16.mxu1 %v16232_v59  ;;  %v16274_v59 = vld [vmem:[%s22143_s3 + $0x1b94] ss:$24 sps:$4 sm:$0xff]  }
 0x555   : > { %8840 = vmatpush1.bf16.msra.mxu1 %v16230_v24  ;;  %v16272_v24 = vld [vmem:[%s22143_s3 + $0x1b90] ss:$24 sps:$4 sm:$0xff]  }
 0x556   : > { %8841 = vmatprep.subr.bf16.mxu1 %v16235_v29  ;;  %v16277_v29 = vld [vmem:[%s22143_s3 + $0x1bc4] ss:$24 sps:$4 sm:$0xff]  }
 0x559   : > { %8842 = vmatpush1.bf16.msra.mxu1 %v16233_v14  ;;  %v16275_v14 = vld [vmem:[%s22143_s3 + $0x1bc0] ss:$24 sps:$4 sm:$0xff]  }
 0x55a   : > { %8843 = vmatprep.subr.bf16.mxu1 %v16238_v61  ;;  %v16280_v61 = vld [vmem:[%s22143_s3 + $0x1bf4] ss:$24 sps:$4 sm:$0xff]  }
 0x55d   : > { %8844 = vmatpush1.bf16.msra.mxu1 %v16236_v32  ;;  %v16278_v32 = vld [vmem:[%s22143_s3 + $0x1bf0] ss:$24 sps:$4 sm:$0xff]  }
 0x55e   : > { %8864 = vmatprep.subr.bf16.mxu1 %v16241_v3  ;;  %v16283_v3 = vld [vmem:[%s22143_s3 + $0x1c24] ss:$24 sps:$4 sm:$0xff]  }
 0x560   : > { %8846 = vmatmul.mubr.bf16.vlgmr.msra.gmra.mrb[12].mxu1 %v19537_v28 }
 0x561   : > { %8855 = vmatprep.mubr.bf16.mxu1 %v19332_v36  ;;  %8865 = vmatpush1.bf16.msra.mxu1 %v16239_v26  ;;  %v16281_v26 = vld [vmem:[%s22143_s3 + $0x1c20] ss:$24 sps:$4 sm:$0xff]  }
 0x562   : > { %8866 = vmatprep.subr.bf16.mxu1 %v16244_v53  ;;  %v16286_v53 = vld [vmem:[%s22143_s3 + $0x1c54] ss:$24 sps:$4 sm:$0xff]  }
 0x565   : > { %8867 = vmatpush1.bf16.msra.mxu1 %v16242_v46  ;;  %v16284_v46 = vld [vmem:[%s22143_s3 + $0x1c50] ss:$24 sps:$4 sm:$0xff]  }
 0x566   : > { %8868 = vmatprep.subr.bf16.mxu1 %v16247_v0  ;;  %v16289_v0 = vld [vmem:[%s22143_s3 + $0x1c84] ss:$24 sps:$4 sm:$0xff]  }
 0x568   : > { %8856 = vmatmul.mubr.bf16.gmra.mrb[88].mxu1 %v19522_v57 }
 0x569   : > { %8869 = vmatpush1.bf16.msra.mxu1 %v16245_v22  ;;  %8896 = vmatprep.mubr.bf16.mxu1 %v19578_v17  ;;  %v16287_v22 = vld [vmem:[%s22143_s3 + $0x1c80] ss:$24 sps:$4 sm:$0xff]  }
 0x56a   : > { %8870 = vmatprep.subr.bf16.mxu1 %v16250_v52  ;;  %v16292_v52 = vld [vmem:[%s22143_s3 + $0x1cb4] ss:$24 sps:$4 sm:$0xff]  }
 0x56b   : > { %v6740_v21 = vpop.f32.mrb[72].mxu1 }
 0x56c   : > { %v20463_v19 = vadd.f32 %v6740_v21, %v20357_v54  ;;  %v6742_v10 = vpop.f32.mrb[73].mxu1  ;;  %v16254_v54 = vld [vmem:[%s22143_s3 + $0x1a70] ss:$24 sps:$4 sm:$0xff]   ;;  %v16293_v21 = vld [vmem:[%s22143_s3 + $0x1ce0] ss:$24 sps:$4 sm:$0xff]  }
 0x56d   : > { %v20466_v58 = vadd.f32 %v6742_v10, %v20360_v23  ;;  %v6744_v16 = vpop.f32.mrb[74].mxu1  ;;  %8871 = vmatpush1.bf16.msra.mxu1 %v16248_v18  ;;  %v16259_v23 = vld [vmem:[%s22143_s3 + $0x1aa4] ss:$24 sps:$4 sm:$0xff]   ;;  %v16290_v18 = vld [vmem:[%s22143_s3 + $0x1cb0] ss:$24 sps:$4 sm:$0xff]  }
 0x56e   : > { %v6745_v15 = vpop.f32.mrb[75].mxu1  ;;  %8872 = vmatprep.subr.bf16.mxu1 %v16253_v4  ;;  %v16295_v4 = vld [vmem:[%s22143_s3 + $0x1ce4] ss:$24 sps:$4 sm:$0xff]   ;;  %v16298_v10 = vld [vmem:[%s22143_s3 + $0x1d14] ss:$24 sps:$4 sm:$0xff]  }
 0x56f   : > { %v16296_v16 = vld [vmem:[%s22143_s3 + $0x1d10] ss:$24 sps:$4 sm:$0xff]  }
 0x571   : > { %8873 = vmatpush1.bf16.msra.mxu1 %v16251_v38  ;;  %v16301_v38 = vld [vmem:[%s22143_s3 + $0x1394] ss:$24 sps:$4 sm:$0xff]  }
 0x572   : > { %8874 = vmatprep.subr.bf16.mxu1 %v16256_v27 }
 0x575   : > { %8875 = vmatpush1.bf16.msra.mxu1 %v16254_v54 }
 0x576   : > { %8876 = vmatprep.subr.bf16.mxu1 %v16259_v23 }
 0x579   : > { %8877 = vmatpush1.bf16.msra.mxu1 %v16257_v47 }
 0x57a   : > { %8878 = vmatprep.subr.bf16.mxu1 %v16262_v5  ;;  %v16299_v5 = vld [vmem:[%s22143_s3 + $0x1390] ss:$24 sps:$4 sm:$0xff]  }
 0x57d   : > { %8879 = vmatpush1.bf16.msra.mxu1 %v16260_v45 }
 0x57e   : > { %8880 = vmatprep.subr.bf16.mxu1 %v16265_v1  ;;  %v16304_v1 = vld [vmem:[%s22143_s3 + $0x13c4] ss:$24 sps:$4 sm:$0xff]  }
 0x581   : > { %8881 = vmatpush1.bf16.msra.mxu1 %v16263_v63  ;;  %v16305_v63 = vld [vmem:[%s22143_s3 + $0x13f0] ss:$24 sps:$4 sm:$0xff]  }
 0x582   : > { %8882 = vmatprep.subr.bf16.mxu1 %v16268_v30  ;;  %v16310_v30 = vld [vmem:[%s22143_s3 + $0x1424] ss:$24 sps:$4 sm:$0xff]  }
 0x585   : > { %8883 = vmatpush1.bf16.msra.mxu1 %v16266_v39  ;;  %v16308_v39 = vld [vmem:[%s22143_s3 + $0x1420] ss:$24 sps:$4 sm:$0xff]  }
 0x586   : > { %8884 = vmatprep.subr.bf16.mxu1 %v16271_v25  ;;  %v16313_v25 = vld [vmem:[%s22143_s3 + $0x1454] ss:$24 sps:$4 sm:$0xff]  }
 0x589   : > { %8885 = vmatpush1.bf16.msra.mxu1 %v16269_v31 }
 0x58a   : > { %8886 = vmatprep.subr.bf16.mxu1 %v16274_v59 }
 0x58d   : > { %8887 = vmatpush1.bf16.msra.mxu1 %v16272_v24 }
 0x58e   : > { %8888 = vmatprep.subr.bf16.mxu1 %v16277_v29 }
 0x591   : > { %8889 = vmatpush1.bf16.msra.mxu1 %v16275_v14 }
 0x592   : > { %8890 = vmatprep.subr.bf16.mxu1 %v16280_v61 }
 0x595   : > { %8891 = vmatpush1.bf16.msra.mxu1 %v16278_v32  ;;  %v16316_v32 = vld [vmem:[%s22143_s3 + $0x1484] ss:$24 sps:$4 sm:$0xff]  }
 0x596   : > { %8892 = vmatprep.subr.bf16.mxu1 %v16283_v3  ;;  %v16314_v3 = vld [vmem:[%s22143_s3 + $0x1480] ss:$24 sps:$4 sm:$0xff]  }
 0x599   : > { %8893 = vmatpush1.bf16.msra.mxu1 %v16281_v26  ;;  %v16319_v26 = vld [vmem:[%s22143_s3 + $0x14b4] ss:$24 sps:$4 sm:$0xff]  }
 0x59a   : > { %8894 = vmatprep.subr.bf16.mxu1 %v16286_v53  ;;  %v16317_v53 = vld [vmem:[%s22143_s3 + $0x14b0] ss:$24 sps:$4 sm:$0xff]  }
 0x59d   : > { %8895 = vmatpush1.bf16.msra.mxu1 %v16284_v46  ;;  %v16322_v46 = vld [vmem:[%s22143_s3 + $0x14e4] ss:$24 sps:$4 sm:$0xff]  }
 0x59e   : > { %8915 = vmatprep.subr.bf16.mxu1 %v16289_v0  ;;  %v16320_v0 = vld [vmem:[%s22143_s3 + $0x14e0] ss:$24 sps:$4 sm:$0xff]  }
 0x5a0   : > { %8897 = vmatmul.mubr.bf16.vlgmr.msra.gmra.mrb[12].mxu1 %v19765_v51 }
 0x5a1   : > { %8906 = vmatprep.mubr.bf16.mxu1 %v19558_v35  ;;  %8916 = vmatpush1.bf16.msra.mxu1 %v16287_v22  ;;  %v16325_v22 = vld [vmem:[%s22143_s3 + $0x1514] ss:$24 sps:$4 sm:$0xff]  }
 0x5a2   : > { %8917 = vmatprep.subr.bf16.mxu1 %v16292_v52  ;;  %v16323_v52 = vld [vmem:[%s22143_s3 + $0x1510] ss:$24 sps:$4 sm:$0xff]  }
 0x5a5   : > { %8918 = vmatpush1.bf16.msra.mxu1 %v16290_v18  ;;  %v16328_v18 = vld [vmem:[%s22143_s3 + $0x1544] ss:$24 sps:$4 sm:$0xff]  }
 0x5a6   : > { %8919 = vmatprep.subr.bf16.mxu1 %v16295_v4  ;;  %v16326_v4 = vld [vmem:[%s22143_s3 + $0x1540] ss:$24 sps:$4 sm:$0xff]  }
 0x5a8   : > { %8907 = vmatmul.mubr.bf16.gmra.mrb[92].mxu1 %v19750_v50 }
 0x5a9   : > { %8920 = vmatpush1.bf16.msra.mxu1 %v16293_v21  ;;  %8947 = vmatprep.mubr.bf16.mxu1 %v16960_v2  ;;  %v16331_v21 = vld [vmem:[%s22143_s3 + $0x1574] ss:$24 sps:$4 sm:$0xff]  }
 0x5aa   : > { %8921 = vmatprep.subr.bf16.mxu1 %v16298_v10  ;;  %v16329_v10 = vld [vmem:[%s22143_s3 + $0x1570] ss:$24 sps:$4 sm:$0xff]  }
 0x5ab   : > { %v6791_v15 = vpop.f32.mrb[76].mxu1 }
 0x5ac   : > { %v6792_v27 = vadd.f32 %v6791_v15, %v20463_v19  ;;  %v6793_v54 = vpop.f32.mrb[77].mxu1  ;;  %v16302_v19 = vld [vmem:[%s22143_s3 + $0x13c0] ss:$24 sps:$4 sm:$0xff]   ;;  %v16337_v15 = vld [vmem:[%s22143_s3 + $0x15d4] ss:$24 sps:$4 sm:$0xff]  }
 0x5ad   : > { %v6794_v23 = vadd.f32 %v6793_v54, %v20466_v58  ;;  %v6795_v47 = vpop.f32.mrb[78].mxu1  ;;  %8922 = vmatpush1.bf16.msra.mxu1 %v16296_v16  ;;  %v16307_v58 = vld [vmem:[%s22143_s3 + $0x13f4] ss:$24 sps:$4 sm:$0xff]   ;;  %v16334_v16 = vld [vmem:[%s22143_s3 + $0x15a4] ss:$24 sps:$4 sm:$0xff]  }
 0x5ae   : > { %v6796_v45 = vpop.f32.mrb[79].mxu1  ;;  %9170 = vmatprep.subr.bf16.mxu1 %v16301_v38  ;;  %v16332_v38 = vld [vmem:[%s22143_s3 + $0x15a0] ss:$24 sps:$4 sm:$0xff]   ;;  %v16340_v54 = vld [vmem:[%s22143_s3 + $0x1604] ss:$24 sps:$4 sm:$0xff]  }
 0x5af   : > { %v16343_v47 = vld [vmem:[%s22143_s3 + $0x1634] ss:$24 sps:$4 sm:$0xff]   ;;  %v16346_v45 = vld [vmem:[%s22143_s3 + $0x1664] ss:$24 sps:$4 sm:$0xff]  }
 0x5b0   : > { %13997 = vmatmul.mubr.msk.bf16.vlgmr.msra.gmra.mrb[12].mxu1 %vm4052_vm6, %v19828_v34 }
 0x5b1   : > { %9171 = vmatpush1.bf16.msra.mxu1 %v16299_v5  ;;  %8957 = vmatprep.mubr.bf16.mxu1 %v16960_v2  ;;  %v16341_v5 = vld [vmem:[%s22143_s3 + $0x1630] ss:$24 sps:$4 sm:$0xff]  }
 0x5b2   : > { %9172 = vmatprep.subr.bf16.mxu1 %v16304_v1  ;;  %v16344_v1 = vld [vmem:[%s22143_s3 + $0x1660] ss:$24 sps:$4 sm:$0xff]  }
 0x5b5   : > { %9173 = vmatpush1.bf16.msra.mxu1 %v16302_v19  ;;  %v16349_v19 = vld [vmem:[%s22143_s3 + $0x1694] ss:$24 sps:$4 sm:$0xff]  }
 0x5b6   : > { %9174 = vmatprep.subr.bf16.mxu1 %v16307_v58  ;;  %v16347_v58 = vld [vmem:[%s22143_s3 + $0x1690] ss:$24 sps:$4 sm:$0xff]  }
 0x5b8   : > { %13998 = vmatmul.mubr.msk.bf16.gmra.mrb[96].mxu1 %vm4052_vm6, %v19815_v41 }
 0x5b9   : > { %9175 = vmatpush1.bf16.msra.mxu1 %v16305_v63  ;;  %9202 = vmatprep.mubr.bf16.mxu1 %v19133_v48  ;;  %v16311_v48 = vld [vmem:[%s22143_s3 + $0x1450] ss:$24 sps:$4 sm:$0xff]   ;;  %v16352_v63 = vld [vmem:[%s22143_s3 + $0x16c4] ss:$24 sps:$4 sm:$0xff]  }
 0x5ba   : > { %9176 = vmatprep.subr.bf16.mxu1 %v16310_v30  ;;  %v16350_v30 = vld [vmem:[%s22143_s3 + $0x16c0] ss:$24 sps:$4 sm:$0xff]  }
 0x5bb   : > { %v6842_v31 = vpop.f32.mrb[80].mxu1 }
 0x5bc   : > { %v20600_v59 = vadd.f32 %v6842_v31, %v6792_v27  ;;  %v6844_v24 = vpop.f32.mrb[81].mxu1  ;;  %v16335_v27 = vld [vmem:[%s22143_s3 + $0x15d0] ss:$24 sps:$4 sm:$0xff]   ;;  %v16361_v31 = vld [vmem:[%s22143_s3 + $0x1754] ss:$24 sps:$4 sm:$0xff]  }
 0x5bd   : > { %v20602_v29 = vadd.f32 %v6844_v24, %v6794_v23  ;;  %v6846_v14 = vpop.f32.mrb[82].mxu1  ;;  %9177 = vmatpush1.bf16.msra.mxu1 %v16308_v39  ;;  %v16338_v23 = vld [vmem:[%s22143_s3 + $0x1600] ss:$24 sps:$4 sm:$0xff]   ;;  %v16355_v39 = vld [vmem:[%s22143_s3 + $0x16f4] ss:$24 sps:$4 sm:$0xff]  }
 0x5be   : > { %v6847_v61 = vpop.f32.mrb[83].mxu1  ;;  %9178 = vmatprep.subr.bf16.mxu1 %v16313_v25  ;;  %v16353_v25 = vld [vmem:[%s22143_s3 + $0x16f0] ss:$24 sps:$4 sm:$0xff]  }
 0x5bf   : > { %v16364_v61 = vld [vmem:[%s22143_s3 + $0x1784] ss:$24 sps:$4 sm:$0xff]  }
 0x5c1   : > { %9179 = vmatpush1.bf16.msra.mxu1 %v16311_v48 }
 0x5c2   : > { %9180 = vmatprep.subr.bf16.mxu1 %v16316_v32  ;;  %v16362_v32 = vld [vmem:[%s22143_s3 + $0x1780] ss:$24 sps:$4 sm:$0xff]  }
 0x5c5   : > { %9181 = vmatpush1.bf16.msra.mxu1 %v16314_v3  ;;  %v16367_v3 = vld [vmem:[%s22143_s3 + $0x17b4] ss:$24 sps:$4 sm:$0xff]  }
 0x5c6   : > { %9182 = vmatprep.subr.bf16.mxu1 %v16319_v26  ;;  %v16365_v26 = vld [vmem:[%s22143_s3 + $0x17b0] ss:$24 sps:$4 sm:$0xff]  }
 0x5c9   : > { %9183 = vmatpush1.bf16.msra.mxu1 %v16317_v53  ;;  %v16370_v53 = vld [vmem:[%s22143_s3 + $0x17e4] ss:$24 sps:$4 sm:$0xff]  }
 0x5ca   : > { %9184 = vmatprep.subr.bf16.mxu1 %v16322_v46  ;;  %v16368_v46 = vld [vmem:[%s22143_s3 + $0x17e0] ss:$24 sps:$4 sm:$0xff]  }
 0x5cd   : > { %9185 = vmatpush1.bf16.msra.mxu1 %v16320_v0  ;;  %v16373_v0 = vld [vmem:[%s22143_s3 + $0x1814] ss:$24 sps:$4 sm:$0xff]  }
 0x5ce   : > { %9186 = vmatprep.subr.bf16.mxu1 %v16325_v22  ;;  %v16371_v22 = vld [vmem:[%s22143_s3 + $0x1810] ss:$24 sps:$4 sm:$0xff]  }
 0x5d1   : > { %9187 = vmatpush1.bf16.msra.mxu1 %v16323_v52  ;;  %v16376_v52 = vld [vmem:[%s22143_s3 + $0x1844] ss:$24 sps:$4 sm:$0xff]  }
 0x5d2   : > { %9188 = vmatprep.subr.bf16.mxu1 %v16328_v18  ;;  %v16374_v18 = vld [vmem:[%s22143_s3 + $0x1840] ss:$24 sps:$4 sm:$0xff]  }
 0x5d5   : > { %9189 = vmatpush1.bf16.msra.mxu1 %v16326_v4  ;;  %v16379_v4 = vld [vmem:[%s22143_s3 + $0x1874] ss:$24 sps:$4 sm:$0xff]  }
 0x5d6   : > { %9190 = vmatprep.subr.bf16.mxu1 %v16331_v21  ;;  %v16377_v21 = vld [vmem:[%s22143_s3 + $0x1870] ss:$24 sps:$4 sm:$0xff]  }
 0x5d9   : > { %9191 = vmatpush1.bf16.msra.mxu1 %v16329_v10  ;;  %v16382_v10 = vld [vmem:[%s22143_s3 + $0x18a4] ss:$24 sps:$4 sm:$0xff]  }
 0x5da   : > { %9192 = vmatprep.subr.bf16.mxu1 %v16334_v16  ;;  %v16380_v16 = vld [vmem:[%s22143_s3 + $0x18a0] ss:$24 sps:$4 sm:$0xff]  }
 0x5dd   : > { %9193 = vmatpush1.bf16.msra.mxu1 %v16332_v38  ;;  %v16385_v38 = vld [vmem:[%s22143_s3 + $0x18d4] ss:$24 sps:$4 sm:$0xff]  }
 0x5de   : > { %9194 = vmatprep.subr.bf16.mxu1 %v16337_v15  ;;  %v16383_v15 = vld [vmem:[%s22143_s3 + $0x18d0] ss:$24 sps:$4 sm:$0xff]  }
 0x5e1   : > { %9195 = vmatpush1.bf16.msra.mxu1 %v16335_v27  ;;  %v16388_v27 = vld [vmem:[%s22143_s3 + $0x1904] ss:$24 sps:$4 sm:$0xff]  }
 0x5e2   : > { %9196 = vmatprep.subr.bf16.mxu1 %v16340_v54  ;;  %v16386_v54 = vld [vmem:[%s22143_s3 + $0x1900] ss:$24 sps:$4 sm:$0xff]  }
 0x5e5   : > { %9197 = vmatpush1.bf16.msra.mxu1 %v16338_v23  ;;  %v16391_v23 = vld [vmem:[%s22143_s3 + $0x1934] ss:$24 sps:$4 sm:$0xff]  }
 0x5e6   : > { %9198 = vmatprep.subr.bf16.mxu1 %v16343_v47  ;;  %v16389_v47 = vld [vmem:[%s22143_s3 + $0x1930] ss:$24 sps:$4 sm:$0xff]  }
 0x5e9   : > { %9199 = vmatpush1.bf16.msra.mxu1 %v16341_v5  ;;  %v16394_v5 = vld [vmem:[%s22143_s3 + $0x1964] ss:$24 sps:$4 sm:$0xff]  }
 0x5ea   : > { %9200 = vmatprep.subr.bf16.mxu1 %v16346_v45  ;;  %v16392_v45 = vld [vmem:[%s22143_s3 + $0x1960] ss:$24 sps:$4 sm:$0xff]  }
 0x5ed   : > { %9201 = vmatpush1.bf16.msra.mxu1 %v16344_v1  ;;  %v16397_v1 = vld [vmem:[%s22143_s3 + $0x1994] ss:$24 sps:$4 sm:$0xff]  }
 0x5ee   : > { %9221 = vmatprep.subr.bf16.mxu1 %v16349_v19  ;;  %v16395_v19 = vld [vmem:[%s22143_s3 + $0x1990] ss:$24 sps:$4 sm:$0xff]  }
 0x5f0   : > { %9203 = vmatmul.mubr.bf16.vlgmr.msra.gmra.mrb[32].mxu1 %v19311_v37  ;;  %v16356_v37 = vld [vmem:[%s22143_s3 + $0x1720] ss:$24 sps:$4 sm:$0xff]  }
 0x5f1   : > { %9212 = vmatprep.mubr.bf16.mxu1 %v19112_v55  ;;  %9222 = vmatpush1.bf16.msra.mxu1 %v16347_v58  ;;  %v16358_v55 = vld [vmem:[%s22143_s3 + $0x1724] ss:$24 sps:$4 sm:$0xff]  }
 0x5f2   : > { %9223 = vmatprep.subr.bf16.mxu1 %v16352_v63  ;;  %v16400_v58 = vld [vmem:[%s22143_s3 + $0x19c4] ss:$24 sps:$4 sm:$0xff]   ;;  %v16398_v63 = vld [vmem:[%s22143_s3 + $0x19c0] ss:$24 sps:$4 sm:$0xff]  }
 0x5f5   : > { %9224 = vmatpush1.bf16.msra.mxu1 %v16350_v30  ;;  %v16403_v30 = vld [vmem:[%s22143_s3 + $0x19f4] ss:$24 sps:$4 sm:$0xff]  }
 0x5f6   : > { %9225 = vmatprep.subr.bf16.mxu1 %v16355_v39  ;;  %v16401_v39 = vld [vmem:[%s22143_s3 + $0x19f0] ss:$24 sps:$4 sm:$0xff]  }
 0x5f8   : > { %9213 = vmatmul.mubr.bf16.gmra.mrb[100].mxu1 %v19296_v11  ;;  %v16359_v11 = vld [vmem:[%s22143_s3 + $0x1750] ss:$24 sps:$4 sm:$0xff]  }
 0x5f9   : > { %9226 = vmatpush1.bf16.msra.mxu1 %v16353_v25  ;;  %9253 = vmatprep.mubr.bf16.mxu1 %v19354_v7  ;;  %v16409_v25 = vld [vmem:[%s22143_s3 + $0x1a54] ss:$24 sps:$4 sm:$0xff]  }
 0x5fa   : > { %9227 = vmatprep.subr.bf16.mxu1 %v16358_v55 }
 0x5fb   : > { %v20704_v24 = vpop.f32.mrb[84].mxu1 }
 0x5fc   : > { %v20706_v14 = vpop.f32.mrb[85].mxu1 }
 0x5fd   : > { %v8810_v48 = vpop.f32.mrb[86].mxu1  ;;  %9228 = vmatpush1.bf16.msra.mxu1 %v16356_v37 }
 0x5fe   : > { %v8811_v7 = vpop.f32.mrb[87].mxu1  ;;  %9229 = vmatprep.subr.bf16.mxu1 %v16361_v31 }
 0x5ff   : > { %v16412_v7 = vld [vmem:[%s22143_s3 + $0x1a84] ss:$24 sps:$4 sm:$0xff]  }
 0x601   : > { %9230 = vmatpush1.bf16.msra.mxu1 %v16359_v11 }
 0x602   : > { %9231 = vmatprep.subr.bf16.mxu1 %v16364_v61  ;;  %v16413_v61 = vld [vmem:[%s22143_s3 + $0x1ab0] ss:$24 sps:$4 sm:$0xff]  }
 0x605   : > { %9232 = vmatpush1.bf16.msra.mxu1 %v16362_v32  ;;  %v16418_v32 = vld [vmem:[%s22143_s3 + $0x1ae4] ss:$24 sps:$4 sm:$0xff]  }
 0x606   : > { %9233 = vmatprep.subr.bf16.mxu1 %v16367_v3  ;;  %v16416_v3 = vld [vmem:[%s22143_s3 + $0x1ae0] ss:$24 sps:$4 sm:$0xff]  }
 0x609   : > { %9234 = vmatpush1.bf16.msra.mxu1 %v16365_v26  ;;  %v16421_v26 = vld [vmem:[%s22143_s3 + $0x1b14] ss:$24 sps:$4 sm:$0xff]  }
 0x60a   : > { %9235 = vmatprep.subr.bf16.mxu1 %v16370_v53  ;;  %v16419_v53 = vld [vmem:[%s22143_s3 + $0x1b10] ss:$24 sps:$4 sm:$0xff]  }
 0x60d   : > { %9236 = vmatpush1.bf16.msra.mxu1 %v16368_v46  ;;  %v16424_v46 = vld [vmem:[%s22143_s3 + $0x1b44] ss:$24 sps:$4 sm:$0xff]  }
 0x60e   : > { %9237 = vmatprep.subr.bf16.mxu1 %v16373_v0  ;;  %v16455_v0 = vld [vmem:[%s22145_s5 + $0x2c0] ss:$8 sps:$4 sm:$0xff]  }
 0x611   : > { %9238 = vmatpush1.bf16.msra.mxu1 %v16371_v22  ;;  %v16457_v22 = vld [vmem:[%s22145_s5 + $0x2c4] ss:$8 sps:$4 sm:$0xff]  }
 0x612   : > { %9239 = vmatprep.subr.bf16.mxu1 %v16376_v52  ;;  %v16460_v52 = vld [vmem:[%s22145_s5 + $0x2d4] ss:$8 sps:$4 sm:$0xff]   ;;  %10295 = vmatprep.subr.bf16.mxu0 %v16457_v22  ;;  %v16452_v22 = vld [vmem:[%s22143_s3 + $0x1d20] ss:$24 sps:$4 sm:$0xff]  }
 0x613   : > { %10296 = vmatpush1.bf16.msra.mxu0 %v16455_v0  ;;  %v16485_v0 = vld [vmem:[%s22145_s5 + $0x360] ss:$8 sps:$4 sm:$0xff]  }
 0x614   : > { %10297 = vmatprep.subr.bf16.mxu0 %v16460_v52 }
 0x615   : > { %9240 = vmatpush1.bf16.msra.mxu1 %v16374_v18  ;;  %v16422_v18 = vld [vmem:[%s22143_s3 + $0x1b40] ss:$24 sps:$4 sm:$0xff]  }
 0x616   : > { %9241 = vmatprep.subr.bf16.mxu1 %v16379_v4  ;;  %v16458_v4 = vld [vmem:[%s22145_s5 + $0x2d0] ss:$8 sps:$4 sm:$0xff]  }
 0x617   : > { %10298 = vmatpush1.bf16.msra.mxu0 %v16458_v4 }
 0x619   : > { %9242 = vmatpush1.bf16.msra.mxu1 %v16377_v21  ;;  %v16427_v21 = vld [vmem:[%s22143_s3 + $0x1b74] ss:$24 sps:$4 sm:$0xff]  }
 0x61a   : > { %9243 = vmatprep.subr.bf16.mxu1 %v16382_v10  ;;  %v16463_v10 = vld [vmem:[%s22145_s5 + $0x2e4] ss:$8 sps:$4 sm:$0xff]  }
 0x61b   : > { %10299 = vmatprep.subr.bf16.mxu0 %v16463_v10 }
 0x61d   : > { %9244 = vmatpush1.bf16.msra.mxu1 %v16380_v16  ;;  %v16425_v16 = vld [vmem:[%s22143_s3 + $0x1b70] ss:$24 sps:$4 sm:$0xff]  }
 0x61e   : > { %9245 = vmatprep.subr.bf16.mxu1 %v16385_v38  ;;  %v16461_v38 = vld [vmem:[%s22145_s5 + $0x2e0] ss:$8 sps:$4 sm:$0xff]  }
 0x61f   : > { %10300 = vmatpush1.bf16.msra.mxu0 %v16461_v38 }
 0x621   : > { %9246 = vmatpush1.bf16.msra.mxu1 %v16383_v15  ;;  %v16430_v15 = vld [vmem:[%s22143_s3 + $0x1ba4] ss:$24 sps:$4 sm:$0xff]  }
 0x622   : > { %9247 = vmatprep.subr.bf16.mxu1 %v16388_v27  ;;  %v16466_v27 = vld [vmem:[%s22145_s5 + $0x2f4] ss:$8 sps:$4 sm:$0xff]  }
 0x623   : > { %10301 = vmatprep.subr.bf16.mxu0 %v16466_v27 }
 0x625   : > { %9248 = vmatpush1.bf16.msra.mxu1 %v16386_v54  ;;  %v16428_v54 = vld [vmem:[%s22143_s3 + $0x1ba0] ss:$24 sps:$4 sm:$0xff]  }
 0x626   : > { %9249 = vmatprep.subr.bf16.mxu1 %v16391_v23  ;;  %v16464_v23 = vld [vmem:[%s22145_s5 + $0x2f0] ss:$8 sps:$4 sm:$0xff]  }
 0x627   : > { %10302 = vmatpush1.bf16.msra.mxu0 %v16464_v23 }
 0x629   : > { %9250 = vmatpush1.bf16.msra.mxu1 %v16389_v47  ;;  %v16433_v47 = vld [vmem:[%s22143_s3 + $0x1bd4] ss:$24 sps:$4 sm:$0xff]  }
 0x62a   : > { %9251 = vmatprep.subr.bf16.mxu1 %v16394_v5  ;;  %v16469_v5 = vld [vmem:[%s22145_s5 + $0x304] ss:$8 sps:$4 sm:$0xff]  }
 0x62b   : > { %10303 = vmatprep.subr.bf16.mxu0 %v16469_v5 }
 0x62d   : > { %9252 = vmatpush1.bf16.msra.mxu1 %v16392_v45  ;;  %v16431_v45 = vld [vmem:[%s22143_s3 + $0x1bd0] ss:$24 sps:$4 sm:$0xff]  }
 0x62e   : > { %9272 = vmatprep.subr.bf16.mxu1 %v16397_v1  ;;  %v16467_v1 = vld [vmem:[%s22145_s5 + $0x300] ss:$8 sps:$4 sm:$0xff]  }
 0x62f   : > { %10304 = vmatpush1.bf16.msra.mxu0 %v16467_v1 }
 0x630   : > { %9254 = vmatmul.mubr.bf16.vlgmr.msra.gmra.mrb[32].mxu1 %v19537_v28  ;;  %v16404_v28 = vld [vmem:[%s22143_s3 + $0x1a20] ss:$24 sps:$4 sm:$0xff]  }
 0x631   : > { %9263 = vmatprep.mubr.bf16.mxu1 %v19332_v36  ;;  %9273 = vmatpush1.bf16.msra.mxu1 %v16395_v19  ;;  %v16406_v36 = vld [vmem:[%s22143_s3 + $0x1a24] ss:$24 sps:$4 sm:$0xff]  }
 0x632   : > { %9274 = vmatprep.subr.bf16.mxu1 %v16400_v58  ;;  %v16436_v19 = vld [vmem:[%s22143_s3 + $0x1c04] ss:$24 sps:$4 sm:$0xff]  }
 0x633   : > { %v16472_v58 = vld [vmem:[%s22145_s5 + $0x314] ss:$8 sps:$4 sm:$0xff]  }
 0x634   : > { %10305 = vmatprep.subr.bf16.mxu0 %v16472_v58  ;;  %v16488_v58 = vld [vmem:[%s22145_s5 + $0x370] ss:$8 sps:$4 sm:$0xff]  }
 0x635   : > { %9275 = vmatpush1.bf16.msra.mxu1 %v16398_v63  ;;  %v16434_v63 = vld [vmem:[%s22143_s3 + $0x1c00] ss:$24 sps:$4 sm:$0xff]  }
 0x636   : > { %9276 = vmatprep.subr.bf16.mxu1 %v16403_v30  ;;  %v16470_v30 = vld [vmem:[%s22145_s5 + $0x310] ss:$8 sps:$4 sm:$0xff]  }
 0x637   : > { %10306 = vmatpush1.bf16.msra.mxu0 %v16470_v30 }
 0x638   : > { %9264 = vmatmul.mubr.bf16.gmra.mrb[104].mxu1 %v19522_v57 }
 0x639   : > { %9277 = vmatpush1.bf16.msra.mxu1 %v16401_v39  ;;  %9304 = vmatprep.mubr.bf16.mxu1 %v19578_v17  ;;  %v16407_v17 = vld [vmem:[%s22143_s3 + $0x1a50] ss:$24 sps:$4 sm:$0xff]   ;;  %v16439_v39 = vld [vmem:[%s22143_s3 + $0x1c34] ss:$24 sps:$4 sm:$0xff]  }
 0x63a   : > { %9278 = vmatprep.subr.bf16.mxu1 %v16406_v36  ;;  %v16475_v36 = vld [vmem:[%s22145_s5 + $0x324] ss:$8 sps:$4 sm:$0xff]  }
 0x63b   : > { %v8857_v55 = vpop.f32.mrb[88].mxu1  ;;  %10307 = vmatprep.subr.bf16.mxu0 %v16475_v36 }
 0x63c   : > { %v20809_v37 = vadd.f32 %v8857_v55, %v20704_v24  ;;  %v8859_v31 = vpop.f32.mrb[89].mxu1  ;;  %v16410_v24 = vld [vmem:[%s22143_s3 + $0x1a80] ss:$24 sps:$4 sm:$0xff]   ;;  %v16442_v55 = vld [vmem:[%s22143_s3 + $0x1c64] ss:$24 sps:$4 sm:$0xff]  }
 0x63d   : > { %v20812_v48 = vadd.f32 %v8859_v31, %v20706_v14  ;;  %v8861_v57 = vpop.f32.mrb[90].mxu1  ;;  %9279 = vmatpush1.bf16.msra.mxu1 %v16404_v28  ;;  %v16415_v14 = vld [vmem:[%s22143_s3 + $0x1ab4] ss:$24 sps:$4 sm:$0xff]   ;;  %v16437_v28 = vld [vmem:[%s22143_s3 + $0x1c30] ss:$24 sps:$4 sm:$0xff]  }
 0x63e   : > { %v8862_v11 = vpop.f32.mrb[91].mxu1  ;;  %9280 = vmatprep.subr.bf16.mxu1 %v16409_v25  ;;  %v16473_v25 = vld [vmem:[%s22145_s5 + $0x320] ss:$8 sps:$4 sm:$0xff]   ;;  %v16478_v31 = vld [vmem:[%s22145_s5 + $0x334] ss:$8 sps:$4 sm:$0xff]  }
 0x63f   : > { %v16440_v57 = vld [vmem:[%s22143_s3 + $0x1c60] ss:$24 sps:$4 sm:$0xff]   ;;  %10308 = vmatpush1.bf16.msra.mxu0 %v16473_v25  ;;  %v16445_v11 = vld [vmem:[%s22143_s3 + $0x1c94] ss:$24 sps:$4 sm:$0xff]  }
 0x640   : > { %10309 = vmatprep.subr.bf16.mxu0 %v16478_v31 }
 0x641   : > { %9281 = vmatpush1.bf16.msra.mxu1 %v16407_v17  ;;  %v16476_v17 = vld [vmem:[%s22145_s5 + $0x330] ss:$8 sps:$4 sm:$0xff]  }
 0x642   : > { %9282 = vmatprep.subr.bf16.mxu1 %v16412_v7  ;;  %v16481_v7 = vld [vmem:[%s22145_s5 + $0x344] ss:$8 sps:$4 sm:$0xff]  }
 0x643   : > { %10310 = vmatpush1.bf16.msra.mxu0 %v16476_v17 }
 0x644   : > { %10311 = vmatprep.subr.bf16.mxu0 %v16481_v7 }
 0x645   : > { %9283 = vmatpush1.bf16.msra.mxu1 %v16410_v24  ;;  %v16443_v24 = vld [vmem:[%s22143_s3 + $0x1c90] ss:$24 sps:$4 sm:$0xff]  }
 0x646   : > { %9284 = vmatprep.subr.bf16.mxu1 %v16415_v14  ;;  %v16448_v14 = vld [vmem:[%s22143_s3 + $0x1cc4] ss:$24 sps:$4 sm:$0xff]  }
 0x649   : > { %9285 = vmatpush1.bf16.msra.mxu1 %v16413_v61  ;;  %v16479_v61 = vld [vmem:[%s22145_s5 + $0x340] ss:$8 sps:$4 sm:$0xff]  }
 0x64a   : > { %9286 = vmatprep.subr.bf16.mxu1 %v16418_v32  ;;  %v16484_v32 = vld [vmem:[%s22145_s5 + $0x354] ss:$8 sps:$4 sm:$0xff]   ;;  %10312 = vmatpush1.bf16.msra.mxu0 %v16479_v61 }
 0x64b   : > { %10313 = vmatprep.subr.bf16.mxu0 %v16484_v32  ;;  %v16496_v32 = vld [vmem:[%s22145_s5 + $0x394] ss:$8 sps:$4 sm:$0xff]  }
 0x64d   : > { %9287 = vmatpush1.bf16.msra.mxu1 %v16416_v3  ;;  %v16446_v3 = vld [vmem:[%s22143_s3 + $0x1cc0] ss:$24 sps:$4 sm:$0xff]  }
 0x64e   : > { %9288 = vmatprep.subr.bf16.mxu1 %v16421_v26  ;;  %v16451_v26 = vld [vmem:[%s22143_s3 + $0x1cf4] ss:$24 sps:$4 sm:$0xff]  }
 0x651   : > { %9289 = vmatpush1.bf16.msra.mxu1 %v16419_v53  ;;  %v16482_v53 = vld [vmem:[%s22145_s5 + $0x350] ss:$8 sps:$4 sm:$0xff]  }
 0x652   : > { %9290 = vmatprep.subr.bf16.mxu1 %v16424_v46  ;;  %v16454_v46 = vld [vmem:[%s22143_s3 + $0x1d24] ss:$24 sps:$4 sm:$0xff]   ;;  %10314 = vmatpush1.bf16.msra.mxu0 %v16482_v53 }
 0x655   : > { %9291 = vmatpush1.bf16.msra.mxu1 %v16422_v18 }
 0x656   : > { %9292 = vmatprep.subr.bf16.mxu1 %v16427_v21 }
 0x659   : > { %9293 = vmatpush1.bf16.msra.mxu1 %v16425_v16 }
 0x65a   : > { %9294 = vmatprep.subr.bf16.mxu1 %v16430_v15 }
 0x65d   : > { %9295 = vmatpush1.bf16.msra.mxu1 %v16428_v54 }
 0x65e   : > { %9296 = vmatprep.subr.bf16.mxu1 %v16433_v47 }
 0x661   : > { %9297 = vmatpush1.bf16.msra.mxu1 %v16431_v45 }
 0x662   : > { %9298 = vmatprep.subr.bf16.mxu1 %v16436_v19 }
 0x665   : > { %9299 = vmatpush1.bf16.msra.mxu1 %v16434_v63  ;;  %v16490_v63 = vld [vmem:[%s22145_s5 + $0x374] ss:$8 sps:$4 sm:$0xff]  }
 0x666   : > { %9300 = vmatprep.subr.bf16.mxu1 %v16439_v39  ;;  %v16493_v39 = vld [vmem:[%s22145_s5 + $0x384] ss:$8 sps:$4 sm:$0xff]  }
 0x669   : > { %9301 = vmatpush1.bf16.msra.mxu1 %v16437_v28 }
 0x66a   : > { %9302 = vmatprep.subr.bf16.mxu1 %v16442_v55 }
 0x66d   : > { %9303 = vmatpush1.bf16.msra.mxu1 %v16440_v57 }
 0x66e   : > { %9323 = vmatprep.subr.bf16.mxu1 %v16445_v11 }
 0x670   : > { %9305 = vmatmul.mubr.bf16.vlgmr.msra.gmra.mrb[32].mxu1 %v19765_v51  ;;  %v16449_v51 = vld [vmem:[%s22143_s3 + $0x1cf0] ss:$24 sps:$4 sm:$0xff]  }
 0x671   : > { %9314 = vmatprep.mubr.bf16.mxu1 %v19558_v35  ;;  %9324 = vmatpush1.bf16.msra.mxu1 %v16443_v24  ;;  %v16487_v35 = vld [vmem:[%s22145_s5 + $0x364] ss:$8 sps:$4 sm:$0xff]  }
 0x672   : > { %9325 = vmatprep.subr.bf16.mxu1 %v16448_v14  ;;  %10315 = vmatprep.subr.bf16.mxu0 %v16487_v35 }
 0x673   : > { %10316 = vmatpush1.bf16.msra.mxu0 %v16485_v0 }
 0x674   : > { %10317 = vmatprep.subr.bf16.mxu0 %v16490_v63 }
 0x675   : > { %9326 = vmatpush1.bf16.msra.mxu1 %v16446_v3 }
 0x676   : > { %9327 = vmatprep.subr.bf16.mxu1 %v16451_v26 }
 0x677   : > { %10318 = vmatpush1.bf16.msra.mxu0 %v16488_v58 }
 0x678   : > { %9315 = vmatmul.mubr.bf16.gmra.mrb[108].mxu1 %v19750_v50  ;;  %v20985_v50 = vld [vmem:[%s22144_s4] sm:$0x3f]  ;;  %10319 = vmatprep.subr.bf16.mxu0 %v16493_v39 }
 0x679   : > { %9328 = vmatpush1.bf16.msra.mxu1 %v16449_v51  ;;  %9355 = vmatprep.mubr.bf16.mxu1 %v16960_v2  ;;  %v9397_v38 = vrot.slane %v20985_v50, %v17485_v6  ;;  %v16494_v51 = vld [vmem:[%s22145_s5 + $0x390] ss:$8 sps:$4 sm:$0xff]  }
 0x67a   : > { %9329 = vmatprep.subr.bf16.mxu1 %v16454_v46 }
 0x67b   : > { %v8908_v52 = vpop.f32.mrb[92].mxu1 }
 0x67c   : > { %v8909_v18 = vadd.f32 %v8908_v52, %v20809_v37  ;;  %v8910_v4 = vpop.f32.mrb[93].mxu1  ;;  %v9401_v37 = vrot.slane %v20985_v50, %v17490_v8 }
 0x67d   : > { %v8911_v21 = vadd.f32 %v8910_v4, %v20812_v48  ;;  %v8912_v10 = vpop.f32.mrb[94].mxu1  ;;  %9330 = vmatpush1.bf16.msra.mxu1 %v16452_v22  ;;  %v16499_v4 = vld [vmem:[%s22145_s5 + $0x3a4] ss:$8 sps:$4 sm:$0xff]  }
 0x67e   : > { %v8913_v16 = vpop.f32.mrb[95].mxu1  ;;  %12096 = vmatprep.subr.bf16.mxu1 %v16960_v2  ;;  %v16502_v10 = vld [vmem:[%s22145_s5 + $0x3b4] ss:$8 sps:$4 sm:$0xff]  }
 0x680   : > { %14001 = vmatmul.mubr.msk.bf16.vlgmr.msra.gmra.mrb[32].mxu1 %vm4052_vm6, %v19828_v34 }
 0x681   : > { %9365 = vmatprep.mubr.bf16.mxu1 %v16960_v2 }
 0x683   : > { %v8949_v48 = vpop.f32.mrb[12].mxu1 }
 0x684   : > { %v9424_v15 = vadd.f32 %v9397_v38, %v8949_v48  ;;  %v8951_v27 = vpop.f32.mrb[13].mxu1 }
 0x685   : > { %v9425_v54 = vadd.f32 %v9401_v37, %v8951_v27  ;;  %v8953_v23 = vpop.f32.mrb[14].mxu1 }
 0x686   : > { %v9442_v47 = vmax.f32 %v9424_v15, 0.0  ;;  %v9430_v34 = vadd.f32 %v9397_v38, %v8953_v23  ;;  %v8955_v5 = vpop.f32.mrb[15].mxu1  ;;  %v16500_v15 = vld [vmem:[%s22145_s5 + $0x3b0] ss:$8 sps:$4 sm:$0xff]  }
 0x687   : > { %v9443_v45 = vmax.f32 %v9425_v54, 0.0  ;;  %v9431_v1 = vadd.f32 %v9401_v37, %v8955_v5 }
 0x688   : > { %v9448_v19 = vmax.f32 %v9430_v34, 0.0  ;;  %14002 = vmatmul.mubr.msk.bf16.gmra.mrb[112].mxu1 %vm4052_vm6, %v19815_v41  ;;  %v9478_v36 = vrot.slane %v9442_v47, 2  ;;  %v16491_v41 = vld [vmem:[%s22145_s5 + $0x380] ss:$8 sps:$4 sm:$0xff]  }
 0x689   : > { %v9449_v30 = vmax.f32 %v9431_v1, 0.0  ;;  %v9481_v25 = vrot.slane %v9443_v45, 2  ;;  %10320 = vmatpush1.bf16.msra.mxu0 %v16491_v41 }
 0x68a   : > { %v9479_v28 = vrot.slane %v9448_v19, 2  ;;  %10321 = vmatprep.subr.bf16.mxu0 %v16496_v32 }
 0x68b   : > { %v9482_v55 = vrot.slane %v9449_v30, 2  ;;  %v8959_v31 = vpop.f32.mrb[96].mxu1 }
 0x68c   : > { %v9480_v57 = vsel %vm520_vm0, %v9478_v36, %v9479_v28  ;;  %v8960_v17 = vadd.f32 %v8959_v31, %v8909_v18  ;;  %v8961_v11 = vpop.f32.mrb[97].mxu1 }
 0x68d   : > { %v8962_v7 = vadd.f32 %v8961_v11, %v8911_v21  ;;  %v8963_v24 = vpop.f32.mrb[98].mxu1  ;;  %v9483_v14 = vsel %vm520_vm0, %v9481_v25, %v9482_v55  ;;  %v21008_v61 = vmax.f32 %v9442_v47, %v9480_v57  ;;  %10322 = vmatpush1.bf16.msra.mxu0 %v16494_v51 }
 0x68e   : > { %v9386_v3 = vadd.f32 %v8960_v17, %v20228_v44  ;;  %v8964_v26 = vpop.f32.mrb[99].mxu1  ;;  %v21014_v53 = vmax.f32 %v9443_v45, %v9483_v14  ;;  %10323 = vmatprep.subr.bf16.mxu0 %v16499_v4  ;;  %v16508_v4 = vld [vmem:[%s22145_s5 + $0x3d4] ss:$8 sps:$4 sm:$0xff]  }
 0x68f   : > { %v9387_v35 = vadd.f32 %v8962_v7, %v20230_v13  ;;  %v16497_v13 = vld [vmem:[%s22145_s5 + $0x3a0] ss:$8 sps:$4 sm:$0xff]  }
 0x690   : > { %v9436_v46 = vadd.f32 %v9397_v38, %v9386_v3  ;;  %v14949_v0 = vpack.i.bf16 %v20239_v9, %v21014_v53 }
 0x691   : > { %v9437_v22 = vadd.f32 %v9401_v37, %v9387_v35  ;;  %10324 = vmatpush1.bf16.msra.mxu0 %v16497_v13  ;;  %v16503_v13 = vld [vmem:[%s22145_s5 + $0x3c0] ss:$8 sps:$4 sm:$0xff]  }
 0x692   : > { %v9454_v52 = vmax.f32 %v9436_v46, 0.0  ;;  %14950 = vrot.lane.b32.xlu0 %v14949_v0, %s16963_s13  ;;  %10325 = vmatprep.subr.bf16.mxu0 %v16502_v10  ;;  %v16509_v10 = vld [vmem:[%s22145_s5 + $0x3e0] ss:$8 sps:$4 sm:$0xff]  }
 0x693   : > { %v9455_v44 = vmax.f32 %v9437_v22, 0.0 }
 0x694   : > { %v9496_v18 = vrot.slane %v9454_v52, 2 }
 0x695   : > { %v9498_v21 = vrot.slane %v9455_v44, 2  ;;  %10326 = vmatpush1.bf16.msra.mxu0 %v16500_v15  ;;  %v16517_v15 = vld [vmem:[%s22145_s5 + $0x404] ss:$8 sps:$4 sm:$0xff]  }
 0x696   : > { %v9497_v16 = vsel %vm520_vm0, %v9479_v28, %v9496_v18  ;;  %v21033_v38 = vmax.f32 %v9454_v52, %v9496_v18 }
 0x697   : > { %v21035_v37 = vmax.f32 %v9448_v19, %v9497_v16  ;;  %v9499_v48 = vsel %vm520_vm0, %v9482_v55, %v9498_v21  ;;  %v21041_v27 = vmax.f32 %v9455_v44, %v9498_v21  ;;  %v16505_v19 = vld [vmem:[%s22145_s5 + $0x3c4] ss:$8 sps:$4 sm:$0xff]   ;;  %v16514_v16 = vld [vmem:[%s22145_s5 + $0x3f4] ss:$8 sps:$4 sm:$0xff]  }
 0x698   : > { %v9533_v54 = vmax.f32 %v9449_v30, %v9499_v48  ;;  %10338 = vmatprep.subr.bf16.mxu0 %v16505_v19  ;;  %v16511_v21 = vld [vmem:[%s22145_s5 + $0x3e4] ss:$8 sps:$4 sm:$0xff]   ;;  %v16512_v48 = vld [vmem:[%s22145_s5 + $0x3f0] ss:$8 sps:$4 sm:$0xff]  }
 0x699   : > { %v14959_v23 = vpack.i.bf16 %v21035_v37, %v21008_v61  ;;  %v16529_v19 = vld [vmem:[%s22145_s5 + $0x444] ss:$8 sps:$4 sm:$0xff]  }
 0x69a   : > { %v14954_v47 = vpack.i.bf16 %v20268_v40, %v9533_v54 }
 0x69b   : > { %14960 = vrot.lane.b32.xlu0 %v14959_v23, %s16963_s13  ;;  %v16520_v23 = vld [vmem:[%s22145_s5 + $0x414] ss:$8 sps:$4 sm:$0xff]  }
 0x69c   : > { %14955 = vrot.lane.b32.xlu1 %v14954_v47, %s16963_s13  ;;  %v16518_v47 = vld [vmem:[%s22145_s5 + $0x410] ss:$8 sps:$4 sm:$0xff]  }
 0x6cb   : > { %v9214_v34 = vpop.f32.mrb[100].mxu1 }
 0x6cc   : > { %v9216_v5 = vpop.f32.mrb[101].mxu1 }
 0x6cd   : > { %v9218_v45 = vpop.f32.mrb[102].mxu1 }
 0x6ce   : > { %v9219_v1 = vpop.f32.mrb[103].mxu1  ;;  %v16526_v45 = vld [vmem:[%s22145_s5 + $0x434] ss:$8 sps:$4 sm:$0xff]  }
 0x6cf   : > { %v16524_v1 = vld [vmem:[%s22145_s5 + $0x430] ss:$8 sps:$4 sm:$0xff]  }
 0x704   : > { %v21051_v58 = vpop.permute.xlu0 %14950 }
 0x705   : > { %v14953_v63 = vunpack.i.h.bf16 %v21051_v58  ;;  %v14952_v30 = vunpack.i.l.bf16 %v21051_v58 }
 0x707   : > { %v9599_v7 = vsel %vm4052_vm6, %v14952_v30, %v14953_v63 }
 0x708   : > { %v9629_v51 = vmax.f32 %v21014_v53, %v9599_v7  ;;  %v16506_v53 = vld [vmem:[%s22145_s5 + $0x3d0] ss:$8 sps:$4 sm:$0xff]  }
 0x70b   : > { %v9265_v39 = vpop.f32.mrb[104].mxu1 }
 0x70c   : > { %v21055_v36 = vadd.f32 %v9265_v39, %v9214_v34  ;;  %v9267_v28 = vpop.f32.mrb[105].mxu1  ;;  %v16523_v34 = vld [vmem:[%s22145_s5 + $0x424] ss:$8 sps:$4 sm:$0xff]   ;;  %v16532_v39 = vld [vmem:[%s22145_s5 + $0x454] ss:$8 sps:$4 sm:$0xff]  }
 0x70d   : > { %v21057_v25 = vadd.f32 %v9267_v28, %v9216_v5  ;;  %v9269_v55 = vpop.f32.mrb[106].mxu1  ;;  %v14961_v31 = vpop.permute.xlu0 %14960  ;;  %v16521_v5 = vld [vmem:[%s22145_s5 + $0x420] ss:$8 sps:$4 sm:$0xff]   ;;  %v16530_v28 = vld [vmem:[%s22145_s5 + $0x450] ss:$8 sps:$4 sm:$0xff]  }
 0x70e   : > { %v14963_v41 = vunpack.i.h.bf16 %v14961_v31  ;;  %v14962_v57 = vunpack.i.l.bf16 %v14961_v31  ;;  %v9270_v17 = vpop.f32.mrb[107].mxu1  ;;  %v21059_v11 = vpop.permute.xlu1 %14955  ;;  %v16535_v55 = vld [vmem:[%s22145_s5 + $0x464] ss:$8 sps:$4 sm:$0xff]   ;;  %v16533_v31 = vld [vmem:[%s22145_s5 + $0x460] ss:$8 sps:$4 sm:$0xff]  }
 0x70f   : > { %v14958_v24 = vunpack.i.h.bf16 %v21059_v11  ;;  %v14957_v14 = vunpack.i.l.bf16 %v21059_v11 }
 0x710   : > { %v9598_v32 = vsel %vm4052_vm6, %v14962_v57, %v14952_v30  ;;  %v16527_v30 = vld [vmem:[%s22145_s5 + $0x440] ss:$8 sps:$4 sm:$0xff]  }
 0x711   : > { %v9628_v3 = vmax.f32 %v21008_v61, %v9598_v32  ;;  %v9603_v26 = vsel %vm4052_vm6, %v14963_v41, %v14957_v14  ;;  %v9604_v35 = vsel %vm4052_vm6, %v14957_v14, %v14958_v24 }
 0x712   : > { %v9634_v46 = vmax.f32 %v21035_v37, %v9603_v26  ;;  %v9635_v0 = vmax.f32 %v9533_v54, %v9604_v35  ;;  %v16515_v54 = vld [vmem:[%s22145_s5 + $0x400] ss:$8 sps:$4 sm:$0xff]   ;;  %v9417_v26 = vrot.slane %v20985_v50, %v1421_v62  ;;  %v16541_v62 = vld [vmem:[%s22145_s5 + $0x484] ss:$8 sps:$4 sm:$0xff]  }
 0x714   : > { %v21074_v22 = vpack.c.bf16 %v9634_v46, %v9628_v3  ;;  %v21076_v52 = vpack.c.bf16 %v9635_v0, %v9629_v51  ;;  %v9413_v3 = vrot.slane %v20985_v50, %v1417_v56 }
 0x716   : > { %v9842_v44 = vrot.slane %v21076_v52, 2  ;;  %v9841_v18 = vrot.slane %v21074_v22, 2 }
 0x718   : > { %10327 = vmatprep.mubr.bf16.mxu0 %v9842_v44 }
 0x719   : > { %10328 = vmatmul.mubr.bf16.vlgmr.msra.gmra.mrb[72].mxu0 %v9841_v18 }
 0x71a   : > { %10339 = vmatpush1.bf16.msra.mxu0 %v16503_v13 }
 0x71b   : > { %10340 = vmatprep.subr.bf16.mxu0 %v16508_v4 }
 0x71e   : > { %10341 = vmatpush1.bf16.msra.mxu0 %v16506_v53 }
 0x71f   : > { %10342 = vmatprep.subr.bf16.mxu0 %v16511_v21  ;;  %v16539_v21 = vld [vmem:[%s22145_s5 + $0x480] ss:$8 sps:$4 sm:$0xff]  }
 0x722   : > { %10343 = vmatpush1.bf16.msra.mxu0 %v16509_v10 }
 0x723   : > { %10344 = vmatprep.subr.bf16.mxu0 %v16514_v16 }
 0x726   : > { %10345 = vmatpush1.bf16.msra.mxu0 %v16512_v48  ;;  %v16544_v48 = vld [vmem:[%s22145_s5 + $0x494] ss:$8 sps:$4 sm:$0xff]  }
 0x727   : > { %10346 = vmatprep.subr.bf16.mxu0 %v16517_v15 }
 0x72a   : > { %10347 = vmatpush1.bf16.msra.mxu0 %v16515_v54 }
 0x72b   : > { %10348 = vmatprep.subr.bf16.mxu0 %v16520_v23 }
 0x72e   : > { %10349 = vmatpush1.bf16.msra.mxu0 %v16518_v47 }
 0x72f   : > { %10350 = vmatprep.subr.bf16.mxu0 %v16523_v34 }
 0x732   : > { %10351 = vmatpush1.bf16.msra.mxu0 %v16521_v5 }
 0x733   : > { %10352 = vmatprep.subr.bf16.mxu0 %v16526_v45 }
 0x736   : > { %10353 = vmatpush1.bf16.msra.mxu0 %v16524_v1 }
 0x737   : > { %10354 = vmatprep.subr.bf16.mxu0 %v16529_v19 }
 0x73a   : > { %10355 = vmatpush1.bf16.msra.mxu0 %v16527_v30 }
 0x73b   : > { %10356 = vmatprep.subr.bf16.mxu0 %v16532_v39  ;;  %v16542_v39 = vld [vmem:[%s22145_s5 + $0x490] ss:$8 sps:$4 sm:$0xff]  }
 0x73e   : > { %10357 = vmatpush1.bf16.msra.mxu0 %v16530_v28 }
 0x73f   : > { %10358 = vmatprep.subr.bf16.mxu0 %v16535_v55 }
 0x742   : > { %10359 = vmatpush1.bf16.msra.mxu0 %v16533_v31 }
 0x74b   : > { %v9316_v41 = vpop.f32.mrb[108].mxu1 }
 0x74c   : > { %v9317_v57 = vadd.f32 %v9316_v41, %v21055_v36  ;;  %v9318_v17 = vpop.f32.mrb[109].mxu1 }
 0x74d   : > { %v9319_v7 = vadd.f32 %v9318_v17, %v21057_v25  ;;  %v9320_v14 = vpop.f32.mrb[110].mxu1  ;;  %v16538_v25 = vld [vmem:[%s22145_s5 + $0x474] ss:$8 sps:$4 sm:$0xff]  }
 0x74e   : > { %v9321_v32 = vpop.f32.mrb[111].mxu1  ;;  %10360 = vmatprep.subr.bf16.mxu0 %v16538_v25 }
 0x74f   : > { %10361 = vmatpush1.bf16.msra.mxu0 %v16536_v49  ;;  %v16547_v32 = vld [vmem:[%s22145_s5 + $0x4a4] ss:$8 sps:$4 sm:$0xff]  }
 0x750   : > { %10362 = vmatprep.subr.bf16.mxu0 %v16541_v62 }
 0x753   : > { %v9357_v35 = vpop.f32.mrb[32].mxu1  ;;  %10363 = vmatpush1.bf16.msra.mxu0 %v16539_v21 }
 0x754   : > { %v9428_v51 = vadd.f32 %v9413_v3, %v9357_v35  ;;  %v9359_v46 = vpop.f32.mrb[33].mxu1  ;;  %10364 = vmatprep.subr.bf16.mxu0 %v16544_v48 }
 0x755   : > { %v9429_v0 = vadd.f32 %v9417_v26, %v9359_v46  ;;  %v9361_v44 = vpop.f32.mrb[34].mxu1 }
 0x756   : > { %v9446_v18 = vmax.f32 %v9428_v51, 0.0  ;;  %v9434_v36 = vadd.f32 %v9413_v3, %v9361_v44  ;;  %v9363_v13 = vpop.f32.mrb[35].mxu1  ;;  %v16548_v44 = vld [vmem:[%s22145_s5 + $0x4b0] ss:$8 sps:$4 sm:$0xff]  }
 0x757   : > { %v9447_v4 = vmax.f32 %v9429_v0, 0.0  ;;  %v9435_v53 = vadd.f32 %v9417_v26, %v9363_v13  ;;  %10365 = vmatpush1.bf16.msra.mxu0 %v16542_v39 }
 0x758   : > { %v9452_v56 = vmax.f32 %v9434_v36, 0.0  ;;  %v9490_v10 = vrot.slane %v9446_v18, 2  ;;  %10366 = vmatprep.subr.bf16.mxu0 %v16547_v32  ;;  %v16568_v32 = vld [vmem:[%s22145_s5 + $0x514] ss:$8 sps:$4 sm:$0xff]  }
 0x759   : > { %v9453_v50 = vmax.f32 %v9435_v53, 0.0  ;;  %v9493_v15 = vrot.slane %v9447_v4, 2  ;;  %v16553_v53 = vld [vmem:[%s22145_s5 + $0x4c4] ss:$8 sps:$4 sm:$0xff]  }
 0x75a   : > { %v9491_v16 = vrot.slane %v9452_v56, 2 }
 0x75b   : > { %v9494_v54 = vrot.slane %v9453_v50, 2  ;;  %v9367_v23 = vpop.f32.mrb[112].mxu1 }
 0x75c   : > { %v9368_v47 = vadd.f32 %v9367_v23, %v9317_v57  ;;  %v9369_v34 = vpop.f32.mrb[113].mxu1  ;;  %v9492_v5 = vsel %vm520_vm0, %v9490_v10, %v9491_v16 }
 0x75d   : > { %v9370_v45 = vadd.f32 %v9369_v34, %v9319_v7  ;;  %v9371_v1 = vpop.f32.mrb[114].mxu1  ;;  %v21167_v19 = vmax.f32 %v9446_v18, %v9492_v5  ;;  %v9495_v30 = vsel %vm520_vm0, %v9493_v15, %v9494_v54 }
 0x75e   : > { %v9390_v28 = vadd.f32 %v9368_v47, %v20600_v59  ;;  %v9372_v55 = vpop.f32.mrb[115].mxu1  ;;  %v9531_v31 = vmax.f32 %v9447_v4, %v9495_v30  ;;  %v16545_v59 = vld [vmem:[%s22145_s5 + $0x4a0] ss:$8 sps:$4 sm:$0xff]   ;;  %v16556_v30 = vld [vmem:[%s22145_s5 + $0x4d4] ss:$8 sps:$4 sm:$0xff]  }
 0x75f   : > { %v9391_v41 = vadd.f32 %v9370_v45, %v20602_v29  ;;  %v14964_v57 = vpack.i.bf16 %v21167_v19, %v20243_v43  ;;  %10367 = vmatpush1.bf16.msra.mxu0 %v16545_v59  ;;  %v16554_v55 = vld [vmem:[%s22145_s5 + $0x4d0] ss:$8 sps:$4 sm:$0xff]   ;;  %v16571_v59 = vld [vmem:[%s22145_s5 + $0x524] ss:$8 sps:$4 sm:$0xff]  }
 0x760   : > { %v9440_v17 = vadd.f32 %v9413_v3, %v9390_v28  ;;  %v9633_v13 = vmax.f32 %v9531_v31, %v21008_v61  ;;  %v21213_v61 = vmax.f32 %v9457_v20, %v20260_v33 }
 0x761   : > { %v9441_v7 = vadd.f32 %v9417_v26, %v9391_v41  ;;  %14965 = vrot.lane.b32.xlu1 %v14964_v57, %s16963_s13  ;;  %v16550_v26 = vld [vmem:[%s22145_s5 + $0x4b4] ss:$8 sps:$4 sm:$0xff]   ;;  %v16557_v41 = vld [vmem:[%s22145_s5 + $0x4e0] ss:$8 sps:$4 sm:$0xff]  }
 0x762   : > { %v9458_v14 = vmax.f32 %v9440_v17, 0.0  ;;  %10368 = vmatprep.subr.bf16.mxu0 %v16550_v26  ;;  %v16562_v57 = vld [vmem:[%s22145_s5 + $0x4f4] ss:$8 sps:$4 sm:$0xff]   ;;  %v16560_v17 = vld [vmem:[%s22145_s5 + $0x4f0] ss:$8 sps:$4 sm:$0xff]  }
 0x763   : > { %v9459_v35 = vmax.f32 %v9441_v7, 0.0  ;;  %10369 = vmatpush1.bf16.msra.mxu0 %v16548_v44  ;;  %v16565_v7 = vld [vmem:[%s22145_s5 + $0x504] ss:$8 sps:$4 sm:$0xff]   ;;  %v16575_v44 = vld [vmem:[%s22145_s5 + $0x540] ss:$8 sps:$4 sm:$0xff]  }
 0x764   : > { %v9504_v51 = vrot.slane %v9458_v14, 2  ;;  %10381 = vmatprep.subr.bf16.mxu0 %v16553_v53  ;;  %v16577_v26 = vld [vmem:[%s22145_s5 + $0x544] ss:$8 sps:$4 sm:$0xff]  }
 0x765   : > { %v9506_v29 = vrot.slane %v9459_v35, 2 }
 0x766   : > { %v9505_v3 = vsel %vm520_vm0, %v9491_v16, %v9504_v51  ;;  %v21207_v62 = vmax.f32 %v9458_v14, %v9504_v51  ;;  %v16563_v14 = vld [vmem:[%s22145_s5 + $0x500] ss:$8 sps:$4 sm:$0xff]  }
 0x767   : > { %v21188_v46 = vmax.f32 %v9452_v56, %v9505_v3  ;;  %v9507_v0 = vsel %vm520_vm0, %v9494_v54, %v9506_v29  ;;  %v14979_v56 = vpack.i.bf16 %v20266_v42, %v21041_v27  ;;  %v16569_v51 = vld [vmem:[%s22145_s5 + $0x520] ss:$8 sps:$4 sm:$0xff]   ;;  %v16572_v3 = vld [vmem:[%s22145_s5 + $0x530] ss:$8 sps:$4 sm:$0xff]  }
 0x768   : > { %v9537_v18 = vmax.f32 %v9453_v50, %v9507_v0  ;;  %v21219_v50 = vmax.f32 %v9459_v35, %v9506_v29  ;;  %v16566_v35 = vld [vmem:[%s22145_s5 + $0x510] ss:$8 sps:$4 sm:$0xff]   ;;  %v16574_v29 = vld [vmem:[%s22145_s5 + $0x534] ss:$8 sps:$4 sm:$0xff]  }
 0x769   : > { %v14969_v36 = vpack.i.bf16 %v21188_v46, %v20275_v12 }
 0x76a   : > { %v14974_v25 = vpack.i.bf16 %v9537_v18, %v9531_v31  ;;  %v9639_v4 = vmax.f32 %v9537_v18, %v21035_v37  ;;  %v14984_v37 = vpack.i.bf16 %v21207_v62, %v21213_v61  ;;  %v16559_v31 = vld [vmem:[%s22145_s5 + $0x4e4] ss:$8 sps:$4 sm:$0xff]   ;;  %v16580_v18 = vld [vmem:[%s22145_s5 + $0x554] ss:$8 sps:$4 sm:$0xff]  }
 0x76b   : > { %14970 = vrot.lane.b32.xlu0 %v14969_v36, %s16963_s13 }
 0x76c   : > { %14975 = vrot.lane.b32.xlu1 %v14974_v25, %s16963_s13  ;;  %v21203_v49 = vpack.c.bf16 %v9639_v4, %v9633_v13  ;;  %v16578_v25 = vld [vmem:[%s22145_s5 + $0x550] ss:$8 sps:$4 sm:$0xff]   ;;  %v16583_v4 = vld [vmem:[%s22145_s5 + $0x564] ss:$8 sps:$4 sm:$0xff]  }
 0x76e   : > { %v9846_v39 = vrot.slane %v21203_v49, 2 }
 0x76f   : > { %14980 = vrot.lane.b32.xlu0 %v14979_v56, %s16963_s13 }
 0x770   : > { %9586 = vrot.lane.b32.xlu1 %v21033_v38, %s16963_s13 }
 0x773   : > { %14985 = vrot.lane.b32.xlu0 %v14984_v37, %s16963_s13  ;;  %v16581_v37 = vld [vmem:[%s22145_s5 + $0x560] ss:$8 sps:$4 sm:$0xff]  }
 0x774   : > { %9596 = vrot.lane.b32.xlu1 %v21219_v50, %s16963_s13  ;;  %s377_s13 = sand.u32 1, %s16950_s18  }
 0x775   : > { %s378_s25 = scalar_lea.vmem [#allocation2], %s377_s13  ;;  %s12243_s14 = scalar_lea.sflag [#allocation3], %s377_s13 }
 0x776   : > { %s12255_s29 = sshll.u32 %s378_s25, 4  ;;  %s22100_s29 = int_to_ptr.vmem [resolvable:$true] %s12255_s29 }
 0x777   : > { %s16896_s15 = scalar_lea.vmem %s22100_s29, 16  ;;  %p16903_p0 = scmp.lt.s32.totalorder %s22100_s29, %s16901_s16 }
 0x778   : > { %p16897_p11 = scmp.ne.s32.totalorder %s22100_s29, %s16896_s15  ;;  %p16904_p1 = scmp.lt.s32.totalorder %s16902_s24, %s16896_s15 }
 0x77a   : > { %p16898_p12 = pnand %p16897_p11, %p17065_p5  ;;  %p16905_p2 = por %p16904_p1, %p16903_p0 }
 0x77c   : > { %p16899_p13 = pneg %p16898_p12 }
 0x77e   : > { %p16906_p3 = pnand %p16905_p2, %p16899_p13 }
 0x7d3   : > { %v21224_v21 = vpop.permute.xlu1 %14965 }
 0x7d4   : > { %v14968_v10 = vunpack.i.h.bf16 %v21224_v21  ;;  %v14967_v60 = vunpack.i.l.bf16 %v21224_v21  ;;  %v16586_v21 = vld [vmem:[%s22145_s5 + $0x574] ss:$8 sps:$4 sm:$0xff]  }
 0x7d6   : > { %v9600_v33 = vsel %vm4052_vm6, %v14953_v63, %v14967_v60  ;;  %v9601_v16 = vsel %vm4052_vm6, %v14967_v60, %v14968_v10 }
 0x7d7   : > { %v9630_v58 = vmax.f32 %v20239_v9, %v9600_v33  ;;  %v9631_v63 = vmax.f32 %v20243_v43, %v9601_v16  ;;  %v16551_v9 = vld [vmem:[%s22145_s5 + $0x4c0] ss:$8 sps:$4 sm:$0xff]   ;;  %v16589_v16 = vld [vmem:[%s22145_s5 + $0x4] ss:$8 sps:$4 sm:$0xff]  }
 0x7dd   : > { %v21228_v20 = vpop.permute.xlu0 %14970 }
 0x7de   : > { %v14973_v48 = vunpack.i.h.bf16 %v21228_v20  ;;  %v14972_v15 = vunpack.i.l.bf16 %v21228_v20  ;;  %v14976_v0 = vpop.permute.xlu1 %14975 }
 0x7df   : > { %v14978_v36 = vunpack.i.h.bf16 %v14976_v0  ;;  %v14977_v13 = vunpack.i.l.bf16 %v14976_v0  ;;  %v16629_v0 = vld [vmem:[%s22145_s5 + $0xe0] ss:$8 sps:$4 sm:$0xff]  }
 0x7e0   : > { %v9605_v54 = vsel %vm4052_vm6, %v14958_v24, %v14972_v15  ;;  %v9606_v23 = vsel %vm4052_vm6, %v14972_v15, %v14973_v48  ;;  %v16590_v15 = vld [vmem:[%s22145_s5 + $0x10] ss:$8 sps:$4 sm:$0xff]  }
 0x7e1   : > { %v9636_v47 = vmax.f32 %v20268_v40, %v9605_v54  ;;  %v9637_v34 = vmax.f32 %v20275_v12, %v9606_v23  ;;  %v21248_v5 = vpop.permute.xlu0 %14980  ;;  %v9602_v53 = vsel %vm4052_vm6, %v14968_v10, %v14977_v13  ;;  %v9607_v56 = vsel %vm4052_vm6, %v14973_v48, %v14978_v36  ;;  %v16584_v10 = vld [vmem:[%s22145_s5 + $0x570] ss:$8 sps:$4 sm:$0xff]   ;;  %v16592_v48 = vld [vmem:[%s22145_s5 + $0x14] ss:$8 sps:$4 sm:$0xff]   ;;  %v16595_v54 = vld [vmem:[%s22145_s5 + $0x24] ss:$8 sps:$4 sm:$0xff]  }
 0x7e2   : > { %v14983_v40 = vunpack.i.h.bf16 %v21248_v5  ;;  %v9632_v60 = vmax.f32 %v21167_v19, %v9602_v53  ;;  %v9638_v33 = vmax.f32 %v21188_v46, %v9607_v56  ;;  %v16587_v19 = vld [vmem:[%s22145_s5] ss:$8 sps:$4 sm:$0xff]   ;;  %v16637_v36 = vld [vmem:[%s22145_s5 + $0x104] ss:$8 sps:$4 sm:$0xff]  }
 0x7e3   : > { %v21250_v45 = vpack.c.bf16 %v9636_v47, %v9630_v58  ;;  %v21252_v1 = vpack.c.bf16 %v9637_v34, %v9631_v63  ;;  %v16593_v23 = vld [vmem:[%s22145_s5 + $0x20] ss:$8 sps:$4 sm:$0xff]   ;;  %v16598_v58 = vld [vmem:[%s22145_s5 + $0x34] ss:$8 sps:$4 sm:$0xff]   ;;  %v16596_v63 = vld [vmem:[%s22145_s5 + $0x30] ss:$8 sps:$4 sm:$0xff]  }
 0x7e4   : > { %v21346_v20 = vpack.c.bf16 %v9638_v33, %v9632_v60  ;;  %v16601_v47 = vld [vmem:[%s22145_s5 + $0x44] ss:$8 sps:$4 sm:$0xff]   ;;  %v16599_v34 = vld [vmem:[%s22145_s5 + $0x40] ss:$8 sps:$4 sm:$0xff]   ;;  %v16644_v60 = vld [vmem:[%s22145_s5 + $0x130] ss:$8 sps:$4 sm:$0xff]  }
 0x7e5   : > { %v21254_v11 = vpop.permute.xlu0 %14985  ;;  %v9844_v24 = vrot.slane %v21252_v1, 2  ;;  %v9843_v43 = vrot.slane %v21250_v45, 2  ;;  %v16635_v13 = vld [vmem:[%s22145_s5 + $0x100] ss:$8 sps:$4 sm:$0xff]   ;;  %v16643_v53 = vld [vmem:[%s22145_s5 + $0x124] ss:$8 sps:$4 sm:$0xff]  }
 0x7e6   : > { %v14987_v12 = vunpack.i.l.bf16 %v21254_v11  ;;  %v9845_v46 = vrot.slane %v21346_v20, 2  ;;  %v16641_v56 = vld [vmem:[%s22145_s5 + $0x120] ss:$8 sps:$4 sm:$0xff]   ;;  %v16649_v33 = vld [vmem:[%s22145_s5 + $0x144] ss:$8 sps:$4 sm:$0xff]  }
 0x7e7   : > { %10370 = vmatprep.mubr.bf16.mxu0 %v9844_v24  ;;  %v16604_v24 = vld [vmem:[%s22145_s5 + $0x54] ss:$8 sps:$4 sm:$0xff]  }
 0x7e8   : > { %v21272_v28 = vsel %vm4052_vm6, %v14983_v40, %v14987_v12  ;;  %10371 = vmatmul.mubr.bf16.vlgmr.msra.gmra.mrb[72].mxu0 %v9843_v43  ;;  %v16607_v43 = vld [vmem:[%s22145_s5 + $0x64] ss:$8 sps:$4 sm:$0xff]  }
 0x7e9   : > { %10382 = vmatpush1.bf16.msra.mxu0 %v16551_v9  ;;  %14179 = vmatprep.mubr.msk.bf16.mxu0 %vm4052_vm6, %v9846_v39  ;;  %v16602_v9 = vld [vmem:[%s22145_s5 + $0x50] ss:$8 sps:$4 sm:$0xff]   ;;  %v16610_v39 = vld [vmem:[%s22145_s5 + $0x74] ss:$8 sps:$4 sm:$0xff]  }
 0x7ea   : > { %10383 = vmatprep.subr.bf16.mxu0 %v16556_v30  ;;  %v16605_v30 = vld [vmem:[%s22145_s5 + $0x60] ss:$8 sps:$4 sm:$0xff]  }
 0x7ed   : > { %10384 = vmatpush1.bf16.msra.mxu0 %v16554_v55  ;;  %v16608_v55 = vld [vmem:[%s22145_s5 + $0x70] ss:$8 sps:$4 sm:$0xff]  }
 0x7ee   : > { %10385 = vmatprep.subr.bf16.mxu0 %v16559_v31  ;;  %v16613_v31 = vld [vmem:[%s22145_s5 + $0x84] ss:$8 sps:$4 sm:$0xff]  }
 0x7f1   : > { %10386 = vmatpush1.bf16.msra.mxu0 %v16557_v41  ;;  %v16611_v41 = vld [vmem:[%s22145_s5 + $0x80] ss:$8 sps:$4 sm:$0xff]  }
 0x7f2   : > { %10387 = vmatprep.subr.bf16.mxu0 %v16562_v57  ;;  %v16616_v57 = vld [vmem:[%s22145_s5 + $0x94] ss:$8 sps:$4 sm:$0xff]  }
 0x7f5   : > { %10388 = vmatpush1.bf16.msra.mxu0 %v16560_v17  ;;  %v16614_v17 = vld [vmem:[%s22145_s5 + $0x90] ss:$8 sps:$4 sm:$0xff]  }
 0x7f6   : > { %10389 = vmatprep.subr.bf16.mxu0 %v16565_v7  ;;  %v16619_v7 = vld [vmem:[%s22145_s5 + $0xa4] ss:$8 sps:$4 sm:$0xff]  }
 0x7f9   : > { %10390 = vmatpush1.bf16.msra.mxu0 %v16563_v14  ;;  %v16617_v14 = vld [vmem:[%s22145_s5 + $0xa0] ss:$8 sps:$4 sm:$0xff]  }
 0x7fa   : > { %10391 = vmatprep.subr.bf16.mxu0 %v16568_v32  ;;  %v16622_v32 = vld [vmem:[%s22145_s5 + $0xb4] ss:$8 sps:$4 sm:$0xff]  }
 0x7fd   : > { %10392 = vmatpush1.bf16.msra.mxu0 %v16566_v35  ;;  %v16620_v35 = vld [vmem:[%s22145_s5 + $0xb0] ss:$8 sps:$4 sm:$0xff]  }
 0x7fe   : > { %10393 = vmatprep.subr.bf16.mxu0 %v16571_v59  ;;  %v16625_v59 = vld [vmem:[%s22145_s5 + $0xc4] ss:$8 sps:$4 sm:$0xff]  }
 0x801   : > { %10394 = vmatpush1.bf16.msra.mxu0 %v16569_v51  ;;  %v16623_v51 = vld [vmem:[%s22145_s5 + $0xc0] ss:$8 sps:$4 sm:$0xff]  }
 0x802   : > { %10395 = vmatprep.subr.bf16.mxu0 %v16574_v29  ;;  %v16628_v29 = vld [vmem:[%s22145_s5 + $0xd4] ss:$8 sps:$4 sm:$0xff]  }
 0x805   : > { %10396 = vmatpush1.bf16.msra.mxu0 %v16572_v3  ;;  %v16626_v3 = vld [vmem:[%s22145_s5 + $0xd0] ss:$8 sps:$4 sm:$0xff]  }
 0x806   : > { %10397 = vmatprep.subr.bf16.mxu0 %v16577_v26  ;;  %v16631_v26 = vld [vmem:[%s22145_s5 + $0xe4] ss:$8 sps:$4 sm:$0xff]  }
 0x809   : > { %10398 = vmatpush1.bf16.msra.mxu0 %v16575_v44  ;;  %v16634_v44 = vld [vmem:[%s22145_s5 + $0xf4] ss:$8 sps:$4 sm:$0xff]  }
 0x80a   : > { %10399 = vmatprep.subr.bf16.mxu0 %v16580_v18  ;;  %v16632_v18 = vld [vmem:[%s22145_s5 + $0xf0] ss:$8 sps:$4 sm:$0xff]  }
 0x80d   : > { %10400 = vmatpush1.bf16.msra.mxu0 %v16578_v25  ;;  %v16640_v25 = vld [vmem:[%s22145_s5 + $0x114] ss:$8 sps:$4 sm:$0xff]  }
 0x80e   : > { %10401 = vmatprep.subr.bf16.mxu0 %v16583_v4  ;;  %v16638_v4 = vld [vmem:[%s22145_s5 + $0x110] ss:$8 sps:$4 sm:$0xff]  }
 0x811   : > { %10402 = vmatpush1.bf16.msra.mxu0 %v16581_v37  ;;  %v16646_v37 = vld [vmem:[%s22145_s5 + $0x134] ss:$8 sps:$4 sm:$0xff]  }
 0x812   : > { %10403 = vmatprep.subr.bf16.mxu0 %v16586_v21  ;;  %v16647_v21 = vld [vmem:[%s22145_s5 + $0x140] ss:$8 sps:$4 sm:$0xff]  }
 0x815   : > { %10404 = vmatpush1.bf16.msra.mxu0 %v16584_v10  ;;  %v16652_v10 = vld [vmem:[%s22145_s5 + $0x154] ss:$8 sps:$4 sm:$0xff]  }
 0x816   : > { %10867 = vmatprep.subr.bf16.mxu0 %v16589_v16  ;;  %v16650_v16 = vld [vmem:[%s22145_s5 + $0x150] ss:$8 sps:$4 sm:$0xff]  }
 0x818   : > { %10414 = vmatmul.mubr.bf16.vlgmr.msra.gmra.mrb[72].mxu0 %v9845_v46  ;;  %v16653_v46 = vld [vmem:[%s22145_s5 + $0x160] ss:$8 sps:$4 sm:$0xff]  }
 0x819   : > { %10868 = vmatpush1.bf16.msra.mxu0 %v16587_v19  ;;  %10899 = vmatprep.mubr.bf16.mxu0 %v21076_v52  ;;  %v16655_v19 = vld [vmem:[%s22145_s5 + $0x164] ss:$8 sps:$4 sm:$0xff]  }
 0x81a   : > { %10869 = vmatprep.subr.bf16.mxu0 %v16592_v48  ;;  %v16658_v48 = vld [vmem:[%s22145_s5 + $0x174] ss:$8 sps:$4 sm:$0xff]  }
 0x81d   : > { %10870 = vmatpush1.bf16.msra.mxu0 %v16590_v15  ;;  %v16656_v15 = vld [vmem:[%s22145_s5 + $0x170] ss:$8 sps:$4 sm:$0xff]  }
 0x81e   : > { %10871 = vmatprep.subr.bf16.mxu0 %v16595_v54  ;;  %v16661_v54 = vld [vmem:[%s22145_s5 + $0x184] ss:$8 sps:$4 sm:$0xff]  }
 0x821   : > { %10872 = vmatpush1.bf16.msra.mxu0 %v16593_v23  ;;  %v16659_v23 = vld [vmem:[%s22145_s5 + $0x180] ss:$8 sps:$4 sm:$0xff]  }
 0x822   : > { %10873 = vmatprep.subr.bf16.mxu0 %v16598_v58  ;;  %v16664_v58 = vld [vmem:[%s22145_s5 + $0x194] ss:$8 sps:$4 sm:$0xff]  }
 0x825   : > { %10874 = vmatpush1.bf16.msra.mxu0 %v16596_v63  ;;  %v16662_v63 = vld [vmem:[%s22145_s5 + $0x190] ss:$8 sps:$4 sm:$0xff]  }
 0x826   : > { %10875 = vmatprep.subr.bf16.mxu0 %v16601_v47  ;;  %v16667_v47 = vld [vmem:[%s22145_s5 + $0x1a4] ss:$8 sps:$4 sm:$0xff]  }
 0x829   : > { %10876 = vmatpush1.bf16.msra.mxu0 %v16599_v34  ;;  %v16665_v34 = vld [vmem:[%s22145_s5 + $0x1a0] ss:$8 sps:$4 sm:$0xff]  }
 0x82a   : > { %10877 = vmatprep.subr.bf16.mxu0 %v16604_v24  ;;  %v16670_v24 = vld [vmem:[%s22145_s5 + $0x1b4] ss:$8 sps:$4 sm:$0xff]  }
 0x82d   : > { %10878 = vmatpush1.bf16.msra.mxu0 %v16602_v9  ;;  %v16668_v9 = vld [vmem:[%s22145_s5 + $0x1b0] ss:$8 sps:$4 sm:$0xff]  }
 0x82e   : > { %10879 = vmatprep.subr.bf16.mxu0 %v16607_v43  ;;  %v16673_v43 = vld [vmem:[%s22145_s5 + $0x1c4] ss:$8 sps:$4 sm:$0xff]  }
 0x831   : > { %10880 = vmatpush1.bf16.msra.mxu0 %v16605_v30  ;;  %v16671_v30 = vld [vmem:[%s22145_s5 + $0x1c0] ss:$8 sps:$4 sm:$0xff]  }
 0x832   : > { %10881 = vmatprep.subr.bf16.mxu0 %v16610_v39  ;;  %v16676_v39 = vld [vmem:[%s22145_s5 + $0x1d4] ss:$8 sps:$4 sm:$0xff]  }
 0x835   : > { %10882 = vmatpush1.bf16.msra.mxu0 %v16608_v55  ;;  %v16674_v55 = vld [vmem:[%s22145_s5 + $0x1d0] ss:$8 sps:$4 sm:$0xff]  }
 0x836   : > { %10883 = vmatprep.subr.bf16.mxu0 %v16613_v31  ;;  %v16679_v31 = vld [vmem:[%s22145_s5 + $0x1e4] ss:$8 sps:$4 sm:$0xff]  }
 0x839   : > { %10884 = vmatpush1.bf16.msra.mxu0 %v16611_v41  ;;  %v16677_v41 = vld [vmem:[%s22145_s5 + $0x1e0] ss:$8 sps:$4 sm:$0xff]  }
 0x83a   : > { %10885 = vmatprep.subr.bf16.mxu0 %v16616_v57  ;;  %v16682_v57 = vld [vmem:[%s22145_s5 + $0x1f4] ss:$8 sps:$4 sm:$0xff]  }
 0x83d   : > { %10886 = vmatpush1.bf16.msra.mxu0 %v16614_v17  ;;  %v16680_v17 = vld [vmem:[%s22145_s5 + $0x1f0] ss:$8 sps:$4 sm:$0xff]  }
 0x83e   : > { %10887 = vmatprep.subr.bf16.mxu0 %v16619_v7  ;;  %v16685_v7 = vld [vmem:[%s22145_s5 + $0x204] ss:$8 sps:$4 sm:$0xff]  }
 0x841   : > { %10888 = vmatpush1.bf16.msra.mxu0 %v16617_v14  ;;  %v16683_v14 = vld [vmem:[%s22145_s5 + $0x200] ss:$8 sps:$4 sm:$0xff]  }
 0x842   : > { %10889 = vmatprep.subr.bf16.mxu0 %v16622_v32  ;;  %v16688_v32 = vld [vmem:[%s22145_s5 + $0x214] ss:$8 sps:$4 sm:$0xff]  }
 0x845   : > { %10890 = vmatpush1.bf16.msra.mxu0 %v16620_v35  ;;  %v16686_v35 = vld [vmem:[%s22145_s5 + $0x210] ss:$8 sps:$4 sm:$0xff]  }
 0x846   : > { %10891 = vmatprep.subr.bf16.mxu0 %v16625_v59  ;;  %v16691_v59 = vld [vmem:[%s22145_s5 + $0x224] ss:$8 sps:$4 sm:$0xff]  }
 0x849   : > { %10892 = vmatpush1.bf16.msra.mxu0 %v16623_v51  ;;  %v16689_v51 = vld [vmem:[%s22145_s5 + $0x220] ss:$8 sps:$4 sm:$0xff]  }
 0x84a   : > { %10893 = vmatprep.subr.bf16.mxu0 %v16628_v29  ;;  %v16694_v29 = vld [vmem:[%s22145_s5 + $0x234] ss:$8 sps:$4 sm:$0xff]  }
 0x84d   : > { %10894 = vmatpush1.bf16.msra.mxu0 %v16626_v3  ;;  %v16692_v3 = vld [vmem:[%s22145_s5 + $0x230] ss:$8 sps:$4 sm:$0xff]  }
 0x84e   : > { %10895 = vmatprep.subr.bf16.mxu0 %v16631_v26  ;;  %v16697_v26 = vld [vmem:[%s22145_s5 + $0x244] ss:$8 sps:$4 sm:$0xff]  }
 0x851   : > { %10896 = vmatpush1.bf16.msra.mxu0 %v16629_v0  ;;  %v16695_v0 = vld [vmem:[%s22145_s5 + $0x240] ss:$8 sps:$4 sm:$0xff]  }
 0x852   : > { %10897 = vmatprep.subr.bf16.mxu0 %v16634_v44  ;;  %v16700_v44 = vld [vmem:[%s22145_s5 + $0x254] ss:$8 sps:$4 sm:$0xff]  }
 0x855   : > { %10898 = vmatpush1.bf16.msra.mxu0 %v16632_v18  ;;  %v16698_v18 = vld [vmem:[%s22145_s5 + $0x250] ss:$8 sps:$4 sm:$0xff]  }
 0x856   : > { %10910 = vmatprep.subr.bf16.mxu0 %v16637_v36  ;;  %v16703_v36 = vld [vmem:[%s22145_s5 + $0x264] ss:$8 sps:$4 sm:$0xff]  }
 0x858   : > { %10900 = vmatmul.mubr.bf16.vlgmr.msra.gmra.mrb[72].mxu0 %v21074_v22 }
 0x859   : > { %10911 = vmatpush1.bf16.msra.mxu0 %v16635_v13  ;;  %10942 = vmatprep.mubr.bf16.mxu0 %v21252_v1  ;;  %v16701_v13 = vld [vmem:[%s22145_s5 + $0x260] ss:$8 sps:$4 sm:$0xff]  }
 0x85a   : > { %10912 = vmatprep.subr.bf16.mxu0 %v16640_v25  ;;  %v16706_v25 = vld [vmem:[%s22145_s5 + $0x274] ss:$8 sps:$4 sm:$0xff]  }
 0x85d   : > { %10913 = vmatpush1.bf16.msra.mxu0 %v16638_v4  ;;  %v16704_v4 = vld [vmem:[%s22145_s5 + $0x270] ss:$8 sps:$4 sm:$0xff]  }
 0x85e   : > { %10914 = vmatprep.subr.bf16.mxu0 %v16643_v53  ;;  %v16709_v53 = vld [vmem:[%s22145_s5 + $0x284] ss:$8 sps:$4 sm:$0xff]  }
 0x861   : > { %10915 = vmatpush1.bf16.msra.mxu0 %v16641_v56  ;;  %v14982_v56 = vunpack.i.l.bf16 %v21248_v5  ;;  %v16763_v5 = vld [vmem:[%s22145_s5 + $0x664] ss:$8 sps:$4 sm:$0xff]  }
 0x862   : > { %10916 = vmatprep.subr.bf16.mxu0 %v16646_v37  ;;  %v16707_v37 = vld [vmem:[%s22145_s5 + $0x280] ss:$8 sps:$4 sm:$0xff]  }
 0x865   : > { %10917 = vmatpush1.bf16.msra.mxu0 %v16644_v60  ;;  %v16712_v60 = vld [vmem:[%s22145_s5 + $0x294] ss:$8 sps:$4 sm:$0xff]  }
 0x866   : > { %10918 = vmatprep.subr.bf16.mxu0 %v16649_v33  ;;  %v9609_v33 = vsel %vm4052_vm6, %v14982_v56, %v14983_v40  ;;  %v16718_v40 = vld [vmem:[%s22145_s5 + $0x2b4] ss:$8 sps:$4 sm:$0xff]  }
 0x869   : > { %10919 = vmatpush1.bf16.msra.mxu0 %v16647_v21  ;;  %v16710_v21 = vld [vmem:[%s22145_s5 + $0x290] ss:$8 sps:$4 sm:$0xff]  }
 0x86a   : > { %10920 = vmatprep.subr.bf16.mxu0 %v16652_v10  ;;  %v16715_v10 = vld [vmem:[%s22145_s5 + $0x2a4] ss:$8 sps:$4 sm:$0xff]  }
 0x86d   : > { %10921 = vmatpush1.bf16.msra.mxu0 %v16650_v16  ;;  %v9641_v16 = vmax.f32 %v21041_v27, %v9609_v33  ;;  %v16721_v27 = vld [vmem:[%s22145_s5 + $0x584] ss:$8 sps:$4 sm:$0xff]   ;;  %v16766_v33 = vld [vmem:[%s22145_s5 + $0x674] ss:$8 sps:$4 sm:$0xff]  }
 0x86e   : > { %10922 = vmatprep.subr.bf16.mxu0 %v16655_v19  ;;  %v16713_v19 = vld [vmem:[%s22145_s5 + $0x2a0] ss:$8 sps:$4 sm:$0xff]  }
 0x871   : > { %10923 = vmatpush1.bf16.msra.mxu0 %v16653_v46  ;;  %v9653_v46 = vpack.c.bf16 %v9641_v16, %v9641_v16  ;;  %v16856_v16 = vld [vmem:[%s22147_s7 + $0xd0] sm:$0xff]  }
 0x872   : > { %10924 = vmatprep.subr.bf16.mxu0 %v16658_v48  ;;  %v16716_v48 = vld [vmem:[%s22145_s5 + $0x2b0] ss:$8 sps:$4 sm:$0xff]  }
 0x875   : > { %10925 = vmatpush1.bf16.msra.mxu0 %v16656_v15  ;;  %v11096_v15 = vrot.slane %v9653_v46, 4 }
 0x876   : > { %10926 = vmatprep.subr.bf16.mxu0 %v16661_v54  ;;  %v16719_v54 = vld [vmem:[%s22145_s5 + $0x580] ss:$8 sps:$4 sm:$0xff]  }
 0x879   : > { %10927 = vmatpush1.bf16.msra.mxu0 %v16659_v23  ;;  %v11095_v23 = vrot.slane %v21076_v52, 4  ;;  %v16727_v52 = vld [vmem:[%s22145_s5 + $0x5a4] ss:$8 sps:$4 sm:$0xff]  }
 0x87a   : > { %10928 = vmatprep.subr.bf16.mxu0 %v16664_v58  ;;  %v16724_v58 = vld [vmem:[%s22145_s5 + $0x594] ss:$8 sps:$4 sm:$0xff]  }
 0x87d   : > { %10929 = vmatpush1.bf16.msra.mxu0 %v16662_v63  ;;  %v11097_v63 = vsel %vm11091_vm7, %v11095_v23, %v11096_v15  ;;  %v16858_v15 = vld [vmem:[%s22147_s7 + $0xd8] sm:$0xff]  }
 0x87e   : > { %10930 = vmatprep.subr.bf16.mxu0 %v16667_v47  ;;  %v16722_v47 = vld [vmem:[%s22145_s5 + $0x590] ss:$8 sps:$4 sm:$0xff]   ;;  %v16772_v23 = vld [vmem:[%s22145_s5 + $0x694] ss:$8 sps:$4 sm:$0xff]  }
 0x881   : > { %10931 = vmatpush1.bf16.msra.mxu0 %v16665_v34  ;;  %v16725_v34 = vld [vmem:[%s22145_s5 + $0x5a0] ss:$8 sps:$4 sm:$0xff]  }
 0x882   : > { %10932 = vmatprep.subr.bf16.mxu0 %v16670_v24  ;;  %v16730_v24 = vld [vmem:[%s22145_s5 + $0x5b4] ss:$8 sps:$4 sm:$0xff]  }
 0x885   : > { %10933 = vmatpush1.bf16.msra.mxu0 %v16668_v9  ;;  %v16728_v9 = vld [vmem:[%s22145_s5 + $0x5b0] ss:$8 sps:$4 sm:$0xff]  }
 0x886   : > { %10934 = vmatprep.subr.bf16.mxu0 %v16673_v43  ;;  %v16733_v43 = vld [vmem:[%s22145_s5 + $0x5c4] ss:$8 sps:$4 sm:$0xff]  }
 0x889   : > { %10935 = vmatpush1.bf16.msra.mxu0 %v16671_v30  ;;  %v16731_v30 = vld [vmem:[%s22145_s5 + $0x5c0] ss:$8 sps:$4 sm:$0xff]  }
 0x88a   : > { %10936 = vmatprep.subr.bf16.mxu0 %v16676_v39  ;;  %v16736_v39 = vld [vmem:[%s22145_s5 + $0x5d4] ss:$8 sps:$4 sm:$0xff]  }
 0x88d   : > { %10937 = vmatpush1.bf16.msra.mxu0 %v16674_v55  ;;  %v16734_v55 = vld [vmem:[%s22145_s5 + $0x5d0] ss:$8 sps:$4 sm:$0xff]  }
 0x88e   : > { %10938 = vmatprep.subr.bf16.mxu0 %v16679_v31  ;;  %v16739_v31 = vld [vmem:[%s22145_s5 + $0x5e4] ss:$8 sps:$4 sm:$0xff]  }
 0x891   : > { %10939 = vmatpush1.bf16.msra.mxu0 %v16677_v41  ;;  %v16737_v41 = vld [vmem:[%s22145_s5 + $0x5e0] ss:$8 sps:$4 sm:$0xff]  }
 0x892   : > { %10940 = vmatprep.subr.bf16.mxu0 %v16682_v57  ;;  %v16742_v57 = vld [vmem:[%s22145_s5 + $0x5f4] ss:$8 sps:$4 sm:$0xff]  }
 0x895   : > { %10941 = vmatpush1.bf16.msra.mxu0 %v16680_v17  ;;  %v16740_v17 = vld [vmem:[%s22145_s5 + $0x5f0] ss:$8 sps:$4 sm:$0xff]  }
 0x896   : > { %10953 = vmatprep.subr.bf16.mxu0 %v16685_v7  ;;  %v16745_v7 = vld [vmem:[%s22145_s5 + $0x604] ss:$8 sps:$4 sm:$0xff]  }
 0x898   : > { %10943 = vmatmul.mubr.bf16.vlgmr.msra.gmra.mrb[72].mxu0 %v21250_v45 }
 0x899   : > { %10954 = vmatpush1.bf16.msra.mxu0 %v16683_v14  ;;  %14268 = vmatprep.mubr.msk.bf16.mxu0 %vm4052_vm6, %v21203_v49  ;;  %v16743_v14 = vld [vmem:[%s22145_s5 + $0x600] ss:$8 sps:$4 sm:$0xff]  }
 0x89a   : > { %10955 = vmatprep.subr.bf16.mxu0 %v16688_v32  ;;  %v16748_v32 = vld [vmem:[%s22145_s5 + $0x614] ss:$8 sps:$4 sm:$0xff]  }
 0x89d   : > { %10956 = vmatpush1.bf16.msra.mxu0 %v16686_v35  ;;  %v16746_v35 = vld [vmem:[%s22145_s5 + $0x610] ss:$8 sps:$4 sm:$0xff]  }
 0x89e   : > { %10957 = vmatprep.subr.bf16.mxu0 %v16691_v59  ;;  %v16751_v59 = vld [vmem:[%s22145_s5 + $0x624] ss:$8 sps:$4 sm:$0xff]  }
 0x8a1   : > { %10958 = vmatpush1.bf16.msra.mxu0 %v16689_v51  ;;  %v16749_v51 = vld [vmem:[%s22145_s5 + $0x620] ss:$8 sps:$4 sm:$0xff]  }
 0x8a2   : > { %10959 = vmatprep.subr.bf16.mxu0 %v16694_v29  ;;  %v16754_v29 = vld [vmem:[%s22145_s5 + $0x634] ss:$8 sps:$4 sm:$0xff]  }
 0x8a5   : > { %10960 = vmatpush1.bf16.msra.mxu0 %v16692_v3  ;;  %v16752_v3 = vld [vmem:[%s22145_s5 + $0x630] ss:$8 sps:$4 sm:$0xff]  }
 0x8a6   : > { %10961 = vmatprep.subr.bf16.mxu0 %v16697_v26  ;;  %v16757_v26 = vld [vmem:[%s22145_s5 + $0x644] ss:$8 sps:$4 sm:$0xff]  }
 0x8a9   : > { %10962 = vmatpush1.bf16.msra.mxu0 %v16695_v0  ;;  %v9587_v0 = vpop.permute.xlu1 %9586 }
 0x8aa   : > { %10963 = vmatprep.subr.bf16.mxu0 %v16700_v44  ;;  %v14988_v44 = vunpack.i.h.bf16 %v21254_v11  ;;  %v16850_v11 = vld [vmem:[%s22145_s5 + $0x834] ss:$8 sps:$4 sm:$0xff]  }
 0x8ad   : > { %10964 = vmatpush1.bf16.msra.mxu0 %v16698_v18  ;;  %v16755_v18 = vld [vmem:[%s22145_s5 + $0x640] ss:$8 sps:$4 sm:$0xff]  }
 0x8ae   : > { %10965 = vmatprep.subr.bf16.mxu0 %v16703_v36  ;;  %v16760_v36 = vld [vmem:[%s22145_s5 + $0x654] ss:$8 sps:$4 sm:$0xff]  }
 0x8b1   : > { %10966 = vmatpush1.bf16.msra.mxu0 %v16701_v13  ;;  %v9608_v13 = vsel %vm4052_vm6, %v9587_v0, %v14982_v56  ;;  %v16802_v0 = vld [vmem:[%s22145_s5 + $0x734] ss:$8 sps:$4 sm:$0xff]  }
 0x8b2   : > { %10967 = vmatprep.subr.bf16.mxu0 %v16706_v25  ;;  %v9611_v25 = vsel %vm4052_vm6, %v14987_v12, %v14988_v44  ;;  %v9640_v56 = vmax.f32 %v21033_v38, %v9608_v13  ;;  %v16761_v12 = vld [vmem:[%s22145_s5 + $0x660] ss:$8 sps:$4 sm:$0xff]  }
 0x8b3   : > { %v16803_v13 = vld [vmem:[%s22145_s5 + $0x740] ss:$8 sps:$4 sm:$0xff]  }
 0x8b5   : > { %10968 = vmatpush1.bf16.msra.mxu0 %v16704_v4  ;;  %v16758_v4 = vld [vmem:[%s22145_s5 + $0x650] ss:$8 sps:$4 sm:$0xff]  }
 0x8b6   : > { %10969 = vmatprep.subr.bf16.mxu0 %v16709_v53  ;;  %v16852_v53 = vld [vmem:[%s22147_s7 + $0xc0] sm:$0xff]  }
 0x8b7   : > { %12097 = vmatpush1.bf16.msra.mxu1 %v16852_v53  ;;  %v16811_v53 = vld [vmem:[%s22145_s5 + $0x764] ss:$8 sps:$4 sm:$0xff]  }
 0x8b8   : > { %12098 = vmatprep.subr.bf16.mxu1 %v16960_v2 }
 0x8b9   : > { %10970 = vmatpush1.bf16.msra.mxu0 %v16707_v37  ;;  %v9643_v37 = vmax.f32 %v21213_v61, %v9611_v25  ;;  %v16764_v61 = vld [vmem:[%s22145_s5 + $0x670] ss:$8 sps:$4 sm:$0xff]   ;;  %v16808_v25 = vld [vmem:[%s22145_s5 + $0x754] ss:$8 sps:$4 sm:$0xff]  }
 0x8ba   : > { %10971 = vmatprep.subr.bf16.mxu0 %v16712_v60  ;;  %v16854_v60 = vld [vmem:[%s22147_s7 + $0xc8] sm:$0xff]  }
 0x8bb   : > { %12099 = vmatpush1.bf16.msra.mxu1 %v16854_v60 }
 0x8bc   : > { %12100 = vmatprep.subr.bf16.mxu1 %v16960_v2 }
 0x8bd   : > { %10972 = vmatpush1.bf16.msra.mxu0 %v16710_v21  ;;  %v9652_v21 = vpack.c.bf16 %v9640_v56, %v9640_v56  ;;  %v9645_v56 = vmax.f32 %v21219_v50, %v21033_v38  ;;  %v16817_v38 = vld [vmem:[%s22145_s5 + $0x784] ss:$8 sps:$4 sm:$0xff]  }
 0x8be   : > { %10973 = vmatprep.subr.bf16.mxu0 %v16715_v10  ;;  %v9655_v10 = vpack.c.bf16 %v9643_v37, %v9643_v37  ;;  %v16809_v37 = vld [vmem:[%s22145_s5 + $0x760] ss:$8 sps:$4 sm:$0xff]  }
 0x8bf   : > { %12101 = vmatpush1.bf16.msra.mxu1 %v16856_v16  ;;  %v16820_v16 = vld [vmem:[%s22145_s5 + $0x794] ss:$8 sps:$4 sm:$0xff]  }
 0x8c0   : > { %v11102_v46 = vrot.slane %v9655_v10, 4  ;;  %12102 = vmatprep.subr.bf16.mxu1 %v16960_v2  ;;  %v11098_v10 = vrot.slane %v21250_v45, 4  ;;  %v16823_v45 = vld [vmem:[%s22145_s5 + $0x7a4] ss:$8 sps:$4 sm:$0xff]  }
 0x8c1   : > { %10974 = vmatpush1.bf16.msra.mxu0 %v16713_v19  ;;  %v16769_v19 = vld [vmem:[%s22145_s5 + $0x684] ss:$8 sps:$4 sm:$0xff]  }
 0x8c2   : > { %10975 = vmatprep.subr.bf16.mxu0 %v16718_v40  ;;  %v11093_v40 = vrot.slane %v9652_v21, 4  ;;  %v11107_v21 = vrot.slane %v21203_v49, 4  ;;  %v16818_v49 = vld [vmem:[%s22145_s5 + $0x790] ss:$8 sps:$4 sm:$0xff]  }
 0x8c3   : > { %12103 = vmatpush1.bf16.msra.mxu1 %v16858_v15  ;;  %v16829_v15 = vld [vmem:[%s22145_s5 + $0x7c4] ss:$8 sps:$4 sm:$0xff]  }
 0x8c4   : > { %12104 = vmatprep.subr.bf16.mxu1 %v16960_v2 }
 0x8c5   : > { %10976 = vmatpush1.bf16.msra.mxu0 %v16716_v48  ;;  %v11092_v48 = vrot.slane %v21074_v22, 4 }
 0x8c6   : > { %11558 = vmatprep.subr.bf16.mxu0 %v16721_v27  ;;  %v16767_v27 = vld [vmem:[%s22145_s5 + $0x680] ss:$8 sps:$4 sm:$0xff]  }
 0x8c8   : > { %10986 = vmatmul.mubr.bf16.vlgmr.msra.gmra.mrb[72].mxu0 %v21346_v20 }
 0x8c9   : > { %11559 = vmatpush1.bf16.msra.mxu0 %v16719_v54  ;;  %11590 = vmatprep.mubr.bf16.mxu0 %v11097_v63  ;;  %v11101_v54 = vrot.slane %v21252_v1, 4  ;;  %v16770_v63 = vld [vmem:[%s22145_s5 + $0x690] ss:$8 sps:$4 sm:$0xff]   ;;  %v16860_v1 = vld [vmem:[%s22147_s7 + $0xe0] sm:$0xff]  }
 0x8ca   : > { %11560 = vmatprep.subr.bf16.mxu0 %v16724_v58  ;;  %v11094_v58 = vsel %vm11091_vm7, %v11092_v48, %v11093_v40  ;;  %12105 = vmatpush1.bf16.msra.mxu1 %v16860_v1  ;;  %v16826_v48 = vld [vmem:[%s22145_s5 + $0x7b4] ss:$8 sps:$4 sm:$0xff]  }
 0x8cb   : > { %v11103_v22 = vsel %vm11091_vm7, %v11101_v54, %v11102_v46  ;;  %12106 = vmatprep.subr.bf16.mxu1 %v16960_v2  ;;  %v16821_v46 = vld [vmem:[%s22145_s5 + $0x7a0] ss:$8 sps:$4 sm:$0xff]   ;;  %v16838_v1 = vld [vmem:[%s22145_s5 + $0x7f4] ss:$8 sps:$4 sm:$0xff]  }
 0x8cc   : > { %v16827_v54 = vld [vmem:[%s22145_s5 + $0x7c0] ss:$8 sps:$4 sm:$0xff]  }
 0x8cd   : > { %11561 = vmatpush1.bf16.msra.mxu0 %v16722_v47  ;;  %v16775_v47 = vld [vmem:[%s22145_s5 + $0x6a4] ss:$8 sps:$4 sm:$0xff]  }
 0x8ce   : > { %11562 = vmatprep.subr.bf16.mxu0 %v16727_v52  ;;  %v16773_v52 = vld [vmem:[%s22145_s5 + $0x6a0] ss:$8 sps:$4 sm:$0xff]  }
 0x8d1   : > { %11563 = vmatpush1.bf16.msra.mxu0 %v16725_v34  ;;  %v16862_v34 = vld [vmem:[%s22147_s7 + $0xe8] sm:$0xff]  }
 0x8d2   : > { %11564 = vmatprep.subr.bf16.mxu0 %v16730_v24  ;;  %v16778_v24 = vld [vmem:[%s22145_s5 + $0x6b4] ss:$8 sps:$4 sm:$0xff]   ;;  %12107 = vmatpush1.bf16.msra.mxu1 %v16862_v34  ;;  %v9597_v34 = vpop.permute.xlu1 %9596 }
 0x8d3   : > { %12108 = vmatprep.subr.bf16.mxu1 %v16960_v2 }
 0x8d5   : > { %11565 = vmatpush1.bf16.msra.mxu0 %v16728_v9  ;;  %v16776_v9 = vld [vmem:[%s22145_s5 + $0x6b0] ss:$8 sps:$4 sm:$0xff]  }
 0x8d6   : > { %11566 = vmatprep.subr.bf16.mxu0 %v16733_v43  ;;  %v16864_v43 = vld [vmem:[%s22147_s7 + $0xf0] sm:$0xff]  }
 0x8d7   : > { %12109 = vmatpush1.bf16.msra.mxu1 %v16864_v43  ;;  %v9612_v43 = vsel %vm4052_vm6, %v14988_v44, %v9597_v34 }
 0x8d8   : > { %12110 = vmatprep.subr.bf16.mxu1 %v16960_v2 }
 0x8d9   : > { %11567 = vmatpush1.bf16.msra.mxu0 %v16731_v30  ;;  %v16781_v30 = vld [vmem:[%s22145_s5 + $0x6c4] ss:$8 sps:$4 sm:$0xff]  }
 0x8da   : > { %11568 = vmatprep.subr.bf16.mxu0 %v16736_v39  ;;  %v16779_v39 = vld [vmem:[%s22145_s5 + $0x6c0] ss:$8 sps:$4 sm:$0xff]  }
 0x8dd   : > { %11569 = vmatpush1.bf16.msra.mxu0 %v16734_v55  ;;  %v16866_v55 = vld [vmem:[%s22147_s7 + $0xf8] sm:$0xff]  }
 0x8de   : > { %11570 = vmatprep.subr.bf16.mxu0 %v16739_v31  ;;  %v16784_v31 = vld [vmem:[%s22145_s5 + $0x6d4] ss:$8 sps:$4 sm:$0xff]   ;;  %12111 = vmatpush1.bf16.msra.mxu1 %v16866_v55  ;;  %v9644_v55 = vmax.f32 %v21207_v62, %v9612_v43  ;;  %v11104_v62 = vrot.slane %v21346_v20, 4 }
 0x8df   : > { %12112 = vmatprep.subr.bf16.mxu1 %v16960_v2  ;;  %v16855_v20 = vld [vmem:[%s22147_s7 + $0x70] sm:$0xff]  }
 0x8e0   : > { %v9656_v44 = vpack.c.bf16 %v9644_v55, %v9644_v55 }
 0x8e1   : > { %11571 = vmatpush1.bf16.msra.mxu0 %v16737_v41  ;;  %v16782_v41 = vld [vmem:[%s22145_s5 + $0x6d0] ss:$8 sps:$4 sm:$0xff]  }
 0x8e2   : > { %11572 = vmatprep.subr.bf16.mxu0 %v16742_v57  ;;  %v16868_v57 = vld [vmem:[%s22147_s7 + $0x100] sm:$0xff]  }
 0x8e3   : > { %12113 = vmatpush1.bf16.msra.mxu1 %v16868_v57  ;;  %v11105_v57 = vrot.slane %v9656_v44, 4 }
 0x8e4   : > { %12114 = vmatprep.subr.bf16.mxu1 %v16960_v2 }
 0x8e5   : > { %11573 = vmatpush1.bf16.msra.mxu0 %v16740_v17  ;;  %v16787_v17 = vld [vmem:[%s22145_s5 + $0x6e4] ss:$8 sps:$4 sm:$0xff]  }
 0x8e6   : > { %11574 = vmatprep.subr.bf16.mxu0 %v16745_v7  ;;  %v16785_v7 = vld [vmem:[%s22145_s5 + $0x6e0] ss:$8 sps:$4 sm:$0xff]  }
 0x8e9   : > { %11575 = vmatpush1.bf16.msra.mxu0 %v16743_v14  ;;  %v16790_v14 = vld [vmem:[%s22145_s5 + $0x6f4] ss:$8 sps:$4 sm:$0xff]  }
 0x8ea   : > { %11576 = vmatprep.subr.bf16.mxu0 %v16748_v32  ;;  %v16788_v32 = vld [vmem:[%s22145_s5 + $0x6f0] ss:$8 sps:$4 sm:$0xff]  }
 0x8ed   : > { %11577 = vmatpush1.bf16.msra.mxu0 %v16746_v35  ;;  %v16793_v35 = vld [vmem:[%s22145_s5 + $0x704] ss:$8 sps:$4 sm:$0xff]  }
 0x8ee   : > { %11578 = vmatprep.subr.bf16.mxu0 %v16751_v59  ;;  %v16791_v59 = vld [vmem:[%s22145_s5 + $0x700] ss:$8 sps:$4 sm:$0xff]  }
 0x8f1   : > { %11579 = vmatpush1.bf16.msra.mxu0 %v16749_v51  ;;  %v16796_v51 = vld [vmem:[%s22145_s5 + $0x714] ss:$8 sps:$4 sm:$0xff]  }
 0x8f2   : > { %11580 = vmatprep.subr.bf16.mxu0 %v16754_v29  ;;  %v16794_v29 = vld [vmem:[%s22145_s5 + $0x710] ss:$8 sps:$4 sm:$0xff]  }
 0x8f5   : > { %11581 = vmatpush1.bf16.msra.mxu0 %v16752_v3  ;;  %v16799_v3 = vld [vmem:[%s22145_s5 + $0x724] ss:$8 sps:$4 sm:$0xff]  }
 0x8f6   : > { %11582 = vmatprep.subr.bf16.mxu0 %v16757_v26  ;;  %v16797_v26 = vld [vmem:[%s22145_s5 + $0x720] ss:$8 sps:$4 sm:$0xff]  }
 0x8f9   : > { %11583 = vmatpush1.bf16.msra.mxu0 %v16755_v18  ;;  %v16800_v18 = vld [vmem:[%s22145_s5 + $0x730] ss:$8 sps:$4 sm:$0xff]  }
 0x8fa   : > { %11584 = vmatprep.subr.bf16.mxu0 %v16760_v36  ;;  %v16805_v36 = vld [vmem:[%s22145_s5 + $0x744] ss:$8 sps:$4 sm:$0xff]  }
 0x8fd   : > { %11585 = vmatpush1.bf16.msra.mxu0 %v16758_v4  ;;  %v16806_v4 = vld [vmem:[%s22145_s5 + $0x750] ss:$8 sps:$4 sm:$0xff]  }
 0x8fe   : > { %11586 = vmatprep.subr.bf16.mxu0 %v16763_v5  ;;  %v9642_v5 = vmax.f32 %v20266_v42, %v21272_v28  ;;  %v16812_v42 = vld [vmem:[%s22145_s5 + $0x770] ss:$8 sps:$4 sm:$0xff]  }
 0x900   : > { %v9654_v60 = vpack.c.bf16 %v9642_v5, %v9642_v5 }
 0x901   : > { %11587 = vmatpush1.bf16.msra.mxu0 %v16761_v12  ;;  %v16814_v12 = vld [vmem:[%s22145_s5 + $0x774] ss:$8 sps:$4 sm:$0xff]  }
 0x902   : > { %11588 = vmatprep.subr.bf16.mxu0 %v16766_v33  ;;  %v9657_v33 = vpack.c.bf16 %v9645_v56, %v9645_v56  ;;  %v11099_v50 = vrot.slane %v9654_v60, 4 }
 0x904   : > { %v11108_v28 = vrot.slane %v9657_v33, 4 }
 0x905   : > { %11589 = vmatpush1.bf16.msra.mxu0 %v16764_v61  ;;  %v16815_v61 = vld [vmem:[%s22145_s5 + $0x780] ss:$8 sps:$4 sm:$0xff]  }
 0x906   : > { %11601 = vmatprep.subr.bf16.mxu0 %v16769_v19  ;;  %v11100_v19 = vsel %vm11091_vm7, %v11098_v10, %v11099_v50  ;;  %v11109_v40 = vsel %vm11091_vm7, %v11107_v21, %v11108_v28 }
 0x908   : > { %11591 = vmatmul.mubr.bf16.vlgmr.msra.gmra.mrb[72].mxu0 %v11094_v58  ;;  %v16830_v58 = vld [vmem:[%s22145_s5 + $0x7d0] ss:$8 sps:$4 sm:$0xff]  }
 0x909   : > { %11602 = vmatpush1.bf16.msra.mxu0 %v16767_v27  ;;  %11633 = vmatprep.mubr.bf16.mxu0 %v11103_v22  ;;  %v16824_v27 = vld [vmem:[%s22145_s5 + $0x7b0] ss:$8 sps:$4 sm:$0xff]   ;;  %v16835_v22 = vld [vmem:[%s22145_s5 + $0x7e4] ss:$8 sps:$4 sm:$0xff]  }
 0x90a   : > { %11603 = vmatprep.subr.bf16.mxu0 %v16772_v23  ;;  %v16832_v23 = vld [vmem:[%s22145_s5 + $0x7d4] ss:$8 sps:$4 sm:$0xff]  }
 0x90d   : > { %11604 = vmatpush1.bf16.msra.mxu0 %v16770_v63  ;;  %v16833_v63 = vld [vmem:[%s22145_s5 + $0x7e0] ss:$8 sps:$4 sm:$0xff]  }
 0x90e   : > { %11605 = vmatprep.subr.bf16.mxu0 %v16775_v47  ;;  %v16836_v47 = vld [vmem:[%s22145_s5 + $0x7f0] ss:$8 sps:$4 sm:$0xff]  }
 0x911   : > { %11606 = vmatpush1.bf16.msra.mxu0 %v16773_v52  ;;  %v16841_v52 = vld [vmem:[%s22145_s5 + $0x804] ss:$8 sps:$4 sm:$0xff]  }
 0x912   : > { %11607 = vmatprep.subr.bf16.mxu0 %v16778_v24  ;;  %v16839_v24 = vld [vmem:[%s22145_s5 + $0x800] ss:$8 sps:$4 sm:$0xff]  }
 0x915   : > { %11608 = vmatpush1.bf16.msra.mxu0 %v16776_v9  ;;  %v16844_v9 = vld [vmem:[%s22145_s5 + $0x814] ss:$8 sps:$4 sm:$0xff]  }
 0x916   : > { %11609 = vmatprep.subr.bf16.mxu0 %v16781_v30  ;;  %v16842_v30 = vld [vmem:[%s22145_s5 + $0x810] ss:$8 sps:$4 sm:$0xff]  }
 0x919   : > { %11610 = vmatpush1.bf16.msra.mxu0 %v16779_v39  ;;  %v16847_v39 = vld [vmem:[%s22145_s5 + $0x824] ss:$8 sps:$4 sm:$0xff]  }
 0x91a   : > { %11611 = vmatprep.subr.bf16.mxu0 %v16784_v31  ;;  %v16845_v31 = vld [vmem:[%s22145_s5 + $0x820] ss:$8 sps:$4 sm:$0xff]  }
 0x91d   : > { %11612 = vmatpush1.bf16.msra.mxu0 %v16782_v41  ;;  %v16848_v41 = vld [vmem:[%s22145_s5 + $0x830] ss:$8 sps:$4 sm:$0xff]  }
 0x91e   : > { %11613 = vmatprep.subr.bf16.mxu0 %v16787_v17  ;;  %v16851_v17 = vld [vmem:[%s22147_s7 + $0x60] sm:$0xff]  }
 0x921   : > { %11614 = vmatpush1.bf16.msra.mxu0 %v16785_v7  ;;  %v11106_v7 = vsel %vm11091_vm7, %v11104_v62, %v11105_v57 }
 0x922   : > { %11615 = vmatprep.subr.bf16.mxu0 %v16790_v14  ;;  %v16853_v14 = vld [vmem:[%s22147_s7 + $0x68] sm:$0xff]  }
 0x925   : > { %11616 = vmatpush1.bf16.msra.mxu0 %v16788_v32  ;;  %v16857_v32 = vld [vmem:[%s22147_s7 + $0x78] sm:$0xff]  }
 0x926   : > { %11617 = vmatprep.subr.bf16.mxu0 %v16793_v35  ;;  %v16859_v35 = vld [vmem:[%s22147_s7 + $0x80] sm:$0xff]  }
 0x929   : > { %11618 = vmatpush1.bf16.msra.mxu0 %v16791_v59  ;;  %v16861_v59 = vld [vmem:[%s22147_s7 + $0x88] sm:$0xff]  }
 0x92a   : > { %11619 = vmatprep.subr.bf16.mxu0 %v16796_v51  ;;  %v16863_v51 = vld [vmem:[%s22147_s7 + $0x90] sm:$0xff]  }
 0x92d   : > { %11620 = vmatpush1.bf16.msra.mxu0 %v16794_v29  ;;  %v16865_v29 = vld [vmem:[%s22147_s7 + $0x98] sm:$0xff]  }
 0x92e   : > { %11621 = vmatprep.subr.bf16.mxu0 %v16799_v3  ;;  %v16867_v3 = vld [vmem:[%s22147_s7 + $0xa0] sm:$0xff]  }
 0x931   : > { %11622 = vmatpush1.bf16.msra.mxu0 %v16797_v26  ;;  %v16869_v26 = vld [vmem:[%s22147_s7 + $0xa8] sm:$0xff]  }
 0x932   : > { %11623 = vmatprep.subr.bf16.mxu0 %v16802_v0  ;;  %v16870_v0 = vld [vmem:[%s22147_s7 + $0x108] sm:$0xff]  }
 0x933   : > { %12115 = vmatpush1.bf16.msra.mxu1 %v16870_v0 }
 0x934   : > { %12116 = vmatprep.subr.bf16.mxu1 %v16960_v2 }
 0x935   : > { %11624 = vmatpush1.bf16.msra.mxu0 %v16800_v18  ;;  %v16871_v18 = vld [vmem:[%s22147_s7 + $0xb0] sm:$0xff]  }
 0x936   : > { %11625 = vmatprep.subr.bf16.mxu0 %v16805_v36  ;;  %v16872_v36 = vld [vmem:[%s22147_s7 + $0x110] sm:$0xff]  }
 0x937   : > { %12117 = vmatpush1.bf16.msra.mxu1 %v16872_v36 }
 0x938   : > { %12118 = vmatprep.subr.bf16.mxu1 %v16960_v2 }
 0x939   : > { %11626 = vmatpush1.bf16.msra.mxu0 %v16803_v13  ;;  %v16873_v13 = vld [vmem:[%s22147_s7 + $0xb8] sm:$0xff]  }
 0x93a   : > { %11627 = vmatprep.subr.bf16.mxu0 %v16808_v25  ;;  %v16874_v25 = vld [vmem:[%s22147_s7 + $0x118] sm:$0xff]  }
 0x93b   : > { %12119 = vmatpush1.bf16.msra.mxu1 %v16874_v25 }
 0x93d   : > { %11628 = vmatpush1.bf16.msra.mxu0 %v16806_v4  ;;  %v11691_v4 = vld [vmem:[%s22146_s6] sm:$0x3] }
 0x93e   : > { %11629 = vmatprep.subr.bf16.mxu0 %v16811_v53  ;;  %v11696_v53 = vrot.slane %v11691_v4, %v17485_v6  ;;  %v11700_v56 = vrot.slane %v11691_v4, %v17490_v8  ;;  %v16876_v8 = vld [vmem:[%s22147_s7 + $0x8] sm:$0xff]  }
 0x941   : > { %11630 = vmatpush1.bf16.msra.mxu0 %v16809_v37 }
 0x942   : > { %11631 = vmatprep.subr.bf16.mxu0 %v16814_v12 }
 0x945   : > { %11632 = vmatpush1.bf16.msra.mxu0 %v16812_v42 }
 0x946   : > { %11644 = vmatprep.subr.bf16.mxu0 %v16817_v38 }
 0x948   : > { %11634 = vmatmul.mubr.bf16.vlgmr.msra.gmra.mrb[72].mxu0 %v11100_v19 }
 0x949   : > { %11645 = vmatpush1.bf16.msra.mxu0 %v16815_v61  ;;  %14445 = vmatprep.mubr.msk.bf16.mxu0 %vm4052_vm6, %v11109_v40  ;;  %v16877_v40 = vld [vmem:[%s22147_s7 + $0x10] sm:$0xff]  }
 0x94a   : > { %11646 = vmatprep.subr.bf16.mxu0 %v16820_v16  ;;  %v16875_v16 = vld [vmem:[%s22147_s7] sm:$0xff]  }
 0x94d   : > { %11647 = vmatpush1.bf16.msra.mxu0 %v16818_v49  ;;  %v16878_v49 = vld [vmem:[%s22147_s7 + $0x18] sm:$0xff]  }
 0x94e   : > { %11648 = vmatprep.subr.bf16.mxu0 %v16823_v45  ;;  %v16879_v45 = vld [vmem:[%s22147_s7 + $0x20] sm:$0xff]  }
 0x951   : > { %11649 = vmatpush1.bf16.msra.mxu0 %v16821_v46  ;;  %v16880_v46 = vld [vmem:[%s22147_s7 + $0x28] sm:$0xff]  }
 0x952   : > { %11650 = vmatprep.subr.bf16.mxu0 %v16826_v48  ;;  %v16881_v48 = vld [vmem:[%s22147_s7 + $0x30] sm:$0xff]  }
 0x955   : > { %11651 = vmatpush1.bf16.msra.mxu0 %v16824_v27  ;;  %v16882_v27 = vld [vmem:[%s22147_s7 + $0x38] sm:$0xff]  }
 0x956   : > { %11652 = vmatprep.subr.bf16.mxu0 %v16829_v15  ;;  %v16883_v15 = vld [vmem:[%s22147_s7 + $0x40] sm:$0xff]  }
 0x959   : > { %11653 = vmatpush1.bf16.msra.mxu0 %v16827_v54  ;;  %v16884_v54 = vld [vmem:[%s22147_s7 + $0x48] sm:$0xff]  }
 0x95a   : > { %11654 = vmatprep.subr.bf16.mxu0 %v16832_v23  ;;  %v16885_v23 = vld [vmem:[%s22147_s7 + $0x50] sm:$0xff]  }
 0x95d   : > { %11655 = vmatpush1.bf16.msra.mxu0 %v16830_v58  ;;  %v16886_v58 = vld [vmem:[%s22147_s7 + $0x58] sm:$0xff]  }
 0x95e   : > { %11656 = vmatprep.subr.bf16.mxu0 %v16835_v22  ;;  %v16887_v22 = vld [vmem:[%s22149_s9] sm:$0xff]  }
 0x961   : > { %11657 = vmatpush1.bf16.msra.mxu0 %v16833_v63  ;;  %v16964_v63 = vmov 0.0  }
 0x962   : > { %11658 = vmatprep.subr.bf16.mxu0 %v16838_v1  ;;  %v16888_v1 = vld [vmem:[%s22149_s9 + $0x8] sm:$0xff]  }
 0x965   : > { %11659 = vmatpush1.bf16.msra.mxu0 %v16836_v47  ;;  %v16890_v47 = vld [vmem:[%s22149_s9 + $0x18] sm:$0xff]  }
 0x966   : > { %11660 = vmatprep.subr.bf16.mxu0 %v16841_v52 }
 0x969   : > { %11661 = vmatpush1.bf16.msra.mxu0 %v16839_v24 }
 0x96a   : > { %11662 = vmatprep.subr.bf16.mxu0 %v16844_v9 }
 0x96d   : > { %11663 = vmatpush1.bf16.msra.mxu0 %v16842_v30 }
 0x96e   : > { %11664 = vmatprep.subr.bf16.mxu0 %v16847_v39 }
 0x971   : > { %11665 = vmatpush1.bf16.msra.mxu0 %v16845_v31 }
 0x972   : > { %11666 = vmatprep.subr.bf16.mxu0 %v16850_v11 }
 0x975   : > { %11667 = vmatpush1.bf16.msra.mxu0 %v16848_v41  ;;  %v14533_v41 = vld [vmem:[%s22148_s8] ss:$0 sm:$0xff] }
 0x976   : > { %11838 = vmatprep.subr.bf16.mxu0 %v16960_v2 }
 0x978   : > { %11677 = vmatmul.mubr.bf16.vlgmr.msra.gmra.mrb[72].mxu0 %v11106_v7 }
 0x979   : > { %11839 = vmatpush1.bf16.msra.mxu0 %v16851_v17 }
 0x97a   : > { %11840 = vmatprep.subr.bf16.mxu0 %v16960_v2 }
 0x97d   : > { %11841 = vmatpush1.bf16.msra.mxu0 %v16853_v14 }
 0x97e   : > { %11842 = vmatprep.subr.bf16.mxu0 %v16960_v2 }
 0x981   : > { %11843 = vmatpush1.bf16.msra.mxu0 %v16855_v20 }
 0x982   : > { %11844 = vmatprep.subr.bf16.mxu0 %v16960_v2 }
 0x985   : > { %11845 = vmatpush1.bf16.msra.mxu0 %v16857_v32  ;;  %v14534_v32 = vld [vmem:[%s22150_s10] ss:$0 sm:$0xff] }
 0x986   : > { %11846 = vmatprep.subr.bf16.mxu0 %v16960_v2 }
 0x989   : > { %11847 = vmatpush1.bf16.msra.mxu0 %v16859_v35 }
 0x98a   : > { %11848 = vmatprep.subr.bf16.mxu0 %v16960_v2 }
 0x98d   : > { %11849 = vmatpush1.bf16.msra.mxu0 %v16861_v59 }
 0x98e   : > { %11850 = vmatprep.subr.bf16.mxu0 %v16960_v2 }
 0x991   : > { %11851 = vmatpush1.bf16.msra.mxu0 %v16863_v51 }
 0x992   : > { %11852 = vmatprep.subr.bf16.mxu0 %v16960_v2 }
 0x995   : > { %11853 = vmatpush1.bf16.msra.mxu0 %v16865_v29 }
 0x996   : > { %11854 = vmatprep.subr.bf16.mxu0 %v16960_v2 }
 0x999   : > { %11855 = vmatpush1.bf16.msra.mxu0 %v16867_v3 }
 0x99a   : > { %11856 = vmatprep.subr.bf16.mxu0 %v16960_v2 }
 0x99d   : > { %11857 = vmatpush1.bf16.msra.mxu0 %v16869_v26 }
 0x99e   : > { %11858 = vmatprep.subr.bf16.mxu0 %v16960_v2 }
 0x9a1   : > { %11859 = vmatpush1.bf16.msra.mxu0 %v16871_v18 }
 0x9a2   : > { %11860 = vmatprep.subr.bf16.mxu0 %v16960_v2 }
 0x9a5   : > { %11861 = vmatpush1.bf16.msra.mxu0 %v16873_v13 }
 0x9a6   : > { %11953 = vmatprep.subr.bf16.mxu0 %v16960_v2 }
 0xa4b   : > { %v11678_v5 = vpop.f32.mrb[72].mxu0 }
 0xa4c   : > { %v11680_v37 = vpop.f32.mrb[73].mxu0  ;;  %v11703_v60 = vadd.f32 %v11696_v53, %v11678_v5 }
 0xa4d   : > { %v11682_v12 = vpop.f32.mrb[74].mxu0  ;;  %v11704_v38 = vadd.f32 %v11700_v56, %v11680_v37 }
 0xa4e   : > { %v11705_v33 = vadd.f32 %v11696_v53, %v11682_v12  ;;  %v11684_v42 = vpop.f32.mrb[75].mxu0 }
 0xa4f   : > { %v11706_v50 = vadd.f32 %v11700_v56, %v11684_v42 }
 0xa50   : > { %v11707_v28 = vpack.c.bf16 %v11705_v33, %v11703_v60 }
 0xa51   : > { %v11708_v21 = vpack.c.bf16 %v11706_v50, %v11704_v38 }
 0xa52   : > { %v11760_v19 = vrot.slane %v11707_v28, 2  ;;  %v12018_v6 = vrot.slane %v11707_v28, 4 }
 0xa53   : > { %v11761_v10 = vrot.slane %v11708_v21, 2  ;;  %v12019_v61 = vrot.slane %v11708_v21, 4 }
 0xa55   : > { %14482 = vmatprep.mubr.msk.bf16.mxu0 %vm4052_vm6, %v11761_v10  ;;  %14532 = vmatprep.mubr.msk.bf16.mxu1 %vm4052_vm6, %v12019_v61 }
 0xa56   : > { %11871 = vmatmul.mubr.bf16.vlgmr.msra.gmra.mrb[76].mxu0 %v11760_v19  ;;  %12129 = vmatmul.mubr.bf16.vlgmr.msra.gmra.mrb[116].mxu1 %v12018_v6 }
 0xa57   : > { %11954 = vmatpush1.bf16.msra.mxu0 %v16875_v16  ;;  %14495 = vmatprep.mubr.msk.bf16.mxu0 %vm4052_vm6, %v11708_v21 }
 0xa58   : > { %11955 = vmatprep.subr.bf16.mxu0 %v16960_v2 }
 0xa5b   : > { %11956 = vmatpush1.bf16.msra.mxu0 %v16876_v8 }
 0xa5c   : > { %11957 = vmatprep.subr.bf16.mxu0 %v16960_v2 }
 0xa5f   : > { %11958 = vmatpush1.bf16.msra.mxu0 %v16877_v40 }
 0xa60   : > { %11959 = vmatprep.subr.bf16.mxu0 %v16960_v2 }
 0xa63   : > { %11960 = vmatpush1.bf16.msra.mxu0 %v16878_v49 }
 0xa64   : > { %11961 = vmatprep.subr.bf16.mxu0 %v16960_v2 }
 0xa67   : > { %11962 = vmatpush1.bf16.msra.mxu0 %v16879_v45 }
 0xa68   : > { %11963 = vmatprep.subr.bf16.mxu0 %v16960_v2 }
 0xa6b   : > { %11964 = vmatpush1.bf16.msra.mxu0 %v16880_v46 }
 0xa6c   : > { %11965 = vmatprep.subr.bf16.mxu0 %v16960_v2 }
 0xa6f   : > { %11966 = vmatpush1.bf16.msra.mxu0 %v16881_v48 }
 0xa70   : > { %11967 = vmatprep.subr.bf16.mxu0 %v16960_v2 }
 0xa73   : > { %11968 = vmatpush1.bf16.msra.mxu0 %v16882_v27 }
 0xa74   : > { %11969 = vmatprep.subr.bf16.mxu0 %v16960_v2 }
 0xa77   : > { %11970 = vmatpush1.bf16.msra.mxu0 %v16883_v15 }
 0xa78   : > { %11971 = vmatprep.subr.bf16.mxu0 %v16960_v2 }
 0xa7b   : > { %11972 = vmatpush1.bf16.msra.mxu0 %v16884_v54 }
 0xa7c   : > { %11973 = vmatprep.subr.bf16.mxu0 %v16960_v2 }
 0xa7f   : > { %11974 = vmatpush1.bf16.msra.mxu0 %v16885_v23 }
 0xa80   : > { %11975 = vmatprep.subr.bf16.mxu0 %v16960_v2  ;;  %v16889_v2 = vld [vmem:[%s22149_s9 + $0x10] sm:$0xff]  }
 0xa83   : > { %11976 = vmatpush1.bf16.msra.mxu0 %v16886_v58 }
 0xa84   : > { %14585 = vmatprep.subr.bf16.mxu0 %v16964_v63 }
 0xa86   : > { %11986 = vmatmul.mubr.bf16.vlgmr.msra.gmra.mrb[80].mxu0 %v11707_v28 }
 0xa87   : > { %14586 = vmatpush3.bf16.msra.mxu0 %v16887_v22  ;;  %14593 = vmatprep.mubr.msk.bf16.mxu0 %vm16965_vm8, %v16964_v63 }
 0xa88   : > { %14587 = vmatprep.subr.bf16.mxu0 %v16964_v63 }
 0xa8b   : > { %14588 = vmatpush3.bf16.msra.mxu0 %v16888_v1 }
 0xa8c   : > { %14589 = vmatprep.subr.bf16.mxu0 %v16964_v63 }
 0xa8f   : > { %14590 = vmatpush3.bf16.msra.mxu0 %v16889_v2 }
 0xa90   : > { %14591 = vmatprep.subr.bf16.mxu0 %v16964_v63 }
 0xa93   : > { %14592 = vmatpush3.bf16.msra.mxu0 %v16890_v47 }
 0xb29   : > { %v11872_v52 = vpop.f32.mrb[76].mxu0  ;;  %v12130_v34 = vpop.f32.mrb[116].mxu1 }
 0xb2a   : > { %v11874_v24 = vpop.f32.mrb[77].mxu0  ;;  %v12132_v9 = vpop.f32.mrb[117].mxu1 }
 0xb2b   : > { %v11875_v43 = vpop.f32.mrb[78].mxu0  ;;  %v12133_v30 = vpop.f32.mrb[118].mxu1 }
 0xb2c   : > { %v11876_v39 = vpop.f32.mrb[79].mxu0  ;;  %v12134_v55 = vpop.f32.mrb[119].mxu1 }
 0xb59   : > { %v11987_v31 = vpop.f32.mrb[80].mxu0 }
 0xb5a   : > { %v11988_v11 = vadd.f32 %v11987_v31, %v11872_v52  ;;  %v11989_v44 = vpop.f32.mrb[81].mxu0 }
 0xb5b   : > { %v11990_v57 = vpop.f32.mrb[82].mxu0 }
 0xb5c   : > { %v12136_v62 = vadd.f32 %v12130_v34, %v11988_v11  ;;  %v11991_v17 = vpop.f32.mrb[83].mxu0 }
 0xb5e   : > { %v12144_v7 = vadd.f32 %v14533_v41, %v12136_v62 }
 0xb60   : > { %v12145_v14 = vmax.f32 %v12144_v7, 0.0 }
 0xb62   : > { %v12146_v20 = vpack.c.bf16 %v12145_v14, %v12145_v14 }
 0xb64   : > { %14594 = vmatmul.mubr.msk.bf16.vlgmr.msra.gmra.mrb[84].mxu0 %vm4052_vm6, %v12146_v20 }
 0xc37   : > { %v12223_v35 = vpop.f32.mrb[84].mxu0 }
 0xc38   : > { %v12224_v59 = vadd.f32 %v14534_v32, %v12223_v35  ;;  %v14595_v51 = vpop.f32.mrb[85].mxu0 }
 0xc39   : > { %v12226_v29 = vpop.f32.mrb[86].mxu0 }
 0xc3a   : > { %v14596_v3 = vpop.f32.mrb[87].mxu0  ;;  %v12230_v26 = vsel %vm12229_vm9, %v12224_v59, -inf }
 0xc3b   : > { %12231 = vmax.xlane.f32.xlu0 %v12230_v26 }
 0xcc8   : > { %v12232_v0 = vpop.xlane.xlu0 %12231 }
 0xcc9   : > { %v12233_v18 = vsub.f32 %v12224_v59, %v12232_v0 }
 0xccb   : > { %v12234_v36 = vmul.f32 1.442695, %v12233_v18 }
 0xccd   : > { %16891 = vpow2.f32 %v12234_v36 }
 0xcd7   : > { %v16892_v13 = vpop.eup %16891 }
 0xcd8   : > { %v12236_v25 = vsel %vm12229_vm9, %v16892_v13, 0.0 }
 0xcd9   : > { %12237 = vadd.xlane.f32.xlu1 %v12236_v25 }
 0xd66   : > { %v12238_v4 = vpop.xlane.xlu1 %12237 }
 0xd67   : > { %16893 = vrcp.f32 %v12238_v4 }
 0xd71   : > { %v16894_v53 = vpop.eup %16893 }
 0xd72   : > { %v12240_v5 = vmul.f32 %v16894_v53, %v16892_v13 }
 0xd74   : > { %12241 = vst [vmem:[%s378_s25] sm:$0x1] %v12240_v5 }
 0xd75   : > { %16909 = shalt.err (!%p16906_p3)
}
 0xd76   : > { %s16910_s13 = scalar_lea.hbm %s22098_s12, 16  ;;  %s16914_s30 = scalar_lea.hbm %s22151_s11, 32 }
 0xd77   : > { %p16911_p4 = scmp.ne.s32.totalorder %s22098_s12, %s16910_s13  ;;  %p16915_p9 = scmp.lt.u32.totalorder %s22098_s12, %s22151_s11 }
 0xd78   : > { %p16916_p10 = scmp.lt.u32.totalorder %s16914_s30, %s16910_s13  ;;  %p16918_p12 = scmp.lt.u32.totalorder %s16910_s13, %s22098_s12 }
 0xd79   : > { %p16912_p7 = pnand %p16911_p4, %p17065_p5 }
 0xd7a   : > { %p16917_p11 = por %p16916_p10, %p16915_p9 }
 0xd7b   : > { %p16913_p8 = pneg %p16912_p7 }
 0xd7c   : > { %p16919_p13 = por %p16918_p12, %p16917_p11 }
 0xd7e   : > { %p16920_p0 = pnand %p16919_p13, %p16913_p8 }
 0xd80   : > { %16923 = shalt.err (!%p16920_p0)
}
 0xd81   : > { %14824 = dma.vmem_to_hbm [thread:$0]  (%p17065_p5), %s22100_s29, 16, %s22098_s12, %s12243_s14  }
 0xd82 PF: > { %p14830_p1 = scmp.ge.s32.totalorder %s16958_s20, 2  ;;  %s12267_s15 = sand.u32 1, %s16946_s17  }
 0xd83   : > { %s12268_s16 = scalar_lea.sflag [#allocation3], %s12267_s15 }
 0xd84   : > { %p14827_p2 = pnand %p14830_p1, %p17069_p6 }
 0xd86   : > { %16941 = dma.done.wait (!%p14827_p2), %s12268_s16, 16  }
 0xd87   : > { %16943 = vsyncadd (!%p14827_p2), %s12268_s16, 4294967280  ;;  %s22155_s24 = sld [smem:[#allocation5_spill]]  ;;  %p21_p3 = scmp.ge.s32.totalorder %s17052_s23, 4  }
 0xd88   : > { %s22156_s17 = smov %s16950_s18  ;;  %s22157_s18 = smov %s16954_s19 }
 0xd89   : > { %s22159_s20 = smov %s17052_s23  ;;  %23 = sbr.rel (!%p21_p3) target bundleno = 3 (0x3), region = 107 }
 0xd8d   : > { %s22158_s19 = smov %s22155_s24 }
 0xd90   :  { %12272 = vsyncpa [#allocation3], 1 }
 0xd91   :  { %12274 = vsyncpa [#allocation3 + $0x1], 1 }

</bundles_post_ra>
